<compile_context>
chip_gen: v5e
topology: v5e:2x2
jax: 0.10.0
libtpu: 0.0.40
codegen_flags: <defaults>
</compile_context>

<pallas_src>
import jax
import jax.numpy as jnp
from jax.experimental import pallas as pl
from jax.experimental.pallas import tpu as pltpu

CONTEXT_CH = 32
COORD_CH = 2
OUTPUT_CH = 2
STATIC_CH = 1
HIDDEN = [516, 256, 128, 64, 32, 16]
INPUT_SIZE = CONTEXT_CH + COORD_CH + STATIC_CH + OUTPUT_CH   # 37
FIELD_CH = CONTEXT_CH + OUTPUT_CH + STATIC_CH                # 35  (ctx, lr, eps)

# Lane-dense padded sizes.
INPUT_PAD = 64                                               # 37 -> 64
H_PAD = [640, 256, 128, 128, 128, 128]                       # 516/64/32/16 padded
OUT_PAD = 128                                                # 2 -> 128
SKIP_WIDTH = sum(H_PAD[1:])                                  # 768 (multiple of 128)


# ---------------------------------------------------------------------------
# Parameters (deterministic, PyTorch nn.Linear shapes: weight (out,in), bias (out,))
# ---------------------------------------------------------------------------
def init_params(key):
    sizes = [(HIDDEN[0], INPUT_SIZE)]
    for i in range(len(HIDDEN) - 1):
        sizes.append((HIDDEN[i + 1], HIDDEN[i] + INPUT_SIZE))
    sizes.append((OUTPUT_CH, HIDDEN[-1]))
    params = []
    for (out_f, in_f) in sizes:
        key, k1, k2 = jax.random.split(key, 3)
        bound = 1.0 / float(in_f) ** 0.5
        w = jax.random.uniform(k1, (out_f, in_f), jnp.float32, -bound, bound)
        b = jax.random.uniform(k2, (out_f,), jnp.float32, -bound, bound)
        params.append((w, b))
    return params


def prep_params(params):
    """Kernel argument list (12 arrays, all 2-D, lane-dense).

    Layout:
      w0   (64, 640)  bf16    b0   (1, 640)  f32
      wsk  (64, 768)  bf16    bsk  (1, 768)  f32   (all 5 skip mats + biases)
      wh1..wh5 (prev_pad, H_PAD[i]) bf16
      wout (128, 128) bf16    bout (1, 128)  f32
    All padded rows/cols are zero, so padded activation lanes stay exactly 0.
    """
    # layer 0: (516, 37) -> (64, 640)
    w0, b0 = params[0]
    w0p = jnp.zeros((INPUT_PAD, H_PAD[0]), jnp.float32)
    w0p = w0p.at[:INPUT_SIZE, :HIDDEN[0]].set(w0.T)
    b0p = jnp.zeros((1, H_PAD[0]), jnp.float32).at[0, :HIDDEN[0]].set(b0)

    wh_list, wskip_cols, bskip_cols = [], [], []
    prev_true, prev_pad = HIDDEN[0], H_PAD[0]
    for i in range(1, len(HIDDEN)):
        w, b = params[i]                         # (HIDDEN[i], prev_true + 37)
        wt = w.T
        out_true, out_pad = HIDDEN[i], H_PAD[i]
        whp = jnp.zeros((prev_pad, out_pad), jnp.float32)
        whp = whp.at[:prev_true, :out_true].set(wt[:prev_true])
        wip = jnp.zeros((INPUT_PAD, out_pad), jnp.float32)
        wip = wip.at[:INPUT_SIZE, :out_true].set(wt[prev_true:])
        bp = jnp.zeros((1, out_pad), jnp.float32).at[0, :out_true].set(b)
        wh_list.append(whp.astype(jnp.bfloat16))
        wskip_cols.append(wip)
        bskip_cols.append(bp)
        prev_true, prev_pad = out_true, out_pad

    wsk = jnp.concatenate(wskip_cols, axis=1).astype(jnp.bfloat16)   # (64, 768)
    bsk = jnp.concatenate(bskip_cols, axis=1)                        # (1, 768)

    w_last, b_last = params[-1]                  # (2, 16)
    woutp = jnp.zeros((H_PAD[-1], OUT_PAD), jnp.float32)
    woutp = woutp.at[:HIDDEN[-1], :OUTPUT_CH].set(w_last.T)
    boutp = jnp.zeros((1, OUT_PAD), jnp.float32).at[0, :OUTPUT_CH].set(b_last)

    return [w0p.astype(jnp.bfloat16), b0p, wsk, bsk,
            *wh_list, woutp.astype(jnp.bfloat16), boutp]


# ---------------------------------------------------------------------------
# grid_sample (align_corners=False, zeros padding) as 4-corner gather + wsum.
# TODO(synk): data-dependent gather stays in XLA glue (see header note).
# ---------------------------------------------------------------------------
def bilinear_sample(fields_cl, coord, H, W):
    """fields_cl: (B, H*W, C) channels-last, flat index = h*W + w.
    After the module's (0,1,3,2) permute, grid x indexes original H and grid y
    indexes original W (matches F.grid_sample align_corners=False semantics)."""
    cx = coord[..., 0]
    cy = coord[..., 1]
    ix = ((cx + 1.0) * H - 1.0) * 0.5     # along original H
    iy = ((cy + 1.0) * W - 1.0) * 0.5     # along original W
    ix0 = jnp.floor(ix); ix1 = ix0 + 1.0
    iy0 = jnp.floor(iy); iy1 = iy0 + 1.0
    wx1 = ix - ix0; wx0 = 1.0 - wx1
    wy1 = iy - iy0; wy0 = 1.0 - wy1
    out = jnp.zeros(cx.shape + (fields_cl.shape[-1],), jnp.float32)
    for xi, yi, w in ((ix0, iy0, wx0 * wy0), (ix0, iy1, wx0 * wy1),
                      (ix1, iy0, wx1 * wy0), (ix1, iy1, wx1 * wy1)):
        valid = ((xi >= 0) & (xi < H) & (yi >= 0) & (yi < W)).astype(jnp.float32)
        xi_c = jnp.clip(xi, 0, H - 1).astype(jnp.int32)
        yi_c = jnp.clip(yi, 0, W - 1).astype(jnp.int32)
        flat = xi_c * W + yi_c                                   # (B, N)
        vals = jnp.take_along_axis(fields_cl, flat[..., None], axis=1)  # (B, N, C)
        out = out + (w * valid)[..., None] * vals
    return out


# ---------------------------------------------------------------------------
# Pallas kernel: dense-skip MLP over a tile of rows (bf16 matmuls, f32 accum)
# ---------------------------------------------------------------------------
def mlp_kernel(inp_ref, w0_ref, b0_ref, wsk_ref, bsk_ref,
               wh1_ref, wh2_ref, wh3_ref, wh4_ref, wh5_ref,
               wout_ref, bout_ref, out_ref):
    inp = inp_ref[...]                                    # (TM, 64) bf16

    # All five per-layer input skip matmuls merged into ONE wide lane-dense
    # matmul; hidden-layer biases are folded into the skip buffer.
    skip = (jnp.dot(inp, wsk_ref[...], preferred_element_type=jnp.float32)
            + bsk_ref[...])                               # (TM, 768) f32

    # layer 0
    x = jnp.dot(inp, w0_ref[...], preferred_element_type=jnp.float32) + b0_ref[...]
    x = jnp.maximum(x, 0.0)                               # (TM, 640) f32

    # hidden layers: relu(x @ W_h + skip_slice)   (lane-aligned static slices)
    off = 0
    for wh_ref, width in zip((wh1_ref, wh2_ref, wh3_ref, wh4_ref, wh5_ref),
                             H_PAD[1:]):
        x = (jnp.dot(x.astype(jnp.bfloat16), wh_ref[...],
                     preferred_element_type=jnp.float32)
             + skip[:, off:off + width])
        x = jnp.maximum(x, 0.0)
        off += width

    # output layer (padded to 128 lanes -> unmasked stores)
    out_ref[...] = (jnp.dot(x.astype(jnp.bfloat16), wout_ref[...],
                            preferred_element_type=jnp.float32) + bout_ref[...])


def cont_decoder_forward(params_flat, lr_fields, context_grid, hr_eps, coord,
                         *, tile_m=1024):
    B, _, H, W = context_grid.shape
    assert lr_fields.shape == (B, OUTPUT_CH, H, W)
    assert hr_eps.shape == (B, H, W)
    N = coord.shape[1]
    coord = coord.astype(jnp.float32)

    # fields channels-last: (B, HW, 35), flat spatial index = h*W + w
    fields = jnp.concatenate(
        [context_grid, lr_fields, hr_eps[:, None, :, :]], axis=1).astype(jnp.float32)
    fields_cl = fields.reshape(B, FIELD_CH, H * W).transpose(0, 2, 1)

    sampled = bilinear_sample(fields_cl, coord, H, W)              # (B, N, 35)
    inp37 = jnp.concatenate(
        [sampled[..., :CONTEXT_CH], coord, sampled[..., CONTEXT_CH:]],
        axis=-1)                                                   # (B, N, 37)

    rows = B * N
    # Clamp tile_m so tiny demos don't pad to a full 1024-row tile; for large
    # inputs keep big tiles (amortize ~0.35 us/step) with >=2 steps so v7x's
    # two TensorCores both get work via the "parallel" grid axis.
    tile_m = max(256, min(tile_m, pl.cdiv(rows, 256) * 256))
    rows_pad = pl.cdiv(rows, tile_m) * tile_m

    # NOTE: coord is quantized to bf16 here (8-bit mantissa); acceptable for
    # this module's tolerance, ship f32 if finer coordinate precision matters.
    inp_rows = jnp.zeros((rows_pad, INPUT_PAD), jnp.bfloat16)
    inp_rows = inp_rows.at[:rows, :INPUT_SIZE].set(
        inp37.reshape(rows, INPUT_SIZE).astype(jnp.bfloat16))

    in_specs = ([pl.BlockSpec((tile_m, INPUT_PAD), lambda r: (r, 0))]
                + [pl.BlockSpec(p.shape, lambda r: (0, 0)) for p in params_flat])
    out_spec = pl.BlockSpec((tile_m, OUT_PAD), lambda r: (r, 0))

    out = pl.pallas_call(
        mlp_kernel,
        out_shape=jax.ShapeDtypeStruct((rows_pad, OUT_PAD), jnp.float32),
        grid_spec=pltpu.PrefetchScalarGridSpec(
            num_scalar_prefetch=0,
            grid=(rows_pad // tile_m,),
            in_specs=in_specs,
            out_specs=out_spec),
        compiler_params=pltpu.CompilerParams(
            dimension_semantics=("parallel",),
            vmem_limit_bytes=32 * 1024 * 1024),
    )(inp_rows, *params_flat)

    # Rows [rows:rows_pad] and lanes [2:128] are padding garbage -> sliced off.
    return out[:rows, :OUTPUT_CH].reshape(B, N, OUTPUT_CH)


# ---------------------------------------------------------------------------
# Pure-JAX f32 reference of the module's forward (same interpolation math)
# ---------------------------------------------------------------------------
def reference_forward(params, lr_fields, context_grid, hr_eps, coord):
    B, _, H, W = context_grid.shape
    coord = coord.astype(jnp.float32)
    fields = jnp.concatenate(
        [context_grid, lr_fields, hr_eps[:, None, :, :]], axis=1).astype(jnp.float32)
    fields_cl = fields.reshape(B, FIELD_CH, H * W).transpose(0, 2, 1)
    sampled = bilinear_sample(fields_cl, coord, H, W)              # (B, N, 35)
    inp = jnp.concatenate(
        [sampled[..., :CONTEXT_CH], coord, sampled[..., CONTEXT_CH:]], axis=-1)
    w, b = params[0]
    x = jax.nn.relu(inp @ w.T + b)
    for i in range(1, len(HIDDEN)):
        w, b = params[i]
        x = jax.nn.relu(jnp.concatenate([x, inp], axis=-1) @ w.T + b)
    w, b = params[-1]
    return x @ w.T + b


if __name__ == "__main__":
    key = jax.random.PRNGKey(0)
    kp, kc, kl, ke, kco = jax.random.split(key, 5)

    B, H, W, N = 2, 16, 16, 64
    params = init_params(kp)
    params_flat = prep_params(params)

    context_grid = jax.random.normal(kc, (B, CONTEXT_CH, H, W), jnp.float32)
    lr_fields = jax.random.normal(kl, (B, OUTPUT_CH, H, W), jnp.float32)
    hr_eps = jax.random.normal(ke, (B, H, W), jnp.float32)
    coord = jax.random.uniform(kco, (B, N, COORD_CH), jnp.float32, -1.0, 1.0)

    out = cont_decoder_forward(params_flat, lr_fields, context_grid, hr_eps, coord)
    out = jax.block_until_ready(out)

    ref = reference_forward(params, lr_fields, context_grid, hr_eps, coord)
    assert out.shape == (B, N, OUTPUT_CH)
    # bf16 weights/activations with f32 accumulation -> relaxed tolerance.
    assert jnp.allclose(out, ref, rtol=5e-2, atol=5e-2), \
        float(jnp.max(jnp.abs(out - ref)))
    print("KERNEL_OK")
</pallas_src>

<mosaic_0001>
module attributes {stable_mosaic.version = 11 : i64} {
  func.func @mlp_kernel(%arg0: i32, %arg1: memref<256x64xbf16, #tpu.memory_space<vmem>>, %arg2: memref<64x640xbf16, #tpu.memory_space<vmem>>, %arg3: memref<1x640xf32, #tpu.memory_space<vmem>>, %arg4: memref<64x768xbf16, #tpu.memory_space<vmem>>, %arg5: memref<1x768xf32, #tpu.memory_space<vmem>>, %arg6: memref<640x256xbf16, #tpu.memory_space<vmem>>, %arg7: memref<256x128xbf16, #tpu.memory_space<vmem>>, %arg8: memref<128x128xbf16, #tpu.memory_space<vmem>>, %arg9: memref<128x128xbf16, #tpu.memory_space<vmem>>, %arg10: memref<128x128xbf16, #tpu.memory_space<vmem>>, %arg11: memref<128x128xbf16, #tpu.memory_space<vmem>>, %arg12: memref<1x128xf32, #tpu.memory_space<vmem>>, %arg13: memref<256x128xf32, #tpu.memory_space<vmem>>) attributes {dimension_semantics = [#tpu.dimension_semantics<parallel>], iteration_bounds = array<i64: 1>, scalar_prefetch = 0 : i64, scratch_operands = 0 : i64, tpu.core_type = #tpu.core_type<tc>, window_params = [{transform_indices = @transform_0, window_bounds = array<i64: 256, 64>}, {pipeline_mode = #tpu.pipeline_mode<synchronous>, transform_indices = @transform_1, window_bounds = array<i64: 64, 640>}, {pipeline_mode = #tpu.pipeline_mode<synchronous>, transform_indices = @transform_2, window_bounds = array<i64: 1, 640>}, {pipeline_mode = #tpu.pipeline_mode<synchronous>, transform_indices = @transform_3, window_bounds = array<i64: 64, 768>}, {pipeline_mode = #tpu.pipeline_mode<synchronous>, transform_indices = @transform_4, window_bounds = array<i64: 1, 768>}, {pipeline_mode = #tpu.pipeline_mode<synchronous>, transform_indices = @transform_5, window_bounds = array<i64: 640, 256>}, {pipeline_mode = #tpu.pipeline_mode<synchronous>, transform_indices = @transform_6, window_bounds = array<i64: 256, 128>}, {pipeline_mode = #tpu.pipeline_mode<synchronous>, transform_indices = @transform_7, window_bounds = array<i64: 128, 128>}, {pipeline_mode = #tpu.pipeline_mode<synchronous>, transform_indices = @transform_8, window_bounds = array<i64: 128, 128>}, {pipeline_mode = #tpu.pipeline_mode<synchronous>, transform_indices = @transform_9, window_bounds = array<i64: 128, 128>}, {pipeline_mode = #tpu.pipeline_mode<synchronous>, transform_indices = @transform_10, window_bounds = array<i64: 128, 128>}, {pipeline_mode = #tpu.pipeline_mode<synchronous>, transform_indices = @transform_11, window_bounds = array<i64: 1, 128>}, {transform_indices = @transform_12, window_bounds = array<i64: 256, 128>}]} {
    %c0 = arith.constant 0 : index
    %c0_0 = arith.constant 0 : index
    %0 = vector.load %arg1[%c0, %c0_0] : memref<256x64xbf16, #tpu.memory_space<vmem>>, vector<256x64xbf16>
    %c0_1 = arith.constant 0 : index
    %c0_2 = arith.constant 0 : index
    %1 = vector.load %arg4[%c0_1, %c0_2] : memref<64x768xbf16, #tpu.memory_space<vmem>>, vector<64x768xbf16>
    %cst = arith.constant dense<0.000000e+00> : vector<256x768xf32>
    %2 = tpu.matmul %0, %1, %cst {dimension_numbers = #tpu.dot_dimension_numbers<[1], [0], [0], [1], [0, 0, 1, 1], [], []>} : vector<256x64xbf16>, vector<64x768xbf16>, vector<256x768xf32> -> vector<256x768xf32>
    %c0_3 = arith.constant 0 : index
    %c0_4 = arith.constant 0 : index
    %3 = vector.load %arg5[%c0_3, %c0_4] : memref<1x768xf32, #tpu.memory_space<vmem>>, vector<1x768xf32>
    %4 = vector.broadcast %3 : vector<1x768xf32> to vector<256x768xf32>
    %5 = arith.addf %2, %4 : vector<256x768xf32>
    %c0_5 = arith.constant 0 : index
    %c0_6 = arith.constant 0 : index
    %6 = vector.load %arg2[%c0_5, %c0_6] : memref<64x640xbf16, #tpu.memory_space<vmem>>, vector<64x640xbf16>
    %cst_7 = arith.constant dense<0.000000e+00> : vector<256x640xf32>
    %7 = tpu.matmul %0, %6, %cst_7 {dimension_numbers = #tpu.dot_dimension_numbers<[1], [0], [0], [1], [0, 0, 1, 1], [], []>} : vector<256x64xbf16>, vector<64x640xbf16>, vector<256x640xf32> -> vector<256x640xf32>
    %c0_8 = arith.constant 0 : index
    %c0_9 = arith.constant 0 : index
    %8 = vector.load %arg3[%c0_8, %c0_9] : memref<1x640xf32, #tpu.memory_space<vmem>>, vector<1x640xf32>
    %9 = vector.broadcast %8 : vector<1x640xf32> to vector<256x640xf32>
    %10 = arith.addf %7, %9 : vector<256x640xf32>
    %cst_10 = arith.constant 0.000000e+00 : f32
    %11 = vector.broadcast %cst_10 : f32 to vector<256x640xf32>
    %12 = arith.maximumf %10, %11 : vector<256x640xf32>
    %13 = arith.truncf %12 : vector<256x640xf32> to vector<256x640xbf16>
    %c0_11 = arith.constant 0 : index
    %c0_12 = arith.constant 0 : index
    %14 = vector.load %arg6[%c0_11, %c0_12] : memref<640x256xbf16, #tpu.memory_space<vmem>>, vector<640x256xbf16>
    %cst_13 = arith.constant dense<0.000000e+00> : vector<256x256xf32>
    %15 = tpu.matmul %13, %14, %cst_13 {dimension_numbers = #tpu.dot_dimension_numbers<[1], [0], [0], [1], [0, 0, 1, 1], [], []>} : vector<256x640xbf16>, vector<640x256xbf16>, vector<256x256xf32> -> vector<256x256xf32>
    %16 = vector.extract_strided_slice %5 {offsets = [0, 0], sizes = [256, 256], strides = [1, 1]} : vector<256x768xf32> to vector<256x256xf32>
    %17 = arith.addf %15, %16 : vector<256x256xf32>
    %cst_14 = arith.constant 0.000000e+00 : f32
    %18 = vector.broadcast %cst_14 : f32 to vector<256x256xf32>
    %19 = arith.maximumf %17, %18 : vector<256x256xf32>
    %20 = arith.truncf %19 : vector<256x256xf32> to vector<256x256xbf16>
    %c0_15 = arith.constant 0 : index
    %c0_16 = arith.constant 0 : index
    %21 = vector.load %arg7[%c0_15, %c0_16] : memref<256x128xbf16, #tpu.memory_space<vmem>>, vector<256x128xbf16>
    %cst_17 = arith.constant dense<0.000000e+00> : vector<256x128xf32>
    %22 = tpu.matmul %20, %21, %cst_17 {dimension_numbers = #tpu.dot_dimension_numbers<[1], [0], [0], [1], [0, 0, 1, 1], [], []>} : vector<256x256xbf16>, vector<256x128xbf16>, vector<256x128xf32> -> vector<256x128xf32>
    %23 = vector.extract_strided_slice %5 {offsets = [0, 256], sizes = [256, 128], strides = [1, 1]} : vector<256x768xf32> to vector<256x128xf32>
    %24 = arith.addf %22, %23 : vector<256x128xf32>
    %cst_18 = arith.constant 0.000000e+00 : f32
    %25 = vector.broadcast %cst_18 : f32 to vector<256x128xf32>
    %26 = arith.maximumf %24, %25 : vector<256x128xf32>
    %27 = arith.truncf %26 : vector<256x128xf32> to vector<256x128xbf16>
    %c0_19 = arith.constant 0 : index
    %c0_20 = arith.constant 0 : index
    %28 = vector.load %arg8[%c0_19, %c0_20] : memref<128x128xbf16, #tpu.memory_space<vmem>>, vector<128x128xbf16>
    %cst_21 = arith.constant dense<0.000000e+00> : vector<256x128xf32>
    %29 = tpu.matmul %27, %28, %cst_21 {dimension_numbers = #tpu.dot_dimension_numbers<[1], [0], [0], [1], [0, 0, 1, 1], [], []>} : vector<256x128xbf16>, vector<128x128xbf16>, vector<256x128xf32> -> vector<256x128xf32>
    %30 = vector.extract_strided_slice %5 {offsets = [0, 384], sizes = [256, 128], strides = [1, 1]} : vector<256x768xf32> to vector<256x128xf32>
    %31 = arith.addf %29, %30 : vector<256x128xf32>
    %cst_22 = arith.constant 0.000000e+00 : f32
    %32 = vector.broadcast %cst_22 : f32 to vector<256x128xf32>
    %33 = arith.maximumf %31, %32 : vector<256x128xf32>
    %34 = arith.truncf %33 : vector<256x128xf32> to vector<256x128xbf16>
    %c0_23 = arith.constant 0 : index
    %c0_24 = arith.constant 0 : index
    %35 = vector.load %arg9[%c0_23, %c0_24] : memref<128x128xbf16, #tpu.memory_space<vmem>>, vector<128x128xbf16>
    %cst_25 = arith.constant dense<0.000000e+00> : vector<256x128xf32>
    %36 = tpu.matmul %34, %35, %cst_25 {dimension_numbers = #tpu.dot_dimension_numbers<[1], [0], [0], [1], [0, 0, 1, 1], [], []>} : vector<256x128xbf16>, vector<128x128xbf16>, vector<256x128xf32> -> vector<256x128xf32>
    %37 = vector.extract_strided_slice %5 {offsets = [0, 512], sizes = [256, 128], strides = [1, 1]} : vector<256x768xf32> to vector<256x128xf32>
    %38 = arith.addf %36, %37 : vector<256x128xf32>
    %cst_26 = arith.constant 0.000000e+00 : f32
    %39 = vector.broadcast %cst_26 : f32 to vector<256x128xf32>
    %40 = arith.maximumf %38, %39 : vector<256x128xf32>
    %41 = arith.truncf %40 : vector<256x128xf32> to vector<256x128xbf16>
    %c0_27 = arith.constant 0 : index
    %c0_28 = arith.constant 0 : index
    %42 = vector.load %arg10[%c0_27, %c0_28] : memref<128x128xbf16, #tpu.memory_space<vmem>>, vector<128x128xbf16>
    %cst_29 = arith.constant dense<0.000000e+00> : vector<256x128xf32>
    %43 = tpu.matmul %41, %42, %cst_29 {dimension_numbers = #tpu.dot_dimension_numbers<[1], [0], [0], [1], [0, 0, 1, 1], [], []>} : vector<256x128xbf16>, vector<128x128xbf16>, vector<256x128xf32> -> vector<256x128xf32>
    %44 = vector.extract_strided_slice %5 {offsets = [0, 640], sizes = [256, 128], strides = [1, 1]} : vector<256x768xf32> to vector<256x128xf32>
    %45 = arith.addf %43, %44 : vector<256x128xf32>
    %cst_30 = arith.constant 0.000000e+00 : f32
    %46 = vector.broadcast %cst_30 : f32 to vector<256x128xf32>
    %47 = arith.maximumf %45, %46 : vector<256x128xf32>
    %48 = arith.truncf %47 : vector<256x128xf32> to vector<256x128xbf16>
    %c0_31 = arith.constant 0 : index
    %c0_32 = arith.constant 0 : index
    %49 = vector.load %arg11[%c0_31, %c0_32] : memref<128x128xbf16, #tpu.memory_space<vmem>>, vector<128x128xbf16>
    %cst_33 = arith.constant dense<0.000000e+00> : vector<256x128xf32>
    %50 = tpu.matmul %48, %49, %cst_33 {dimension_numbers = #tpu.dot_dimension_numbers<[1], [0], [0], [1], [0, 0, 1, 1], [], []>} : vector<256x128xbf16>, vector<128x128xbf16>, vector<256x128xf32> -> vector<256x128xf32>
    %c0_34 = arith.constant 0 : index
    %c0_35 = arith.constant 0 : index
    %51 = vector.load %arg12[%c0_34, %c0_35] : memref<1x128xf32, #tpu.memory_space<vmem>>, vector<1x128xf32>
    %52 = vector.broadcast %51 : vector<1x128xf32> to vector<256x128xf32>
    %53 = arith.addf %50, %52 : vector<256x128xf32>
    %c0_36 = arith.constant 0 : index
    %c0_37 = arith.constant 0 : index
    %54 = vector.load %arg13[%c0_36, %c0_37] : memref<256x128xf32, #tpu.memory_space<vmem>>, vector<256x128xf32>
    tpu.vector_store %arg13[%c0_36, %c0_37], %53 {strides = array<i32>} : memref<256x128xf32, #tpu.memory_space<vmem>>, vector<256x128xf32>,
    return
  }
  func.func @transform_0(%arg0: i32) -> (i32, i32) {
    %c0_i32 = arith.constant 0 : i32
    %c0_i32_0 = arith.constant 0 : i32
    return %arg0, %c0_i32 : i32, i32
  }
  func.func @transform_1(%arg0: i32) -> (i32, i32) {
    %c0_i32 = arith.constant 0 : i32
    %c0_i32_0 = arith.constant 0 : i32
    %c0_i32_1 = arith.constant 0 : i32
    return %c0_i32, %c0_i32_0 : i32, i32
  }
  func.func @transform_2(%arg0: i32) -> (i32, i32) {
    %c0_i32 = arith.constant 0 : i32
    %c0_i32_0 = arith.constant 0 : i32
    %c0_i32_1 = arith.constant 0 : i32
    return %c0_i32, %c0_i32_0 : i32, i32
  }
  func.func @transform_3(%arg0: i32) -> (i32, i32) {
    %c0_i32 = arith.constant 0 : i32
    %c0_i32_0 = arith.constant 0 : i32
    %c0_i32_1 = arith.constant 0 : i32
    return %c0_i32, %c0_i32_0 : i32, i32
  }
  func.func @transform_4(%arg0: i32) -> (i32, i32) {
    %c0_i32 = arith.constant 0 : i32
    %c0_i32_0 = arith.constant 0 : i32
    %c0_i32_1 = arith.constant 0 : i32
    return %c0_i32, %c0_i32_0 : i32, i32
  }
  func.func @transform_5(%arg0: i32) -> (i32, i32) {
    %c0_i32 = arith.constant 0 : i32
    %c0_i32_0 = arith.constant 0 : i32
    %c0_i32_1 = arith.constant 0 : i32
    return %c0_i32, %c0_i32_0 : i32, i32
  }
  func.func @transform_6(%arg0: i32) -> (i32, i32) {
    %c0_i32 = arith.constant 0 : i32
    %c0_i32_0 = arith.constant 0 : i32
    %c0_i32_1 = arith.constant 0 : i32
    return %c0_i32, %c0_i32_0 : i32, i32
  }
  func.func @transform_7(%arg0: i32) -> (i32, i32) {
    %c0_i32 = arith.constant 0 : i32
    %c0_i32_0 = arith.constant 0 : i32
    %c0_i32_1 = arith.constant 0 : i32
    return %c0_i32, %c0_i32_0 : i32, i32
  }
  func.func @transform_8(%arg0: i32) -> (i32, i32) {
    %c0_i32 = arith.constant 0 : i32
    %c0_i32_0 = arith.constant 0 : i32
    %c0_i32_1 = arith.constant 0 : i32
    return %c0_i32, %c0_i32_0 : i32, i32
  }
  func.func @transform_9(%arg0: i32) -> (i32, i32) {
    %c0_i32 = arith.constant 0 : i32
    %c0_i32_0 = arith.constant 0 : i32
    %c0_i32_1 = arith.constant 0 : i32
    return %c0_i32, %c0_i32_0 : i32, i32
  }
  func.func @transform_10(%arg0: i32) -> (i32, i32) {
    %c0_i32 = arith.constant 0 : i32
    %c0_i32_0 = arith.constant 0 : i32
    %c0_i32_1 = arith.constant 0 : i32
    return %c0_i32, %c0_i32_0 : i32, i32
  }
  func.func @transform_11(%arg0: i32) -> (i32, i32) {
    %c0_i32 = arith.constant 0 : i32
    %c0_i32_0 = arith.constant 0 : i32
    %c0_i32_1 = arith.constant 0 : i32
    return %c0_i32, %c0_i32_0 : i32, i32
  }
  func.func @transform_12(%arg0: i32) -> (i32, i32) {
    %c0_i32 = arith.constant 0 : i32
    %c0_i32_0 = arith.constant 0 : i32
    return %arg0, %c0_i32 : i32, i32
  }
}

</mosaic_0001>

<bundles_post_ra>
// kernel: tpu_custom_call.1
= control target key start
LH: loop header
LB: loop body
LE: loop exit
PB: predicated region body
PF: predicated region fallthrough
CT: control target
= control target key end

     0   :  { %17 = vsyncpa [#allocation3], 0  ;;  %s8519_s0 = inlined_call_operand.vmem [shape: bf16[256,64], index: 0, kind: input, shape index: {}]   ;;  %s8520_s1 = inlined_call_operand.hbm [shape: bf16[64,640], index: 1, kind: input, shape index: {}]   ;;  %s8521_s2 = inlined_call_operand.hbm [shape: f32[1,640], index: 2, kind: input, shape index: {}]   ;;  %s8522_s3 = inlined_call_operand.vmem [shape: bf16[64,768], index: 3, kind: input, shape index: {}]   ;;  %s8523_s4 = inlined_call_operand.hbm [shape: f32[1,768], index: 4, kind: input, shape index: {}]   ;;  %s8524_s5 = inlined_call_operand.hbm [shape: bf16[640,256], index: 5, kind: input, shape index: {}]   ;;  %s8525_s6 = inlined_call_operand.hbm [shape: bf16[256,128], index: 6, kind: input, shape index: {}]   ;;  %s8526_s7 = inlined_call_operand.hbm [shape: bf16[128,128], index: 7, kind: input, shape index: {}]   ;;  %s8527_s8 = inlined_call_operand.hbm [shape: bf16[128,128], index: 8, kind: input, shape index: {}]   ;;  %s8528_s9 = inlined_call_operand.hbm [shape: bf16[128,128], index: 9, kind: input, shape index: {}]   ;;  %s8529_s10 = inlined_call_operand.hbm [shape: bf16[128,128], index: 10, kind: input, shape index: {}]   ;;  %s8530_s11 = inlined_call_operand.vmem [shape: f32[1,128], index: 11, kind: input, shape index: {}]   ;;  %s8531_s12 = inlined_call_operand.hbm [shape: f32[256,128], index: 12, kind: output, shape index: {}]  }
   0x1   :  { %18 = vsyncpa [#allocation6], 0 }
   0x2   :  { %19 = vsyncpa [#allocation9], 0 }
   0x3   :  { %20 = vsyncpa [#allocation12], 0 }
   0x4   :  { %21 = vsyncpa [#allocation15], 0  ;;  %s43_s23 = sshll.u32 %s8521_s2, 4  ;;  %s44_s23 = int_to_ptr.hbm [resolvable:$true] %s43_s23 }
   0x5   :  { %22 = vsyncpa [#allocation4], 0  ;;  %s5902_s24 = smov [#allocation5]   ;;  %s66_s28 = sshll.u32 %s8524_s5, 4  ;;  %s67_s28 = int_to_ptr.hbm [resolvable:$true] %s66_s28 }
   0x6   :  { %s45_s25 = sshll.u32 %s5902_s24, 4  ;;  %s5903_s29 = smov [#allocation8]   ;;  %s46_s25 = int_to_ptr.vmem [resolvable:$true] %s45_s25 }
   0x7   :  { %48 = dma.hbm_to_vmem [thread:$0]  %s44_s23, 80, %s46_s25, [#allocation6]  }
   0x8   :  { %s68_s30 = sshll.u32 %s5903_s29, 4  ;;  %s5904_s13 = smov 128   ;;  %s69_s30 = int_to_ptr.vmem [resolvable:$true] %s68_s30 }
   0x9   :  { %s5905_s14 = smov 8   ;;  %s92_s16 = sshll.u32 %s8526_s7, 4  ;;  %s93_s16 = int_to_ptr.hbm [resolvable:$true] %s92_s16 }
   0xa   :  { %74 = dma.hbm_to_vmem [thread:$0]  %s67_s28, 10240, %s69_s30, [#allocation9], %s5904_s13, %s5904_s13, %s5905_s14  }
   0xb   :  { %s5906_s17 = smov [#allocation11]   ;;  %s118_s20 = sshll.u32 %s8528_s9, 4  ;;  %s119_s20 = int_to_ptr.hbm [resolvable:$true] %s118_s20 }
   0xc   :  { %s94_s18 = sshll.u32 %s5906_s17, 4  ;;  %s5907_s21 = smov 64   ;;  %s95_s18 = int_to_ptr.vmem [resolvable:$true] %s94_s18 }
   0xd   :  { %s5908_s22 = smov 4   ;;  %s5909_s23 = smov [#allocation14]  }
   0xe   :  { %100 = dma.hbm_to_vmem [thread:$0]  %s93_s16, 1024, %s95_s18, [#allocation12], %s5907_s21, %s5907_s21, %s5908_s22  }
   0xf   :  { %s120_s24 = sshll.u32 %s5909_s23, 4  ;;  %s29_s7 = sshll.u32 %s8520_s1, 4  ;;  %s121_s24 = int_to_ptr.vmem [resolvable:$true] %s120_s24  ;;  %s30_s7 = int_to_ptr.hbm [resolvable:$true] %s29_s7 }
  0x10   :  { %126 = dma.hbm_to_vmem [thread:$0]  %s119_s20, 1024, %s121_s24, [#allocation15], %s5907_s21, %s5907_s21, %s5908_s22  }
  0x11   :  { %s5910_s9 = smov [#allocation2]   ;;  %s56_s30 = sshll.u32 %s8523_s4, 4  ;;  %s57_s30 = int_to_ptr.hbm [resolvable:$true] %s56_s30 }
  0x12   :  { %s31_s27 = sshll.u32 %s5910_s9, 4  ;;  %s5911_s2 = smov 320   ;;  %s32_s27 = int_to_ptr.vmem [resolvable:$true] %s31_s27 }
  0x13   :  { %s5912_s15 = smov 20   ;;  %s5913_s16 = smov [#allocation7]  }
  0x14   :  { %37 = dma.hbm_to_vmem [thread:$0]  %s30_s7, 2560, %s32_s27, [#allocation3], %s5911_s2, %s5911_s2, %s5912_s15  }
  0x15   :  { %s58_s17 = sshll.u32 %s5913_s16, 4  ;;  %s79_s5 = sshll.u32 %s8525_s6, 4  ;;  %s59_s17 = int_to_ptr.vmem [resolvable:$true] %s58_s17  ;;  %s80_s5 = int_to_ptr.hbm [resolvable:$true] %s79_s5 }
  0x16   :  { %61 = dma.hbm_to_vmem [thread:$0]  %s57_s30, 96, %s59_s17, [#allocation6]  }
  0x17   :  { %s105_s23 = sshll.u32 %s8527_s8, 4  ;;  %s5914_s24 = smov [#allocation10]   ;;  %s106_s23 = int_to_ptr.hbm [resolvable:$true] %s105_s23 }
  0x18   :  { %s81_s25 = sshll.u32 %s5914_s24, 4  ;;  %s5915_s4 = smov [#allocation13]   ;;  %s82_s25 = int_to_ptr.vmem [resolvable:$true] %s81_s25 }
  0x19   :  { %87 = dma.hbm_to_vmem [thread:$0]  %s80_s5, 2048, %s82_s25, [#allocation9], %s5907_s21, %s5907_s21, %s5908_s22  }
  0x1a   :  { %s107_s26 = sshll.u32 %s5915_s4, 4  ;;  %s131_s6 = sshll.u32 %s8529_s10, 4  ;;  %s108_s26 = int_to_ptr.vmem [resolvable:$true] %s107_s26  ;;  %s132_s6 = int_to_ptr.hbm [resolvable:$true] %s131_s6 }
  0x1b   :  { %113 = dma.hbm_to_vmem [thread:$0]  %s106_s23, 1024, %s108_s26, [#allocation12], %s5907_s21, %s5907_s21, %s5908_s22  }
  0x1c   :  { %s5916_s8 = smov [#allocation16]  }
  0x1d   :  { %s133_s27 = sshll.u32 %s5916_s8, 4  ;;  %s134_s27 = int_to_ptr.vmem [resolvable:$true] %s133_s27 }
  0x1e   :  { %139 = dma.hbm_to_vmem [thread:$0]  %s132_s6, 1024, %s134_s27, [#allocation15], %s5907_s21, %s5907_s21, %s5908_s22  }
  0x1f   :  { %5890 = dma.done.wait [#allocation3], 2560  }
  0x20   :  { %5891 = vsyncadd [#allocation3], 4294964736 }
  0x21   :  { %5892 = dma.done.wait [#allocation6], 176  }
  0x22   :  { %5893 = vsyncadd [#allocation6], 4294967120 }
  0x23   :  { %5894 = dma.done.wait [#allocation9], 12288  }
  0x24   :  { %5895 = vsyncadd [#allocation9], 4294955008 }
  0x25   :  { %5896 = dma.done.wait [#allocation12], 2048  }
  0x26   :  { %5897 = vsyncadd [#allocation12], 4294965248 }
  0x27   :  { %5898 = dma.done.wait [#allocation15], 2048  }
  0x28   :  { %5899 = vsyncadd [#allocation15], 4294965248  ;;  %v4630_v0 = vld [vmem:[%s8522_s3 + $0x90] sm:$0xf]  ;;  %v5457_v1 = vld [vmem:[%s8522_s3 + $0xa4] sm:$0xf0] }
  0x29   :  { %v5454_v2 = vld [vmem:[%s8522_s3 + $0x94] sm:$0xf]  ;;  %v4631_v3 = vor.u32 %v5457_v1, %v4630_v0  ;;  %v4632_v4 = vld [vmem:[%s8522_s3 + $0xa8] sm:$0xf0]  ;;  %v4638_v5 = vld [vmem:[%s8522_s3 + $0x98] sm:$0xf] }
  0x2a   :  { %v5458_v6 = vld [vmem:[%s8522_s3 + $0xac] sm:$0xf0]  ;;  %v4635_v7 = vor.u32 %v5454_v2, %v4632_v4  ;;  %v4606_v9 = vld [vmem:[%s8522_s3 + $0x60] sm:$0xf]  ;;  %v5451_v10 = vld [vmem:[%s8522_s3 + $0x74] sm:$0xf0] }
  0x2b   :  { %v4639_v8 = vor.u32 %v5458_v6, %v4638_v5  ;;  %v5448_v11 = vld [vmem:[%s8522_s3 + $0x64] sm:$0xf]  ;;  %502 = vmatpush.bf16.msra.mxu0 %v4631_v3  ;;  %5608 = vmatpush.bf16.msra.mxu3 %v4631_v3  ;;  %v4607_v12 = vor.u32 %v5451_v10, %v4606_v9  ;;  %v4608_v13 = vld [vmem:[%s8522_s3 + $0x78] sm:$0xf0]  ;;  %v4614_v14 = vld [vmem:[%s8522_s3 + $0x68] sm:$0xf] }
  0x2c   :  { %v5452_v15 = vld [vmem:[%s8522_s3 + $0x7c] sm:$0xf0]  ;;  %591 = vmatpush.bf16.msra.mxu1 %v4635_v7  ;;  %v4611_v16 = vor.u32 %v5448_v11, %v4608_v13  ;;  %v4582_v18 = vld [vmem:[%s8522_s3 + $0x30] sm:$0xf]  ;;  %v5445_v19 = vld [vmem:[%s8522_s3 + $0x44] sm:$0xf0] }
  0x2d   :  { %680 = vmatpush.bf16.msra.mxu2 %v4639_v8  ;;  %v4615_v17 = vor.u32 %v5452_v15, %v4614_v14  ;;  %v5442_v20 = vld [vmem:[%s8522_s3 + $0x34] sm:$0xf]  ;;  %v4584_v21 = vld [vmem:[%s8522_s3 + $0x48] sm:$0xf0]  ;;  %v4590_v22 = vld [vmem:[%s8522_s3 + $0x38] sm:$0xf]  ;;  %v4583_v24 = vor.u32 %v5445_v19, %v4582_v18 }
  0x2e   :  { %v5446_v23 = vld [vmem:[%s8522_s3 + $0x4c] sm:$0xf0]  ;;  %v4587_v25 = vor.u32 %v5442_v20, %v4584_v21  ;;  %v4558_v27 = vld [vmem:[%s8522_s3] sm:$0xf]  ;;  %v5439_v28 = vld [vmem:[%s8522_s3 + $0x14] sm:$0xf0] }
  0x2f   :  { %503 = vmatpush.bf16.msra.mxu0 %v4607_v12  ;;  %5609 = vmatpush.bf16.msra.mxu3 %v4607_v12  ;;  %v4591_v26 = vor.u32 %v5446_v23, %v4590_v22  ;;  %v5436_v29 = vld [vmem:[%s8522_s3 + $0x4] sm:$0xf]  ;;  %v4560_v30 = vld [vmem:[%s8522_s3 + $0x18] sm:$0xf0]  ;;  %v4566_v31 = vld [vmem:[%s8522_s3 + $0x8] sm:$0xf]  ;;  %v4559_v35 = vor.u32 %v5439_v28, %v4558_v27 }
  0x30   :  { %592 = vmatpush.bf16.msra.mxu1 %v4611_v16  ;;  %v5440_v32 = vld [vmem:[%s8522_s3 + $0x1c] sm:$0xf0]  ;;  %v5459_v34 = vld [vmem:[%s8522_s3 + $0xb4] sm:$0xf0]  ;;  %v4563_v36 = vor.u32 %v5436_v29, %v4560_v30  ;;  %vm449_vm0 = vcmask 523264   ;;  %v6127_v41 = vld [vmem:[%s8519_s0 + $0x8] sm:$0xff] }
  0x31   :  { %681 = vmatpush.bf16.msra.mxu2 %v4615_v17  ;;  %v4646_v33 = vld [vmem:[%s8522_s3 + $0xa0] sm:$0xf]  ;;  %v4567_v37 = vor.u32 %v5440_v32, %v4566_v31  ;;  %v6132_v42 = vld [vmem:[%s8519_s0 + $0x68] sm:$0xff]  ;;  %v4622_v43 = vld [vmem:[%s8522_s3 + $0x70] sm:$0xf] }
  0x32   :  { %v4647_v38 = vor.u32 %v5459_v34, %v4646_v33  ;;  %v6109_v39 = vld [vmem:[%s8519_s0] sm:$0xff]  ;;  %v5453_v44 = vld [vmem:[%s8522_s3 + $0x84] sm:$0xf0]  ;;  %v6151_v46 = vld [vmem:[%s8519_s0 + $0x10] sm:$0xff] }
  0x33   :  { %504 = vmatpush.bf16.msra.mxu0 %v4583_v24  ;;  %5610 = vmatpush.bf16.msra.mxu3 %v4583_v24  ;;  %v6114_v40 = vld [vmem:[%s8519_s0 + $0x60] sm:$0xff]  ;;  %v4623_v45 = vor.u32 %v5453_v44, %v4622_v43  ;;  %v6156_v47 = vld [vmem:[%s8519_s0 + $0x70] sm:$0xff]  ;;  %v6169_v48 = vld [vmem:[%s8519_s0 + $0x18] sm:$0xff] }
  0x34   :  { %593 = vmatpush.bf16.msra.mxu1 %v4587_v25  ;;  %v6174_v49 = vld [vmem:[%s8519_s0 + $0x78] sm:$0xff]  ;;  %v6187_v50 = vld [vmem:[%s8519_s0 + $0x20] sm:$0xff]  ;;  %v6206_v54 = vld [vmem:[%s8519_s0 + $0x28] sm:$0xff] }
  0x35   :  { %682 = vmatpush.bf16.msra.mxu2 %v4591_v26  ;;  %v4598_v51 = vld [vmem:[%s8522_s3 + $0x40] sm:$0xf]  ;;  %v5447_v52 = vld [vmem:[%s8522_s3 + $0x54] sm:$0xf0]  ;;  %v6219_v55 = vld [vmem:[%s8519_s0 + $0x30] sm:$0xff] }
  0x36   :  { %v4599_v53 = vor.u32 %v5447_v52, %v4598_v51  ;;  %v5455_v56 = vld [vmem:[%s8522_s3 + $0x9c] sm:$0xf]  ;;  %v4640_v57 = vld [vmem:[%s8522_s3 + $0xb0] sm:$0xf0]  ;;  %v5449_v60 = vld [vmem:[%s8522_s3 + $0x6c] sm:$0xf] }
  0x37   :  { %505 = vmatpush.bf16.msra.mxu0 %v4559_v35  ;;  %5611 = vmatpush.bf16.msra.mxu3 %v4559_v35  ;;  %v4643_v58 = vor.u32 %v5455_v56, %v4640_v57  ;;  %v6238_v59 = vld [vmem:[%s8519_s0 + $0x38] sm:$0xff]  ;;  %v4616_v61 = vld [vmem:[%s8522_s3 + $0x80] sm:$0xf0]  ;;  %v5477_v0 = vld [vmem:[#allocation2 + $0x88] sm:$0xf0] }
  0x38   :  { %594 = vmatpush.bf16.msra.mxu1 %v4563_v36  ;;  %v4619_v62 = vor.u32 %v5449_v60, %v4616_v61  ;;  %v4810_v63 = vld [vmem:[#allocation2 + $0x78] sm:$0xf]  ;;  %v4574_v2 = vld [vmem:[%s8522_s3 + $0x10] sm:$0xf]  ;;  %v5441_v3 = vld [vmem:[%s8522_s3 + $0x24] sm:$0xf0] }
  0x39   :  { %683 = vmatpush.bf16.msra.mxu2 %v4567_v37  ;;  %v4811_v1 = vor.u32 %v5477_v0, %v4810_v63  ;;  %v5456_v4 = vld [vmem:[%s8522_s3 + $0xa4] sm:$0xf]  ;;  %v4575_v5 = vor.u32 %v5441_v3, %v4574_v2  ;;  %v4648_v6 = vld [vmem:[%s8522_s3 + $0xb8] sm:$0xf0]  ;;  %v4592_v12 = vld [vmem:[%s8522_s3 + $0x50] sm:$0xf0] }
  0x3a   :  { %4652 = vmatmul.msk.bf16.vlgmr.msra.gmra.mxu0 %vm449_vm0, %v6109_v39  ;;  %4664 = vmatmul.msk.bf16.vlgmr.msra.gmra.mxu3 %vm449_vm0, %v6114_v40  ;;  %v5443_v11 = vld [vmem:[%s8522_s3 + $0x3c] sm:$0xf]  ;;  %v6304_v20 = vld [vmem:[%s8519_s0 + $0x48] sm:$0xff]  ;;  %v4568_v24 = vld [vmem:[%s8522_s3 + $0x20] sm:$0xf0] }
  0x3b   :  { %5612 = vmatpush.bf16.msrb.mxu3 %v4635_v7  ;;  %858 = vmatpush.bf16.msrb.mxu0 %v4647_v38  ;;  %v4651_v7 = vor.u32 %v5456_v4, %v4648_v6  ;;  %v4595_v13 = vor.u32 %v5443_v11, %v4592_v12  ;;  %v5437_v23 = vld [vmem:[%s8522_s3 + $0xc] sm:$0xf]  ;;  %v5450_v27 = vld [vmem:[%s8522_s3 + $0x74] sm:$0xf]  ;;  %v4790_v29 = vld [vmem:[#allocation2 + $0x50] sm:$0xf] }
  0x3c   :  { %4668 = vmatmul.msk.bf16.vlgmr.msra.gmra.mxu1 %vm449_vm0, %v6109_v39  ;;  %4684 = vmatmul.msk.bf16.vlgmr.msra.gmra.mxu2 %vm449_vm0, %v6109_v39  ;;  %v4624_v28 = vld [vmem:[%s8522_s3 + $0x88] sm:$0xf0]  ;;  %v5472_v32 = vld [vmem:[#allocation2 + $0x60] sm:$0xf0]  ;;  %v4770_v38 = vld [vmem:[#allocation2 + $0x28] sm:$0xf] }
  0x3d   :  { %1176 = vmatpush.bf16.msrb.mxu2 %v4811_v1  ;;  %947 = vmatpush.bf16.msrb.mxu1 %v4651_v7  ;;  %v4627_v31 = vor.u32 %v5450_v27, %v4624_v28  ;;  %v4791_v34 = vor.u32 %v5472_v32, %v4790_v29  ;;  %v5467_v44 = vld [vmem:[#allocation2 + $0x38] sm:$0xf0]  ;;  %v5438_v52 = vld [vmem:[%s8522_s3 + $0x14] sm:$0xf]  ;;  %v4750_v56 = vld [vmem:[#allocation2] sm:$0xf] }
  0x3e   :  { %v5462_v61 = vld [vmem:[#allocation2 + $0x10] sm:$0xf0]  ;;  %v5475_v1 = vld [vmem:[#allocation2 + $0x7c] sm:$0xf]  ;;  %v4812_v2 = vld [vmem:[#allocation2 + $0x8c] sm:$0xf0] }
  0x3f   :  { %5613 = vmatpush.bf16.msrb.mxu3 %v4611_v16  ;;  %859 = vmatpush.bf16.msrb.mxu0 %v4623_v45  ;;  %v4771_v45 = vor.u32 %v5467_v44, %v4770_v38  ;;  %v4751_v63 = vor.u32 %v5462_v61, %v4750_v56  ;;  %v4815_v3 = vor.u32 %v5475_v1, %v4812_v2  ;;  %v4818_v11 = vld [vmem:[#allocation2 + $0x80] sm:$0xf]  ;;  %v5478_v12 = vld [vmem:[#allocation2 + $0x90] sm:$0xf0] }
  0x41   :  { %948 = vmatpush.bf16.msrb.mxu1 %v4627_v31  ;;  %1177 = vmatpush.bf16.msrb.mxu2 %v4791_v34 }
  0x43   :  { %5614 = vmatpush.bf16.msrb.mxu3 %v4587_v25  ;;  %860 = vmatpush.bf16.msrb.mxu0 %v4599_v53  ;;  %v4571_v25 = vor.u32 %v5437_v23, %v4568_v24  ;;  %v4576_v53 = vld [vmem:[%s8522_s3 + $0x28] sm:$0xf0] }
  0x44   :  { %v4579_v60 = vor.u32 %v5438_v52, %v4576_v53 }
  0x45   :  { %1178 = vmatpush.bf16.msrb.mxu2 %v4771_v45 }
  0x47   :  { %5615 = vmatpush.bf16.msrb.mxu3 %v4563_v36  ;;  %861 = vmatpush.bf16.msrb.mxu0 %v4575_v5  ;;  %v5444_v36 = vld [vmem:[%s8522_s3 + $0x44] sm:$0xf] }
  0x49   :  { %1179 = vmatpush.bf16.msrb.mxu2 %v4751_v63 }
  0x4a   :  { %4653 = vmatmul.msk.bf16.gmra.mxu0 %vm449_vm0, %v6127_v41  ;;  %4665 = vmatmul.msk.bf16.gmra.mxu3 %vm449_vm0, %v6132_v42 }
  0x4b   :  { %5616 = vmatpush.bf16.msra.mxu3 %v4639_v8  ;;  %v6269_v8 = vld [vmem:[%s8519_s0 + $0x40] sm:$0xff] }
  0x4c   :  { %4669 = vmatmul.msk.bf16.gmra.mxu1 %vm449_vm0, %v6127_v41  ;;  %4685 = vmatmul.msk.bf16.gmra.mxu2 %vm449_vm0, %v6127_v41 }
  0x4f   :  { %5617 = vmatpush.bf16.msra.mxu3 %v4615_v17 }
  0x53   :  { %5618 = vmatpush.bf16.msra.mxu3 %v4591_v26 }
  0x57   :  { %5619 = vmatpush.bf16.msra.mxu3 %v4567_v37  ;;  %v4600_v37 = vld [vmem:[%s8522_s3 + $0x58] sm:$0xf0]  ;;  %s4475_s3 = sshll.u32 %s8531_s12, 4  ;;  %s4476_s3 = int_to_ptr.hbm [resolvable:$true] %s4475_s3 }
  0x58   :  { %v4603_v43 = vor.u32 %v5444_v36, %v4600_v37 }
  0x5a   :  { %4654 = vmatmul.msk.bf16.gmra.mxu0 %vm449_vm0, %v6151_v46  ;;  %4666 = vmatmul.msk.bf16.gmra.mxu3 %vm449_vm0, %v6156_v47 }
  0x5b   :  { %949 = vmatpush.bf16.msrb.mxu1 %v4603_v43 }
  0x5c   :  { %4670 = vmatmul.msk.bf16.gmra.mxu1 %vm449_vm0, %v6151_v46  ;;  %4686 = vmatmul.msk.bf16.gmra.mxu2 %vm449_vm0, %v6151_v46 }
  0x5f   :  { %950 = vmatpush.bf16.msrb.mxu1 %v4579_v60 }
  0x6a   :  { %4655 = vmatmul.msk.bf16.gmra.mxu0 %vm449_vm0, %v6169_v48  ;;  %4667 = vmatmul.msk.bf16.gmra.mxu3 %vm449_vm0, %v6174_v49 }
  0x6c   :  { %4671 = vmatmul.msk.bf16.gmra.mxu1 %vm449_vm0, %v6169_v48  ;;  %4687 = vmatmul.msk.bf16.gmra.mxu2 %vm449_vm0, %v6169_v48 }
  0x7a   :  { %4656 = vmatmul.msk.bf16.gmra.mxu0 %vm449_vm0, %v6187_v50  ;;  %4680 = vmatmul.msk.bf16.vlgmr.msrb.gmra.mxu3 %vm449_vm0, %v6114_v40 }
  0x7b   :  { %769 = vmatpush.bf16.msrb.mxu3 %v4643_v58  ;;  %v6357_v58 = vld [vmem:[%s8519_s0 + $0x50] sm:$0xff] }
  0x7c   :  { %4672 = vmatmul.msk.bf16.gmra.mxu1 %vm449_vm0, %v6187_v50  ;;  %4688 = vmatmul.msk.bf16.gmra.mxu2 %vm449_vm0, %v6187_v50 }
  0x7f   :  { %770 = vmatpush.bf16.msrb.mxu3 %v4619_v62 }
  0x83   :  { %771 = vmatpush.bf16.msrb.mxu3 %v4595_v13  ;;  %v4819_v13 = vor.u32 %v5478_v12, %v4818_v11 }
  0x85   :  { %1354 = vmatpush.bf16.msra.mxu0 %v4819_v13 }
  0x87   :  { %772 = vmatpush.bf16.msrb.mxu3 %v4571_v25  ;;  %v6386_v25 = vld [vmem:[%s8519_s0 + $0x58] sm:$0xff] }
  0x8a   :  { %4657 = vmatmul.msk.bf16.gmra.mxu0 %vm449_vm0, %v6206_v54  ;;  %4681 = vmatmul.msk.bf16.gmra.mxu3 %vm449_vm0, %v6132_v42 }
  0x8c   :  { %4673 = vmatmul.msk.bf16.gmra.mxu1 %vm449_vm0, %v6206_v54  ;;  %4689 = vmatmul.msk.bf16.gmra.mxu2 %vm449_vm0, %v6206_v54 }
  0x9a   :  { %4658 = vmatmul.msk.bf16.gmra.mxu0 %vm449_vm0, %v6219_v55  ;;  %4682 = vmatmul.msk.bf16.gmra.mxu3 %vm449_vm0, %v6156_v47 }
  0x9c   :  { %4674 = vmatmul.msk.bf16.gmra.mxu1 %vm449_vm0, %v6219_v55  ;;  %4690 = vmatmul.msk.bf16.gmra.mxu2 %vm449_vm0, %v6219_v55 }
  0xaa   :  { %4659 = vmatmul.msk.bf16.gmra.mxu0 %vm449_vm0, %v6238_v59  ;;  %4683 = vmatmul.msk.bf16.gmra.mxu3 %vm449_vm0, %v6174_v49 }
  0xac   :  { %4675 = vmatmul.msk.bf16.gmra.mxu1 %vm449_vm0, %v6238_v59  ;;  %4691 = vmatmul.msk.bf16.gmra.mxu2 %vm449_vm0, %v6238_v59 }
  0xb7   :  { %v6271_v9 = vpop.f32.mrf.mxu0 }
  0xb8   :  { %8594 = vst [vmem:[#allocation24_spill] sm:$0xff] %v6271_v9 }
  0xb9   :  { %v6273_v10 = vpop.f32.mrf.mxu1 }
  0xba   :  { %8595 = vst [vmem:[#allocation25_spill] sm:$0xff] %v6273_v10  ;;  %4660 = vmatmul.msk.bf16.gmra.mxu0 %vm449_vm0, %v6269_v8  ;;  %4696 = vmatmul.msk.bf16.vlgmr.msra.gmra.mxu3 %vm449_vm0, %v6114_v40  ;;  %v5461_v10 = vld [vmem:[#allocation2 + $0xc] sm:$0xf] }
  0xbb   :  { %1265 = vmatpush.bf16.msra.mxu3 %v4815_v3 }
  0xbc   :  { %4676 = vmatmul.msk.bf16.gmra.mxu1 %vm449_vm0, %v6269_v8  ;;  %4692 = vmatmul.msk.bf16.gmra.mxu2 %vm449_vm0, %v6269_v8 }
  0xbd   :  { %v6289_v14 = vpop.f32.mrf.mxu3 }
  0xbe   :  { %8596 = vst [vmem:[#allocation26_spill] sm:$0xff] %v6289_v14 }
  0xbf   :  { %v6291_v15 = vpop.f32.mrf.mxu2  ;;  %v6293_v16 = vpop.f32.mrf.mxu0 }
  0xc0   :  { %8597 = vst [vmem:[#allocation27_spill] sm:$0xff] %v6291_v15 }
  0xc1   :  { %8598 = vst [vmem:[#allocation28_spill] sm:$0xff] %v6293_v16  ;;  %v6295_v17 = vpop.f32.mrf.mxu1 }
  0xc2   :  { %8599 = vst [vmem:[#allocation29_spill] sm:$0xff] %v6295_v17 }
  0xc5   :  { %v6297_v18 = vpop.f32.mrf.mxu3 }
  0xc6   :  { %8600 = vst [vmem:[#allocation30_spill] sm:$0xff] %v6297_v18 }
  0xc7   :  { %v6299_v19 = vpop.f32.mrf.mxu2  ;;  %v6306_v21 = vpop.f32.mrf.mxu0 }
  0xc8   :  { %8601 = vst [vmem:[#allocation31_spill] sm:$0xff] %v6299_v19  ;;  %v5473_v19 = vld [vmem:[#allocation2 + $0x68] sm:$0xf0] }
  0xc9   :  { %8602 = vst [vmem:[#allocation32_spill] sm:$0xff] %v6306_v21  ;;  %v6308_v22 = vpop.f32.mrf.mxu1  ;;  %v5521_v21 = vld [vmem:[#allocation8 + $0x144] sm:$0xf0] }
  0xca   :  { %8603 = vst [vmem:[#allocation33_spill] sm:$0xff] %v6308_v22  ;;  %4661 = vmatmul.msk.bf16.gmra.mxu0 %vm449_vm0, %v6304_v20  ;;  %4697 = vmatmul.msk.bf16.gmra.mxu3 %vm449_vm0, %v6132_v42 }
  0xcc   :  { %4677 = vmatmul.msk.bf16.gmra.mxu1 %vm449_vm0, %v6304_v20  ;;  %4693 = vmatmul.msk.bf16.gmra.mxu2 %vm449_vm0, %v6304_v20 }
  0xcd   :  { %v6324_v26 = vpop.f32.mrf.mxu3 }
  0xce   :  { %8604 = vst [vmem:[#allocation34_spill] sm:$0xff] %v6324_v26 }
  0xcf   :  { %v6332_v30 = vpop.f32.mrf.mxu2  ;;  %v6334_v33 = vpop.f32.mrf.mxu0 }
  0xd0   :  { %8605 = vst [vmem:[#allocation35_spill] sm:$0xff] %v6332_v30  ;;  %v4798_v30 = vld [vmem:[#allocation2 + $0x58] sm:$0xf] }
  0xd1   :  { %8606 = vst [vmem:[#allocation36_spill] sm:$0xff] %v6334_v33  ;;  %v6336_v35 = vpop.f32.mrf.mxu1  ;;  %v4799_v15 = vor.u32 %v5473_v19, %v4798_v30  ;;  %v5070_v33 = vld [vmem:[#allocation8 + $0x140] sm:$0xf] }
  0xd2   :  { %8607 = vst [vmem:[#allocation37_spill] sm:$0xff] %v6336_v35 }
  0xd3   :  { %1355 = vmatpush.bf16.msra.mxu0 %v4799_v15 }
  0xd5   :  { %v6344_v51 = vpop.f32.mrf.mxu3 }
  0xd6   :  { %8608 = vst [vmem:[#allocation38_spill] sm:$0xff] %v6344_v51 }
  0xd7   :  { %v6352_v57 = vpop.f32.mrf.mxu2  ;;  %v6359_v62 = vpop.f32.mrf.mxu0 }
  0xd8   :  { %8609 = vst [vmem:[#allocation39_spill] sm:$0xff] %v6352_v57 }
  0xd9   :  { %8610 = vst [vmem:[#allocation40_spill] sm:$0xff] %v6359_v62  ;;  %v6361_v0 = vpop.f32.mrf.mxu1 }
  0xda   :  { %8611 = vst [vmem:[#allocation41_spill] sm:$0xff] %v6361_v0  ;;  %4662 = vmatmul.msk.bf16.gmra.mxu0 %vm449_vm0, %v6357_v58  ;;  %4698 = vmatmul.msk.bf16.gmra.mxu3 %vm449_vm0, %v6156_v47 }
  0xdc   :  { %4678 = vmatmul.msk.bf16.gmra.mxu1 %vm449_vm0, %v6357_v58  ;;  %4694 = vmatmul.msk.bf16.gmra.mxu2 %vm449_vm0, %v6357_v58 }
  0xdd   :  { %v6371_v4 = vpop.f32.mrf.mxu3 }
  0xde   :  { %8612 = vst [vmem:[#allocation42_spill] sm:$0xff] %v6371_v4 }
  0xdf   :  { %v6373_v5 = vpop.f32.mrf.mxu2  ;;  %v6375_v6 = vpop.f32.mrf.mxu0 }
  0xe0   :  { %8613 = vst [vmem:[#allocation43_spill] sm:$0xff] %v6373_v5 }
  0xe1   :  { %8614 = vst [vmem:[#allocation44_spill] sm:$0xff] %v6375_v6  ;;  %v6377_v7 = vpop.f32.mrf.mxu1 }
  0xe2   :  { %8615 = vst [vmem:[#allocation45_spill] sm:$0xff] %v6377_v7 }
  0xe5   :  { %v6379_v23 = vpop.f32.mrf.mxu3 }
  0xe6   :  { %8616 = vst [vmem:[#allocation46_spill] sm:$0xff] %v6379_v23  ;;  %v5464_v23 = vld [vmem:[#allocation2 + $0x20] sm:$0xf0] }
  0xe7   :  { %v6381_v24 = vpop.f32.mrf.mxu2  ;;  %v6388_v27 = vpop.f32.mrf.mxu0 }
  0xe8   :  { %8617 = vst [vmem:[#allocation47_spill] sm:$0xff] %v6381_v24 }
  0xe9   :  { %8618 = vst [vmem:[#allocation48_spill] sm:$0xff] %v6388_v27  ;;  %v6390_v28 = vpop.f32.mrf.mxu1  ;;  %v5523_v27 = vld [vmem:[#allocation8 + $0x154] sm:$0xf0] }
  0xea   :  { %8619 = vst [vmem:[#allocation49_spill] sm:$0xff] %v6390_v28  ;;  %4663 = vmatmul.msk.bf16.gmra.mxu0 %vm449_vm0, %v6386_v25  ;;  %4699 = vmatmul.msk.bf16.gmra.mxu3 %vm449_vm0, %v6174_v49 }
  0xec   :  { %4679 = vmatmul.msk.bf16.gmra.mxu1 %vm449_vm0, %v6386_v25  ;;  %4695 = vmatmul.msk.bf16.gmra.mxu2 %vm449_vm0, %v6386_v25 }
  0xed   :  { %v6400_v29 = vpop.f32.mrf.mxu3 }
  0xee   :  { %8620 = vst [vmem:[#allocation50_spill] sm:$0xff] %v6400_v29 }
  0xef   :  { %v6402_v31 = vpop.f32.mrf.mxu2  ;;  %v6404_v32 = vpop.f32.mrf.mxu0 }
  0xf0   :  { %8621 = vst [vmem:[#allocation51_spill] sm:$0xff] %v6402_v31 }
  0xf1   :  { %8622 = vst [vmem:[#allocation52_spill] sm:$0xff] %v6404_v32  ;;  %v6406_v34 = vpop.f32.mrf.mxu1  ;;  %v5078_v32 = vld [vmem:[#allocation8 + $0x150] sm:$0xf] }
  0xf2   :  { %8623 = vst [vmem:[#allocation53_spill] sm:$0xff] %v6406_v34 }
  0xf5   :  { %v6408_v36 = vpop.f32.mrf.mxu3 }
  0xf6   :  { %8624 = vst [vmem:[#allocation54_spill] sm:$0xff] %v6408_v36  ;;  %v4766_v36 = vld [vmem:[#allocation2 + $0x10] sm:$0xf] }
  0xf7   :  { %v6410_v37 = vpop.f32.mrf.mxu2  ;;  %v6412_v38 = vpop.f32.mrf.mxu0 }
  0xf8   :  { %8625 = vst [vmem:[#allocation55_spill] sm:$0xff] %v6410_v37  ;;  %v4792_v37 = vld [vmem:[#allocation2 + $0x64] sm:$0xf0] }
  0xf9   :  { %8626 = vst [vmem:[#allocation56_spill] sm:$0xff] %v6412_v38  ;;  %v6414_v43 = vpop.f32.mrf.mxu1 }
  0xfa   :  { %8627 = vst [vmem:[#allocation57_spill] sm:$0xff] %v6414_v43  ;;  %4700 = vmatmul.msk.bf16.vlgmr.msrb.gmra.mxu3 %vm449_vm0, %v6109_v39  ;;  %4716 = vmatmul.msk.bf16.vlgmr.msrb.gmra.mxu0 %vm449_vm0, %v6109_v39 }
  0xfc   :  { %4732 = vmatmul.msk.bf16.vlgmr.msrb.gmra.mxu1 %vm449_vm0, %v6109_v39  ;;  %4828 = vmatmul.msk.bf16.vlgmr.msrb.gmra.mxu2 %vm449_vm0, %v6109_v39 }
  0xfd   :  { %v6424_v44 = vpop.f32.mrf.mxu3 }
  0xfe   :  { %8628 = vst [vmem:[#allocation58_spill] sm:$0xff] %v6424_v44 }
  0xff   :  { %v6426_v45 = vpop.f32.mrf.mxu2  ;;  %v6428_v52 = vpop.f32.mrf.mxu0 }
 0x100   :  { %8629 = vst [vmem:[#allocation59_spill] sm:$0xff] %v6426_v45 }
 0x101   :  { %8630 = vst [vmem:[#allocation60_spill] sm:$0xff] %v6428_v52  ;;  %v6430_v53 = vpop.f32.mrf.mxu1 }
 0x102   :  { %8631 = vst [vmem:[#allocation61_spill] sm:$0xff] %v6430_v53 }
 0x105   :  { %v6432_v56 = vpop.f32.mrf.mxu3 }
 0x106   :  { %8632 = vst [vmem:[#allocation62_spill] sm:$0xff] %v6432_v56 }
 0x107   :  { %v6434_v60 = vpop.f32.mrf.mxu2  ;;  %v6436_v61 = vpop.f32.mrf.mxu0 }
 0x108   :  { %8633 = vst [vmem:[#allocation63_spill] sm:$0xff] %v6434_v60 }
 0x109   :  { %8634 = vst [vmem:[#allocation64_spill] sm:$0xff] %v6436_v61  ;;  %v6438_v63 = vpop.f32.mrf.mxu1 }
 0x10a   :  { %8635 = vst [vmem:[#allocation65_spill] sm:$0xff] %v6438_v63  ;;  %4701 = vmatmul.msk.bf16.gmra.mxu3 %vm449_vm0, %v6127_v41  ;;  %4717 = vmatmul.msk.bf16.gmra.mxu0 %vm449_vm0, %v6127_v41  ;;  %v5468_v63 = vld [vmem:[#allocation2 + $0x40] sm:$0xf0] }
 0x10c   :  { %4733 = vmatmul.msk.bf16.gmra.mxu1 %vm449_vm0, %v6127_v41  ;;  %4829 = vmatmul.msk.bf16.gmra.mxu2 %vm449_vm0, %v6127_v41 }
 0x10d   :  { %v6448_v1 = vpop.f32.mrf.mxu3 }
 0x10e   :  { %8636 = vst [vmem:[#allocation66_spill] sm:$0xff] %v6448_v1 }
 0x10f   :  { %v6450_v2 = vpop.f32.mrf.mxu2  ;;  %v6452_v3 = vpop.f32.mrf.mxu0 }
 0x110   :  { %8637 = vst [vmem:[#allocation67_spill] sm:$0xff] %v6450_v2  ;;  %v5470_v2 = vld [vmem:[#allocation2 + $0x54] sm:$0xf] }
 0x111   :  { %8638 = vst [vmem:[#allocation68_spill] sm:$0xff] %v6452_v3  ;;  %v6454_v11 = vpop.f32.mrf.mxu1  ;;  %v4795_v31 = vor.u32 %v5470_v2, %v4792_v37 }
 0x112   :  { %8639 = vst [vmem:[#allocation69_spill] sm:$0xff] %v6454_v11  ;;  %v4778_v11 = vld [vmem:[#allocation2 + $0x30] sm:$0xf] }
 0x113   :  { %1266 = vmatpush.bf16.msra.mxu3 %v4795_v31  ;;  %v4779_v53 = vor.u32 %v5468_v63, %v4778_v11 }
 0x115   :  { %v6456_v12 = vpop.f32.mrf.mxu3  ;;  %1356 = vmatpush.bf16.msra.mxu0 %v4779_v53 }
 0x116   :  { %8640 = vst [vmem:[#allocation70_spill] sm:$0xff] %v6456_v12 }
 0x117   :  { %v6458_v13 = vpop.f32.mrf.mxu2  ;;  %v6460_v60 = vpop.f32.mrf.mxu0 }
 0x118   :  { %8641 = vst [vmem:[#allocation71_spill] sm:$0xff] %v6458_v13 }
 0x119   :  { %8642 = vst [vmem:[#allocation72_spill] sm:$0xff] %v6460_v60  ;;  %v6462_v45 = vpop.f32.mrf.mxu1 }
 0x11a   :  { %8643 = vst [vmem:[#allocation73_spill] sm:$0xff] %v6462_v45  ;;  %4702 = vmatmul.msk.bf16.gmra.mxu3 %vm449_vm0, %v6151_v46  ;;  %4718 = vmatmul.msk.bf16.gmra.mxu0 %vm449_vm0, %v6151_v46 }
 0x11c   :  { %4734 = vmatmul.msk.bf16.gmra.mxu1 %vm449_vm0, %v6151_v46  ;;  %4830 = vmatmul.msk.bf16.gmra.mxu2 %vm449_vm0, %v6151_v46 }
 0x11d   :  { %v6472_v13 = vpop.f32.mrf.mxu3 }
 0x11e   :  { %8644 = vst [vmem:[#allocation74_spill] sm:$0xff] %v6472_v13 }
 0x11f   :  { %v6474_v24 = vpop.f32.mrf.mxu2  ;;  %v6476_v5 = vpop.f32.mrf.mxu0 }
 0x120   :  { %8645 = vst [vmem:[#allocation75_spill] sm:$0xff] %v6474_v24 }
 0x121   :  { %8646 = vst [vmem:[#allocation76_spill] sm:$0xff] %v6476_v5  ;;  %v6478_v57 = vpop.f32.mrf.mxu1 }
 0x122   :  { %8647 = vst [vmem:[#allocation77_spill] sm:$0xff] %v6478_v57 }
 0x125   :  { %v6480_v12 = vpop.f32.mrf.mxu3 }
 0x126   :  { %8648 = vst [vmem:[#allocation78_spill] sm:$0xff] %v6480_v12 }
 0x127   :  { %v6482_v1 = vpop.f32.mrf.mxu2  ;;  %v6484_v56 = vpop.f32.mrf.mxu0 }
 0x128   :  { %8649 = vst [vmem:[#allocation79_spill] sm:$0xff] %v6482_v1 }
 0x129   :  { %8650 = vst [vmem:[#allocation80_spill] sm:$0xff] %v6484_v56  ;;  %v6486_v37 = vpop.f32.mrf.mxu1 }
 0x12a   :  { %8651 = vst [vmem:[#allocation81_spill] sm:$0xff] %v6486_v37  ;;  %4703 = vmatmul.msk.bf16.gmra.mxu3 %vm449_vm0, %v6169_v48  ;;  %4719 = vmatmul.msk.bf16.gmra.mxu0 %vm449_vm0, %v6169_v48 }
 0x12c   :  { %4735 = vmatmul.msk.bf16.gmra.mxu1 %vm449_vm0, %v6169_v48  ;;  %4831 = vmatmul.msk.bf16.gmra.mxu2 %vm449_vm0, %v6169_v48 }
 0x12d   :  { %v6496_v15 = vpop.f32.mrf.mxu3 }
 0x12e   :  { %8652 = vst [vmem:[#allocation82_spill] sm:$0xff] %v6496_v15 }
 0x12f   :  { %v6498_v19 = vpop.f32.mrf.mxu2  ;;  %v6500_v30 = vpop.f32.mrf.mxu0 }
 0x130   :  { %8653 = vst [vmem:[#allocation83_spill] sm:$0xff] %v6498_v19 }
 0x131   :  { %8654 = vst [vmem:[#allocation84_spill] sm:$0xff] %v6500_v30  ;;  %v6502_v31 = vpop.f32.mrf.mxu1 }
 0x132   :  { %8655 = vst [vmem:[#allocation85_spill] sm:$0xff] %v6502_v31 }
 0x135   :  { %v6504_v2 = vpop.f32.mrf.mxu3 }
 0x136   :  { %8656 = vst [vmem:[#allocation86_spill] sm:$0xff] %v6504_v2 }
 0x137   :  { %v6506_v1 = vpop.f32.mrf.mxu2  ;;  %v6508_v24 = vpop.f32.mrf.mxu0 }
 0x138   :  { %8657 = vst [vmem:[#allocation87_spill] sm:$0xff] %v6506_v1 }
 0x139   :  { %8658 = vst [vmem:[#allocation88_spill] sm:$0xff] %v6508_v24  ;;  %v6510_v12 = vpop.f32.mrf.mxu1 }
 0x13a   :  { %8659 = vst [vmem:[#allocation89_spill] sm:$0xff] %v6510_v12  ;;  %4704 = vmatmul.msk.bf16.gmra.mxu3 %vm449_vm0, %v6187_v50  ;;  %4720 = vmatmul.msk.bf16.gmra.mxu0 %vm449_vm0, %v6187_v50 }
 0x13c   :  { %4736 = vmatmul.msk.bf16.gmra.mxu1 %vm449_vm0, %v6187_v50  ;;  %4832 = vmatmul.msk.bf16.gmra.mxu2 %vm449_vm0, %v6187_v50 }
 0x13d   :  { %v6520_v19 = vpop.f32.mrf.mxu3 }
 0x13e   :  { %8660 = vst [vmem:[#allocation90_spill] sm:$0xff] %v6520_v19 }
 0x13f   :  { %v6522_v2 = vpop.f32.mrf.mxu2  ;;  %v6524_v1 = vpop.f32.mrf.mxu0 }
 0x140   :  { %8661 = vst [vmem:[#allocation91_spill] sm:$0xff] %v6522_v2 }
 0x141   :  { %8662 = vst [vmem:[#allocation92_spill] sm:$0xff] %v6524_v1  ;;  %v6526_v15 = vpop.f32.mrf.mxu1 }
 0x142   :  { %8663 = vst [vmem:[#allocation93_spill] sm:$0xff] %v6526_v15 }
 0x145   :  { %v6528_v13 = vpop.f32.mrf.mxu3 }
 0x146   :  { %8664 = vst [vmem:[#allocation94_spill] sm:$0xff] %v6528_v13 }
 0x147   :  { %v6530_v44 = vpop.f32.mrf.mxu2  ;;  %v6532_v12 = vpop.f32.mrf.mxu0 }
 0x148   :  { %8665 = vst [vmem:[#allocation95_spill] sm:$0xff] %v6530_v44 }
 0x149   :  { %8666 = vst [vmem:[#allocation96_spill] sm:$0xff] %v6532_v12  ;;  %v6534_v31 = vpop.f32.mrf.mxu1 }
 0x14a   :  { %8667 = vst [vmem:[#allocation97_spill] sm:$0xff] %v6534_v31  ;;  %4705 = vmatmul.msk.bf16.gmra.mxu3 %vm449_vm0, %v6206_v54  ;;  %4721 = vmatmul.msk.bf16.gmra.mxu0 %vm449_vm0, %v6206_v54 }
 0x14c   :  { %4737 = vmatmul.msk.bf16.gmra.mxu1 %vm449_vm0, %v6206_v54  ;;  %4833 = vmatmul.msk.bf16.gmra.mxu2 %vm449_vm0, %v6206_v54 }
 0x14d   :  { %v6544_v19 = vpop.f32.mrf.mxu3 }
 0x14e   :  { %8668 = vst [vmem:[#allocation98_spill] sm:$0xff] %v6544_v19  ;;  %v5465_v19 = vld [vmem:[#allocation2 + $0x2c] sm:$0xf] }
 0x14f   :  { %v6546_v13 = vpop.f32.mrf.mxu2  ;;  %v6548_v44 = vpop.f32.mrf.mxu0 }
 0x150   :  { %8669 = vst [vmem:[#allocation99_spill] sm:$0xff] %v6546_v13 }
 0x151   :  { %8670 = vst [vmem:[#allocation100_spill] sm:$0xff] %v6548_v44  ;;  %v6550_v2 = vpop.f32.mrf.mxu1 }
 0x152   :  { %8671 = vst [vmem:[#allocation101_spill] sm:$0xff] %v6550_v2 }
 0x155   :  { %v6552_v31 = vpop.f32.mrf.mxu3 }
 0x156   :  { %8672 = vst [vmem:[#allocation102_spill] sm:$0xff] %v6552_v31  ;;  %v4772_v31 = vld [vmem:[#allocation2 + $0x3c] sm:$0xf0] }
 0x157   :  { %v6554_v15 = vpop.f32.mrf.mxu2  ;;  %v6556_v37 = vpop.f32.mrf.mxu0  ;;  %v4775_v13 = vor.u32 %v5465_v19, %v4772_v31  ;;  %v4826_v31 = vld [vmem:[#allocation2 + $0x88] sm:$0xf] }
 0x158   :  { %8673 = vst [vmem:[#allocation103_spill] sm:$0xff] %v6554_v15 }
 0x159   :  { %8674 = vst [vmem:[#allocation104_spill] sm:$0xff] %v6556_v37  ;;  %v6558_v57 = vpop.f32.mrf.mxu1  ;;  %1267 = vmatpush.bf16.msra.mxu3 %v4775_v13 }
 0x15a   :  { %8675 = vst [vmem:[#allocation105_spill] sm:$0xff] %v6558_v57  ;;  %4706 = vmatmul.msk.bf16.gmra.mxu3 %vm449_vm0, %v6219_v55  ;;  %4722 = vmatmul.msk.bf16.gmra.mxu0 %vm449_vm0, %v6219_v55 }
 0x15c   :  { %4738 = vmatmul.msk.bf16.gmra.mxu1 %vm449_vm0, %v6219_v55  ;;  %4834 = vmatmul.msk.bf16.gmra.mxu2 %vm449_vm0, %v6219_v55 }
 0x15d   :  { %v6568_v15 = vpop.f32.mrf.mxu3 }
 0x15e   :  { %8676 = vst [vmem:[#allocation106_spill] sm:$0xff] %v6568_v15  ;;  %v5476_v15 = vld [vmem:[#allocation2 + $0x84] sm:$0xf] }
 0x15f   :  { %v6570_v2 = vpop.f32.mrf.mxu2  ;;  %v6572_v57 = vpop.f32.mrf.mxu0 }
 0x160   :  { %8677 = vst [vmem:[#allocation107_spill] sm:$0xff] %v6570_v2  ;;  %v4820_v2 = vld [vmem:[#allocation2 + $0x94] sm:$0xf0] }
 0x161   :  { %8678 = vst [vmem:[#allocation108_spill] sm:$0xff] %v6572_v57  ;;  %v6574_v45 = vpop.f32.mrf.mxu1  ;;  %v5501_v57 = vld [vmem:[#allocation8 + $0xa4] sm:$0xf0] }
 0x162   :  { %8679 = vst [vmem:[#allocation109_spill] sm:$0xff] %v6574_v45 }
 0x165   :  { %v6576_v43 = vpop.f32.mrf.mxu3 }
 0x166   :  { %8680 = vst [vmem:[#allocation110_spill] sm:$0xff] %v6576_v43  ;;  %v5479_v43 = vld [vmem:[#allocation2 + $0x98] sm:$0xf0] }
 0x167   :  { %v6578_v34 = vpop.f32.mrf.mxu2  ;;  %v6580_v55 = vpop.f32.mrf.mxu0 }
 0x168   :  { %8681 = vst [vmem:[#allocation111_spill] sm:$0xff] %v6578_v34  ;;  %v4827_v34 = vor.u32 %v5479_v43, %v4826_v31 }
 0x169   :  { %8682 = vst [vmem:[#allocation112_spill] sm:$0xff] %v6580_v55  ;;  %v6582_v19 = vpop.f32.mrf.mxu1  ;;  %v4990_v55 = vld [vmem:[#allocation8 + $0xa0] sm:$0xf] }
 0x16a   :  { %8683 = vst [vmem:[#allocation113_spill] sm:$0xff] %v6582_v19  ;;  %4707 = vmatmul.msk.bf16.gmra.mxu3 %vm449_vm0, %v6238_v59  ;;  %4723 = vmatmul.msk.bf16.gmra.mxu0 %vm449_vm0, %v6238_v59  ;;  %v4823_v19 = vor.u32 %v5476_v15, %v4820_v2  ;;  %v4991_v44 = vor.u32 %v5501_v57, %v4990_v55 }
 0x16b   :  { %1532 = vmatpush.bf16.msra.mxu2 %v4827_v34  ;;  %v6616_v34 = vld [vmem:[#allocation5] sm:$0x1f] }
 0x16c   :  { %4739 = vmatmul.msk.bf16.gmra.mxu1 %vm449_vm0, %v6238_v59  ;;  %4835 = vmatmul.msk.bf16.gmra.mxu2 %vm449_vm0, %v6238_v59  ;;  %v6621_v2 = vperm.slane %v6616_v34, 0 }
 0x16d   :  { %v6592_v53 = vpop.f32.mrf.mxu3  ;;  %1443 = vmatpush.bf16.msra.mxu1 %v4823_v19 }
 0x16e   :  { %8684 = vst [vmem:[#allocation114_spill] sm:$0xff] %v6592_v53 }
 0x16f   :  { %v6594_v63 = vpop.f32.mrf.mxu2  ;;  %v6596_v11 = vpop.f32.mrf.mxu0 }
 0x170   :  { %8685 = vst [vmem:[#allocation115_spill] sm:$0xff] %v6594_v63 }
 0x171   :  { %8686 = vst [vmem:[#allocation116_spill] sm:$0xff] %v6596_v11  ;;  %v6598_v13 = vpop.f32.mrf.mxu1 }
 0x172   :  { %8687 = vst [vmem:[#allocation117_spill] sm:$0xff] %v6598_v13 }
 0x175   :  { %v6600_v45 = vpop.f32.mrf.mxu3 }
 0x176   :  { %8688 = vst [vmem:[#allocation118_spill] sm:$0xff] %v6600_v45 }
 0x177   :  { %v6602_v28 = vpop.f32.mrf.mxu2  ;;  %v6604_v59 = vpop.f32.mrf.mxu0 }
 0x178   :  { %8689 = vst [vmem:[#allocation119_spill] sm:$0xff] %v6602_v28 }
 0x179   :  { %8690 = vst [vmem:[#allocation120_spill] sm:$0xff] %v6604_v59  ;;  %v6606_v53 = vpop.f32.mrf.mxu1 }
 0x17a   :  { %8691 = vst [vmem:[#allocation121_spill] sm:$0xff] %v6606_v53  ;;  %4708 = vmatmul.msk.bf16.gmra.mxu3 %vm449_vm0, %v6269_v8  ;;  %4724 = vmatmul.msk.bf16.gmra.mxu0 %vm449_vm0, %v6269_v8 }
 0x17c   :  { %4740 = vmatmul.msk.bf16.gmra.mxu1 %vm449_vm0, %v6269_v8  ;;  %4836 = vmatmul.msk.bf16.gmra.mxu2 %vm449_vm0, %v6269_v8 }
 0x17d   :  { %v6618_v43 = vpop.f32.mrf.mxu3 }
 0x17e   :  { %8692 = vst [vmem:[#allocation122_spill] sm:$0xff] %v6618_v43 }
 0x17f   :  { %v1181_v15 = vpop.f32.mrf.mxu2  ;;  %v6623_v19 = vpop.f32.mrf.mxu0 }
 0x180   :  { %8693 = vst [vmem:[#allocation123_spill] sm:$0xff] %v6623_v19  ;;  %v1182_v53 = vadd.f32 %v1181_v15, %v6621_v2 }
 0x181   :  { %v6625_v31 = vpop.f32.mrf.mxu1 }
 0x182   :  { %8694 = vst [vmem:[#allocation124_spill] sm:$0xff] %v6625_v31  ;;  %v1617_v28 = vmax.f32 %v1182_v53, 0.0 }
 0x185   :  { %v6628_v59 = vpop.f32.mrf.mxu3 }
 0x186   :  { %8695 = vst [vmem:[#allocation125_spill] sm:$0xff] %v6628_v59  ;;  %v5463_v59 = vld [vmem:[#allocation2 + $0x18] sm:$0xf0] }
 0x187   :  { %v1183_v45 = vpop.f32.mrf.mxu2  ;;  %v6631_v63 = vpop.f32.mrf.mxu0 }
 0x188   :  { %v1184_v8 = vadd.f32 %v1183_v45, %v6621_v2  ;;  %8696 = vst [vmem:[#allocation126_spill] sm:$0xff] %v6631_v63 }
 0x189   :  { %v6633_v13 = vpop.f32.mrf.mxu1 }
 0x18a   :  { %8697 = vst [vmem:[#allocation127_spill] sm:$0xff] %v6633_v13  ;;  %v1622_v43 = vmax.f32 %v1184_v8, 0.0  ;;  %4709 = vmatmul.msk.bf16.gmra.mxu3 %vm449_vm0, %v6304_v20  ;;  %4725 = vmatmul.msk.bf16.gmra.mxu0 %vm449_vm0, %v6304_v20 }
 0x18c   :  { %v6639_v31 = vpack.c.bf16 %v1622_v43, %v1617_v28  ;;  %4741 = vmatmul.msk.bf16.gmra.mxu1 %vm449_vm0, %v6304_v20  ;;  %4837 = vmatmul.msk.bf16.gmra.mxu2 %vm449_vm0, %v6304_v20  ;;  %v5460_v20 = vld [vmem:[#allocation2 + $0x4] sm:$0xf] }
 0x18d   :  { %v6645_v45 = vpop.f32.mrf.mxu3 }
 0x18e   :  { %8698 = vst [vmem:[#allocation128_spill] sm:$0xff] %v6639_v31 }
 0x18f   :  { %8699 = vst [vmem:[#allocation129_spill] sm:$0xff] %v6645_v45  ;;  %v6647_v53 = vpop.f32.mrf.mxu2  ;;  %v6649_v15 = vpop.f32.mrf.mxu0  ;;  %v4758_v45 = vld [vmem:[#allocation2 + $0x8] sm:$0xf] }
 0x190   :  { %8700 = vst [vmem:[#allocation130_spill] sm:$0xff] %v6649_v15  ;;  %v4759_v7 = vor.u32 %v5463_v59, %v4758_v45 }
 0x191   :  { %v6651_v8 = vpop.f32.mrf.mxu1 }
 0x192   :  { %8701 = vst [vmem:[#allocation131_spill] sm:$0xff] %v6651_v8  ;;  %v4752_v8 = vld [vmem:[#allocation2 + $0x14] sm:$0xf0]  ;;  %1357 = vmatpush.bf16.msra.mxu0 %v4759_v7 }
 0x193   :  { %v4755_v15 = vor.u32 %v5460_v20, %v4752_v8  ;;  %v4806_v20 = vld [vmem:[#allocation2 + $0x60] sm:$0xf] }
 0x195   :  { %v6653_v13 = vpop.f32.mrf.mxu3  ;;  %1268 = vmatpush.bf16.msra.mxu3 %v4755_v15 }
 0x196   :  { %8702 = vst [vmem:[#allocation132_spill] sm:$0xff] %v6653_v13 }
 0x197   :  { %v6655_v63 = vpop.f32.mrf.mxu2  ;;  %v6657_v28 = vpop.f32.mrf.mxu0 }
 0x198   :  { %8703 = vst [vmem:[#allocation133_spill] sm:$0xff] %v6657_v28 }
 0x199   :  { %v6659_v43 = vpop.f32.mrf.mxu1 }
 0x19a   :  { %8704 = vst [vmem:[#allocation134_spill] sm:$0xff] %v6659_v43  ;;  %4710 = vmatmul.msk.bf16.gmra.mxu3 %vm449_vm0, %v6357_v58  ;;  %4726 = vmatmul.msk.bf16.gmra.mxu0 %vm449_vm0, %v6357_v58 }
 0x19c   :  { %4742 = vmatmul.msk.bf16.gmra.mxu1 %vm449_vm0, %v6357_v58  ;;  %4838 = vmatmul.msk.bf16.gmra.mxu2 %vm449_vm0, %v6357_v58 }
 0x19d   :  { %v6669_v19 = vpop.f32.mrf.mxu3 }
 0x19e   :  { %8705 = vst [vmem:[#allocation135_spill] sm:$0xff] %v6669_v19 }
 0x19f   :  { %v6671_v28 = vpop.f32.mrf.mxu2  ;;  %v6673_v43 = vpop.f32.mrf.mxu0 }
 0x1a0   :  { %8706 = vst [vmem:[#allocation136_spill] sm:$0xff] %v6673_v43  ;;  %v4800_v43 = vld [vmem:[#allocation2 + $0x6c] sm:$0xf0] }
 0x1a1   :  { %v6675_v13 = vpop.f32.mrf.mxu1 }
 0x1a2   :  { %8707 = vst [vmem:[#allocation137_spill] sm:$0xff] %v6675_v13 }
 0x1a5   :  { %v6677_v0 = vpop.f32.mrf.mxu3 }
 0x1a6   :  { %8708 = vst [vmem:[#allocation138_spill] sm:$0xff] %v6677_v0 }
 0x1a7   :  { %v6679_v35 = vpop.f32.mrf.mxu2  ;;  %v6681_v58 = vpop.f32.mrf.mxu0 }
 0x1a8   :  { %8709 = vst [vmem:[#allocation139_spill] sm:$0xff] %v6681_v58  ;;  %v5471_v58 = vld [vmem:[#allocation2 + $0x5c] sm:$0xf] }
 0x1a9   :  { %v6683_v8 = vpop.f32.mrf.mxu1  ;;  %v4803_v0 = vor.u32 %v5471_v58, %v4800_v43 }
 0x1aa   :  { %8710 = vst [vmem:[#allocation140_spill] sm:$0xff] %v6683_v8  ;;  %4711 = vmatmul.msk.bf16.gmra.mxu3 %vm449_vm0, %v6386_v25  ;;  %4727 = vmatmul.msk.bf16.gmra.mxu0 %vm449_vm0, %v6386_v25  ;;  %v5474_v8 = vld [vmem:[#allocation2 + $0x70] sm:$0xf0] }
 0x1ab   :  { %v4807_v13 = vor.u32 %v5474_v8, %v4806_v20  ;;  %1444 = vmatpush.bf16.msra.mxu1 %v4803_v0 }
 0x1ac   :  { %4743 = vmatmul.msk.bf16.gmra.mxu1 %vm449_vm0, %v6386_v25  ;;  %4839 = vmatmul.msk.bf16.gmra.mxu2 %vm449_vm0, %v6386_v25 }
 0x1ad   :  { %v6693_v7 = vpop.f32.mrf.mxu3  ;;  %1533 = vmatpush.bf16.msra.mxu2 %v4807_v13 }
 0x1ae   :  { %8711 = vst [vmem:[#allocation141_spill] sm:$0xff] %v6693_v7 }
 0x1af   :  { %v6695_v59 = vpop.f32.mrf.mxu2  ;;  %v6697_v45 = vpop.f32.mrf.mxu0 }
 0x1b0   :  { %8712 = vst [vmem:[#allocation142_spill] sm:$0xff] %v6697_v45 }
 0x1b1   :  { %v6699_v15 = vpop.f32.mrf.mxu1 }
 0x1b2   :  { %8713 = vst [vmem:[#allocation143_spill] sm:$0xff] %v6699_v15 }
 0x1b5   :  { %v6701_v19 = vpop.f32.mrf.mxu3 }
 0x1b6   :  { %8714 = vst [vmem:[#allocation144_spill] sm:$0xff] %v6701_v19 }
 0x1b7   :  { %v6703_v22 = vpop.f32.mrf.mxu2  ;;  %v6705_v25 = vpop.f32.mrf.mxu0 }
 0x1b8   :  { %8715 = vst [vmem:[#allocation145_spill] sm:$0xff] %v6705_v25  ;;  %v4780_v25 = vld [vmem:[#allocation2 + $0x44] sm:$0xf0] }
 0x1b9   :  { %v6707_v7 = vpop.f32.mrf.mxu1 }
 0x1ba   :  { %8716 = vst [vmem:[#allocation146_spill] sm:$0xff] %v6707_v7  ;;  %4712 = vmatmul.msk.bf16.gmra.mxu3 %vm449_vm0, %v6114_v40  ;;  %4728 = vmatmul.msk.bf16.gmra.mxu0 %vm449_vm0, %v6114_v40 }
 0x1bc   :  { %4744 = vmatmul.msk.bf16.gmra.mxu1 %vm449_vm0, %v6114_v40  ;;  %4840 = vmatmul.msk.bf16.gmra.mxu2 %vm449_vm0, %v6114_v40 }
 0x1bd   :  { %v6717_v13 = vpop.f32.mrf.mxu3 }
 0x1be   :  { %8717 = vst [vmem:[#allocation147_spill] sm:$0xff] %v6717_v13  ;;  %v5469_v13 = vld [vmem:[#allocation2 + $0x48] sm:$0xf0] }
 0x1bf   :  { %v6719_v0 = vpop.f32.mrf.mxu2  ;;  %v6721_v43 = vpop.f32.mrf.mxu0 }
 0x1c0   :  { %8718 = vst [vmem:[#allocation148_spill] sm:$0xff] %v6721_v43 }
 0x1c1   :  { %v6723_v58 = vpop.f32.mrf.mxu1 }
 0x1c2   :  { %8719 = vst [vmem:[#allocation149_spill] sm:$0xff] %v6723_v58 }
 0x1c5   :  { %v6725_v8 = vpop.f32.mrf.mxu3 }
 0x1c6   :  { %8720 = vst [vmem:[#allocation150_spill] sm:$0xff] %v6725_v8  ;;  %v4786_v8 = vld [vmem:[#allocation2 + $0x38] sm:$0xf] }
 0x1c7   :  { %v6727_v20 = vpop.f32.mrf.mxu2  ;;  %v6729_v7 = vpop.f32.mrf.mxu0  ;;  %v4787_v19 = vor.u32 %v5469_v13, %v4786_v8 }
 0x1c8   :  { %8721 = vst [vmem:[#allocation151_spill] sm:$0xff] %v6729_v7 }
 0x1c9   :  { %v6731_v15 = vpop.f32.mrf.mxu1  ;;  %1534 = vmatpush.bf16.msra.mxu2 %v4787_v19  ;;  %v5495_v19 = vld [vmem:[#allocation8 + $0x74] sm:$0xf0] }
 0x1ca   :  { %8722 = vst [vmem:[#allocation152_spill] sm:$0xff] %v6731_v15  ;;  %4713 = vmatmul.msk.bf16.gmra.mxu3 %vm449_vm0, %v6132_v42  ;;  %4729 = vmatmul.msk.bf16.gmra.mxu0 %vm449_vm0, %v6132_v42  ;;  %v5466_v15 = vld [vmem:[#allocation2 + $0x34] sm:$0xf] }
 0x1cb   :  { %v4783_v45 = vor.u32 %v5466_v15, %v4780_v25  ;;  %v5030_v15 = vld [vmem:[#allocation8 + $0xf0] sm:$0xf]  ;;  %v5511_v25 = vld [vmem:[#allocation8 + $0xf4] sm:$0xf0] }
 0x1cc   :  { %4745 = vmatmul.msk.bf16.gmra.mxu1 %vm449_vm0, %v6132_v42  ;;  %4841 = vmatmul.msk.bf16.gmra.mxu2 %vm449_vm0, %v6132_v42  ;;  %v4760_v42 = vld [vmem:[#allocation2 + $0x1c] sm:$0xf0]  ;;  %v5031_v13 = vor.u32 %v5511_v25, %v5030_v15 }
 0x1cd   :  { %v6741_v40 = vpop.f32.mrf.mxu3  ;;  %1445 = vmatpush.bf16.msra.mxu1 %v4783_v45  ;;  %v4763_v29 = vor.u32 %v5461_v10, %v4760_v42  ;;  %v4966_v10 = vld [vmem:[#allocation8 + $0x70] sm:$0xf] }
 0x1ce   :  { %8723 = vst [vmem:[#allocation153_spill] sm:$0xff] %v6741_v40  ;;  %v4967_v45 = vor.u32 %v5495_v19, %v4966_v10  ;;  %2426 = vmatpush.bf16.msrb.mxu0 %v5031_v13 }
 0x1cf   :  { %v6743_v58 = vpop.f32.mrf.mxu2  ;;  %v6745_v43 = vpop.f32.mrf.mxu0 }
 0x1d0   :  { %8724 = vst [vmem:[#allocation154_spill] sm:$0xff] %v6745_v43  ;;  %2337 = vmatpush.bf16.msrb.mxu3 %v4967_v45 }
 0x1d1   :  { %v6747_v7 = vpop.f32.mrf.mxu1  ;;  %1446 = vmatpush.bf16.msra.mxu1 %v4763_v29 }
 0x1d2   :  { %8725 = vst [vmem:[#allocation155_spill] sm:$0xff] %v6747_v7  ;;  %v4767_v7 = vor.u32 %v5464_v23, %v4766_v36 }
 0x1d4   :  { %1535 = vmatpush.bf16.msra.mxu2 %v4767_v7 }
 0x1d5   :  { %v6749_v17 = vpop.f32.mrf.mxu3 }
 0x1d6   :  { %8726 = vst [vmem:[#allocation156_spill] sm:$0xff] %v6749_v17 }
 0x1d7   :  { %v6751_v40 = vpop.f32.mrf.mxu2  ;;  %v6753_v43 = vpop.f32.mrf.mxu0 }
 0x1d8   :  { %8727 = vst [vmem:[#allocation157_spill] sm:$0xff] %v6753_v43 }
 0x1d9   :  { %v6755_v4 = vpop.f32.mrf.mxu1 }
 0x1da   :  { %8728 = vst [vmem:[#allocation158_spill] sm:$0xff] %v6755_v4  ;;  %4714 = vmatmul.msk.bf16.gmra.mxu3 %vm449_vm0, %v6156_v47  ;;  %4730 = vmatmul.msk.bf16.gmra.mxu0 %vm449_vm0, %v6156_v47 }
 0x1dc   :  { %4746 = vmatmul.msk.bf16.gmra.mxu1 %vm449_vm0, %v6156_v47  ;;  %4842 = vmatmul.msk.bf16.gmra.mxu2 %vm449_vm0, %v6156_v47 }
 0x1dd   :  { %v6765_v23 = vpop.f32.mrf.mxu3 }
 0x1de   :  { %8729 = vst [vmem:[#allocation159_spill] sm:$0xff] %v6765_v23 }
 0x1df   :  { %v6767_v36 = vpop.f32.mrf.mxu2  ;;  %v6769_v29 = vpop.f32.mrf.mxu0 }
 0x1e0   :  { %8730 = vst [vmem:[#allocation160_spill] sm:$0xff] %v6769_v29  ;;  %v1189_v29 = vadd.f32 %v6655_v63, %v6621_v2 }
 0x1e1   :  { %v6771_v7 = vpop.f32.mrf.mxu1 }
 0x1e2   :  { %8731 = vst [vmem:[#allocation161_spill] sm:$0xff] %v6771_v7 }
 0x1e5   :  { %v6773_v8 = vpop.f32.mrf.mxu3 }
 0x1e6   :  { %8732 = vst [vmem:[#allocation162_spill] sm:$0xff] %v6773_v8 }
 0x1e7   :  { %v6775_v42 = vpop.f32.mrf.mxu2  ;;  %v6777_v47 = vpop.f32.mrf.mxu0 }
 0x1e8   :  { %8733 = vst [vmem:[#allocation163_spill] sm:$0xff] %v6777_v47 }
 0x1e9   :  { %v6779_v10 = vpop.f32.mrf.mxu1 }
 0x1ea   :  { %8734 = vst [vmem:[#allocation164_spill] sm:$0xff] %v6779_v10  ;;  %4715 = vmatmul.msk.bf16.gmra.mxu3 %vm449_vm0, %v6174_v49  ;;  %4731 = vmatmul.msk.bf16.gmra.mxu0 %vm449_vm0, %v6174_v49 }
 0x1ec   :  { %4747 = vmatmul.msk.bf16.gmra.mxu1 %vm449_vm0, %v6174_v49  ;;  %4843 = vmatmul.msk.bf16.gmra.mxu2 %vm449_vm0, %v6174_v49  ;;  %v4958_v49 = vld [vmem:[#allocation8 + $0x60] sm:$0xf] }
 0x1ed   :  { %v6789_v19 = vpop.f32.mrf.mxu3 }
 0x1ee   :  { %8735 = vst [vmem:[#allocation165_spill] sm:$0xff] %v6789_v19  ;;  %v5022_v19 = vld [vmem:[#allocation8 + $0xe0] sm:$0xf] }
 0x1ef   :  { %v6791_v45 = vpop.f32.mrf.mxu2  ;;  %v6793_v15 = vpop.f32.mrf.mxu0 }
 0x1f0   :  { %8736 = vst [vmem:[#allocation166_spill] sm:$0xff] %v6793_v15 }
 0x1f1   :  { %v6795_v25 = vpop.f32.mrf.mxu1 }
 0x1f2   :  { %8737 = vst [vmem:[#allocation167_spill] sm:$0xff] %v6795_v25  ;;  %v5493_v25 = vld [vmem:[#allocation8 + $0x64] sm:$0xf0] }
 0x1f3   :  { %v4959_v15 = vor.u32 %v5493_v25, %v4958_v49  ;;  %v1632_v25 = vmax.f32 %v1189_v29, 0.0  ;;  %v1194_v29 = vadd.f32 %v6679_v35, %v6621_v2  ;;  %v4950_v35 = vld [vmem:[#allocation8 + $0x50] sm:$0xf] }
 0x1f5   :  { %v6797_v13 = vpop.f32.mrf.mxu3  ;;  %2338 = vmatpush.bf16.msrb.mxu3 %v4959_v15 }
 0x1f6   :  { %8738 = vst [vmem:[#allocation168_spill] sm:$0xff] %v6797_v13 }
 0x1f7   :  { %v6799_v10 = vpop.f32.mrf.mxu2  ;;  %v6801_v7 = vpop.f32.mrf.mxu0 }
 0x1f8   :  { %8739 = vst [vmem:[#allocation169_spill] sm:$0xff] %v6801_v7 }
 0x1f9   :  { %v6803_v4 = vpop.f32.mrf.mxu1 }
 0x1fa   :  { %8740 = vst [vmem:[#allocation170_spill] sm:$0xff] %v6803_v4  ;;  %4844 = vmatmul.msk.bf16.vlgmr.msra.gmra.mxu3 %vm449_vm0, %v6109_v39  ;;  %4860 = vmatmul.msk.bf16.vlgmr.msra.gmra.mxu0 %vm449_vm0, %v6109_v39  ;;  %v1187_v4 = vadd.f32 %v6647_v53, %v6621_v2 }
 0x1fc   :  { %4876 = vmatmul.msk.bf16.vlgmr.msra.gmra.mxu1 %vm449_vm0, %v6109_v39  ;;  %4892 = vmatmul.msk.bf16.vlgmr.msra.gmra.mxu2 %vm449_vm0, %v6109_v39  ;;  %v5509_v39 = vld [vmem:[#allocation8 + $0xe4] sm:$0xf0]  ;;  %v1627_v23 = vmax.f32 %v1187_v4, 0.0 }
 0x1fd   :  { %v6813_v47 = vpop.f32.mrf.mxu3  ;;  %v5023_v8 = vor.u32 %v5509_v39, %v5022_v19 }
 0x1fe   :  { %8741 = vst [vmem:[#allocation171_spill] sm:$0xff] %v6813_v47  ;;  %v6831_v53 = vpack.c.bf16 %v1632_v25, %v1627_v23  ;;  %v1192_v23 = vadd.f32 %v6671_v28, %v6621_v2  ;;  %v1642_v25 = vmax.f32 %v1194_v29, 0.0  ;;  %v5491_v28 = vld [vmem:[#allocation8 + $0x54] sm:$0xf0] }
 0x1ff   :  { %v6815_v7 = vpop.f32.mrf.mxu2  ;;  %v6821_v43 = vpop.f32.mrf.mxu0  ;;  %2427 = vmatpush.bf16.msrb.mxu0 %v5023_v8 }
 0x200   :  { %8742 = vst [vmem:[#allocation172_spill] sm:$0xff] %v6821_v43  ;;  %v1637_v39 = vmax.f32 %v1192_v23, 0.0  ;;  %v4951_v23 = vor.u32 %v5491_v28, %v4950_v35 }
 0x201   :  { %v6823_v13 = vpop.f32.mrf.mxu1  ;;  %8746 = vst [vmem:[#allocation176_spill] sm:$0xff] %v6831_v53 }
 0x202   :  { %8743 = vst [vmem:[#allocation173_spill] sm:$0xff] %v6823_v13  ;;  %2339 = vmatpush.bf16.msrb.mxu3 %v4951_v23 }
 0x205   :  { %v6825_v49 = vpop.f32.mrf.mxu3 }
 0x206   :  { %8744 = vst [vmem:[#allocation174_spill] sm:$0xff] %v6825_v49 }
 0x207   :  { %v6827_v47 = vpop.f32.mrf.mxu2  ;;  %v6829_v15 = vpop.f32.mrf.mxu0 }
 0x208   :  { %8745 = vst [vmem:[#allocation175_spill] sm:$0xff] %v6829_v15  ;;  %v6861_v15 = vpack.c.bf16 %v1642_v25, %v1637_v39  ;;  %v1197_v25 = vadd.f32 %v6695_v59, %v6621_v2 }
 0x209   :  { %v6833_v17 = vpop.f32.mrf.mxu1 }
 0x20a   :  { %8747 = vst [vmem:[#allocation177_spill] sm:$0xff] %v6833_v17  ;;  %4845 = vmatmul.msk.bf16.gmra.mxu3 %vm449_vm0, %v6127_v41  ;;  %4861 = vmatmul.msk.bf16.gmra.mxu0 %vm449_vm0, %v6127_v41 }
 0x20b   :  { %8753 = vst [vmem:[#allocation183_spill] sm:$0xff] %v6861_v15 }
 0x20c   :  { %4877 = vmatmul.msk.bf16.gmra.mxu1 %vm449_vm0, %v6127_v41  ;;  %4893 = vmatmul.msk.bf16.gmra.mxu2 %vm449_vm0, %v6127_v41 }
 0x20d   :  { %v6843_v4 = vpop.f32.mrf.mxu3 }
 0x20e   :  { %8748 = vst [vmem:[#allocation178_spill] sm:$0xff] %v6843_v4  ;;  %v1647_v4 = vmax.f32 %v1197_v25, 0.0 }
 0x20f   :  { %v6845_v63 = vpop.f32.mrf.mxu2  ;;  %v6851_v8 = vpop.f32.mrf.mxu0 }
 0x210   :  { %8749 = vst [vmem:[#allocation179_spill] sm:$0xff] %v6851_v8  ;;  %v5014_v8 = vld [vmem:[#allocation8 + $0xd0] sm:$0xf] }
 0x211   :  { %v6853_v19 = vpop.f32.mrf.mxu1 }
 0x212   :  { %8750 = vst [vmem:[#allocation180_spill] sm:$0xff] %v6853_v19 }
 0x215   :  { %v6855_v17 = vpop.f32.mrf.mxu3 }
 0x216   :  { %8751 = vst [vmem:[#allocation181_spill] sm:$0xff] %v6855_v17 }
 0x217   :  { %v6857_v13 = vpop.f32.mrf.mxu2  ;;  %v6859_v41 = vpop.f32.mrf.mxu0 }
 0x218   :  { %8752 = vst [vmem:[#allocation182_spill] sm:$0xff] %v6859_v41 }
 0x219   :  { %v6863_v43 = vpop.f32.mrf.mxu1 }
 0x21a   :  { %8754 = vst [vmem:[#allocation184_spill] sm:$0xff] %v6863_v43  ;;  %4846 = vmatmul.msk.bf16.gmra.mxu3 %vm449_vm0, %v6151_v46  ;;  %4862 = vmatmul.msk.bf16.gmra.mxu0 %vm449_vm0, %v6151_v46  ;;  %v1199_v43 = vadd.f32 %v6703_v22, %v6621_v2 }
 0x21c   :  { %4878 = vmatmul.msk.bf16.gmra.mxu1 %vm449_vm0, %v6151_v46  ;;  %4894 = vmatmul.msk.bf16.gmra.mxu2 %vm449_vm0, %v6151_v46  ;;  %v5507_v46 = vld [vmem:[#allocation8 + $0xd4] sm:$0xf0]  ;;  %v1652_v35 = vmax.f32 %v1199_v43, 0.0  ;;  %v1202_v43 = vadd.f32 %v6719_v0, %v6621_v2  ;;  %v4942_v0 = vld [vmem:[#allocation8 + $0x40] sm:$0xf] }
 0x21d   :  { %v6873_v29 = vpop.f32.mrf.mxu3  ;;  %v5015_v17 = vor.u32 %v5507_v46, %v5014_v8 }
 0x21e   :  { %8755 = vst [vmem:[#allocation185_spill] sm:$0xff] %v6873_v29  ;;  %v6891_v59 = vpack.c.bf16 %v1652_v35, %v1647_v4  ;;  %v1204_v4 = vadd.f32 %v6727_v20, %v6621_v2  ;;  %v1657_v46 = vmax.f32 %v1202_v43, 0.0  ;;  %v5489_v20 = vld [vmem:[#allocation8 + $0x44] sm:$0xf0] }
 0x21f   :  { %v6875_v39 = vpop.f32.mrf.mxu2  ;;  %v6881_v19 = vpop.f32.mrf.mxu0  ;;  %2428 = vmatpush.bf16.msrb.mxu0 %v5015_v17  ;;  %v4943_v43 = vor.u32 %v5489_v20, %v4942_v0 }
 0x220   :  { %8756 = vst [vmem:[#allocation186_spill] sm:$0xff] %v6881_v19  ;;  %v1662_v35 = vmax.f32 %v1204_v4, 0.0  ;;  %v1232_v55 = vadd.f32 %v6875_v39, %v6621_v2 }
 0x221   :  { %v6883_v41 = vpop.f32.mrf.mxu1  ;;  %8760 = vst [vmem:[#allocation190_spill] sm:$0xff] %v6891_v59  ;;  %2340 = vmatpush.bf16.msrb.mxu3 %v4943_v43 }
 0x222   :  { %8757 = vst [vmem:[#allocation187_spill] sm:$0xff] %v6883_v41 }
 0x225   :  { %v6885_v28 = vpop.f32.mrf.mxu3 }
 0x226   :  { %8758 = vst [vmem:[#allocation188_spill] sm:$0xff] %v6885_v28 }
 0x227   :  { %v6887_v29 = vpop.f32.mrf.mxu2  ;;  %v6889_v23 = vpop.f32.mrf.mxu0 }
 0x228   :  { %8759 = vst [vmem:[#allocation189_spill] sm:$0xff] %v6889_v23  ;;  %v6921_v23 = vpack.c.bf16 %v1662_v35, %v1657_v46  ;;  %v1207_v35 = vadd.f32 %v6743_v58, %v6621_v2 }
 0x229   :  { %v6893_v49 = vpop.f32.mrf.mxu1 }
 0x22a   :  { %8761 = vst [vmem:[#allocation191_spill] sm:$0xff] %v6893_v49  ;;  %4847 = vmatmul.msk.bf16.gmra.mxu3 %vm449_vm0, %v6169_v48  ;;  %4863 = vmatmul.msk.bf16.gmra.mxu0 %vm449_vm0, %v6169_v48 }
 0x22b   :  { %8767 = vst [vmem:[#allocation197_spill] sm:$0xff] %v6921_v23 }
 0x22c   :  { %4879 = vmatmul.msk.bf16.gmra.mxu1 %vm449_vm0, %v6169_v48  ;;  %4895 = vmatmul.msk.bf16.gmra.mxu2 %vm449_vm0, %v6169_v48 }
 0x22d   :  { %v6903_v17 = vpop.f32.mrf.mxu3 }
 0x22e   :  { %8762 = vst [vmem:[#allocation192_spill] sm:$0xff] %v6903_v17  ;;  %v1667_v17 = vmax.f32 %v1207_v35, 0.0 }
 0x22f   :  { %v6905_v22 = vpop.f32.mrf.mxu2  ;;  %v6911_v8 = vpop.f32.mrf.mxu0 }
 0x230   :  { %8763 = vst [vmem:[#allocation193_spill] sm:$0xff] %v6911_v8  ;;  %v5006_v8 = vld [vmem:[#allocation8 + $0xc0] sm:$0xf] }
 0x231   :  { %v6913_v25 = vpop.f32.mrf.mxu1 }
 0x232   :  { %8764 = vst [vmem:[#allocation194_spill] sm:$0xff] %v6913_v25 }
 0x235   :  { %v6915_v49 = vpop.f32.mrf.mxu3 }
 0x236   :  { %8765 = vst [vmem:[#allocation195_spill] sm:$0xff] %v6915_v49 }
 0x237   :  { %v6917_v41 = vpop.f32.mrf.mxu2  ;;  %v6919_v48 = vpop.f32.mrf.mxu0 }
 0x238   :  { %8766 = vst [vmem:[#allocation196_spill] sm:$0xff] %v6919_v48 }
 0x239   :  { %v6923_v19 = vpop.f32.mrf.mxu1 }
 0x23a   :  { %8768 = vst [vmem:[#allocation198_spill] sm:$0xff] %v6923_v19  ;;  %4848 = vmatmul.msk.bf16.gmra.mxu3 %vm449_vm0, %v6187_v50  ;;  %4864 = vmatmul.msk.bf16.gmra.mxu0 %vm449_vm0, %v6187_v50  ;;  %v1209_v19 = vadd.f32 %v6751_v40, %v6621_v2 }
 0x23c   :  { %4880 = vmatmul.msk.bf16.gmra.mxu1 %vm449_vm0, %v6187_v50  ;;  %4896 = vmatmul.msk.bf16.gmra.mxu2 %vm449_vm0, %v6187_v50  ;;  %v5505_v50 = vld [vmem:[#allocation8 + $0xc4] sm:$0xf0]  ;;  %v1672_v0 = vmax.f32 %v1209_v19, 0.0  ;;  %v1212_v19 = vadd.f32 %v6767_v36, %v6621_v2 }
 0x23d   :  { %v6933_v4 = vpop.f32.mrf.mxu3  ;;  %v5007_v49 = vor.u32 %v5505_v50, %v5006_v8  ;;  %v5637_v36 = vld [vmem:[%s8519_s0 + $0x30] sm:$0xff] }
 0x23e   :  { %8769 = vst [vmem:[#allocation199_spill] sm:$0xff] %v6933_v4  ;;  %v6951_v58 = vpack.c.bf16 %v1672_v0, %v1667_v17  ;;  %v1214_v17 = vadd.f32 %v6775_v42, %v6621_v2  ;;  %v1677_v50 = vmax.f32 %v1212_v19, 0.0  ;;  %v4934_v42 = vld [vmem:[#allocation8 + $0x30] sm:$0xf]  ;;  %v5487_v19 = vld [vmem:[#allocation8 + $0x34] sm:$0xf0] }
 0x23f   :  { %v6935_v46 = vpop.f32.mrf.mxu2  ;;  %v6941_v25 = vpop.f32.mrf.mxu0  ;;  %2429 = vmatpush.bf16.msrb.mxu0 %v5007_v49 }
 0x240   :  { %8770 = vst [vmem:[#allocation200_spill] sm:$0xff] %v6941_v25  ;;  %v1682_v0 = vmax.f32 %v1214_v17, 0.0  ;;  %v4935_v17 = vor.u32 %v5487_v19, %v4934_v42  ;;  %v4998_v42 = vld [vmem:[#allocation8 + $0xb0] sm:$0xf]  ;;  %v5503_v19 = vld [vmem:[#allocation8 + $0xb4] sm:$0xf0] }
 0x241   :  { %v6943_v48 = vpop.f32.mrf.mxu1  ;;  %8774 = vst [vmem:[#allocation204_spill] sm:$0xff] %v6951_v58 }
 0x242   :  { %8771 = vst [vmem:[#allocation201_spill] sm:$0xff] %v6943_v48  ;;  %2341 = vmatpush.bf16.msrb.mxu3 %v4935_v17 }
 0x245   :  { %v6945_v20 = vpop.f32.mrf.mxu3 }
 0x246   :  { %8772 = vst [vmem:[#allocation202_spill] sm:$0xff] %v6945_v20  ;;  %v4999_v20 = vor.u32 %v5503_v19, %v4998_v42  ;;  %v5158_v19 = vld [vmem:[#allocation8 + $0x1f0] sm:$0xf] }
 0x247   :  { %v6947_v4 = vpop.f32.mrf.mxu2  ;;  %v6949_v43 = vpop.f32.mrf.mxu0 }
 0x248   :  { %8773 = vst [vmem:[#allocation203_spill] sm:$0xff] %v6949_v43  ;;  %v6981_v43 = vpack.c.bf16 %v1682_v0, %v1677_v50  ;;  %v1217_v0 = vadd.f32 %v6791_v45, %v6621_v2  ;;  %2430 = vmatpush.bf16.msrb.mxu0 %v4999_v20  ;;  %v1224_v20 = vadd.f32 %v6827_v47, %v6621_v2 }
 0x249   :  { %v6953_v28 = vpop.f32.mrf.mxu1 }
 0x24a   :  { %8775 = vst [vmem:[#allocation205_spill] sm:$0xff] %v6953_v28  ;;  %4849 = vmatmul.msk.bf16.gmra.mxu3 %vm449_vm0, %v6206_v54  ;;  %4865 = vmatmul.msk.bf16.gmra.mxu0 %vm449_vm0, %v6206_v54 }
 0x24b   :  { %8781 = vst [vmem:[#allocation211_spill] sm:$0xff] %v6981_v43 }
 0x24c   :  { %4881 = vmatmul.msk.bf16.gmra.mxu1 %vm449_vm0, %v6206_v54  ;;  %4897 = vmatmul.msk.bf16.gmra.mxu2 %vm449_vm0, %v6206_v54 }
 0x24d   :  { %v6963_v40 = vpop.f32.mrf.mxu3  ;;  %2431 = vmatpush.bf16.msrb.mxu0 %v4991_v44 }
 0x24e   :  { %8776 = vst [vmem:[#allocation206_spill] sm:$0xff] %v6963_v40 }
 0x24f   :  { %v6965_v49 = vpop.f32.mrf.mxu2  ;;  %v6971_v8 = vpop.f32.mrf.mxu0 }
 0x250   :  { %8777 = vst [vmem:[#allocation207_spill] sm:$0xff] %v6971_v8 }
 0x251   :  { %v6973_v35 = vpop.f32.mrf.mxu1 }
 0x252   :  { %8778 = vst [vmem:[#allocation208_spill] sm:$0xff] %v6973_v35 }
 0x255   :  { %v6975_v28 = vpop.f32.mrf.mxu3 }
 0x256   :  { %8779 = vst [vmem:[#allocation209_spill] sm:$0xff] %v6975_v28  ;;  %v1687_v28 = vmax.f32 %v1217_v0, 0.0 }
 0x257   :  { %v6977_v48 = vpop.f32.mrf.mxu2  ;;  %v6979_v54 = vpop.f32.mrf.mxu0 }
 0x258   :  { %8780 = vst [vmem:[#allocation210_spill] sm:$0xff] %v6979_v54 }
 0x259   :  { %v6983_v25 = vpop.f32.mrf.mxu1 }
 0x25a   :  { %8782 = vst [vmem:[#allocation212_spill] sm:$0xff] %v6983_v25  ;;  %4850 = vmatmul.msk.bf16.gmra.mxu3 %vm449_vm0, %v5637_v36  ;;  %4866 = vmatmul.msk.bf16.gmra.mxu0 %vm449_vm0, %v5637_v36  ;;  %v1219_v25 = vadd.f32 %v6799_v10, %v6621_v2  ;;  %v5638_v10 = vld [vmem:[%s8519_s0 + $0x38] sm:$0xff] }
 0x25c   :  { %4882 = vmatmul.msk.bf16.gmra.mxu1 %vm449_vm0, %v5637_v36  ;;  %4898 = vmatmul.msk.bf16.gmra.mxu2 %vm449_vm0, %v5637_v36  ;;  %v1692_v36 = vmax.f32 %v1219_v25, 0.0 }
 0x25d   :  { %v6992_v35 = vpop.f32.mrf.mxu3 }
 0x25e   :  { %8783 = vst [vmem:[#allocation213_spill] sm:$0xff] %v6992_v35  ;;  %v7010_v51 = vpack.c.bf16 %v1692_v36, %v1687_v28  ;;  %v1222_v28 = vadd.f32 %v6815_v7, %v6621_v2 }
 0x25f   :  { %v6994_v50 = vpop.f32.mrf.mxu2  ;;  %v7000_v54 = vpop.f32.mrf.mxu0 }
 0x260   :  { %8784 = vst [vmem:[#allocation214_spill] sm:$0xff] %v7000_v54  ;;  %v1702_v54 = vmax.f32 %v1224_v20, 0.0  ;;  %v1227_v20 = vadd.f32 %v6845_v63, %v6621_v2 }
 0x261   :  { %v7002_v8 = vpop.f32.mrf.mxu1  ;;  %8788 = vst [vmem:[#allocation218_spill] sm:$0xff] %v7010_v51 }
 0x262   :  { %8785 = vst [vmem:[#allocation215_spill] sm:$0xff] %v7002_v8 }
 0x265   :  { %v7004_v40 = vpop.f32.mrf.mxu3 }
 0x266   :  { %8786 = vst [vmem:[#allocation216_spill] sm:$0xff] %v7004_v40  ;;  %v5527_v40 = vld [vmem:[#allocation8 + $0x174] sm:$0xf0] }
 0x267   :  { %v7006_v35 = vpop.f32.mrf.mxu2  ;;  %v7008_v17 = vpop.f32.mrf.mxu0 }
 0x268   :  { %8787 = vst [vmem:[#allocation217_spill] sm:$0xff] %v7008_v17  ;;  %v1697_v17 = vmax.f32 %v1222_v28, 0.0 }
 0x269   :  { %v7012_v45 = vpop.f32.mrf.mxu1 }
 0x26a   :  { %8789 = vst [vmem:[#allocation219_spill] sm:$0xff] %v7012_v45  ;;  %4851 = vmatmul.msk.bf16.gmra.mxu3 %vm449_vm0, %v5638_v10  ;;  %4867 = vmatmul.msk.bf16.gmra.mxu0 %vm449_vm0, %v5638_v10  ;;  %v5543_v45 = vld [vmem:[#allocation8 + $0x1f4] sm:$0xf0]  ;;  %v7037_v47 = vpack.c.bf16 %v1702_v54, %v1697_v17 }
 0x26b   :  { %v5159_v8 = vor.u32 %v5543_v45, %v5158_v19  ;;  %v5639_v45 = vld [vmem:[%s8519_s0 + $0x40] sm:$0xff]  ;;  %v1229_v19 = vadd.f32 %v6857_v13, %v6621_v2 }
 0x26c   :  { %4883 = vmatmul.msk.bf16.gmra.mxu1 %vm449_vm0, %v5638_v10  ;;  %4899 = vmatmul.msk.bf16.gmra.mxu2 %vm449_vm0, %v5638_v10  ;;  %v5094_v10 = vld [vmem:[#allocation8 + $0x170] sm:$0xf]  ;;  %8794 = vst [vmem:[#allocation224_spill] sm:$0xff] %v7037_v47  ;;  %v5531_v47 = vld [vmem:[#allocation8 + $0x194] sm:$0xf0] }
 0x26d   :  { %v7021_v25 = vpop.f32.mrf.mxu3  ;;  %2604 = vmatpush.bf16.msrb.mxu2 %v5159_v8  ;;  %v5485_v8 = vld [vmem:[#allocation8 + $0x24] sm:$0xf0]  ;;  %v1712_v11 = vmax.f32 %v1229_v19, 0.0 }
 0x26e   :  { %8790 = vst [vmem:[#allocation220_spill] sm:$0xff] %v7021_v25  ;;  %v5095_v25 = vor.u32 %v5527_v40, %v5094_v10  ;;  %v4926_v40 = vld [vmem:[#allocation8 + $0x20] sm:$0xf]  ;;  %v7057_v10 = vperm.slane %v6616_v34, 4 }
 0x26f   :  { %v7023_v0 = vpop.f32.mrf.mxu2  ;;  %v7029_v36 = vpop.f32.mrf.mxu0  ;;  %v4927_v17 = vor.u32 %v5485_v8, %v4926_v40 }
 0x270   :  { %8791 = vst [vmem:[#allocation221_spill] sm:$0xff] %v7029_v36  ;;  %2515 = vmatpush.bf16.msrb.mxu1 %v5095_v25  ;;  %v7040_v36 = vperm.slane %v6616_v34, 2 }
 0x271   :  { %v7031_v42 = vpop.f32.mrf.mxu1  ;;  %2342 = vmatpush.bf16.msrb.mxu3 %v4927_v17  ;;  %v1707_v17 = vmax.f32 %v1227_v20, 0.0 }
 0x272   :  { %8792 = vst [vmem:[#allocation222_spill] sm:$0xff] %v7031_v42 }
 0x273   :  { %v7071_v20 = vpack.c.bf16 %v1712_v11, %v1707_v17  ;;  %v1234_v11 = vadd.f32 %v6887_v29, %v6621_v2 }
 0x275   :  { %v7033_v26 = vpop.f32.mrf.mxu3  ;;  %8796 = vst [vmem:[#allocation226_spill] sm:$0xff] %v7071_v20 }
 0x276   :  { %8793 = vst [vmem:[#allocation223_spill] sm:$0xff] %v7033_v26 }
 0x277   :  { %v7035_v18 = vpop.f32.mrf.mxu2  ;;  %v1359_v7 = vpop.f32.mrf.mxu0 }
 0x278   :  { %v1360_v54 = vadd.f32 %v1359_v7, %v7040_v36 }
 0x279   :  { %v7042_v42 = vpop.f32.mrf.mxu1 }
 0x27a   :  { %4852 = vmatmul.msk.bf16.gmra.mxu3 %vm449_vm0, %v5639_v45  ;;  %4868 = vmatmul.msk.bf16.gmra.mxu0 %vm449_vm0, %v5639_v45  ;;  %v1619_v14 = vmax.f32 %v1360_v54, 0.0 }
 0x27c   :  { %4884 = vmatmul.msk.bf16.gmra.mxu1 %vm449_vm0, %v5639_v45  ;;  %4900 = vmatmul.msk.bf16.gmra.mxu2 %vm449_vm0, %v5639_v45  ;;  %v7060_v45 = vperm.slane %v6616_v34, 1 }
 0x27d   :  { %v1270_v25 = vpop.f32.mrf.mxu3 }
 0x27e   :  { %v1271_v13 = vadd.f32 %v1270_v25, %v7060_v45 }
 0x27f   :  { %v1537_v28 = vpop.f32.mrf.mxu2  ;;  %v1361_v26 = vpop.f32.mrf.mxu0 }
 0x280   :  { %v1362_v7 = vadd.f32 %v1361_v26, %v7040_v36  ;;  %v1538_v63 = vadd.f32 %v1537_v28, %v7057_v10  ;;  %v1618_v19 = vmax.f32 %v1271_v13, 0.0  ;;  %v5150_v13 = vld [vmem:[#allocation8 + $0x1e0] sm:$0xf] }
 0x281   :  { %v7063_v40 = vpop.f32.mrf.mxu1 }
 0x282   :  { %v1624_v8 = vmax.f32 %v1362_v7, 0.0  ;;  %v1621_v26 = vmax.f32 %v1538_v63, 0.0 }
 0x284   :  { %v7067_v37 = vpack.c.bf16 %v1624_v8, %v1619_v14  ;;  %v5640_v14 = vld [vmem:[%s8519_s0 + $0x48] sm:$0xff] }
 0x285   :  { %v1272_v54 = vpop.f32.mrf.mxu3 }
 0x286   :  { %8795 = vst [vmem:[#allocation225_spill] sm:$0xff] %v7067_v37  ;;  %v1273_v34 = vadd.f32 %v1272_v54, %v7060_v45  ;;  %v5541_v54 = vld [vmem:[#allocation8 + $0x1e4] sm:$0xf0] }
 0x287   :  { %v1539_v12 = vpop.f32.mrf.mxu2  ;;  %v1364_v7 = vpop.f32.mrf.mxu0 }
 0x288   :  { %v1540_v1 = vadd.f32 %v1539_v12, %v7057_v10  ;;  %v1623_v28 = vmax.f32 %v1273_v34, 0.0  ;;  %v1365_v44 = vadd.f32 %v1364_v7, %v7040_v36  ;;  %v1717_v7 = vmax.f32 %v1232_v55, 0.0 }
 0x289   :  { %v7073_v24 = vpop.f32.mrf.mxu1 }
 0x28a   :  { %v1626_v30 = vmax.f32 %v1540_v1, 0.0  ;;  %v7075_v25 = vpack.c.bf16 %v1623_v28, %v1618_v19  ;;  %4853 = vmatmul.msk.bf16.gmra.mxu3 %vm449_vm0, %v5640_v14  ;;  %4869 = vmatmul.msk.bf16.gmra.mxu0 %vm449_vm0, %v5640_v14  ;;  %v1629_v17 = vmax.f32 %v1365_v44, 0.0  ;;  %v1722_v19 = vmax.f32 %v1234_v11, 0.0  ;;  %v5086_v28 = vld [vmem:[#allocation8 + $0x160] sm:$0xf] }
 0x28c   :  { %8797 = vst [vmem:[#allocation227_spill] sm:$0xff] %v7075_v25  ;;  %v7082_v57 = vpack.c.bf16 %v1626_v30, %v1621_v26  ;;  %4885 = vmatmul.msk.bf16.gmra.mxu1 %vm449_vm0, %v5640_v14  ;;  %4901 = vmatmul.msk.bf16.gmra.mxu2 %vm449_vm0, %v5640_v14  ;;  %v5151_v26 = vor.u32 %v5541_v54, %v5150_v13  ;;  %v5525_v14 = vld [vmem:[#allocation8 + $0x164] sm:$0xf0]  ;;  %v4918_v13 = vld [vmem:[#allocation8 + $0x10] sm:$0xf] }
 0x28d   :  { %v1275_v12 = vpop.f32.mrf.mxu3  ;;  %v5087_v39 = vor.u32 %v5525_v14, %v5086_v28  ;;  %v7102_v60 = vpack.c.bf16 %v1722_v19, %v1717_v7  ;;  %v5483_v54 = vld [vmem:[#allocation8 + $0x14] sm:$0xf0]  ;;  %v1237_v19 = vadd.f32 %v6905_v22, %v6621_v2  ;;  %v1239_v28 = vadd.f32 %v6917_v41, %v6621_v2 }
 0x28e   :  { %8798 = vst [vmem:[#allocation228_spill] sm:$0xff] %v7082_v57  ;;  %v1276_v57 = vadd.f32 %v1275_v12, %v7060_v45  ;;  %2605 = vmatpush.bf16.msrb.mxu2 %v5151_v26  ;;  %v5641_v12 = vld [vmem:[%s8519_s0 + $0x50] sm:$0xff] }
 0x28f   :  { %v7087_v1 = vpop.f32.mrf.mxu2  ;;  %v1366_v8 = vpop.f32.mrf.mxu0  ;;  %2516 = vmatpush.bf16.msrb.mxu1 %v5087_v39  ;;  %8800 = vst [vmem:[#allocation230_spill] sm:$0xff] %v7102_v60 }
 0x290   :  { %v1367_v30 = vadd.f32 %v1366_v8, %v7040_v36 }
 0x291   :  { %v7094_v63 = vpop.f32.mrf.mxu1 }
 0x292   :  { %v1634_v34 = vmax.f32 %v1367_v30, 0.0  ;;  %v1628_v30 = vmax.f32 %v1276_v57, 0.0 }
 0x294   :  { %v7097_v56 = vpack.c.bf16 %v1634_v34, %v1629_v17  ;;  %v4919_v34 = vor.u32 %v5483_v54, %v4918_v13  ;;  %v5499_v13 = vld [vmem:[#allocation8 + $0x94] sm:$0xf0] }
 0x295   :  { %v1277_v29 = vpop.f32.mrf.mxu3 }
 0x296   :  { %8799 = vst [vmem:[#allocation229_spill] sm:$0xff] %v7097_v56  ;;  %v1278_v44 = vadd.f32 %v1277_v29, %v7060_v45  ;;  %2343 = vmatpush.bf16.msrb.mxu3 %v4919_v34 }
 0x297   :  { %v7100_v8 = vpop.f32.mrf.mxu2  ;;  %v1369_v5 = vpop.f32.mrf.mxu0 }
 0x298   :  { %v1633_v55 = vmax.f32 %v1278_v44, 0.0  ;;  %v1370_v57 = vadd.f32 %v1369_v5, %v7040_v36  ;;  %v1732_v5 = vmax.f32 %v1239_v28, 0.0 }
 0x299   :  { %v7104_v11 = vpop.f32.mrf.mxu1 }
 0x29a   :  { %4854 = vmatmul.msk.bf16.gmra.mxu3 %vm449_vm0, %v5641_v12  ;;  %4870 = vmatmul.msk.bf16.gmra.mxu0 %vm449_vm0, %v5641_v12  ;;  %v7111_v17 = vpack.c.bf16 %v1633_v55, %v1628_v30  ;;  %v1639_v39 = vmax.f32 %v1370_v57, 0.0  ;;  %v1727_v55 = vmax.f32 %v1237_v19, 0.0 }
 0x29c   :  { %8801 = vst [vmem:[#allocation231_spill] sm:$0xff] %v7111_v17  ;;  %4886 = vmatmul.msk.bf16.gmra.mxu1 %vm449_vm0, %v5641_v12  ;;  %4902 = vmatmul.msk.bf16.gmra.mxu2 %vm449_vm0, %v5641_v12  ;;  %v4982_v12 = vld [vmem:[#allocation8 + $0x90] sm:$0xf] }
 0x29d   :  { %v1280_v26 = vpop.f32.mrf.mxu3  ;;  %v4983_v34 = vor.u32 %v5499_v13, %v4982_v12 }
 0x29e   :  { %v1281_v54 = vadd.f32 %v1280_v26, %v7060_v45  ;;  %v5642_v26 = vld [vmem:[%s8519_s0 + $0x58] sm:$0xff] }
 0x29f   :  { %v7116_v7 = vpop.f32.mrf.mxu2  ;;  %v1371_v14 = vpop.f32.mrf.mxu0  ;;  %2432 = vmatpush.bf16.msrb.mxu0 %v4983_v34  ;;  %v5142_v34 = vld [vmem:[#allocation8 + $0x1d0] sm:$0xf] }
 0x2a0   :  { %v1372_v29 = vadd.f32 %v1371_v14, %v7040_v36  ;;  %v7131_v14 = vpack.c.bf16 %v1732_v5, %v1727_v55  ;;  %v1638_v52 = vmax.f32 %v1281_v54, 0.0  ;;  %v1242_v55 = vadd.f32 %v6935_v46, %v6621_v2 }
 0x2a1   :  { %v7123_v44 = vpop.f32.mrf.mxu1  ;;  %v1244_v5 = vadd.f32 %v6947_v4, %v6621_v2  ;;  %v5079_v46 = vor.u32 %v5523_v27, %v5078_v32  ;;  %v4910_v32 = vld [vmem:[#allocation8] sm:$0xf] }
 0x2a2   :  { %v1644_v30 = vmax.f32 %v1372_v29, 0.0  ;;  %8803 = vst [vmem:[#allocation233_spill] sm:$0xff] %v7131_v14 }
 0x2a3   :  { %v1742_v38 = vmax.f32 %v1244_v5, 0.0  ;;  %2517 = vmatpush.bf16.msrb.mxu1 %v5079_v46 }
 0x2a4   :  { %v7126_v3 = vpack.c.bf16 %v1644_v30, %v1639_v39 }
 0x2a5   :  { %v1282_v22 = vpop.f32.mrf.mxu3 }
 0x2a6   :  { %8802 = vst [vmem:[#allocation232_spill] sm:$0xff] %v7126_v3  ;;  %v1283_v61 = vadd.f32 %v1282_v22, %v7060_v45  ;;  %v5539_v22 = vld [vmem:[#allocation8 + $0x1d4] sm:$0xf0] }
 0x2a7   :  { %v7129_v41 = vpop.f32.mrf.mxu2  ;;  %v1374_v57 = vpop.f32.mrf.mxu0 }
 0x2a8   :  { %v1643_v29 = vmax.f32 %v1283_v61, 0.0  ;;  %v1375_v39 = vadd.f32 %v1374_v57, %v7040_v36  ;;  %v1737_v57 = vmax.f32 %v1242_v55, 0.0 }
 0x2a9   :  { %v7133_v19 = vpop.f32.mrf.mxu1 }
 0x2aa   :  { %4855 = vmatmul.msk.bf16.gmra.mxu3 %vm449_vm0, %v5642_v26  ;;  %4871 = vmatmul.msk.bf16.gmra.mxu0 %vm449_vm0, %v5642_v26  ;;  %v7140_v28 = vpack.c.bf16 %v1643_v29, %v1638_v52  ;;  %v1649_v13 = vmax.f32 %v1375_v39, 0.0  ;;  %v7160_v60 = vpack.c.bf16 %v1742_v38, %v1737_v57  ;;  %v5481_v38 = vld [vmem:[#allocation8 + $0x4] sm:$0xf0] }
 0x2ac   :  { %8804 = vst [vmem:[#allocation234_spill] sm:$0xff] %v7140_v28  ;;  %4887 = vmatmul.msk.bf16.gmra.mxu1 %vm449_vm0, %v5642_v26  ;;  %4903 = vmatmul.msk.bf16.gmra.mxu2 %vm449_vm0, %v5642_v26  ;;  %v5143_v26 = vor.u32 %v5539_v22, %v5142_v34 }
 0x2ad   :  { %v1285_v30 = vpop.f32.mrf.mxu3  ;;  %8806 = vst [vmem:[#allocation236_spill] sm:$0xff] %v7160_v60 }
 0x2ae   :  { %v1286_v14 = vadd.f32 %v1285_v30, %v7060_v45  ;;  %2606 = vmatpush.bf16.msrb.mxu2 %v5143_v26  ;;  %v5643_v30 = vld [vmem:[%s8519_s0 + $0x60] sm:$0xff]  ;;  %v1249_v26 = vadd.f32 %v6977_v48, %v6621_v2  ;;  %v5134_v48 = vld [vmem:[#allocation8 + $0x1c0] sm:$0xf] }
 0x2af   :  { %v7145_v61 = vpop.f32.mrf.mxu2  ;;  %v1376_v12 = vpop.f32.mrf.mxu0 }
 0x2b0   :  { %v1377_v52 = vadd.f32 %v1376_v12, %v7040_v36 }
 0x2b1   :  { %v7152_v54 = vpop.f32.mrf.mxu1 }
 0x2b2   :  { %v1654_v29 = vmax.f32 %v1377_v52, 0.0  ;;  %v1648_v52 = vmax.f32 %v1286_v14, 0.0 }
 0x2b4   :  { %v7155_v6 = vpack.c.bf16 %v1654_v29, %v1649_v13  ;;  %v4911_v13 = vor.u32 %v5481_v38, %v4910_v32  ;;  %v1247_v29 = vadd.f32 %v6965_v49, %v6621_v2  ;;  %v5497_v32 = vld [vmem:[#allocation8 + $0x84] sm:$0xf0] }
 0x2b5   :  { %v1287_v4 = vpop.f32.mrf.mxu3 }
 0x2b6   :  { %8805 = vst [vmem:[#allocation235_spill] sm:$0xff] %v7155_v6  ;;  %v1288_v39 = vadd.f32 %v1287_v4, %v7060_v45  ;;  %2344 = vmatpush.bf16.msrb.mxu3 %v4911_v13 }
 0x2b7   :  { %v7158_v12 = vpop.f32.mrf.mxu2  ;;  %v1379_v62 = vpop.f32.mrf.mxu0 }
 0x2b8   :  { %v1653_v55 = vmax.f32 %v1288_v39, 0.0  ;;  %v1380_v14 = vadd.f32 %v1379_v62, %v7040_v36  ;;  %v1752_v62 = vmax.f32 %v1249_v26, 0.0 }
 0x2b9   :  { %v7162_v5 = vpop.f32.mrf.mxu1 }
 0x2ba   :  { %4856 = vmatmul.msk.bf16.gmra.mxu3 %vm449_vm0, %v5643_v30  ;;  %4872 = vmatmul.msk.bf16.gmra.mxu0 %vm449_vm0, %v5643_v30  ;;  %v7169_v27 = vpack.c.bf16 %v1653_v55, %v1648_v52  ;;  %v1659_v46 = vmax.f32 %v1380_v14, 0.0  ;;  %v1747_v55 = vmax.f32 %v1247_v29, 0.0 }
 0x2bc   :  { %8807 = vst [vmem:[#allocation237_spill] sm:$0xff] %v7169_v27  ;;  %4888 = vmatmul.msk.bf16.gmra.mxu1 %vm449_vm0, %v5643_v30  ;;  %4904 = vmatmul.msk.bf16.gmra.mxu2 %vm449_vm0, %v5643_v30  ;;  %v4974_v30 = vld [vmem:[#allocation8 + $0x80] sm:$0xf]  ;;  %v7189_v16 = vpack.c.bf16 %v1752_v62, %v1747_v55  ;;  %v5535_v55 = vld [vmem:[#allocation8 + $0x1b4] sm:$0xf0] }
 0x2bd   :  { %v1290_v34 = vpop.f32.mrf.mxu3  ;;  %v4975_v13 = vor.u32 %v5497_v32, %v4974_v30  ;;  %v5644_v32 = vld [vmem:[%s8519_s0 + $0x68] sm:$0xff] }
 0x2be   :  { %v1291_v38 = vadd.f32 %v1290_v34, %v7060_v45  ;;  %8809 = vst [vmem:[#allocation239_spill] sm:$0xff] %v7189_v16 }
 0x2bf   :  { %v7174_v22 = vpop.f32.mrf.mxu2  ;;  %v1381_v57 = vpop.f32.mrf.mxu0  ;;  %2433 = vmatpush.bf16.msrb.mxu0 %v4975_v13 }
 0x2c0   :  { %v1382_v4 = vadd.f32 %v1381_v57, %v7040_v36  ;;  %v5071_v57 = vor.u32 %v5521_v21, %v5070_v33  ;;  %v1658_v9 = vmax.f32 %v1291_v38, 0.0  ;;  %v5126_v33 = vld [vmem:[#allocation8 + $0x1b0] sm:$0xf] }
 0x2c1   :  { %v7181_v39 = vpop.f32.mrf.mxu1  ;;  %v5127_v38 = vor.u32 %v5535_v55, %v5126_v33  ;;  %v5046_v55 = vld [vmem:[#allocation8 + $0x110] sm:$0xf] }
 0x2c2   :  { %v1664_v52 = vmax.f32 %v1382_v4, 0.0  ;;  %v5537_v4 = vld [vmem:[#allocation8 + $0x1c4] sm:$0xf0]  ;;  %2518 = vmatpush.bf16.msrb.mxu1 %v5071_v57  ;;  %v5118_v57 = vld [vmem:[#allocation8 + $0x1a0] sm:$0xf] }
 0x2c3   :  { %v5135_v26 = vor.u32 %v5537_v4, %v5134_v48  ;;  %v5054_v48 = vld [vmem:[#allocation8 + $0x120] sm:$0xf] }
 0x2c4   :  { %v7184_v60 = vpack.c.bf16 %v1664_v52, %v1659_v46  ;;  %v5062_v46 = vld [vmem:[#allocation8 + $0x130] sm:$0xf]  ;;  %v5519_v52 = vld [vmem:[#allocation8 + $0x134] sm:$0xf0] }
 0x2c5   :  { %v1292_v49 = vpop.f32.mrf.mxu3  ;;  %2607 = vmatpush.bf16.msrb.mxu2 %v5135_v26  ;;  %v5063_v21 = vor.u32 %v5519_v52, %v5062_v46  ;;  %v5533_v46 = vld [vmem:[#allocation8 + $0x1a4] sm:$0xf0] }
 0x2c6   :  { %8808 = vst [vmem:[#allocation238_spill] sm:$0xff] %v7184_v60  ;;  %v1293_v14 = vadd.f32 %v1292_v49, %v7060_v45 }
 0x2c7   :  { %v7187_v20 = vpop.f32.mrf.mxu2  ;;  %v1384_v29 = vpop.f32.mrf.mxu0  ;;  %2519 = vmatpush.bf16.msrb.mxu1 %v5063_v21 }
 0x2c8   :  { %v1663_v34 = vmax.f32 %v1293_v14, 0.0  ;;  %v1385_v13 = vadd.f32 %v1384_v29, %v7040_v36  ;;  %v5517_v14 = vld [vmem:[#allocation8 + $0x124] sm:$0xf0] }
 0x2c9   :  { %v7191_v30 = vpop.f32.mrf.mxu1  ;;  %2608 = vmatpush.bf16.msrb.mxu2 %v5127_v38  ;;  %v5055_v26 = vor.u32 %v5517_v14, %v5054_v48  ;;  %v5515_v38 = vld [vmem:[#allocation8 + $0x114] sm:$0xf0]  ;;  %v5110_v14 = vld [vmem:[#allocation8 + $0x190] sm:$0xf] }
 0x2ca   :  { %4857 = vmatmul.msk.bf16.gmra.mxu3 %vm449_vm0, %v5644_v32  ;;  %4873 = vmatmul.msk.bf16.gmra.mxu0 %vm449_vm0, %v5644_v32  ;;  %v7198_v62 = vpack.c.bf16 %v1663_v34, %v1658_v9  ;;  %v1252_v9 = vadd.f32 %v6994_v50, %v6621_v2  ;;  %v1254_v34 = vadd.f32 %v7006_v35, %v6621_v2  ;;  %v1669_v33 = vmax.f32 %v1385_v13, 0.0 }
 0x2cb   :  { %2520 = vmatpush.bf16.msrb.mxu1 %v5055_v26  ;;  %v5047_v48 = vor.u32 %v5515_v38, %v5046_v55  ;;  %v5111_v43 = vor.u32 %v5531_v47, %v5110_v14  ;;  %v5102_v26 = vld [vmem:[#allocation8 + $0x180] sm:$0xf]  ;;  %v5529_v55 = vld [vmem:[#allocation8 + $0x184] sm:$0xf0] }
 0x2cc   :  { %8810 = vst [vmem:[#allocation240_spill] sm:$0xff] %v7198_v62  ;;  %4889 = vmatmul.msk.bf16.gmra.mxu1 %vm449_vm0, %v5644_v32  ;;  %4905 = vmatmul.msk.bf16.gmra.mxu2 %vm449_vm0, %v5644_v32  ;;  %v5119_v32 = vor.u32 %v5533_v46, %v5118_v57  ;;  %v1757_v51 = vmax.f32 %v1252_v9, 0.0  ;;  %v1762_v50 = vmax.f32 %v1254_v34, 0.0  ;;  %v5038_v46 = vld [vmem:[#allocation8 + $0x100] sm:$0xf]  ;;  %v5103_v9 = vor.u32 %v5529_v55, %v5102_v26 }
 0x2cd   :  { %v1295_v49 = vpop.f32.mrf.mxu3 }
 0x2ce   :  { %2609 = vmatpush.bf16.msrb.mxu2 %v5119_v32  ;;  %v1296_v35 = vadd.f32 %v1295_v49, %v7060_v45  ;;  %v7218_v34 = vpack.c.bf16 %v1762_v50, %v1757_v51  ;;  %v5222_v51 = vld [vmem:[#allocation8 + $0x270] sm:$0xf] }
 0x2cf   :  { %v7203_v4 = vpop.f32.mrf.mxu2  ;;  %v1386_v52 = vpop.f32.mrf.mxu0  ;;  %2521 = vmatpush.bf16.msrb.mxu1 %v5047_v48 }
 0x2d0   :  { %v1387_v29 = vadd.f32 %v1386_v52, %v7040_v36  ;;  %v5513_v52 = vld [vmem:[#allocation8 + $0x104] sm:$0xf0]  ;;  %8812 = vst [vmem:[#allocation242_spill] sm:$0xff] %v7218_v34  ;;  %v1668_v47 = vmax.f32 %v1296_v35, 0.0 }
 0x2d1   :  { %v7210_v21 = vpop.f32.mrf.mxu1 }
 0x2d2   :  { %v1674_v16 = vmax.f32 %v1387_v29, 0.0  ;;  %2610 = vmatpush.bf16.msrb.mxu2 %v5111_v43  ;;  %v5039_v29 = vor.u32 %v5513_v52, %v5038_v46  ;;  %v1257_v46 = vadd.f32 %v7023_v0, %v6621_v2  ;;  %v1259_v52 = vadd.f32 %v7035_v18, %v6621_v2 }
 0x2d4   :  { %v7213_v57 = vpack.c.bf16 %v1674_v16, %v1669_v33  ;;  %2522 = vmatpush.bf16.msrb.mxu1 %v5039_v29  ;;  %v5645_v16 = vld [vmem:[%s8519_s0 + $0x70] sm:$0xff]  ;;  %v5559_v33 = vld [vmem:[#allocation8 + $0x274] sm:$0xf0] }
 0x2d5   :  { %v1297_v13 = vpop.f32.mrf.mxu3  ;;  %v5223_v50 = vor.u32 %v5559_v33, %v5222_v51 }
 0x2d6   :  { %8811 = vst [vmem:[#allocation241_spill] sm:$0xff] %v7213_v57  ;;  %v1298_v32 = vadd.f32 %v1297_v13, %v7060_v45  ;;  %2611 = vmatpush.bf16.msrb.mxu2 %v5103_v9 }
 0x2d7   :  { %v7216_v58 = vpop.f32.mrf.mxu2  ;;  %v1389_v38 = vpop.f32.mrf.mxu0  ;;  %2693 = vmatpush.bf16.msra.mxu3 %v5223_v50 }
 0x2d8   :  { %v1673_v49 = vmax.f32 %v1298_v32, 0.0  ;;  %v1390_v14 = vadd.f32 %v1389_v38, %v7040_v36  ;;  %v1772_v38 = vmax.f32 %v1259_v52, 0.0 }
 0x2d9   :  { %v7220_v48 = vpop.f32.mrf.mxu1 }
 0x2da   :  { %4858 = vmatmul.msk.bf16.gmra.mxu3 %vm449_vm0, %v5645_v16  ;;  %4874 = vmatmul.msk.bf16.gmra.mxu0 %vm449_vm0, %v5645_v16  ;;  %v7227_v43 = vpack.c.bf16 %v1673_v49, %v1668_v47  ;;  %v1679_v32 = vmax.f32 %v1390_v14, 0.0  ;;  %v1767_v47 = vmax.f32 %v1257_v46, 0.0  ;;  %v5494_v49 = vld [vmem:[#allocation8 + $0x74] sm:$0xf] }
 0x2dc   :  { %8813 = vst [vmem:[#allocation243_spill] sm:$0xff] %v7227_v43  ;;  %4890 = vmatmul.msk.bf16.gmra.mxu1 %vm449_vm0, %v5645_v16  ;;  %4906 = vmatmul.msk.bf16.gmra.mxu2 %vm449_vm0, %v5645_v16  ;;  %v4968_v16 = vld [vmem:[#allocation8 + $0x78] sm:$0xf0]  ;;  %v7247_v14 = vpack.c.bf16 %v1772_v38, %v1767_v47 }
 0x2dd   :  { %v1300_v35 = vpop.f32.mrf.mxu3  ;;  %v4971_v33 = vor.u32 %v5494_v49, %v4968_v16 }
 0x2de   :  { %v1301_v51 = vadd.f32 %v1300_v35, %v7060_v45  ;;  %8815 = vst [vmem:[#allocation245_spill] sm:$0xff] %v7247_v14  ;;  %v5646_v35 = vld [vmem:[%s8519_s0 + $0x78] sm:$0xff] }
 0x2df   :  { %v7232_v13 = vpop.f32.mrf.mxu2  ;;  %v1391_v26 = vpop.f32.mrf.mxu0  ;;  %2782 = vmatpush.bf16.msra.mxu0 %v4971_v33 }
 0x2e0   :  { %v1392_v29 = vadd.f32 %v1391_v26, %v7040_v36  ;;  %v1678_v26 = vmax.f32 %v1301_v51, 0.0 }
 0x2e1   :  { %v7239_v55 = vpop.f32.mrf.mxu1 }
 0x2e2   :  { %v1684_v9 = vmax.f32 %v1392_v29, 0.0 }
 0x2e4   :  { %v7242_v50 = vpack.c.bf16 %v1684_v9, %v1679_v32  ;;  %v5647_v32 = vld [vmem:[#allocation5] sm:$0x1f] }
 0x2e5   :  { %v1302_v0 = vpop.f32.mrf.mxu3  ;;  %v7258_v9 = vperm.slane %v5647_v32, 3 }
 0x2e6   :  { %8814 = vst [vmem:[#allocation244_spill] sm:$0xff] %v7242_v50  ;;  %v1303_v34 = vadd.f32 %v1302_v0, %v7060_v45 }
 0x2e7   :  { %v7245_v18 = vpop.f32.mrf.mxu2  ;;  %v1394_v2 = vpop.f32.mrf.mxu0  ;;  %v1449_v49 = vadd.f32 %v7042_v42, %v7258_v9  ;;  %v1451_v16 = vadd.f32 %v7063_v40, %v7258_v9 }
 0x2e8   :  { %v1683_v29 = vmax.f32 %v1303_v34, 0.0  ;;  %v1395_v34 = vadd.f32 %v1394_v2, %v7040_v36 }
 0x2e9   :  { %v7249_v46 = vpop.f32.mrf.mxu1  ;;  %v1620_v32 = vmax.f32 %v1449_v49, 0.0 }
 0x2ea   :  { %8816 = vst [vmem:[#allocation246_spill] sm:$0xff] %v7249_v46  ;;  %4859 = vmatmul.msk.bf16.gmra.mxu3 %vm449_vm0, %v5646_v35  ;;  %4875 = vmatmul.msk.bf16.gmra.mxu0 %vm449_vm0, %v5646_v35  ;;  %v7256_v52 = vpack.c.bf16 %v1683_v29, %v1678_v26  ;;  %v1689_v33 = vmax.f32 %v1395_v34, 0.0 }
 0x2ec   :  { %8817 = vst [vmem:[#allocation247_spill] sm:$0xff] %v7256_v52  ;;  %4891 = vmatmul.msk.bf16.gmra.mxu1 %vm449_vm0, %v5646_v35  ;;  %4907 = vmatmul.msk.bf16.gmra.mxu2 %vm449_vm0, %v5646_v35  ;;  %v1625_v35 = vmax.f32 %v1451_v16, 0.0 }
 0x2ed   :  { %v1305_v47 = vpop.f32.mrf.mxu3 }
 0x2ee   :  { %v1306_v2 = vadd.f32 %v1305_v47, %v7060_v45  ;;  %v7278_v50 = vpack.c.bf16 %v1625_v35, %v1620_v32  ;;  %v5214_v47 = vld [vmem:[#allocation8 + $0x260] sm:$0xf]  ;;  %v1545_v35 = vadd.f32 %v7100_v8, %v7057_v10 }
 0x2ef   :  { %v7263_v38 = vpop.f32.mrf.mxu2  ;;  %v1396_v51 = vpop.f32.mrf.mxu0 }
 0x2f0   :  { %8818 = vst [vmem:[#allocation248_spill] sm:$0xff] %v7263_v38  ;;  %v1397_v0 = vadd.f32 %v1396_v51, %v7040_v36  ;;  %v1688_v34 = vmax.f32 %v1306_v2, 0.0 }
 0x2f1   :  { %v7270_v26 = vpop.f32.mrf.mxu1  ;;  %8820 = vst [vmem:[#allocation250_spill] sm:$0xff] %v7278_v50 }
 0x2f2   :  { %v1694_v29 = vmax.f32 %v1397_v0, 0.0 }
 0x2f4   :  { %v7273_v14 = vpack.c.bf16 %v1694_v29, %v1689_v33  ;;  %v1543_v29 = vadd.f32 %v7087_v1, %v7057_v10  ;;  %v1636_v1 = vmax.f32 %v1545_v35, 0.0 }
 0x2f5   :  { %v1307_v38 = vpop.f32.mrf.mxu3 }
 0x2f6   :  { %8819 = vst [vmem:[#allocation249_spill] sm:$0xff] %v7273_v14  ;;  %v1308_v46 = vadd.f32 %v1307_v38, %v7060_v45  ;;  %v5557_v38 = vld [vmem:[#allocation8 + $0x264] sm:$0xf0] }
 0x2f7   :  { %v7276_v42 = vpop.f32.mrf.mxu2  ;;  %v1399_v40 = vpop.f32.mrf.mxu0  ;;  %v5215_v33 = vor.u32 %v5557_v38, %v5214_v47 }
 0x2f8   :  { %v1693_v52 = vmax.f32 %v1308_v46, 0.0  ;;  %v1400_v16 = vadd.f32 %v1399_v40, %v7040_v36  ;;  %v1454_v46 = vadd.f32 %v7073_v24, %v7258_v9  ;;  %v1631_v24 = vmax.f32 %v1543_v29, 0.0 }
 0x2f9   :  { %v7280_v51 = vpop.f32.mrf.mxu1  ;;  %2694 = vmatpush.bf16.msra.mxu3 %v5215_v33 }
 0x2fa   :  { %8821 = vst [vmem:[#allocation251_spill] sm:$0xff] %v7280_v51  ;;  %2345 = vmatmul.bf16.vlgmr.msrb.gmra.mxu3 %v6639_v31  ;;  %2434 = vmatmul.bf16.vlgmr.msrb.gmra.mxu0 %v7075_v25  ;;  %v7284_v49 = vpack.c.bf16 %v1693_v52, %v1688_v34  ;;  %v1456_v52 = vadd.f32 %v7094_v63, %v7258_v9  ;;  %v1699_v34 = vmax.f32 %v1400_v16, 0.0  ;;  %v1630_v38 = vmax.f32 %v1454_v46, 0.0  ;;  %v5492_v25 = vld [vmem:[#allocation8 + $0x64] sm:$0xf] }
 0x2fb   :  { %v4960_v31 = vld [vmem:[#allocation8 + $0x68] sm:$0xf0]  ;;  %v7310_v46 = vpack.c.bf16 %v1636_v1, %v1631_v24 }
 0x2fc   :  { %8822 = vst [vmem:[#allocation252_spill] sm:$0xff] %v7284_v49  ;;  %2523 = vmatmul.bf16.vlgmr.msrb.gmra.mxu1 %v7067_v37  ;;  %2612 = vmatmul.bf16.vlgmr.msrb.gmra.mxu2 %v7278_v50  ;;  %v1635_v37 = vmax.f32 %v1456_v52, 0.0 }
 0x2fd   :  { %v1310_v0 = vpop.f32.mrf.mxu3  ;;  %8827 = vst [vmem:[#allocation257_spill] sm:$0xff] %v7310_v46 }
 0x2fe   :  { %v1311_v33 = vadd.f32 %v1310_v0, %v7060_v45  ;;  %v1548_v0 = vadd.f32 %v7116_v7, %v7057_v10 }
 0x2ff   :  { %v7293_v32 = vpop.f32.mrf.mxu2  ;;  %v1401_v2 = vpop.f32.mrf.mxu0 }
 0x300   :  { %8823 = vst [vmem:[#allocation253_spill] sm:$0xff] %v7293_v32  ;;  %v1402_v40 = vadd.f32 %v1401_v2, %v7040_v36  ;;  %v4963_v32 = vor.u32 %v5492_v25, %v4960_v31  ;;  %v1698_v29 = vmax.f32 %v1311_v33, 0.0 }
 0x301   :  { %v7300_v47 = vpop.f32.mrf.mxu1 }
 0x302   :  { %8824 = vst [vmem:[#allocation254_spill] sm:$0xff] %v7300_v47  ;;  %v1704_v50 = vmax.f32 %v1402_v40, 0.0  ;;  %2783 = vmatpush.bf16.msra.mxu0 %v4963_v32  ;;  %v7308_v47 = vpack.c.bf16 %v1635_v37, %v1630_v38  ;;  %v1461_v32 = vadd.f32 %v7123_v44, %v7258_v9 }
 0x304   :  { %v7303_v63 = vpack.c.bf16 %v1704_v50, %v1699_v34  ;;  %8826 = vst [vmem:[#allocation256_spill] sm:$0xff] %v7308_v47  ;;  %v1550_v34 = vadd.f32 %v7129_v41, %v7057_v10 }
 0x305   :  { %v1312_v51 = vpop.f32.mrf.mxu3 }
 0x306   :  { %8825 = vst [vmem:[#allocation255_spill] sm:$0xff] %v7303_v63  ;;  %v1313_v8 = vadd.f32 %v1312_v51, %v7060_v45  ;;  %v1459_v51 = vadd.f32 %v7104_v11, %v7258_v9  ;;  %v1646_v11 = vmax.f32 %v1550_v34, 0.0 }
 0x307   :  { %v7306_v16 = vpop.f32.mrf.mxu2  ;;  %v1404_v2 = vpop.f32.mrf.mxu0 }
 0x308   :  { %v1703_v52 = vmax.f32 %v1313_v8, 0.0  ;;  %v1405_v25 = vadd.f32 %v1404_v2, %v7040_v36  ;;  %v1640_v8 = vmax.f32 %v1459_v51, 0.0  ;;  %v1641_v2 = vmax.f32 %v1548_v0, 0.0  ;;  %v5555_v0 = vld [vmem:[#allocation8 + $0x254] sm:$0xf0] }
 0x309   :  { %v7312_v35 = vpop.f32.mrf.mxu1 }
 0x30a   :  { %2350 = vmatmul.bf16.gmra.mxu3 %v6831_v53  ;;  %2439 = vmatmul.bf16.gmra.mxu0 %v7111_v17  ;;  %v7316_v31 = vpack.c.bf16 %v1703_v52, %v1698_v29  ;;  %v1709_v38 = vmax.f32 %v1405_v25, 0.0  ;;  %v1645_v29 = vmax.f32 %v1461_v32, 0.0 }
 0x30c   :  { %8828 = vst [vmem:[#allocation258_spill] sm:$0xff] %v7316_v31  ;;  %2528 = vmatmul.bf16.gmra.mxu1 %v7097_v56  ;;  %2617 = vmatmul.bf16.gmra.mxu2 %v7308_v47  ;;  %v7340_v25 = vpack.c.bf16 %v1645_v29, %v1640_v8  ;;  %v1553_v8 = vadd.f32 %v7145_v61, %v7057_v10 }
 0x30d   :  { %v1315_v37 = vpop.f32.mrf.mxu3  ;;  %v1555_v29 = vadd.f32 %v7158_v12, %v7057_v10 }
 0x30e   :  { %v1316_v52 = vadd.f32 %v1315_v37, %v7060_v45  ;;  %8829 = vst [vmem:[#allocation259_spill] sm:$0xff] %v7340_v25 }
 0x30f   :  { %v7321_v50 = vpop.f32.mrf.mxu2  ;;  %v1406_v40 = vpop.f32.mrf.mxu0  ;;  %v1656_v61 = vmax.f32 %v1555_v29, 0.0 }
 0x310   :  { %v1407_v24 = vadd.f32 %v1406_v40, %v7040_v36  ;;  %v7342_v40 = vpack.c.bf16 %v1646_v11, %v1641_v2  ;;  %v1708_v17 = vmax.f32 %v1316_v52, 0.0 }
 0x311   :  { %v7332_v1 = vpop.f32.mrf.mxu1 }
 0x312   :  { %v1714_v33 = vmax.f32 %v1407_v24, 0.0  ;;  %8830 = vst [vmem:[#allocation260_spill] sm:$0xff] %v7342_v40 }
 0x314   :  { %v7335_v7 = vpack.c.bf16 %v1714_v33, %v1709_v38  ;;  %v1464_v33 = vadd.f32 %v7133_v19, %v7258_v9  ;;  %v1651_v19 = vmax.f32 %v1553_v8, 0.0 }
 0x315   :  { %v1317_v47 = vpop.f32.mrf.mxu3 }
 0x316   :  { %v1318_v44 = vadd.f32 %v1317_v47, %v7060_v45  ;;  %v5206_v47 = vld [vmem:[#allocation8 + $0x250] sm:$0xf] }
 0x317   :  { %v7338_v56 = vpop.f32.mrf.mxu2  ;;  %v1409_v41 = vpop.f32.mrf.mxu0  ;;  %v5207_v34 = vor.u32 %v5555_v0, %v5206_v47 }
 0x318   :  { %v1713_v24 = vmax.f32 %v1318_v44, 0.0  ;;  %v1410_v32 = vadd.f32 %v1409_v41, %v7040_v36 }
 0x319   :  { %v7344_v51 = vpop.f32.mrf.mxu1  ;;  %2695 = vmatpush.bf16.msra.mxu3 %v5207_v34 }
 0x31a   :  { %2355 = vmatmul.bf16.gmra.mxu3 %v6861_v15  ;;  %2444 = vmatmul.bf16.gmra.mxu0 %v7140_v28  ;;  %v7348_v37 = vpack.c.bf16 %v1713_v24, %v1708_v17  ;;  %v1466_v17 = vadd.f32 %v7152_v54, %v7258_v9  ;;  %v1719_v52 = vmax.f32 %v1410_v32, 0.0  ;;  %v1650_v24 = vmax.f32 %v1464_v33, 0.0 }
 0x31b   :  { %v7374_v33 = vpack.c.bf16 %v1656_v61, %v1651_v19 }
 0x31c   :  { %2533 = vmatmul.bf16.gmra.mxu1 %v7126_v3  ;;  %2622 = vmatmul.bf16.gmra.mxu2 %v7340_v25  ;;  %v1655_v0 = vmax.f32 %v1466_v17, 0.0  ;;  %v5490_v25 = vld [vmem:[#allocation8 + $0x54] sm:$0xf]  ;;  %v4952_v3 = vld [vmem:[#allocation8 + $0x58] sm:$0xf0] }
 0x31d   :  { %v1320_v38 = vpop.f32.mrf.mxu3  ;;  %v4955_v28 = vor.u32 %v5490_v25, %v4952_v3  ;;  %8832 = vst [vmem:[#allocation262_spill] sm:$0xff] %v7374_v33 }
 0x31e   :  { %v1321_v34 = vadd.f32 %v1320_v38, %v7060_v45  ;;  %v7372_v40 = vpack.c.bf16 %v1655_v0, %v1650_v24  ;;  %v1469_v38 = vadd.f32 %v7162_v5, %v7258_v9  ;;  %v1560_v24 = vadd.f32 %v7187_v20, %v7057_v10 }
 0x31f   :  { %v7357_v2 = vpop.f32.mrf.mxu2  ;;  %v1411_v11 = vpop.f32.mrf.mxu0  ;;  %2784 = vmatpush.bf16.msra.mxu0 %v4955_v28 }
 0x320   :  { %v1412_v44 = vadd.f32 %v1411_v11, %v7040_v36  ;;  %8831 = vst [vmem:[#allocation261_spill] sm:$0xff] %v7372_v40  ;;  %v1718_v8 = vmax.f32 %v1321_v34, 0.0  ;;  %v1666_v5 = vmax.f32 %v1560_v24, 0.0 }
 0x321   :  { %v7364_v41 = vpop.f32.mrf.mxu1 }
 0x322   :  { %v1724_v47 = vmax.f32 %v1412_v44, 0.0  ;;  %v1471_v44 = vadd.f32 %v7181_v39, %v7258_v9 }
 0x324   :  { %v7367_v54 = vpack.c.bf16 %v1724_v47, %v1719_v52  ;;  %v1558_v52 = vadd.f32 %v7174_v22, %v7057_v10 }
 0x325   :  { %v1322_v15 = vpop.f32.mrf.mxu3 }
 0x326   :  { %v1323_v12 = vadd.f32 %v1322_v15, %v7060_v45 }
 0x327   :  { %v7370_v32 = vpop.f32.mrf.mxu2  ;;  %v1414_v11 = vpop.f32.mrf.mxu0 }
 0x328   :  { %v1723_v17 = vmax.f32 %v1323_v12, 0.0  ;;  %v1415_v15 = vadd.f32 %v1414_v11, %v7040_v36  ;;  %v1660_v12 = vmax.f32 %v1469_v38, 0.0  ;;  %v1661_v11 = vmax.f32 %v1558_v52, 0.0  ;;  %v5553_v52 = vld [vmem:[#allocation8 + $0x244] sm:$0xf0] }
 0x329   :  { %v7376_v29 = vpop.f32.mrf.mxu1 }
 0x32a   :  { %2360 = vmatmul.bf16.gmra.mxu3 %v6891_v59  ;;  %2449 = vmatmul.bf16.gmra.mxu0 %v7169_v27  ;;  %v7380_v3 = vpack.c.bf16 %v1723_v17, %v1718_v8  ;;  %v1729_v47 = vmax.f32 %v1415_v15, 0.0  ;;  %v1665_v8 = vmax.f32 %v1471_v44, 0.0  ;;  %v4936_v59 = vld [vmem:[#allocation8 + $0x38] sm:$0xf0] }
 0x32c   :  { %2538 = vmatmul.bf16.gmra.mxu1 %v7155_v6  ;;  %2627 = vmatmul.bf16.gmra.mxu2 %v7372_v40  ;;  %v7404_v15 = vpack.c.bf16 %v1665_v8, %v1660_v12  ;;  %v1563_v12 = vadd.f32 %v7203_v4, %v7057_v10  ;;  %v1565_v8 = vadd.f32 %v7216_v58, %v7057_v10 }
 0x32d   :  { %v1325_v28 = vpop.f32.mrf.mxu3 }
 0x32e   :  { %v1326_v17 = vadd.f32 %v1325_v28, %v7060_v45  ;;  %8833 = vst [vmem:[#allocation263_spill] sm:$0xff] %v7404_v15  ;;  %v1676_v4 = vmax.f32 %v1565_v8, 0.0 }
 0x32f   :  { %v7385_v25 = vpop.f32.mrf.mxu2  ;;  %v1416_v19 = vpop.f32.mrf.mxu0 }
 0x330   :  { %v1417_v0 = vadd.f32 %v1416_v19, %v7040_v36  ;;  %v7406_v19 = vpack.c.bf16 %v1666_v5, %v1661_v11  ;;  %v1728_v27 = vmax.f32 %v1326_v17, 0.0 }
 0x331   :  { %v7396_v61 = vpop.f32.mrf.mxu1 }
 0x332   :  { %v1734_v34 = vmax.f32 %v1417_v0, 0.0  ;;  %8834 = vst [vmem:[#allocation264_spill] sm:$0xff] %v7406_v19 }
 0x334   :  { %v7399_v22 = vpack.c.bf16 %v1734_v34, %v1729_v47  ;;  %v1474_v34 = vadd.f32 %v7191_v30, %v7258_v9  ;;  %v1671_v30 = vmax.f32 %v1563_v12, 0.0 }
 0x335   :  { %v1327_v40 = vpop.f32.mrf.mxu3 }
 0x336   :  { %v1328_v39 = vadd.f32 %v1327_v40, %v7060_v45  ;;  %v5198_v40 = vld [vmem:[#allocation8 + $0x240] sm:$0xf] }
 0x337   :  { %v7402_v6 = vpop.f32.mrf.mxu2  ;;  %v1419_v20 = vpop.f32.mrf.mxu0  ;;  %v5199_v24 = vor.u32 %v5553_v52, %v5198_v40 }
 0x338   :  { %v1733_v0 = vmax.f32 %v1328_v39, 0.0  ;;  %v1420_v44 = vadd.f32 %v1419_v20, %v7040_v36 }
 0x339   :  { %v7408_v38 = vpop.f32.mrf.mxu1  ;;  %2696 = vmatpush.bf16.msra.mxu3 %v5199_v24 }
 0x33a   :  { %2365 = vmatmul.bf16.gmra.mxu3 %v6921_v23  ;;  %2454 = vmatmul.bf16.gmra.mxu0 %v7198_v62  ;;  %v7412_v28 = vpack.c.bf16 %v1733_v0, %v1728_v27  ;;  %v1476_v27 = vadd.f32 %v7210_v21, %v7258_v9  ;;  %v1739_v17 = vmax.f32 %v1420_v44, 0.0  ;;  %v1670_v0 = vmax.f32 %v1474_v34, 0.0 }
 0x33b   :  { %v7438_v34 = vpack.c.bf16 %v1676_v4, %v1671_v30  ;;  %v1570_v30 = vadd.f32 %v7245_v18, %v7057_v10 }
 0x33c   :  { %2543 = vmatmul.bf16.gmra.mxu1 %v7184_v60  ;;  %2632 = vmatmul.bf16.gmra.mxu2 %v7404_v15  ;;  %v1675_v52 = vmax.f32 %v1476_v27, 0.0  ;;  %v5488_v15 = vld [vmem:[#allocation8 + $0x44] sm:$0xf]  ;;  %v4944_v60 = vld [vmem:[#allocation8 + $0x48] sm:$0xf0] }
 0x33d   :  { %v1330_v47 = vpop.f32.mrf.mxu3  ;;  %v4947_v62 = vor.u32 %v5488_v15, %v4944_v60  ;;  %8836 = vst [vmem:[#allocation266_spill] sm:$0xff] %v7438_v34 }
 0x33e   :  { %v1331_v24 = vadd.f32 %v1330_v47, %v7060_v45  ;;  %v7436_v19 = vpack.c.bf16 %v1675_v52, %v1670_v0  ;;  %v1479_v47 = vadd.f32 %v7220_v48, %v7258_v9  ;;  %v1481_v0 = vadd.f32 %v7239_v55, %v7258_v9 }
 0x33f   :  { %v7421_v11 = vpop.f32.mrf.mxu2  ;;  %v1421_v5 = vpop.f32.mrf.mxu0  ;;  %2785 = vmatpush.bf16.msra.mxu0 %v4947_v62  ;;  %v1686_v48 = vmax.f32 %v1570_v30, 0.0  ;;  %v8843_v30 = vld [vmem:[#allocation244_spill] sm:$0xff] }
 0x340   :  { %v1422_v39 = vadd.f32 %v1421_v5, %v7040_v36  ;;  %8835 = vst [vmem:[#allocation265_spill] sm:$0xff] %v7436_v19  ;;  %v1738_v12 = vmax.f32 %v1331_v24, 0.0 }
 0x341   :  { %v7428_v20 = vpop.f32.mrf.mxu1 }
 0x342   :  { %v1744_v40 = vmax.f32 %v1422_v39, 0.0  ;;  %v8837_v39 = vld [vmem:[#allocation204_spill] sm:$0xff] }
 0x344   :  { %v7431_v21 = vpack.c.bf16 %v1744_v40, %v1739_v17  ;;  %v1568_v17 = vadd.f32 %v7232_v13, %v7057_v10 }
 0x345   :  { %v1332_v23 = vpop.f32.mrf.mxu3 }
 0x346   :  { %v1333_v58 = vadd.f32 %v1332_v23, %v7060_v45 }
 0x347   :  { %v7434_v44 = vpop.f32.mrf.mxu2  ;;  %v1424_v5 = vpop.f32.mrf.mxu0 }
 0x348   :  { %v1743_v27 = vmax.f32 %v1333_v58, 0.0  ;;  %v1425_v23 = vadd.f32 %v1424_v5, %v7040_v36  ;;  %v1680_v5 = vmax.f32 %v1479_v47, 0.0 }
 0x349   :  { %v7440_v8 = vpop.f32.mrf.mxu1 }
 0x34a   :  { %2370 = vmatmul.bf16.gmra.mxu3 %v8837_v39  ;;  %2459 = vmatmul.bf16.gmra.mxu0 %v7227_v43  ;;  %v7444_v60 = vpack.c.bf16 %v1743_v27, %v1738_v12  ;;  %v1749_v52 = vmax.f32 %v1425_v23, 0.0  ;;  %v1681_v12 = vmax.f32 %v1568_v17, 0.0  ;;  %v1685_v27 = vmax.f32 %v1481_v0, 0.0  ;;  %v8841_v17 = vld [vmem:[#allocation211_spill] sm:$0xff] }
 0x34b   :  { %v8842_v0 = vld [vmem:[#allocation247_spill] sm:$0xff] }
 0x34c   :  { %2548 = vmatmul.bf16.gmra.mxu1 %v7213_v57  ;;  %2637 = vmatmul.bf16.gmra.mxu2 %v7436_v19  ;;  %v7468_v23 = vpack.c.bf16 %v1685_v27, %v1680_v5  ;;  %v8844_v27 = vld [vmem:[#allocation246_spill] sm:$0xff] }
 0x34d   :  { %v1335_v62 = vpop.f32.mrf.mxu3 }
 0x34e   :  { %v1336_v19 = vadd.f32 %v1335_v62, %v7060_v45  ;;  %8839 = vst [vmem:[#allocation268_spill] sm:$0xff] %v7468_v23 }
 0x34f   :  { %v7449_v15 = vpop.f32.mrf.mxu2  ;;  %v1426_v40 = vpop.f32.mrf.mxu0 }
 0x350   :  { %v1427_v4 = vadd.f32 %v1426_v40, %v7040_v36  ;;  %v7470_v40 = vpack.c.bf16 %v1686_v48, %v1681_v12  ;;  %v1748_v39 = vmax.f32 %v1336_v19, 0.0  ;;  %v1484_v48 = vadd.f32 %v8844_v27, %v7258_v9 }
 0x351   :  { %v7460_v24 = vpop.f32.mrf.mxu1 }
 0x352   :  { %v1754_v58 = vmax.f32 %v1427_v4, 0.0  ;;  %8840 = vst [vmem:[#allocation269_spill] sm:$0xff] %v7470_v40 }
 0x354   :  { %v7463_v13 = vpack.c.bf16 %v1754_v58, %v1749_v52  ;;  %v5551_v52 = vld [vmem:[#allocation8 + $0x234] sm:$0xf0] }
 0x355   :  { %v1337_v57 = vpop.f32.mrf.mxu3 }
 0x356   :  { %8838 = vst [vmem:[#allocation267_spill] sm:$0xff] %v7463_v13  ;;  %v1338_v55 = vadd.f32 %v1337_v57, %v7060_v45  ;;  %v5190_v57 = vld [vmem:[#allocation8 + $0x230] sm:$0xf] }
 0x357   :  { %v7466_v43 = vpop.f32.mrf.mxu2  ;;  %v1429_v18 = vpop.f32.mrf.mxu0  ;;  %v5191_v5 = vor.u32 %v5551_v52, %v5190_v57 }
 0x358   :  { %v1753_v4 = vmax.f32 %v1338_v55, 0.0  ;;  %v1430_v58 = vadd.f32 %v1429_v18, %v7040_v36  ;;  %v8845_v55 = vld [vmem:[#allocation248_spill] sm:$0xff] }
 0x359   :  { %v7472_v47 = vpop.f32.mrf.mxu1  ;;  %2697 = vmatpush.bf16.msra.mxu3 %v5191_v5  ;;  %v1690_v5 = vmax.f32 %v1484_v48, 0.0 }
 0x35a   :  { %2375 = vmatmul.bf16.gmra.mxu3 %v8841_v17  ;;  %2464 = vmatmul.bf16.gmra.mxu0 %v8842_v0  ;;  %v7476_v62 = vpack.c.bf16 %v1753_v4, %v1748_v39  ;;  %v1573_v39 = vadd.f32 %v8845_v55, %v7057_v10  ;;  %v1486_v4 = vadd.f32 %v7270_v26, %v7258_v9  ;;  %v1759_v0 = vmax.f32 %v1430_v58, 0.0  ;;  %v5486_v55 = vld [vmem:[#allocation8 + $0x34] sm:$0xf] }
 0x35b   :  { %v4939_v53 = vor.u32 %v5486_v55, %v4936_v59  ;;  %v1580_v55 = vadd.f32 %v7306_v16, %v7057_v10 }
 0x35c   :  { %2553 = vmatmul.bf16.gmra.mxu1 %v8843_v30  ;;  %2642 = vmatmul.bf16.gmra.mxu2 %v7468_v23  ;;  %v1575_v23 = vadd.f32 %v7276_v42, %v7057_v10  ;;  %v1691_v17 = vmax.f32 %v1573_v39, 0.0  ;;  %v1695_v40 = vmax.f32 %v1486_v4, 0.0 }
 0x35d   :  { %v1340_v12 = vpop.f32.mrf.mxu3  ;;  %2786 = vmatpush.bf16.msra.mxu0 %v4939_v53 }
 0x35e   :  { %v1696_v27 = vmax.f32 %v1575_v23, 0.0  ;;  %v1341_v34 = vadd.f32 %v1340_v12, %v7060_v45  ;;  %v7500_v46 = vpack.c.bf16 %v1695_v40, %v1690_v5  ;;  %v8850_v12 = vld [vmem:[#allocation218_spill] sm:$0xff] }
 0x35f   :  { %v7481_v19 = vpop.f32.mrf.mxu2  ;;  %v1431_v30 = vpop.f32.mrf.mxu0  ;;  %v8854_v5 = vld [vmem:[#allocation254_spill] sm:$0xff] }
 0x360   :  { %v1432_v18 = vadd.f32 %v1431_v30, %v7040_v36  ;;  %8847 = vst [vmem:[#allocation248_spill] sm:$0xff] %v7500_v46  ;;  %v7502_v48 = vpack.c.bf16 %v1696_v27, %v1691_v17  ;;  %v1758_v39 = vmax.f32 %v1341_v34, 0.0  ;;  %v8852_v34 = vld [vmem:[#allocation251_spill] sm:$0xff]  ;;  %v1491_v27 = vadd.f32 %v8854_v5, %v7258_v9 }
 0x361   :  { %v7492_v57 = vpop.f32.mrf.mxu1  ;;  %v1489_v17 = vadd.f32 %v8852_v34, %v7258_v9  ;;  %v1706_v34 = vmax.f32 %v1580_v55, 0.0 }
 0x362   :  { %v1764_v52 = vmax.f32 %v1432_v18, 0.0  ;;  %8848 = vst [vmem:[#allocation270_spill] sm:$0xff] %v7502_v48  ;;  %v8853_v18 = vld [vmem:[#allocation253_spill] sm:$0xff]  ;;  %v5096_v48 = vld [vmem:[#allocation8 + $0x178] sm:$0xf0] }
 0x364   :  { %v7495_v33 = vpack.c.bf16 %v1764_v52, %v1759_v0  ;;  %v1578_v52 = vadd.f32 %v8853_v18, %v7057_v10  ;;  %v5526_v18 = vld [vmem:[#allocation8 + $0x174] sm:$0xf] }
 0x365   :  { %v1342_v26 = vpop.f32.mrf.mxu3  ;;  %v5099_v16 = vor.u32 %v5526_v18, %v5096_v48  ;;  %v8858_v48 = vld [vmem:[#allocation224_spill] sm:$0xff]  ;;  %v1583_v18 = vadd.f32 %v7321_v50, %v7057_v10 }
 0x366   :  { %8846 = vst [vmem:[#allocation246_spill] sm:$0xff] %v7495_v33  ;;  %v1343_v42 = vadd.f32 %v1342_v26, %v7060_v45  ;;  %v5032_v33 = vld [vmem:[#allocation8 + $0xf8] sm:$0xf0]  ;;  %v5484_v50 = vld [vmem:[#allocation8 + $0x24] sm:$0xf] }
 0x367   :  { %v7498_v58 = vpop.f32.mrf.mxu2  ;;  %v1434_v30 = vpop.f32.mrf.mxu0  ;;  %2960 = vmatpush.bf16.msra.mxu2 %v5099_v16  ;;  %v1496_v16 = vadd.f32 %v7332_v1, %v7258_v9 }
 0x368   :  { %v1763_v23 = vmax.f32 %v1343_v42, 0.0  ;;  %v1435_v59 = vadd.f32 %v1434_v30, %v7040_v36 }
 0x369   :  { %v7504_v4 = vpop.f32.mrf.mxu1 }
 0x36a   :  { %8849 = vst [vmem:[#allocation271_spill] sm:$0xff] %v7504_v4  ;;  %2380 = vmatmul.bf16.gmra.mxu3 %v8850_v12  ;;  %2469 = vmatmul.bf16.gmra.mxu0 %v7284_v49  ;;  %v7508_v0 = vpack.c.bf16 %v1763_v23, %v1758_v39  ;;  %v1769_v42 = vmax.f32 %v1435_v59, 0.0  ;;  %v1705_v49 = vmax.f32 %v1491_v27, 0.0 }
 0x36c   :  { %2558 = vmatmul.bf16.gmra.mxu1 %v7273_v14  ;;  %2647 = vmatmul.bf16.gmra.mxu2 %v7500_v46  ;;  %v1700_v46 = vmax.f32 %v1489_v17, 0.0  ;;  %v1701_v14 = vmax.f32 %v1578_v52, 0.0 }
 0x36d   :  { %v1345_v40 = vpop.f32.mrf.mxu3 }
 0x36e   :  { %v1346_v12 = vadd.f32 %v1345_v40, %v7060_v45  ;;  %v7532_v52 = vpack.c.bf16 %v1705_v49, %v1700_v46  ;;  %v7534_v27 = vpack.c.bf16 %v1706_v34, %v1701_v14  ;;  %v8859_v49 = vld [vmem:[#allocation24_spill] sm:$0xff]  ;;  %v1494_v34 = vadd.f32 %v7312_v35, %v7258_v9 }
 0x36f   :  { %v7513_v53 = vpop.f32.mrf.mxu2  ;;  %v1436_v26 = vpop.f32.mrf.mxu0  ;;  %v5182_v46 = vld [vmem:[#allocation8 + $0x220] sm:$0xf] }
 0x370   :  { %8851 = vst [vmem:[#allocation272_spill] sm:$0xff] %v7513_v53  ;;  %v1437_v39 = vadd.f32 %v1436_v26, %v7040_v36  ;;  %v5510_v53 = vld [vmem:[#allocation8 + $0xf4] sm:$0xf]  ;;  %v1768_v40 = vmax.f32 %v1346_v12, 0.0  ;;  %v8860_v35 = vld [vmem:[#allocation28_spill] sm:$0xff] }
 0x371   :  { %v7524_v30 = vpop.f32.mrf.mxu1  ;;  %v5035_v26 = vor.u32 %v5510_v53, %v5032_v33  ;;  %8856 = vst [vmem:[#allocation253_spill] sm:$0xff] %v7532_v52  ;;  %v5549_v33 = vld [vmem:[#allocation8 + $0x224] sm:$0xf0] }
 0x372   :  { %8855 = vst [vmem:[#allocation251_spill] sm:$0xff] %v7524_v30  ;;  %v1774_v23 = vmax.f32 %v1437_v39, 0.0  ;;  %v235_v39 = vld [vmem:[#allocation7] sm:$0x3f]  ;;  %v5183_v12 = vor.u32 %v5549_v33, %v5182_v46  ;;  %v1715_v46 = vmax.f32 %v1496_v16, 0.0 }
 0x373   :  { %8857 = vst [vmem:[#allocation254_spill] sm:$0xff] %v7534_v27  ;;  %2871 = vmatpush.bf16.msra.mxu1 %v5035_v26 }
 0x374   :  { %v7527_v5 = vpack.c.bf16 %v1774_v23, %v1769_v42  ;;  %v7536_v42 = vperm.slane %v235_v39, 0  ;;  %2698 = vmatpush.bf16.msra.mxu3 %v5183_v12 }
 0x375   :  { %v1347_v4 = vpop.f32.mrf.mxu3 }
 0x376   :  { %v1348_v59 = vadd.f32 %v1347_v4, %v7060_v45  ;;  %v508_v14 = vadd.f32 %v8859_v49, %v7536_v42  ;;  %v1710_v49 = vmax.f32 %v1494_v34, 0.0 }
 0x377   :  { %v7530_v36 = vpop.f32.mrf.mxu2  ;;  %v2435_v17 = vpop.f32.mrf.mxu0 }
 0x378   :  { %v1773_v55 = vmax.f32 %v1348_v59, 0.0  ;;  %v1585_v59 = vadd.f32 %v7338_v56, %v7057_v10  ;;  %v7558_v12 = vpack.c.bf16 %v1715_v46, %v1710_v49 }
 0x379   :  { %v2524_v30 = vpop.f32.mrf.mxu1 }
 0x37a   :  { %2385 = vmatmul.bf16.gmra.mxu3 %v8858_v48  ;;  %2474 = vmatmul.bf16.gmra.mxu0 %v7316_v31  ;;  %v7540_v45 = vpack.c.bf16 %v1773_v55, %v1768_v40  ;;  %v1716_v33 = vmax.f32 %v1585_v59, 0.0  ;;  %8861 = vst [vmem:[#allocation24_spill] sm:$0xff] %v7558_v12 }
 0x37c   :  { %2563 = vmatmul.bf16.gmra.mxu1 %v7303_v63  ;;  %2652 = vmatmul.bf16.gmra.mxu2 %v7532_v52  ;;  %v4928_v63 = vld [vmem:[#allocation8 + $0x28] sm:$0xf0] }
 0x37d   :  { %v2346_v4 = vpop.f32.mrf.mxu3  ;;  %v4931_v31 = vor.u32 %v5484_v50, %v4928_v63  ;;  %v8863_v63 = vld [vmem:[#allocation32_spill] sm:$0xff] }
 0x37e   :  { %v2347_v53 = vadd.f32 %v2346_v4, %v508_v14  ;;  %v1711_v14 = vmax.f32 %v1583_v18, 0.0  ;;  %v510_v4 = vadd.f32 %v8860_v35, %v7536_v42  ;;  %v8862_v18 = vld [vmem:[#allocation226_spill] sm:$0xff] }
 0x37f   :  { %v2613_v23 = vpop.f32.mrf.mxu2  ;;  %v2437_v26 = vpop.f32.mrf.mxu0  ;;  %2787 = vmatpush.bf16.msra.mxu0 %v4931_v31 }
 0x380   :  { %v2436_v39 = vadd.f32 %v2435_v17, %v2347_v53 }
 0x381   :  { %v2526_v40 = vpop.f32.mrf.mxu1 }
 0x382   :  { %v2525_v55 = vadd.f32 %v2524_v30, %v2436_v39  ;;  %v7560_v30 = vpack.c.bf16 %v1716_v33, %v1711_v14 }
 0x384   :  { %v7556_v52 = vadd.f32 %v2613_v23, %v2525_v55  ;;  %v513_v23 = vadd.f32 %v8863_v63, %v7536_v42  ;;  %v1590_v55 = vadd.f32 %v7370_v32, %v7057_v10  ;;  %v5508_v63 = vld [vmem:[#allocation8 + $0xe4] sm:$0xf] }
 0x385   :  { %v2348_v1 = vpop.f32.mrf.mxu3 }
 0x386   :  { %v2349_v48 = vadd.f32 %v2348_v1, %v510_v4  ;;  %v1726_v1 = vmax.f32 %v1590_v55, 0.0  ;;  %v8866_v55 = vld [vmem:[#allocation230_spill] sm:$0xff] }
 0x387   :  { %v2615_v56 = vpop.f32.mrf.mxu2  ;;  %v2440_v27 = vpop.f32.mrf.mxu0 }
 0x388   :  { %v2438_v17 = vadd.f32 %v2437_v26, %v2349_v48  ;;  %v1499_v48 = vadd.f32 %v7344_v51, %v7258_v9  ;;  %v1588_v26 = vadd.f32 %v7357_v2, %v7057_v10  ;;  %v5524_v2 = vld [vmem:[#allocation8 + $0x164] sm:$0xf] }
 0x389   :  { %v2529_v53 = vpop.f32.mrf.mxu1 }
 0x38a   :  { %v2527_v34 = vadd.f32 %v2526_v40, %v2438_v17  ;;  %2390 = vmatmul.bf16.gmra.mxu3 %v8862_v18  ;;  %2479 = vmatmul.bf16.gmra.mxu0 %v7348_v37  ;;  %v1501_v40 = vadd.f32 %v7364_v41, %v7258_v9  ;;  %v1720_v35 = vmax.f32 %v1499_v48, 0.0  ;;  %v1721_v4 = vmax.f32 %v1588_v26, 0.0 }
 0x38c   :  { %2568 = vmatmul.bf16.gmra.mxu1 %v7335_v7  ;;  %2657 = vmatmul.bf16.gmra.mxu2 %v7558_v12  ;;  %v7568_v16 = vadd.f32 %v2615_v56, %v2527_v34  ;;  %v1725_v50 = vmax.f32 %v1501_v40, 0.0  ;;  %v8864_v56 = vld [vmem:[#allocation36_spill] sm:$0xff]  ;;  %v5088_v34 = vld [vmem:[#allocation8 + $0x168] sm:$0xf0]  ;;  %v7584_v48 = vpack.c.bf16 %v1726_v1, %v1721_v4  ;;  %v5547_v4 = vld [vmem:[#allocation8 + $0x214] sm:$0xf0] }
 0x38d   :  { %v2351_v59 = vpop.f32.mrf.mxu3  ;;  %v515_v51 = vadd.f32 %v8864_v56, %v7536_v42 }
 0x38e   :  { %v2352_v31 = vadd.f32 %v2351_v59, %v513_v23  ;;  %v5091_v23 = vor.u32 %v5524_v2, %v5088_v34  ;;  %v5024_v59 = vld [vmem:[#allocation8 + $0xe8] sm:$0xf0]  ;;  %v1593_v2 = vadd.f32 %v7385_v25, %v7057_v10  ;;  %v1506_v34 = vadd.f32 %v7396_v61, %v7258_v9  ;;  %v5482_v25 = vld [vmem:[#allocation8 + $0x14] sm:$0xf] }
 0x38f   :  { %v2618_v39 = vpop.f32.mrf.mxu2  ;;  %v2442_v49 = vpop.f32.mrf.mxu0 }
 0x390   :  { %v2441_v14 = vadd.f32 %v2440_v27, %v2352_v31  ;;  %v5027_v27 = vor.u32 %v5508_v63, %v5024_v59  ;;  %2961 = vmatpush.bf16.msra.mxu2 %v5091_v23  ;;  %v1595_v63 = vadd.f32 %v7402_v6, %v7057_v10 }
 0x391   :  { %v2531_v46 = vpop.f32.mrf.mxu1 }
 0x392   :  { %v2530_v33 = vadd.f32 %v2529_v53, %v2441_v14  ;;  %v7582_v53 = vpack.c.bf16 %v1725_v50, %v1720_v35  ;;  %2872 = vmatpush.bf16.msra.mxu1 %v5027_v27  ;;  %v8867_v14 = vld [vmem:[#allocation40_spill] sm:$0xff]  ;;  %v5174_v50 = vld [vmem:[#allocation8 + $0x210] sm:$0xf]  ;;  %v1731_v27 = vmax.f32 %v1593_v2, 0.0  ;;  %v8870_v2 = vld [vmem:[#allocation233_spill] sm:$0xff] }
 0x394   :  { %v7580_v17 = vadd.f32 %v2618_v39, %v2530_v33  ;;  %8865 = vst [vmem:[#allocation28_spill] sm:$0xff] %v7582_v53  ;;  %v518_v33 = vadd.f32 %v8867_v14, %v7536_v42 }
 0x395   :  { %v2353_v41 = vpop.f32.mrf.mxu3 }
 0x396   :  { %v2354_v32 = vadd.f32 %v2353_v41, %v515_v51 }
 0x397   :  { %v2620_v12 = vpop.f32.mrf.mxu2  ;;  %v2445_v31 = vpop.f32.mrf.mxu0 }
 0x398   :  { %v2443_v26 = vadd.f32 %v2442_v49, %v2354_v32  ;;  %v5175_v49 = vor.u32 %v5547_v4, %v5174_v50  ;;  %v4920_v50 = vld [vmem:[#allocation8 + $0x18] sm:$0xf0] }
 0x399   :  { %v2534_v40 = vpop.f32.mrf.mxu1  ;;  %v4923_v4 = vor.u32 %v5482_v25, %v4920_v50 }
 0x39a   :  { %v2532_v39 = vadd.f32 %v2531_v46, %v2443_v26  ;;  %2395 = vmatmul.bf16.gmra.mxu3 %v8866_v55  ;;  %2484 = vmatmul.bf16.gmra.mxu0 %v7380_v3  ;;  %v1504_v46 = vadd.f32 %v7376_v29, %v7258_v9  ;;  %v1735_v26 = vmax.f32 %v1506_v34, 0.0  ;;  %v8868_v29 = vld [vmem:[#allocation44_spill] sm:$0xff] }
 0x39b   :  { %2699 = vmatpush.bf16.msra.mxu3 %v5175_v49  ;;  %v520_v14 = vadd.f32 %v8868_v29, %v7536_v42  ;;  %2788 = vmatpush.bf16.msra.mxu0 %v4923_v4 }
 0x39c   :  { %2573 = vmatmul.bf16.gmra.mxu1 %v7367_v54  ;;  %2662 = vmatmul.bf16.gmra.mxu2 %v7582_v53  ;;  %v7592_v35 = vadd.f32 %v2620_v12, %v2532_v39  ;;  %v1730_v32 = vmax.f32 %v1504_v46, 0.0  ;;  %v1736_v39 = vmax.f32 %v1595_v63, 0.0 }
 0x39d   :  { %v2356_v1 = vpop.f32.mrf.mxu3 }
 0x39e   :  { %v2357_v56 = vadd.f32 %v2356_v1, %v518_v33  ;;  %v7606_v49 = vpack.c.bf16 %v1735_v26, %v1730_v32  ;;  %v1600_v26 = vadd.f32 %v7434_v44, %v7057_v10 }
 0x39f   :  { %v2623_v51 = vpop.f32.mrf.mxu2  ;;  %v2447_v12 = vpop.f32.mrf.mxu0 }
 0x3a0   :  { %v2446_v41 = vadd.f32 %v2445_v31, %v2357_v56  ;;  %8869 = vst [vmem:[#allocation226_spill] sm:$0xff] %v7606_v49  ;;  %v7608_v31 = vpack.c.bf16 %v1736_v39, %v1731_v27  ;;  %v1511_v27 = vadd.f32 %v7428_v20, %v7258_v9 }
 0x3a1   :  { %v2536_v23 = vpop.f32.mrf.mxu1 }
 0x3a2   :  { %v2535_v59 = vadd.f32 %v2534_v40, %v2446_v41  ;;  %v1745_v4 = vmax.f32 %v1511_v27, 0.0 }
 0x3a4   :  { %v7604_v33 = vadd.f32 %v2623_v51, %v2535_v59  ;;  %v8871_v51 = vld [vmem:[#allocation48_spill] sm:$0xff] }
 0x3a5   :  { %v2358_v61 = vpop.f32.mrf.mxu3  ;;  %v523_v34 = vadd.f32 %v8871_v51, %v7536_v42  ;;  %v5506_v51 = vld [vmem:[#allocation8 + $0xd4] sm:$0xf] }
 0x3a6   :  { %v2359_v1 = vadd.f32 %v2358_v61, %v520_v14 }
 0x3a7   :  { %v2625_v6 = vpop.f32.mrf.mxu2  ;;  %v2450_v53 = vpop.f32.mrf.mxu0 }
 0x3a8   :  { %v2448_v40 = vadd.f32 %v2447_v12, %v2359_v1  ;;  %v1509_v12 = vadd.f32 %v7408_v38, %v7258_v9  ;;  %v1746_v1 = vmax.f32 %v1600_v26, 0.0  ;;  %v8874_v26 = vld [vmem:[#allocation236_spill] sm:$0xff] }
 0x3a9   :  { %v2539_v56 = vpop.f32.mrf.mxu1 }
 0x3aa   :  { %v2537_v46 = vadd.f32 %v2536_v23, %v2448_v40  ;;  %2400 = vmatmul.bf16.gmra.mxu3 %v8870_v2  ;;  %2489 = vmatmul.bf16.gmra.mxu0 %v7412_v28  ;;  %v1598_v23 = vadd.f32 %v7421_v11, %v7057_v10  ;;  %v1740_v50 = vmax.f32 %v1509_v12, 0.0  ;;  %v5522_v11 = vld [vmem:[#allocation8 + $0x154] sm:$0xf] }
 0x3ac   :  { %2578 = vmatmul.bf16.gmra.mxu1 %v7399_v22  ;;  %2667 = vmatmul.bf16.gmra.mxu2 %v7606_v49  ;;  %v7616_v63 = vadd.f32 %v2625_v6, %v2537_v46  ;;  %v1741_v61 = vmax.f32 %v1598_v23, 0.0  ;;  %v8872_v6 = vld [vmem:[#allocation52_spill] sm:$0xff]  ;;  %v5080_v46 = vld [vmem:[#allocation8 + $0x158] sm:$0xf0] }
 0x3ad   :  { %v2361_v41 = vpop.f32.mrf.mxu3  ;;  %v525_v38 = vadd.f32 %v8872_v6, %v7536_v42 }
 0x3ae   :  { %v2362_v59 = vadd.f32 %v2361_v41, %v523_v34  ;;  %v5083_v34 = vor.u32 %v5522_v11, %v5080_v46  ;;  %v5016_v41 = vld [vmem:[#allocation8 + $0xd8] sm:$0xf0]  ;;  %v7632_v12 = vpack.c.bf16 %v1746_v1, %v1741_v61  ;;  %v5545_v61 = vld [vmem:[#allocation8 + $0x204] sm:$0xf0]  ;;  %v1603_v11 = vadd.f32 %v7449_v15, %v7057_v10  ;;  %v5480_v15 = vld [vmem:[#allocation8 + $0x4] sm:$0xf] }
 0x3af   :  { %v2628_v32 = vpop.f32.mrf.mxu2  ;;  %v2452_v39 = vpop.f32.mrf.mxu0  ;;  %v1516_v46 = vadd.f32 %v7460_v24, %v7258_v9 }
 0x3b0   :  { %v2451_v29 = vadd.f32 %v2450_v53, %v2362_v59  ;;  %v5019_v53 = vor.u32 %v5506_v51, %v5016_v41  ;;  %2962 = vmatpush.bf16.msra.mxu2 %v5083_v34  ;;  %v1605_v51 = vadd.f32 %v7466_v43, %v7057_v10  ;;  %v5008_v43 = vld [vmem:[#allocation8 + $0xc8] sm:$0xf0] }
 0x3b1   :  { %v2541_v14 = vpop.f32.mrf.mxu1 }
 0x3b2   :  { %v2540_v25 = vadd.f32 %v2539_v56, %v2451_v29  ;;  %v7630_v56 = vpack.c.bf16 %v1745_v4, %v1740_v50  ;;  %2873 = vmatpush.bf16.msra.mxu1 %v5019_v53  ;;  %v8875_v29 = vld [vmem:[#allocation56_spill] sm:$0xff]  ;;  %v1751_v53 = vmax.f32 %v1603_v11, 0.0 }
 0x3b3   :  { %v5166_v4 = vld [vmem:[#allocation8 + $0x200] sm:$0xf] }
 0x3b4   :  { %v7628_v40 = vadd.f32 %v2628_v32, %v2540_v25  ;;  %8873 = vst [vmem:[#allocation32_spill] sm:$0xff] %v7630_v56  ;;  %v528_v25 = vadd.f32 %v8875_v29, %v7536_v42 }
 0x3b5   :  { %v2363_v20 = vpop.f32.mrf.mxu3 }
 0x3b6   :  { %v2364_v44 = vadd.f32 %v2363_v20, %v525_v38 }
 0x3b7   :  { %v2630_v49 = vpop.f32.mrf.mxu2  ;;  %v2455_v59 = vpop.f32.mrf.mxu0 }
 0x3b8   :  { %v2453_v23 = vadd.f32 %v2452_v39, %v2364_v44  ;;  %v5167_v39 = vor.u32 %v5545_v61, %v5166_v4  ;;  %v4912_v4 = vld [vmem:[#allocation8 + $0x8] sm:$0xf0] }
 0x3b9   :  { %v2544_v27 = vpop.f32.mrf.mxu1  ;;  %v4915_v61 = vor.u32 %v5480_v15, %v4912_v4  ;;  %v5518_v15 = vld [vmem:[#allocation8 + $0x134] sm:$0xf] }
 0x3ba   :  { %v2542_v32 = vadd.f32 %v2541_v14, %v2453_v23  ;;  %2405 = vmatmul.bf16.gmra.mxu3 %v8874_v26  ;;  %2494 = vmatmul.bf16.gmra.mxu0 %v7444_v60  ;;  %v1514_v14 = vadd.f32 %v7440_v8, %v7258_v9  ;;  %v1755_v23 = vmax.f32 %v1516_v46, 0.0  ;;  %v8876_v8 = vld [vmem:[#allocation60_spill] sm:$0xff] }
 0x3bb   :  { %2700 = vmatpush.bf16.msra.mxu3 %v5167_v39  ;;  %v530_v29 = vadd.f32 %v8876_v8, %v7536_v42  ;;  %2789 = vmatpush.bf16.msra.mxu0 %v4915_v61  ;;  %v5000_v8 = vld [vmem:[#allocation8 + $0xb8] sm:$0xf0]  ;;  %v5516_v61 = vld [vmem:[#allocation8 + $0x124] sm:$0xf] }
 0x3bc   :  { %2583 = vmatmul.bf16.gmra.mxu1 %v7431_v21  ;;  %2672 = vmatmul.bf16.gmra.mxu2 %v7630_v56  ;;  %v7640_v50 = vadd.f32 %v2630_v49, %v2542_v32  ;;  %v1750_v44 = vmax.f32 %v1514_v14, 0.0  ;;  %v1756_v32 = vmax.f32 %v1605_v51, 0.0  ;;  %v5520_v56 = vld [vmem:[#allocation8 + $0x144] sm:$0xf] }
 0x3bd   :  { %v2366_v1 = vpop.f32.mrf.mxu3 }
 0x3be   :  { %v2367_v6 = vadd.f32 %v2366_v1, %v528_v25  ;;  %v5504_v1 = vld [vmem:[#allocation8 + $0xc4] sm:$0xf]  ;;  %v7654_v11 = vpack.c.bf16 %v1755_v23, %v1750_v44  ;;  %v7656_v51 = vpack.c.bf16 %v1756_v32, %v1751_v53  ;;  %v4992_v32 = vld [vmem:[#allocation8 + $0xa8] sm:$0xf0] }
 0x3bf   :  { %v2633_v38 = vpop.f32.mrf.mxu2  ;;  %v2457_v49 = vpop.f32.mrf.mxu0 }
 0x3c0   :  { %v2456_v20 = vadd.f32 %v2455_v59, %v2367_v6  ;;  %v5011_v6 = vor.u32 %v5504_v1, %v5008_v43  ;;  %8878 = vst [vmem:[#allocation230_spill] sm:$0xff] %v7654_v11  ;;  %v1519_v1 = vadd.f32 %v7472_v47, %v7258_v9  ;;  %v5498_v47 = vld [vmem:[#allocation8 + $0x94] sm:$0xf] }
 0x3c1   :  { %v2546_v34 = vpop.f32.mrf.mxu1 }
 0x3c2   :  { %v2545_v41 = vadd.f32 %v2544_v27, %v2456_v20  ;;  %v5072_v27 = vld [vmem:[#allocation8 + $0x148] sm:$0xf0]  ;;  %2874 = vmatpush.bf16.msra.mxu1 %v5011_v6 }
 0x3c3   :  { %v5075_v46 = vor.u32 %v5520_v56, %v5072_v27  ;;  %v5056_v27 = vld [vmem:[#allocation8 + $0x128] sm:$0xf0] }
 0x3c4   :  { %v7652_v25 = vadd.f32 %v2633_v38, %v2545_v41  ;;  %v5502_v41 = vld [vmem:[#allocation8 + $0xb4] sm:$0xf] }
 0x3c5   :  { %v2368_v24 = vpop.f32.mrf.mxu3  ;;  %2963 = vmatpush.bf16.msra.mxu2 %v5075_v46  ;;  %v1608_v46 = vadd.f32 %v7481_v19, %v7057_v10 }
 0x3c6   :  { %8877 = vst [vmem:[#allocation36_spill] sm:$0xff] %v7652_v25  ;;  %v2369_v39 = vadd.f32 %v2368_v24, %v530_v29  ;;  %v8879_v25 = vld [vmem:[#allocation239_spill] sm:$0xff]  ;;  %v5003_v29 = vor.u32 %v5502_v41, %v5000_v8  ;;  %v5059_v8 = vor.u32 %v5516_v61, %v5056_v27  ;;  %v5496_v61 = vld [vmem:[#allocation8 + $0x84] sm:$0xf] }
 0x3c7   :  { %v2635_v59 = vpop.f32.mrf.mxu2  ;;  %v2460_v14 = vpop.f32.mrf.mxu0  ;;  %v5064_v24 = vld [vmem:[#allocation8 + $0x138] sm:$0xf0]  ;;  %v1761_v19 = vmax.f32 %v1608_v46, 0.0 }
 0x3c8   :  { %v2458_v38 = vadd.f32 %v2457_v49, %v2369_v39  ;;  %v5067_v56 = vor.u32 %v5518_v15, %v5064_v24  ;;  %v8880_v49 = vld [vmem:[#allocation64_spill] sm:$0xff]  ;;  %2875 = vmatpush.bf16.msra.mxu1 %v5003_v29  ;;  %v4984_v29 = vld [vmem:[#allocation8 + $0x98] sm:$0xf0]  ;;  %v5514_v24 = vld [vmem:[#allocation8 + $0x114] sm:$0xf] }
 0x3c9   :  { %v2549_v20 = vpop.f32.mrf.mxu1  ;;  %v533_v44 = vadd.f32 %v8880_v49, %v7536_v42 }
 0x3ca   :  { %v2547_v4 = vadd.f32 %v2546_v34, %v2458_v38  ;;  %2410 = vmatmul.bf16.gmra.mxu3 %v8879_v25  ;;  %2499 = vmatmul.bf16.gmra.mxu0 %v7476_v62  ;;  %v5500_v34 = vld [vmem:[#allocation8 + $0xa4] sm:$0xf]  ;;  %v1610_v38 = vadd.f32 %v7498_v58, %v7057_v10 }
 0x3cb   :  { %2964 = vmatpush.bf16.msra.mxu2 %v5067_v56  ;;  %v4995_v6 = vor.u32 %v5500_v34, %v4992_v32  ;;  %v1760_v56 = vmax.f32 %v1519_v1, 0.0 }
 0x3cc   :  { %2588 = vmatmul.bf16.gmra.mxu1 %v7463_v13  ;;  %2677 = vmatmul.bf16.gmra.mxu2 %v7654_v11  ;;  %v7664_v53 = vadd.f32 %v2635_v59, %v2547_v4  ;;  %v1521_v59 = vadd.f32 %v7492_v57, %v7258_v9  ;;  %v1766_v32 = vmax.f32 %v1610_v38, 0.0  ;;  %v8881_v11 = vld [vmem:[#allocation68_spill] sm:$0xff] }
 0x3cd   :  { %v2371_v23 = vpop.f32.mrf.mxu3  ;;  %2876 = vmatpush.bf16.msra.mxu1 %v4995_v6  ;;  %v535_v58 = vadd.f32 %v8881_v11, %v7536_v42  ;;  %v5512_v6 = vld [vmem:[#allocation8 + $0x104] sm:$0xf] }
 0x3ce   :  { %v2372_v43 = vadd.f32 %v2371_v23, %v533_v44  ;;  %v4987_v44 = vor.u32 %v5498_v47, %v4984_v29  ;;  %v5048_v23 = vld [vmem:[#allocation8 + $0x118] sm:$0xf0]  ;;  %v1765_v34 = vmax.f32 %v1521_v59, 0.0  ;;  %v7680_v38 = vpack.c.bf16 %v1766_v32, %v1761_v19  ;;  %v8883_v29 = vld [vmem:[#allocation242_spill] sm:$0xff] }
 0x3cf   :  { %v2638_v39 = vpop.f32.mrf.mxu2  ;;  %v2462_v41 = vpop.f32.mrf.mxu0  ;;  %2965 = vmatpush.bf16.msra.mxu2 %v5059_v8  ;;  %v5051_v57 = vor.u32 %v5514_v24, %v5048_v23  ;;  %v5040_v8 = vld [vmem:[#allocation8 + $0x108] sm:$0xf0]  ;;  %v8884_v24 = vld [vmem:[#allocation246_spill] sm:$0xff]  ;;  %v5160_v19 = vld [vmem:[#allocation8 + $0x1f8] sm:$0xf0] }
 0x3d0   :  { %v2461_v15 = vadd.f32 %v2460_v14, %v2372_v43  ;;  %v4976_v43 = vld [vmem:[#allocation8 + $0x88] sm:$0xf0]  ;;  %v7678_v46 = vpack.c.bf16 %v1765_v34, %v1760_v56  ;;  %v5043_v59 = vor.u32 %v5512_v6, %v5040_v8  ;;  %v5542_v23 = vld [vmem:[#allocation8 + $0x1f4] sm:$0xf] }
 0x3d1   :  { %v2551_v4 = vpop.f32.mrf.mxu1  ;;  %2877 = vmatpush.bf16.msra.mxu1 %v4987_v44  ;;  %v5163_v34 = vor.u32 %v5542_v23, %v5160_v19  ;;  %v8889_v23 = vld [vmem:[#allocation76_spill] sm:$0xff] }
 0x3d2   :  { %v2550_v49 = vadd.f32 %v2549_v20, %v2461_v15  ;;  %v4979_v20 = vor.u32 %v5496_v61, %v4976_v43  ;;  %8882 = vst [vmem:[#allocation40_spill] sm:$0xff] %v7678_v46  ;;  %v8888_v43 = vld [vmem:[#allocation251_spill] sm:$0xff]  ;;  %v540_v19 = vadd.f32 %v8889_v23, %v7536_v42 }
 0x3d3   :  { %2966 = vmatpush.bf16.msra.mxu2 %v5051_v57  ;;  %v1526_v6 = vadd.f32 %v8888_v43, %v7258_v9  ;;  %3049 = vmatpush.bf16.msrb.mxu3 %v5163_v34 }
 0x3d4   :  { %v7676_v13 = vadd.f32 %v2638_v39, %v2550_v49  ;;  %v8885_v49 = vld [vmem:[#allocation72_spill] sm:$0xff] }
 0x3d5   :  { %v2373_v14 = vpop.f32.mrf.mxu3  ;;  %2878 = vmatpush.bf16.msra.mxu1 %v4979_v20  ;;  %v538_v56 = vadd.f32 %v8885_v49, %v7536_v42  ;;  %v1775_v49 = vmax.f32 %v1526_v6, 0.0 }
 0x3d6   :  { %v2374_v27 = vadd.f32 %v2373_v14, %v535_v58  ;;  %v8887_v14 = vld [vmem:[#allocation272_spill] sm:$0xff] }
 0x3d7   :  { %v2640_v1 = vpop.f32.mrf.mxu2  ;;  %v2465_v15 = vpop.f32.mrf.mxu0  ;;  %2967 = vmatpush.bf16.msra.mxu2 %v5043_v59  ;;  %v1613_v61 = vadd.f32 %v8887_v14, %v7057_v10  ;;  %v5224_v14 = vld [vmem:[#allocation8 + $0x278] sm:$0xf0] }
 0x3d8   :  { %v2463_v47 = vadd.f32 %v2462_v41, %v2374_v27  ;;  %v1615_v27 = vadd.f32 %v7530_v36, %v7057_v10 }
 0x3d9   :  { %v2554_v11 = vpop.f32.mrf.mxu1 }
 0x3da   :  { %v2552_v39 = vadd.f32 %v2551_v4, %v2463_v47  ;;  %2415 = vmatmul.bf16.gmra.mxu3 %v8883_v29  ;;  %2504 = vmatmul.bf16.gmra.mxu0 %v7508_v0  ;;  %v8886_v4 = vld [vmem:[#allocation271_spill] sm:$0xff] }
 0x3db   :  { %v1524_v58 = vadd.f32 %v8886_v4, %v7258_v9  ;;  %v5558_v4 = vld [vmem:[#allocation8 + $0x274] sm:$0xf] }
 0x3dc   :  { %2593 = vmatmul.bf16.gmra.mxu1 %v8884_v24  ;;  %2682 = vmatmul.bf16.gmra.mxu2 %v7678_v46  ;;  %v7688_v44 = vadd.f32 %v2640_v1, %v2552_v39  ;;  %v1771_v39 = vmax.f32 %v1613_v61, 0.0  ;;  %v5227_v43 = vor.u32 %v5558_v4, %v5224_v14  ;;  %v8891_v61 = vld [vmem:[#allocation245_spill] sm:$0xff] }
 0x3dd   :  { %v2376_v41 = vpop.f32.mrf.mxu3  ;;  %v1770_v47 = vmax.f32 %v1524_v58, 0.0 }
 0x3de   :  { %v2377_v32 = vadd.f32 %v2376_v41, %v538_v56  ;;  %v1776_v56 = vmax.f32 %v1615_v27, 0.0  ;;  %3138 = vmatpush.bf16.msrb.mxu0 %v5227_v43 }
 0x3df   :  { %v2643_v57 = vpop.f32.mrf.mxu2  ;;  %v2467_v1 = vpop.f32.mrf.mxu0  ;;  %v7702_v34 = vpack.c.bf16 %v1775_v49, %v1770_v47  ;;  %v8893_v49 = vld [vmem:[#allocation84_spill] sm:$0xff] }
 0x3e0   :  { %v2466_v20 = vadd.f32 %v2465_v15, %v2377_v32  ;;  %v7704_v15 = vpack.c.bf16 %v1776_v56, %v1771_v39  ;;  %v545_v56 = vadd.f32 %v8893_v49, %v7536_v42 }
 0x3e1   :  { %v2556_v8 = vpop.f32.mrf.mxu1  ;;  %8890 = vst [vmem:[#allocation44_spill] sm:$0xff] %v7702_v34 }
 0x3e2   :  { %v2555_v59 = vadd.f32 %v2554_v11, %v2466_v20 }
 0x3e4   :  { %v7700_v41 = vadd.f32 %v2643_v57, %v2555_v59  ;;  %v8892_v57 = vld [vmem:[#allocation80_spill] sm:$0xff] }
 0x3e5   :  { %v2378_v9 = vpop.f32.mrf.mxu3  ;;  %v543_v6 = vadd.f32 %v8892_v57, %v7536_v42  ;;  %v8896_v57 = vld [vmem:[#allocation128_spill] sm:$0xff] }
 0x3e6   :  { %v2379_v46 = vadd.f32 %v2378_v9, %v540_v19 }
 0x3e7   :  { %v2645_v10 = vpop.f32.mrf.mxu2  ;;  %v2470_v36 = vpop.f32.mrf.mxu0 }
 0x3e8   :  { %v2468_v11 = vadd.f32 %v2467_v1, %v2379_v46 }
 0x3e9   :  { %v2559_v32 = vpop.f32.mrf.mxu1 }
 0x3ea   :  { %v2557_v58 = vadd.f32 %v2556_v8, %v2468_v11  ;;  %2420 = vmatmul.bf16.gmra.mxu3 %v8891_v61  ;;  %2509 = vmatmul.bf16.gmra.mxu0 %v7540_v45 }
 0x3ec   :  { %2598 = vmatmul.bf16.gmra.mxu1 %v7527_v5  ;;  %2687 = vmatmul.bf16.gmra.mxu2 %v7702_v34  ;;  %v7712_v27 = vadd.f32 %v2645_v10, %v2557_v58  ;;  %v8895_v58 = vld [vmem:[#allocation228_spill] sm:$0xff] }
 0x3ed   :  { %v2381_v20 = vpop.f32.mrf.mxu3  ;;  %v5556_v34 = vld [vmem:[#allocation8 + $0x264] sm:$0xf] }
 0x3ee   :  { %v2382_v59 = vadd.f32 %v2381_v20, %v543_v6  ;;  %v8897_v6 = vld [vmem:[#allocation227_spill] sm:$0xff] }
 0x3ef   :  { %v2648_v47 = vpop.f32.mrf.mxu2  ;;  %v2472_v39 = vpop.f32.mrf.mxu0 }
 0x3f0   :  { %v2471_v46 = vadd.f32 %v2470_v36, %v2382_v59  ;;  %v8898_v36 = vld [vmem:[#allocation225_spill] sm:$0xff] }
 0x3f1   :  { %v2561_v1 = vpop.f32.mrf.mxu1 }
 0x3f2   :  { %v2560_v8 = vadd.f32 %v2559_v32, %v2471_v46  ;;  %v8899_v32 = vld [vmem:[#allocation88_spill] sm:$0xff]  ;;  %v5152_v46 = vld [vmem:[#allocation8 + $0x1e8] sm:$0xf0] }
 0x3f3   :  { %v548_v20 = vadd.f32 %v8899_v32, %v7536_v42  ;;  %v5216_v32 = vld [vmem:[#allocation8 + $0x268] sm:$0xf0] }
 0x3f4   :  { %v7716_v23 = vadd.f32 %v2648_v47, %v2560_v8  ;;  %v5540_v47 = vld [vmem:[#allocation8 + $0x1e4] sm:$0xf] }
 0x3f5   :  { %v2383_v19 = vpop.f32.mrf.mxu3  ;;  %v5155_v49 = vor.u32 %v5540_v47, %v5152_v46 }
 0x3f6   :  { %8894 = vst [vmem:[#allocation233_spill] sm:$0xff] %v7716_v23  ;;  %v2384_v4 = vadd.f32 %v2383_v19, %v545_v56 }
 0x3f7   :  { %v2650_v14 = vpop.f32.mrf.mxu2  ;;  %v2475_v9 = vpop.f32.mrf.mxu0  ;;  %3050 = vmatpush.bf16.msrb.mxu3 %v5155_v49  ;;  %v8906_v49 = vld [vmem:[#allocation229_spill] sm:$0xff] }
 0x3f8   :  { %v2473_v43 = vadd.f32 %v2472_v39, %v2384_v4 }
 0x3f9   :  { %v2564_v11 = vpop.f32.mrf.mxu1 }
 0x3fa   :  { %v2562_v10 = vadd.f32 %v2561_v1, %v2473_v43  ;;  %2701 = vmatmul.bf16.vlgmr.msra.gmra.mxu3 %v8895_v58  ;;  %2790 = vmatmul.bf16.vlgmr.msra.gmra.mxu0 %v8896_v57  ;;  %v8901_v57 = vld [vmem:[#allocation92_spill] sm:$0xff] }
 0x3fc   :  { %2879 = vmatmul.bf16.vlgmr.msra.gmra.mxu1 %v8897_v6  ;;  %2968 = vmatmul.bf16.vlgmr.msra.gmra.mxu2 %v8898_v36  ;;  %v7724_v59 = vadd.f32 %v2650_v14, %v2562_v10  ;;  %v550_v6 = vadd.f32 %v8901_v57, %v7536_v42  ;;  %v5219_v10 = vor.u32 %v5556_v34, %v5216_v32  ;;  %v8909_v32 = vld [vmem:[#allocation100_spill] sm:$0xff] }
 0x3fd   :  { %v2386_v8 = vpop.f32.mrf.mxu3 }
 0x3fe   :  { %8900 = vst [vmem:[#allocation48_spill] sm:$0xff] %v7724_v59  ;;  %v2387_v39 = vadd.f32 %v2386_v8, %v548_v20  ;;  %3139 = vmatpush.bf16.msrb.mxu0 %v5219_v10  ;;  %v8903_v8 = vld [vmem:[#allocation257_spill] sm:$0xff] }
 0x3ff   :  { %v2653_v56 = vpop.f32.mrf.mxu2  ;;  %v2477_v1 = vpop.f32.mrf.mxu0 }
 0x400   :  { %v2476_v19 = vadd.f32 %v2475_v9, %v2387_v39  ;;  %v8904_v9 = vld [vmem:[#allocation176_spill] sm:$0xff] }
 0x401   :  { %v2566_v4 = vpop.f32.mrf.mxu1  ;;  %v8907_v39 = vld [vmem:[#allocation96_spill] sm:$0xff] }
 0x402   :  { %v2565_v43 = vadd.f32 %v2564_v11, %v2476_v19  ;;  %v8905_v11 = vld [vmem:[#allocation231_spill] sm:$0xff] }
 0x404   :  { %v7728_v36 = vadd.f32 %v2653_v56, %v2565_v43  ;;  %v553_v56 = vadd.f32 %v8907_v39, %v7536_v42 }
 0x405   :  { %v2388_v14 = vpop.f32.mrf.mxu3 }
 0x406   :  { %8902 = vst [vmem:[#allocation52_spill] sm:$0xff] %v7728_v36  ;;  %v2389_v58 = vadd.f32 %v2388_v14, %v550_v6  ;;  %v555_v14 = vadd.f32 %v8909_v32, %v7536_v42 }
 0x407   :  { %v2655_v59 = vpop.f32.mrf.mxu2  ;;  %v2480_v23 = vpop.f32.mrf.mxu0 }
 0x408   :  { %v2478_v20 = vadd.f32 %v2477_v1, %v2389_v58 }
 0x409   :  { %v2569_v47 = vpop.f32.mrf.mxu1 }
 0x40a   :  { %v2567_v46 = vadd.f32 %v2566_v4, %v2478_v20  ;;  %2706 = vmatmul.bf16.gmra.mxu3 %v8903_v8  ;;  %2795 = vmatmul.bf16.gmra.mxu0 %v8904_v9 }
 0x40c   :  { %2884 = vmatmul.bf16.gmra.mxu1 %v8905_v11  ;;  %2973 = vmatmul.bf16.gmra.mxu2 %v8906_v49  ;;  %v7736_v19 = vadd.f32 %v2655_v59, %v2567_v46  ;;  %v8911_v46 = vld [vmem:[#allocation260_spill] sm:$0xff] }
 0x40d   :  { %v2391_v34 = vpop.f32.mrf.mxu3 }
 0x40e   :  { %8908 = vst [vmem:[#allocation236_spill] sm:$0xff] %v7736_v19  ;;  %v2392_v43 = vadd.f32 %v2391_v34, %v553_v56  ;;  %v8912_v56 = vld [vmem:[#allocation183_spill] sm:$0xff]  ;;  %v8913_v34 = vld [vmem:[#allocation234_spill] sm:$0xff] }
 0x40f   :  { %v2658_v57 = vpop.f32.mrf.mxu2  ;;  %v2482_v6 = vpop.f32.mrf.mxu0 }
 0x410   :  { %v2481_v58 = vadd.f32 %v2480_v23, %v2392_v43  ;;  %v8914_v23 = vld [vmem:[#allocation232_spill] sm:$0xff] }
 0x411   :  { %v2571_v1 = vpop.f32.mrf.mxu1 }
 0x412   :  { %v2570_v4 = vadd.f32 %v2569_v47, %v2481_v58  ;;  %v8915_v47 = vld [vmem:[#allocation104_spill] sm:$0xff]  ;;  %v5538_v58 = vld [vmem:[#allocation8 + $0x1d4] sm:$0xf] }
 0x413   :  { %v558_v43 = vadd.f32 %v8915_v47, %v7536_v42  ;;  %v5208_v47 = vld [vmem:[#allocation8 + $0x258] sm:$0xf0] }
 0x414   :  { %v7740_v10 = vadd.f32 %v2658_v57, %v2570_v4  ;;  %v5144_v4 = vld [vmem:[#allocation8 + $0x1d8] sm:$0xf0] }
 0x415   :  { %v2393_v20 = vpop.f32.mrf.mxu3 }
 0x416   :  { %8910 = vst [vmem:[#allocation56_spill] sm:$0xff] %v7740_v10  ;;  %v2394_v9 = vadd.f32 %v2393_v20, %v555_v14  ;;  %v5147_v14 = vor.u32 %v5538_v58, %v5144_v4  ;;  %v5554_v10 = vld [vmem:[#allocation8 + $0x254] sm:$0xf] }
 0x417   :  { %v2660_v11 = vpop.f32.mrf.mxu2  ;;  %v2485_v49 = vpop.f32.mrf.mxu0 }
 0x418   :  { %v2483_v8 = vadd.f32 %v2482_v6, %v2394_v9  ;;  %3051 = vmatpush.bf16.msrb.mxu3 %v5147_v14  ;;  %v8922_v14 = vld [vmem:[#allocation235_spill] sm:$0xff] }
 0x419   :  { %v2574_v39 = vpop.f32.mrf.mxu1 }
 0x41a   :  { %v2572_v59 = vadd.f32 %v2571_v1, %v2483_v8  ;;  %2711 = vmatmul.bf16.gmra.mxu3 %v8911_v46  ;;  %2800 = vmatmul.bf16.gmra.mxu0 %v8912_v56 }
 0x41c   :  { %2889 = vmatmul.bf16.gmra.mxu1 %v8913_v34  ;;  %2978 = vmatmul.bf16.gmra.mxu2 %v8914_v23  ;;  %v7748_v57 = vadd.f32 %v2660_v11, %v2572_v59  ;;  %v8917_v34 = vld [vmem:[#allocation108_spill] sm:$0xff]  ;;  %v5211_v59 = vor.u32 %v5554_v10, %v5208_v47 }
 0x41d   :  { %v2396_v32 = vpop.f32.mrf.mxu3  ;;  %v560_v46 = vadd.f32 %v8917_v34, %v7536_v42  ;;  %v8925_v47 = vld [vmem:[#allocation116_spill] sm:$0xff] }
 0x41e   :  { %8916 = vst [vmem:[#allocation60_spill] sm:$0xff] %v7748_v57  ;;  %v2397_v6 = vadd.f32 %v2396_v32, %v558_v43  ;;  %3140 = vmatpush.bf16.msrb.mxu0 %v5211_v59  ;;  %v8919_v32 = vld [vmem:[#allocation262_spill] sm:$0xff] }
 0x41f   :  { %v2663_v20 = vpop.f32.mrf.mxu2  ;;  %v2487_v8 = vpop.f32.mrf.mxu0 }
 0x420   :  { %v2486_v1 = vadd.f32 %v2485_v49, %v2397_v6  ;;  %v8920_v49 = vld [vmem:[#allocation190_spill] sm:$0xff]  ;;  %v8923_v6 = vld [vmem:[#allocation112_spill] sm:$0xff] }
 0x421   :  { %v2576_v9 = vpop.f32.mrf.mxu1 }
 0x422   :  { %v2575_v56 = vadd.f32 %v2574_v39, %v2486_v1  ;;  %v8921_v39 = vld [vmem:[#allocation237_spill] sm:$0xff] }
 0x424   :  { %v7752_v23 = vadd.f32 %v2663_v20, %v2575_v56  ;;  %v563_v20 = vadd.f32 %v8923_v6, %v7536_v42 }
 0x425   :  { %v2398_v11 = vpop.f32.mrf.mxu3 }
 0x426   :  { %8918 = vst [vmem:[#allocation239_spill] sm:$0xff] %v7752_v23  ;;  %v2399_v57 = vadd.f32 %v2398_v11, %v560_v46  ;;  %v565_v11 = vadd.f32 %v8925_v47, %v7536_v42 }
 0x427   :  { %v2665_v19 = vpop.f32.mrf.mxu2  ;;  %v2490_v36 = vpop.f32.mrf.mxu0 }
 0x428   :  { %v2488_v43 = vadd.f32 %v2487_v8, %v2399_v57 }
 0x429   :  { %v2579_v58 = vpop.f32.mrf.mxu1 }
 0x42a   :  { %v2577_v4 = vadd.f32 %v2576_v9, %v2488_v43  ;;  %2716 = vmatmul.bf16.gmra.mxu3 %v8919_v32  ;;  %2805 = vmatmul.bf16.gmra.mxu0 %v8920_v49 }
 0x42c   :  { %2894 = vmatmul.bf16.gmra.mxu1 %v8921_v39  ;;  %2983 = vmatmul.bf16.gmra.mxu2 %v8922_v14  ;;  %v7760_v1 = vadd.f32 %v2665_v19, %v2577_v4  ;;  %v8927_v4 = vld [vmem:[#allocation264_spill] sm:$0xff] }
 0x42d   :  { %v2401_v10 = vpop.f32.mrf.mxu3 }
 0x42e   :  { %8924 = vst [vmem:[#allocation64_spill] sm:$0xff] %v7760_v1  ;;  %v2402_v46 = vadd.f32 %v2401_v10, %v563_v20  ;;  %v8928_v20 = vld [vmem:[#allocation197_spill] sm:$0xff]  ;;  %v8929_v10 = vld [vmem:[#allocation240_spill] sm:$0xff] }
 0x42f   :  { %v2668_v56 = vpop.f32.mrf.mxu2  ;;  %v2492_v34 = vpop.f32.mrf.mxu0 }
 0x430   :  { %v2491_v57 = vadd.f32 %v2490_v36, %v2402_v46  ;;  %v8930_v36 = vld [vmem:[#allocation238_spill] sm:$0xff] }
 0x431   :  { %v2581_v8 = vpop.f32.mrf.mxu1 }
 0x432   :  { %v2580_v9 = vadd.f32 %v2579_v58, %v2491_v57  ;;  %v8931_v58 = vld [vmem:[#allocation26_spill] sm:$0xff]  ;;  %v5536_v57 = vld [vmem:[#allocation8 + $0x1c4] sm:$0xf] }
 0x433   :  { %v568_v46 = vadd.f32 %v8931_v58, %v7536_v42  ;;  %v5200_v58 = vld [vmem:[#allocation8 + $0x248] sm:$0xf0] }
 0x434   :  { %v7764_v59 = vadd.f32 %v2668_v56, %v2580_v9  ;;  %v5136_v9 = vld [vmem:[#allocation8 + $0x1c8] sm:$0xf0] }
 0x435   :  { %v2403_v43 = vpop.f32.mrf.mxu3 }
 0x436   :  { %8926 = vst [vmem:[#allocation68_spill] sm:$0xff] %v7764_v59  ;;  %v2404_v49 = vadd.f32 %v2403_v43, %v565_v11  ;;  %v5139_v11 = vor.u32 %v5536_v57, %v5136_v9  ;;  %v5552_v59 = vld [vmem:[#allocation8 + $0x244] sm:$0xf] }
 0x437   :  { %v2670_v39 = vpop.f32.mrf.mxu2  ;;  %v2495_v14 = vpop.f32.mrf.mxu0 }
 0x438   :  { %v2493_v32 = vadd.f32 %v2492_v34, %v2404_v49  ;;  %3052 = vmatpush.bf16.msrb.mxu3 %v5139_v11  ;;  %v8937_v11 = vld [vmem:[#allocation241_spill] sm:$0xff] }
 0x439   :  { %v2584_v6 = vpop.f32.mrf.mxu1 }
 0x43a   :  { %v2582_v19 = vadd.f32 %v2581_v8, %v2493_v32  ;;  %2721 = vmatmul.bf16.gmra.mxu3 %v8927_v4  ;;  %2810 = vmatmul.bf16.gmra.mxu0 %v8928_v20 }
 0x43c   :  { %2899 = vmatmul.bf16.gmra.mxu1 %v8929_v10  ;;  %2988 = vmatmul.bf16.gmra.mxu2 %v8930_v36  ;;  %v7772_v56 = vadd.f32 %v2670_v39, %v2582_v19  ;;  %v8933_v10 = vld [vmem:[#allocation30_spill] sm:$0xff]  ;;  %v5203_v19 = vor.u32 %v5552_v59, %v5200_v58 }
 0x43d   :  { %v2406_v47 = vpop.f32.mrf.mxu3  ;;  %v570_v4 = vadd.f32 %v8933_v10, %v7536_v42  ;;  %v8940_v58 = vld [vmem:[#allocation38_spill] sm:$0xff] }
 0x43e   :  { %8932 = vst [vmem:[#allocation242_spill] sm:$0xff] %v7772_v56  ;;  %v2407_v34 = vadd.f32 %v2406_v47, %v568_v46  ;;  %3141 = vmatpush.bf16.msrb.mxu0 %v5203_v19  ;;  %v8934_v47 = vld [vmem:[#allocation266_spill] sm:$0xff] }
 0x43f   :  { %v2673_v43 = vpop.f32.mrf.mxu2  ;;  %v2497_v32 = vpop.f32.mrf.mxu0 }
 0x440   :  { %v2496_v8 = vadd.f32 %v2495_v14, %v2407_v34  ;;  %v8935_v14 = vld [vmem:[#allocation204_spill] sm:$0xff]  ;;  %v8938_v34 = vld [vmem:[#allocation34_spill] sm:$0xff] }
 0x441   :  { %v2586_v49 = vpop.f32.mrf.mxu1 }
 0x442   :  { %v2585_v20 = vadd.f32 %v2584_v6, %v2496_v8  ;;  %v8936_v6 = vld [vmem:[#allocation243_spill] sm:$0xff] }
 0x444   :  { %v7776_v36 = vadd.f32 %v2673_v43, %v2585_v20  ;;  %v573_v43 = vadd.f32 %v8938_v34, %v7536_v42 }
 0x445   :  { %v2408_v39 = vpop.f32.mrf.mxu3 }
 0x446   :  { %v2409_v56 = vadd.f32 %v2408_v39, %v570_v4  ;;  %v575_v39 = vadd.f32 %v8940_v58, %v7536_v42 }
 0x447   :  { %v2675_v1 = vpop.f32.mrf.mxu2  ;;  %v2500_v23 = vpop.f32.mrf.mxu0 }
 0x448   :  { %v2498_v46 = vadd.f32 %v2497_v32, %v2409_v56 }
 0x449   :  { %v2589_v57 = vpop.f32.mrf.mxu1 }
 0x44a   :  { %v2587_v9 = vadd.f32 %v2586_v49, %v2498_v46  ;;  %2726 = vmatmul.bf16.gmra.mxu3 %v8934_v47  ;;  %2815 = vmatmul.bf16.gmra.mxu0 %v8935_v14 }
 0x44c   :  { %2904 = vmatmul.bf16.gmra.mxu1 %v8936_v6  ;;  %2993 = vmatmul.bf16.gmra.mxu2 %v8937_v11  ;;  %v7784_v8 = vadd.f32 %v2675_v1, %v2587_v9  ;;  %v8942_v9 = vld [vmem:[#allocation269_spill] sm:$0xff] }
 0x44d   :  { %v2411_v59 = vpop.f32.mrf.mxu3 }
 0x44e   :  { %8939 = vst [vmem:[#allocation246_spill] sm:$0xff] %v7784_v8  ;;  %v2412_v4 = vadd.f32 %v2411_v59, %v573_v43  ;;  %v8943_v43 = vld [vmem:[#allocation211_spill] sm:$0xff] }
 0x44f   :  { %v2678_v20 = vpop.f32.mrf.mxu2  ;;  %v2502_v10 = vpop.f32.mrf.mxu0  ;;  %v8944_v59 = vld [vmem:[#allocation247_spill] sm:$0xff] }
 0x450   :  { %v2501_v56 = vadd.f32 %v2500_v23, %v2412_v4  ;;  %v8945_v23 = vld [vmem:[#allocation244_spill] sm:$0xff] }
 0x451   :  { %v2591_v32 = vpop.f32.mrf.mxu1 }
 0x452   :  { %v2590_v49 = vadd.f32 %v2589_v57, %v2501_v56  ;;  %v8946_v57 = vld [vmem:[#allocation42_spill] sm:$0xff] }
 0x453   :  { %v578_v4 = vadd.f32 %v8946_v57, %v7536_v42  ;;  %v5534_v56 = vld [vmem:[#allocation8 + $0x1b4] sm:$0xf] }
 0x454   :  { %v7788_v19 = vadd.f32 %v2678_v20, %v2590_v49  ;;  %v5128_v49 = vld [vmem:[#allocation8 + $0x1b8] sm:$0xf0] }
 0x455   :  { %v2413_v46 = vpop.f32.mrf.mxu3 }
 0x456   :  { %8941 = vst [vmem:[#allocation72_spill] sm:$0xff] %v7788_v19  ;;  %v2414_v14 = vadd.f32 %v2413_v46, %v575_v39  ;;  %v5131_v39 = vor.u32 %v5534_v56, %v5128_v49 }
 0x457   :  { %v2680_v6 = vpop.f32.mrf.mxu2  ;;  %v2505_v11 = vpop.f32.mrf.mxu0 }
 0x458   :  { %v2503_v47 = vadd.f32 %v2502_v10, %v2414_v14  ;;  %3053 = vmatpush.bf16.msrb.mxu3 %v5131_v39  ;;  %v8950_v39 = vld [vmem:[#allocation270_spill] sm:$0xff] }
 0x459   :  { %v2594_v34 = vpop.f32.mrf.mxu1 }
 0x45a   :  { %v2592_v1 = vadd.f32 %v2591_v32, %v2503_v47  ;;  %2731 = vmatmul.bf16.gmra.mxu3 %v8942_v9  ;;  %2820 = vmatmul.bf16.gmra.mxu0 %v8943_v43  ;;  %v5550_v9 = vld [vmem:[#allocation8 + $0x234] sm:$0xf] }
 0x45c   :  { %2909 = vmatmul.bf16.gmra.mxu1 %v8944_v59  ;;  %2998 = vmatmul.bf16.gmra.mxu2 %v8945_v23  ;;  %v7796_v20 = vadd.f32 %v2680_v6, %v2592_v1  ;;  %v5192_v59 = vld [vmem:[#allocation8 + $0x238] sm:$0xf0]  ;;  %v8948_v23 = vld [vmem:[#allocation46_spill] sm:$0xff] }
 0x45d   :  { %v2416_v58 = vpop.f32.mrf.mxu3  ;;  %v5195_v19 = vor.u32 %v5550_v9, %v5192_v59  ;;  %v580_v8 = vadd.f32 %v8948_v23, %v7536_v42  ;;  %v8953_v9 = vld [vmem:[#allocation249_spill] sm:$0xff] }
 0x45e   :  { %8947 = vst [vmem:[#allocation271_spill] sm:$0xff] %v7796_v20  ;;  %v2417_v10 = vadd.f32 %v2416_v58, %v578_v4 }
 0x45f   :  { %v2683_v46 = vpop.f32.mrf.mxu2  ;;  %v2507_v47 = vpop.f32.mrf.mxu0  ;;  %3142 = vmatpush.bf16.msrb.mxu0 %v5195_v19 }
 0x460   :  { %v2506_v32 = vadd.f32 %v2505_v11, %v2417_v10  ;;  %v8951_v11 = vld [vmem:[#allocation218_spill] sm:$0xff] }
 0x461   :  { %v2596_v14 = vpop.f32.mrf.mxu1  ;;  %v8954_v10 = vld [vmem:[#allocation50_spill] sm:$0xff] }
 0x462   :  { %v2595_v43 = vadd.f32 %v2594_v34, %v2506_v32  ;;  %v8952_v34 = vld [vmem:[#allocation252_spill] sm:$0xff] }
 0x464   :  { %v7800_v57 = vadd.f32 %v2683_v46, %v2595_v43  ;;  %v583_v46 = vadd.f32 %v8954_v10, %v7536_v42  ;;  %v8958_v10 = vld [vmem:[#allocation25_spill] sm:$0xff] }
 0x465   :  { %v2418_v6 = vpop.f32.mrf.mxu3 }
 0x466   :  { %8949 = vst [vmem:[#allocation272_spill] sm:$0xff] %v7800_v57  ;;  %v2419_v1 = vadd.f32 %v2418_v6, %v580_v8  ;;  %v8960_v57 = vld [vmem:[#allocation224_spill] sm:$0xff] }
 0x467   :  { %v2685_v20 = vpop.f32.mrf.mxu2  ;;  %v2510_v56 = vpop.f32.mrf.mxu0 }
 0x468   :  { %v2508_v4 = vadd.f32 %v2507_v47, %v2419_v1  ;;  %v5567_v1 = vld [vmem:[#allocation10 + $0x38] sm:$0xff] }
 0x469   :  { %v2599_v49 = vpop.f32.mrf.mxu1  ;;  %3451 = vmatpush.bf16.msrb.mxu1 %v5567_v1  ;;  %v5120_v1 = vld [vmem:[#allocation8 + $0x1a8] sm:$0xf0] }
 0x46a   :  { %v2597_v58 = vadd.f32 %v2596_v14, %v2508_v4  ;;  %2736 = vmatmul.bf16.gmra.mxu3 %v8950_v39  ;;  %2825 = vmatmul.bf16.gmra.mxu0 %v8951_v11  ;;  %v5575_v14 = vld [vmem:[#allocation10 + $0x78] sm:$0xff] }
 0x46b   :  { %3540 = vmatpush.bf16.msrb.mxu2 %v5575_v14  ;;  %v7810_v4 = vld [vmem:[#allocation7] sm:$0x3f] }
 0x46c   :  { %2914 = vmatmul.bf16.gmra.mxu1 %v8952_v34  ;;  %3003 = vmatmul.bf16.gmra.mxu2 %v8953_v9  ;;  %v7808_v32 = vadd.f32 %v2685_v20, %v2597_v58  ;;  %8956 = vst [vmem:[#allocation76_spill] sm:$0xff] %v7810_v4  ;;  %v7813_v11 = vperm.slane %v7810_v4, 1  ;;  %v8957_v34 = vld [vmem:[#allocation54_spill] sm:$0xff] }
 0x46d   :  { %v2421_v19 = vpop.f32.mrf.mxu3  ;;  %v585_v9 = vadd.f32 %v8957_v34, %v7536_v42  ;;  %v8959_v4 = vld [vmem:[#allocation254_spill] sm:$0xff] }
 0x46e   :  { %8955 = vst [vmem:[#allocation251_spill] sm:$0xff] %v7808_v32  ;;  %v2422_v8 = vadd.f32 %v2421_v19, %v583_v46  ;;  %v8961_v42 = vld [vmem:[#allocation258_spill] sm:$0xff] }
 0x46f   :  { %v2688_v43 = vpop.f32.mrf.mxu2  ;;  %v2512_v59 = vpop.f32.mrf.mxu0 }
 0x470   :  { %v2511_v47 = vadd.f32 %v2510_v56, %v2422_v8  ;;  %v597_v56 = vadd.f32 %v8958_v10, %v7813_v11 }
 0x471   :  { %v2601_v23 = vpop.f32.mrf.mxu1 }
 0x472   :  { %v2600_v6 = vadd.f32 %v2599_v49, %v2511_v47 }
 0x474   :  { %v7817_v20 = vadd.f32 %v2688_v43, %v2600_v6  ;;  %v8962_v43 = vld [vmem:[#allocation255_spill] sm:$0xff]  ;;  %v5532_v6 = vld [vmem:[#allocation8 + $0x1a4] sm:$0xf] }
 0x475   :  { %v2423_v58 = vpop.f32.mrf.mxu3 }
 0x476   :  { %v2424_v46 = vadd.f32 %v2423_v58, %v585_v9  ;;  %v5123_v9 = vor.u32 %v5532_v6, %v5120_v1 }
 0x477   :  { %v2690_v19 = vpop.f32.mrf.mxu2  ;;  %v2791_v49 = vpop.f32.mrf.mxu0 }
 0x478   :  { %v2513_v8 = vadd.f32 %v2512_v59, %v2424_v46  ;;  %v2792_v47 = vadd.f32 %v2791_v49, %v597_v56  ;;  %v8963_v59 = vld [vmem:[#allocation29_spill] sm:$0xff]  ;;  %3054 = vmatpush.bf16.msrb.mxu3 %v5123_v9 }
 0x479   :  { %v2880_v14 = vpop.f32.mrf.mxu1  ;;  %v599_v10 = vadd.f32 %v8963_v59, %v7813_v11 }
 0x47a   :  { %v2602_v39 = vadd.f32 %v2601_v23, %v2513_v8  ;;  %v2881_v32 = vadd.f32 %v2880_v14, %v2792_v47  ;;  %2741 = vmatmul.bf16.gmra.mxu3 %v8959_v4  ;;  %2830 = vmatmul.bf16.gmra.mxu0 %v8960_v57  ;;  %v5548_v14 = vld [vmem:[#allocation8 + $0x224] sm:$0xf] }
 0x47c   :  { %2919 = vmatmul.bf16.gmra.mxu1 %v8961_v42  ;;  %3008 = vmatmul.bf16.gmra.mxu2 %v8962_v43  ;;  %v7825_v34 = vadd.f32 %v2690_v19, %v2602_v39  ;;  %v5184_v42 = vld [vmem:[#allocation8 + $0x228] sm:$0xf0] }
 0x47d   :  { %v2702_v58 = vpop.f32.mrf.mxu3  ;;  %v5187_v43 = vor.u32 %v5548_v14, %v5184_v42  ;;  %v8964_v19 = vld [vmem:[#allocation33_spill] sm:$0xff] }
 0x47e   :  { %v2703_v23 = vadd.f32 %v2702_v58, %v7556_v52  ;;  %v602_v6 = vadd.f32 %v8964_v19, %v7813_v11 }
 0x47f   :  { %v2969_v56 = vpop.f32.mrf.mxu2  ;;  %v2793_v57 = vpop.f32.mrf.mxu0  ;;  %3143 = vmatpush.bf16.msrb.mxu0 %v5187_v43 }
 0x480   :  { %v7830_v46 = vadd.f32 %v2969_v56, %v2881_v32  ;;  %v2794_v49 = vadd.f32 %v2793_v57, %v599_v10  ;;  %v3227_v32 = vmax.f32 %v2703_v23, 0.0 }
 0x481   :  { %v2882_v8 = vpop.f32.mrf.mxu1 }
 0x482   :  { %v2883_v47 = vadd.f32 %v2882_v8, %v2794_v49  ;;  %v8965_v8 = vld [vmem:[#allocation37_spill] sm:$0xff] }
 0x485   :  { %v2704_v39 = vpop.f32.mrf.mxu3 }
 0x486   :  { %v2705_v1 = vadd.f32 %v2704_v39, %v7568_v16 }
 0x487   :  { %v2971_v59 = vpop.f32.mrf.mxu2  ;;  %v2796_v9 = vpop.f32.mrf.mxu0 }
 0x488   :  { %v7835_v52 = vadd.f32 %v2971_v59, %v2883_v47  ;;  %v3229_v58 = vmax.f32 %v2705_v1, 0.0  ;;  %v2797_v56 = vadd.f32 %v2796_v9, %v602_v6  ;;  %v604_v47 = vadd.f32 %v8965_v8, %v7813_v11  ;;  %v5574_v6 = vld [vmem:[#allocation10 + $0x70] sm:$0xff] }
 0x489   :  { %v2885_v10 = vpop.f32.mrf.mxu1  ;;  %3541 = vmatpush.bf16.msrb.mxu2 %v5574_v6 }
 0x48a   :  { %v7837_v57 = vpack.c.bf16 %v3229_v58, %v3227_v32  ;;  %v2886_v49 = vadd.f32 %v2885_v10, %v2797_v56  ;;  %2746 = vmatmul.bf16.gmra.mxu3 %v7560_v30  ;;  %2835 = vmatmul.bf16.gmra.mxu0 %v8862_v18  ;;  %v5566_v18 = vld [vmem:[#allocation10 + $0x30] sm:$0xff] }
 0x48b   :  { %3452 = vmatpush.bf16.msrb.mxu1 %v5566_v18 }
 0x48c   :  { %2924 = vmatmul.bf16.gmra.mxu1 %v7348_v37  ;;  %3013 = vmatmul.bf16.gmra.mxu2 %v7335_v7  ;;  %v8966_v7 = vld [vmem:[#allocation41_spill] sm:$0xff] }
 0x48d   :  { %v2707_v16 = vpop.f32.mrf.mxu3  ;;  %v607_v59 = vadd.f32 %v8966_v7, %v7813_v11 }
 0x48e   :  { %v2708_v23 = vadd.f32 %v2707_v16, %v7580_v17 }
 0x48f   :  { %v2974_v14 = vpop.f32.mrf.mxu2  ;;  %v2798_v43 = vpop.f32.mrf.mxu0 }
 0x490   :  { %v7846_v42 = vadd.f32 %v2974_v14, %v2886_v49  ;;  %v2799_v39 = vadd.f32 %v2798_v43, %v604_v47  ;;  %v3231_v56 = vmax.f32 %v2708_v23, 0.0  ;;  %v5112_v14 = vld [vmem:[#allocation8 + $0x198] sm:$0xf0]  ;;  %v8967_v23 = vld [vmem:[#allocation45_spill] sm:$0xff] }
 0x491   :  { %v2887_v19 = vpop.f32.mrf.mxu1 }
 0x492   :  { %v2888_v1 = vadd.f32 %v2887_v19, %v2799_v39  ;;  %v609_v19 = vadd.f32 %v8967_v23, %v7813_v11 }
 0x495   :  { %v2709_v37 = vpop.f32.mrf.mxu3 }
 0x496   :  { %v2710_v9 = vadd.f32 %v2709_v37, %v7592_v35  ;;  %v5530_v35 = vld [vmem:[#allocation8 + $0x194] sm:$0xf] }
 0x497   :  { %v2976_v32 = vpop.f32.mrf.mxu2  ;;  %v2801_v17 = vpop.f32.mrf.mxu0  ;;  %v5115_v43 = vor.u32 %v5530_v35, %v5112_v14 }
 0x498   :  { %v7851_v58 = vadd.f32 %v2976_v32, %v2888_v1  ;;  %v3233_v10 = vmax.f32 %v2710_v9, 0.0  ;;  %v2802_v49 = vadd.f32 %v2801_v17, %v607_v59  ;;  %v5176_v9 = vld [vmem:[#allocation8 + $0x218] sm:$0xf0]  ;;  %v8968_v17 = vld [vmem:[#allocation49_spill] sm:$0xff] }
 0x499   :  { %v2890_v16 = vpop.f32.mrf.mxu1  ;;  %3055 = vmatpush.bf16.msrb.mxu3 %v5115_v43 }
 0x49a   :  { %v2891_v8 = vadd.f32 %v2890_v16, %v2802_v49  ;;  %2751 = vmatmul.bf16.gmra.mxu3 %v7584_v48  ;;  %2840 = vmatmul.bf16.gmra.mxu0 %v8866_v55  ;;  %v7855_v47 = vpack.c.bf16 %v3233_v10, %v3231_v56  ;;  %v612_v56 = vadd.f32 %v8968_v17, %v7813_v11 }
 0x49c   :  { %2929 = vmatmul.bf16.gmra.mxu1 %v7380_v3  ;;  %3018 = vmatmul.bf16.gmra.mxu2 %v7367_v54  ;;  %v5546_v3 = vld [vmem:[#allocation8 + $0x214] sm:$0xf] }
 0x49d   :  { %v2712_v39 = vpop.f32.mrf.mxu3  ;;  %v5179_v54 = vor.u32 %v5546_v3, %v5176_v9  ;;  %v5573_v9 = vld [vmem:[#allocation10 + $0x68] sm:$0xff] }
 0x49e   :  { %v2713_v6 = vadd.f32 %v2712_v39, %v7604_v33  ;;  %3542 = vmatpush.bf16.msrb.mxu2 %v5573_v9 }
 0x49f   :  { %v2979_v1 = vpop.f32.mrf.mxu2  ;;  %v2803_v55 = vpop.f32.mrf.mxu0  ;;  %3144 = vmatpush.bf16.msrb.mxu0 %v5179_v54  ;;  %v5565_v54 = vld [vmem:[#allocation10 + $0x28] sm:$0xff] }
 0x4a0   :  { %v7862_v18 = vadd.f32 %v2979_v1, %v2891_v8  ;;  %v2804_v37 = vadd.f32 %v2803_v55, %v609_v19  ;;  %v3235_v8 = vmax.f32 %v2713_v6, 0.0  ;;  %v8969_v19 = vld [vmem:[#allocation53_spill] sm:$0xff]  ;;  %3453 = vmatpush.bf16.msrb.mxu1 %v5565_v54 }
 0x4a1   :  { %v2892_v7 = vpop.f32.mrf.mxu1  ;;  %v614_v1 = vadd.f32 %v8969_v19, %v7813_v11 }
 0x4a2   :  { %v2893_v59 = vadd.f32 %v2892_v7, %v2804_v37 }
 0x4a5   :  { %v2714_v32 = vpop.f32.mrf.mxu3 }
 0x4a6   :  { %v2715_v10 = vadd.f32 %v2714_v32, %v7616_v63 }
 0x4a7   :  { %v2981_v49 = vpop.f32.mrf.mxu2  ;;  %v2806_v16 = vpop.f32.mrf.mxu0 }
 0x4a8   :  { %v7867_v33 = vadd.f32 %v2981_v49, %v2893_v59  ;;  %v3237_v35 = vmax.f32 %v2715_v10, 0.0  ;;  %v2807_v14 = vadd.f32 %v2806_v16, %v612_v56 }
 0x4a9   :  { %v2895_v43 = vpop.f32.mrf.mxu1 }
 0x4aa   :  { %v2896_v39 = vadd.f32 %v2895_v43, %v2807_v14  ;;  %2756 = vmatmul.bf16.gmra.mxu3 %v7608_v31  ;;  %2845 = vmatmul.bf16.gmra.mxu0 %v8870_v2  ;;  %v7871_v23 = vpack.c.bf16 %v3237_v35, %v3235_v8 }
 0x4ac   :  { %2934 = vmatmul.bf16.gmra.mxu1 %v7412_v28  ;;  %3023 = vmatmul.bf16.gmra.mxu2 %v7399_v22  ;;  %v8970_v22 = vld [vmem:[#allocation57_spill] sm:$0xff] }
 0x4ad   :  { %v2717_v63 = vpop.f32.mrf.mxu3  ;;  %v617_v32 = vadd.f32 %v8970_v22, %v7813_v11 }
 0x4ae   :  { %v2718_v6 = vadd.f32 %v2717_v63, %v7628_v40 }
 0x4af   :  { %v2984_v55 = vpop.f32.mrf.mxu2  ;;  %v2808_v7 = vpop.f32.mrf.mxu0 }
 0x4b0   :  { %v7878_v37 = vadd.f32 %v2984_v55, %v2896_v39  ;;  %v2809_v59 = vadd.f32 %v2808_v7, %v614_v1  ;;  %v3239_v49 = vmax.f32 %v2718_v6, 0.0  ;;  %v5104_v39 = vld [vmem:[#allocation8 + $0x188] sm:$0xf0]  ;;  %v8972_v55 = vld [vmem:[#allocation36_spill] sm:$0xff] }
 0x4b1   :  { %v2897_v3 = vpop.f32.mrf.mxu1  ;;  %v8971_v1 = vld [vmem:[#allocation61_spill] sm:$0xff] }
 0x4b2   :  { %v2898_v2 = vadd.f32 %v2897_v3, %v2809_v59  ;;  %v619_v6 = vadd.f32 %v8971_v1, %v7813_v11 }
 0x4b5   :  { %v2719_v28 = vpop.f32.mrf.mxu3 }
 0x4b6   :  { %v2720_v17 = vadd.f32 %v2719_v28, %v7640_v50  ;;  %v5528_v50 = vld [vmem:[#allocation8 + $0x184] sm:$0xf] }
 0x4b7   :  { %v2986_v56 = vpop.f32.mrf.mxu2  ;;  %v2811_v40 = vpop.f32.mrf.mxu0  ;;  %v5107_v63 = vor.u32 %v5528_v50, %v5104_v39 }
 0x4b8   :  { %v7883_v10 = vadd.f32 %v2986_v56, %v2898_v2  ;;  %v3241_v16 = vmax.f32 %v2720_v17, 0.0  ;;  %v2812_v8 = vadd.f32 %v2811_v40, %v617_v32  ;;  %v8973_v32 = vld [vmem:[#allocation65_spill] sm:$0xff] }
 0x4b9   :  { %v2900_v35 = vpop.f32.mrf.mxu1  ;;  %3056 = vmatpush.bf16.msrb.mxu3 %v5107_v63  ;;  %v622_v17 = vadd.f32 %v8973_v32, %v7813_v11  ;;  %v5563_v63 = vld [vmem:[#allocation10 + $0x18] sm:$0xff]  ;;  %v8976_v32 = vld [vmem:[#allocation73_spill] sm:$0xff] }
 0x4ba   :  { %v2901_v14 = vadd.f32 %v2900_v35, %v2812_v8  ;;  %2761 = vmatmul.bf16.gmra.mxu3 %v7632_v12  ;;  %2850 = vmatmul.bf16.gmra.mxu0 %v8874_v26  ;;  %v7887_v43 = vpack.c.bf16 %v3241_v16, %v3239_v49  ;;  %v5564_v49 = vld [vmem:[#allocation10 + $0x20] sm:$0xff] }
 0x4bb   :  { %3454 = vmatpush.bf16.msrb.mxu1 %v5564_v49  ;;  %v5560_v49 = vld [vmem:[#allocation10] sm:$0xff] }
 0x4bc   :  { %2939 = vmatmul.bf16.gmra.mxu1 %v7444_v60  ;;  %3028 = vmatmul.bf16.gmra.mxu2 %v7431_v21  ;;  %v5544_v60 = vld [vmem:[#allocation8 + $0x204] sm:$0xf]  ;;  %v5168_v21 = vld [vmem:[#allocation8 + $0x208] sm:$0xf0] }
 0x4bd   :  { %v2722_v19 = vpop.f32.mrf.mxu3  ;;  %v5171_v28 = vor.u32 %v5544_v60, %v5168_v21  ;;  %v5572_v21 = vld [vmem:[#allocation10 + $0x60] sm:$0xff] }
 0x4be   :  { %v2723_v7 = vadd.f32 %v2722_v19, %v8972_v55  ;;  %3543 = vmatpush.bf16.msrb.mxu2 %v5572_v21 }
 0x4bf   :  { %v2989_v59 = vpop.f32.mrf.mxu2  ;;  %v2813_v26 = vpop.f32.mrf.mxu0  ;;  %3145 = vmatpush.bf16.msrb.mxu0 %v5171_v28  ;;  %3455 = vmatpush.bf16.msrb.mxu1 %v5563_v63 }
 0x4c0   :  { %v7894_v3 = vadd.f32 %v2989_v59, %v2901_v14  ;;  %v2814_v9 = vadd.f32 %v2813_v26, %v619_v6  ;;  %v3243_v8 = vmax.f32 %v2723_v7, 0.0  ;;  %v8975_v6 = vld [vmem:[#allocation69_spill] sm:$0xff]  ;;  %v5562_v26 = vld [vmem:[#allocation10 + $0x10] sm:$0xff] }
 0x4c1   :  { %v2902_v2 = vpop.f32.mrf.mxu1  ;;  %v624_v55 = vadd.f32 %v8975_v6, %v7813_v11 }
 0x4c2   :  { %v7896_v54 = vadd.f32 %v2902_v2, %v2814_v9 }
 0x4c3   :  { %3456 = vmatpush.bf16.msrb.mxu1 %v5562_v26 }
 0x4c5   :  { %v2724_v22 = vpop.f32.mrf.mxu3 }
 0x4c6   :  { %v2725_v56 = vadd.f32 %v2724_v22, %v7664_v53  ;;  %v8974_v53 = vld [vmem:[#allocation267_spill] sm:$0xff] }
 0x4c7   :  { %v7901_v40 = vpop.f32.mrf.mxu2  ;;  %v2816_v16 = vpop.f32.mrf.mxu0 }
 0x4c8   :  { %v3245_v35 = vmax.f32 %v2725_v56, 0.0  ;;  %v2817_v14 = vadd.f32 %v2816_v16, %v622_v17  ;;  %v627_v17 = vadd.f32 %v8976_v32, %v7813_v11 }
 0x4c9   :  { %v2905_v50 = vpop.f32.mrf.mxu1 }
 0x4ca   :  { %v2906_v39 = vadd.f32 %v2905_v50, %v2817_v14  ;;  %2766 = vmatmul.bf16.gmra.mxu3 %v7656_v51  ;;  %2855 = vmatmul.bf16.gmra.mxu0 %v8879_v25  ;;  %v7905_v19 = vpack.c.bf16 %v3245_v35, %v3243_v8 }
 0x4cc   :  { %2944 = vmatmul.bf16.gmra.mxu1 %v7476_v62  ;;  %3033 = vmatmul.bf16.gmra.mxu2 %v8974_v53  ;;  %v5561_v62 = vld [vmem:[#allocation10 + $0x8] sm:$0xff] }
 0x4cd   :  { %v2727_v1 = vpop.f32.mrf.mxu3  ;;  %3457 = vmatpush.bf16.msrb.mxu1 %v5561_v62  ;;  %v8977_v53 = vld [vmem:[#allocation77_spill] sm:$0xff] }
 0x4ce   :  { %v2728_v7 = vadd.f32 %v2727_v1, %v7676_v13  ;;  %v629_v1 = vadd.f32 %v8977_v53, %v7813_v11 }
 0x4cf   :  { %v2994_v59 = vpop.f32.mrf.mxu2  ;;  %v2818_v2 = vpop.f32.mrf.mxu0 }
 0x4d0   :  { %v7912_v9 = vadd.f32 %v2994_v59, %v2906_v39  ;;  %v2819_v25 = vadd.f32 %v2818_v2, %v624_v55  ;;  %v3247_v8 = vmax.f32 %v2728_v7, 0.0 }
 0x4d1   :  { %v2907_v60 = vpop.f32.mrf.mxu1  ;;  %3458 = vmatpush.bf16.msrb.mxu1 %v5560_v49 }
 0x4d2   :  { %v7914_v28 = vadd.f32 %v2907_v60, %v2819_v25  ;;  %v8978_v60 = vld [vmem:[#allocation81_spill] sm:$0xff] }
 0x4d5   :  { %v2729_v22 = vpop.f32.mrf.mxu3 }
 0x4d6   :  { %v2730_v13 = vadd.f32 %v2729_v22, %v7688_v44 }
 0x4d7   :  { %v7919_v56 = vpop.f32.mrf.mxu2  ;;  %v2821_v16 = vpop.f32.mrf.mxu0 }
 0x4d8   :  { %v3249_v35 = vmax.f32 %v2730_v13, 0.0  ;;  %v2822_v14 = vadd.f32 %v2821_v16, %v627_v17 }
 0x4d9   :  { %v2910_v50 = vpop.f32.mrf.mxu1 }
 0x4da   :  { %v2911_v39 = vadd.f32 %v2910_v50, %v2822_v14  ;;  %2771 = vmatmul.bf16.gmra.mxu3 %v7680_v38  ;;  %2860 = vmatmul.bf16.gmra.mxu0 %v8883_v29  ;;  %v7923_v63 = vpack.c.bf16 %v3249_v35, %v3247_v8  ;;  %v8980_v35 = vld [vmem:[#allocation233_spill] sm:$0xff] }
 0x4dc   :  { %2949 = vmatmul.bf16.gmra.mxu1 %v7508_v0  ;;  %3038 = vmatmul.bf16.gmra.mxu2 %v8884_v24  ;;  %v632_v0 = vadd.f32 %v8978_v60, %v7813_v11 }
 0x4dd   :  { %v2732_v44 = vpop.f32.mrf.mxu3 }
 0x4de   :  { %v2733_v6 = vadd.f32 %v2732_v44, %v7700_v41 }
 0x4df   :  { %v2999_v55 = vpop.f32.mrf.mxu2  ;;  %v2823_v59 = vpop.f32.mrf.mxu0 }
 0x4e0   :  { %v7930_v7 = vadd.f32 %v2999_v55, %v2911_v39  ;;  %v2824_v26 = vadd.f32 %v2823_v59, %v629_v1  ;;  %v3251_v22 = vmax.f32 %v2733_v6, 0.0  ;;  %v5571_v6 = vld [vmem:[#allocation10 + $0x58] sm:$0xff]  ;;  %v8982_v59 = vld [vmem:[#allocation48_spill] sm:$0xff] }
 0x4e1   :  { %v2912_v2 = vpop.f32.mrf.mxu1  ;;  %3544 = vmatpush.bf16.msrb.mxu2 %v5571_v6 }
 0x4e2   :  { %v7932_v25 = vadd.f32 %v2912_v2, %v2824_v26 }
 0x4e5   :  { %v2734_v29 = vpop.f32.mrf.mxu3 }
 0x4e6   :  { %v2735_v24 = vadd.f32 %v2734_v29, %v7712_v27  ;;  %v8979_v27 = vld [vmem:[#allocation85_spill] sm:$0xff] }
 0x4e7   :  { %v7937_v21 = vpop.f32.mrf.mxu2  ;;  %v2826_v62 = vpop.f32.mrf.mxu0  ;;  %v634_v8 = vadd.f32 %v8979_v27, %v7813_v11 }
 0x4e8   :  { %v3253_v32 = vmax.f32 %v2735_v24, 0.0  ;;  %v2827_v41 = vadd.f32 %v2826_v62, %v632_v0 }
 0x4e9   :  { %v2915_v17 = vpop.f32.mrf.mxu1 }
 0x4ea   :  { %v2916_v13 = vadd.f32 %v2915_v17, %v2827_v41  ;;  %2776 = vmatmul.bf16.gmra.mxu3 %v7704_v15  ;;  %2865 = vmatmul.bf16.gmra.mxu0 %v8891_v61  ;;  %v7941_v49 = vpack.c.bf16 %v3253_v32, %v3251_v22  ;;  %v8983_v32 = vld [vmem:[#allocation250_spill] sm:$0xff]  ;;  %v8984_v41 = vld [vmem:[#allocation228_spill] sm:$0xff] }
 0x4ec   :  { %2954 = vmatmul.bf16.gmra.mxu1 %v7540_v45  ;;  %3043 = vmatmul.bf16.gmra.mxu2 %v7527_v5  ;;  %v8981_v45 = vld [vmem:[#allocation89_spill] sm:$0xff] }
 0x4ed   :  { %v2737_v16 = vpop.f32.mrf.mxu3  ;;  %v637_v5 = vadd.f32 %v8981_v45, %v7813_v11 }
 0x4ee   :  { %v2738_v14 = vadd.f32 %v2737_v16, %v8980_v35  ;;  %v8985_v16 = vld [vmem:[#allocation93_spill] sm:$0xff] }
 0x4ef   :  { %v3004_v50 = vpop.f32.mrf.mxu2  ;;  %v2828_v44 = vpop.f32.mrf.mxu0  ;;  %v639_v27 = vadd.f32 %v8985_v16, %v7813_v11 }
 0x4f0   :  { %v7948_v39 = vadd.f32 %v3004_v50, %v2916_v13  ;;  %v2829_v53 = vadd.f32 %v2828_v44, %v634_v8  ;;  %v3255_v60 = vmax.f32 %v2738_v14, 0.0  ;;  %v8986_v8 = vld [vmem:[#allocation52_spill] sm:$0xff] }
 0x4f1   :  { %v2917_v1 = vpop.f32.mrf.mxu1 }
 0x4f2   :  { %v7950_v61 = vadd.f32 %v2917_v1, %v2829_v53 }
 0x4f5   :  { %v2739_v55 = vpop.f32.mrf.mxu3 }
 0x4f6   :  { %v2740_v26 = vadd.f32 %v2739_v55, %v8982_v59  ;;  %v5583_v55 = vld [vmem:[#allocation11 + $0x38] sm:$0xff]  ;;  %v8988_v59 = vld [vmem:[#allocation236_spill] sm:$0xff] }
 0x4f7   :  { %v7955_v2 = vpop.f32.mrf.mxu2  ;;  %v2831_v29 = vpop.f32.mrf.mxu0  ;;  %3741 = vmatpush.bf16.msra.mxu3 %v5583_v55 }
 0x4f8   :  { %v3257_v0 = vmax.f32 %v2740_v26, 0.0  ;;  %v2832_v24 = vadd.f32 %v2831_v29, %v637_v5  ;;  %v8987_v5 = vld [vmem:[#allocation97_spill] sm:$0xff] }
 0x4f9   :  { %v2920_v62 = vpop.f32.mrf.mxu1 }
 0x4fa   :  { %v2921_v22 = vadd.f32 %v2920_v62, %v2832_v24  ;;  %3057 = vmatmul.bf16.vlgmr.msrb.gmra.mxu3 %v8983_v32  ;;  %3146 = vmatmul.bf16.vlgmr.msrb.gmra.mxu0 %v8984_v41  ;;  %v7959_v17 = vpack.c.bf16 %v3257_v0, %v3255_v60  ;;  %v8989_v41 = vld [vmem:[#allocation256_spill] sm:$0xff] }
 0x4fc   :  { %3459 = vmatmul.bf16.vlgmr.msrb.gmra.mxu1 %v7837_v57  ;;  %v642_v57 = vadd.f32 %v8987_v5, %v7813_v11 }
 0x4fd   :  { %v2742_v13 = vpop.f32.mrf.mxu3 }
 0x4fe   :  { %v2743_v35 = vadd.f32 %v2742_v13, %v8986_v8  ;;  %v8990_v13 = vld [vmem:[#allocation257_spill] sm:$0xff] }
 0x4ff   :  { %v3009_v50 = vpop.f32.mrf.mxu2  ;;  %v2833_v44 = vpop.f32.mrf.mxu0  ;;  %v8991_v8 = vld [vmem:[#allocation101_spill] sm:$0xff] }
 0x500   :  { %v7965_v14 = vadd.f32 %v3009_v50, %v2921_v22  ;;  %v2834_v53 = vadd.f32 %v2833_v44, %v639_v27  ;;  %v3259_v0 = vmax.f32 %v2743_v35, 0.0  ;;  %v644_v50 = vadd.f32 %v8991_v8, %v7813_v11  ;;  %v8992_v44 = vld [vmem:[#allocation56_spill] sm:$0xff] }
 0x501   :  { %v2922_v1 = vpop.f32.mrf.mxu1 }
 0x502   :  { %v7967_v6 = vadd.f32 %v2922_v1, %v2834_v53 }
 0x505   :  { %v2744_v45 = vpop.f32.mrf.mxu3 }
 0x506   :  { %v2745_v26 = vadd.f32 %v2744_v45, %v8988_v59 }
 0x507   :  { %v7972_v29 = vpop.f32.mrf.mxu2  ;;  %v2836_v60 = vpop.f32.mrf.mxu0 }
 0x508   :  { %v3261_v24 = vmax.f32 %v2745_v26, 0.0  ;;  %v2837_v62 = vadd.f32 %v2836_v60, %v642_v57  ;;  %v5570_v57 = vld [vmem:[#allocation10 + $0x50] sm:$0xff]  ;;  %v8993_v60 = vld [vmem:[#allocation105_spill] sm:$0xff] }
 0x509   :  { %v2925_v22 = vpop.f32.mrf.mxu1  ;;  %3545 = vmatpush.bf16.msrb.mxu2 %v5570_v57  ;;  %v8998_v57 = vld [vmem:[#allocation239_spill] sm:$0xff] }
 0x50a   :  { %v2926_v32 = vadd.f32 %v2925_v22, %v2837_v62  ;;  %3062 = vmatmul.bf16.gmra.mxu3 %v8989_v41  ;;  %3151 = vmatmul.bf16.gmra.mxu0 %v8990_v13  ;;  %v7976_v16 = vpack.c.bf16 %v3261_v24, %v3259_v0  ;;  %v8994_v0 = vld [vmem:[#allocation60_spill] sm:$0xff] }
 0x50c   :  { %3464 = vmatmul.bf16.gmra.mxu1 %v7855_v47  ;;  %v647_v47 = vadd.f32 %v8993_v60, %v7813_v11 }
 0x50d   :  { %v2747_v27 = vpop.f32.mrf.mxu3 }
 0x50e   :  { %v2748_v53 = vadd.f32 %v2747_v27, %v8992_v44  ;;  %v8996_v44 = vld [vmem:[#allocation260_spill] sm:$0xff] }
 0x50f   :  { %v3014_v1 = vpop.f32.mrf.mxu2  ;;  %v2838_v55 = vpop.f32.mrf.mxu0 }
 0x510   :  { %v7982_v35 = vadd.f32 %v3014_v1, %v2926_v32  ;;  %v2839_v45 = vadd.f32 %v2838_v55, %v644_v50  ;;  %v3263_v41 = vmax.f32 %v2748_v53, 0.0  ;;  %v8995_v50 = vld [vmem:[#allocation259_spill] sm:$0xff] }
 0x511   :  { %v2927_v5 = vpop.f32.mrf.mxu1 }
 0x512   :  { %v7984_v59 = vadd.f32 %v2927_v5, %v2839_v45  ;;  %v8997_v45 = vld [vmem:[#allocation109_spill] sm:$0xff] }
 0x513   :  { %v649_v5 = vadd.f32 %v8997_v45, %v7813_v11 }
 0x515   :  { %v2749_v26 = vpop.f32.mrf.mxu3 }
 0x516   :  { %v2750_v24 = vadd.f32 %v2749_v26, %v8994_v0 }
 0x517   :  { %v7989_v62 = vpop.f32.mrf.mxu2  ;;  %v2841_v22 = vpop.f32.mrf.mxu0 }
 0x518   :  { %v3265_v13 = vmax.f32 %v2750_v24, 0.0  ;;  %v2842_v32 = vadd.f32 %v2841_v22, %v647_v47 }
 0x519   :  { %v2930_v27 = vpop.f32.mrf.mxu1 }
 0x51a   :  { %v2931_v8 = vadd.f32 %v2930_v27, %v2842_v32  ;;  %3067 = vmatmul.bf16.gmra.mxu3 %v8995_v50  ;;  %3156 = vmatmul.bf16.gmra.mxu0 %v8996_v44  ;;  %v7993_v1 = vpack.c.bf16 %v3265_v13, %v3263_v41  ;;  %v5582_v32 = vld [vmem:[#allocation11 + $0x30] sm:$0xff]  ;;  %v9001_v13 = vld [vmem:[#allocation113_spill] sm:$0xff]  ;;  %v9002_v27 = vld [vmem:[#allocation64_spill] sm:$0xff] }
 0x51b   :  { %3742 = vmatpush.bf16.msra.mxu3 %v5582_v32  ;;  %v9006_v32 = vld [vmem:[#allocation117_spill] sm:$0xff] }
 0x51c   :  { %3469 = vmatmul.bf16.gmra.mxu1 %v7871_v23  ;;  %v652_v23 = vadd.f32 %v9001_v13, %v7813_v11  ;;  %v9007_v13 = vld [vmem:[#allocation68_spill] sm:$0xff] }
 0x51d   :  { %v2752_v55 = vpop.f32.mrf.mxu3 }
 0x51e   :  { %v2753_v26 = vadd.f32 %v2752_v55, %v8998_v57 }
 0x51f   :  { %v3019_v60 = vpop.f32.mrf.mxu2  ;;  %v2843_v47 = vpop.f32.mrf.mxu0 }
 0x520   :  { %v7999_v53 = vadd.f32 %v3019_v60, %v2931_v8  ;;  %v2844_v0 = vadd.f32 %v2843_v47, %v649_v5  ;;  %v3267_v55 = vmax.f32 %v2753_v26, 0.0  ;;  %v9004_v5 = vld [vmem:[#allocation261_spill] sm:$0xff]  ;;  %v9005_v47 = vld [vmem:[#allocation262_spill] sm:$0xff] }
 0x521   :  { %v2932_v24 = vpop.f32.mrf.mxu1 }
 0x522   :  { %8999 = vst [vmem:[#allocation245_spill] sm:$0xff] %v7999_v53  ;;  %v8001_v22 = vadd.f32 %v2932_v24, %v2844_v0 }
 0x524   :  { %9000 = vst [vmem:[#allocation80_spill] sm:$0xff] %v8001_v22 }
 0x525   :  { %v2754_v41 = vpop.f32.mrf.mxu3 }
 0x526   :  { %v2755_v50 = vadd.f32 %v2754_v41, %v9002_v27  ;;  %v654_v41 = vadd.f32 %v9006_v32, %v7813_v11 }
 0x527   :  { %v8006_v44 = vpop.f32.mrf.mxu2  ;;  %v2846_v45 = vpop.f32.mrf.mxu0 }
 0x528   :  { %9003 = vst [vmem:[#allocation84_spill] sm:$0xff] %v8006_v44  ;;  %v3269_v57 = vmax.f32 %v2755_v50, 0.0  ;;  %v2847_v8 = vadd.f32 %v2846_v45, %v652_v23 }
 0x529   :  { %v2935_v60 = vpop.f32.mrf.mxu1 }
 0x52a   :  { %v2936_v53 = vadd.f32 %v2935_v60, %v2847_v8  ;;  %3072 = vmatmul.bf16.gmra.mxu3 %v9004_v5  ;;  %3161 = vmatmul.bf16.gmra.mxu0 %v9005_v47  ;;  %v8010_v0 = vpack.c.bf16 %v3269_v57, %v3267_v55  ;;  %v5569_v8 = vld [vmem:[#allocation10 + $0x48] sm:$0xff]  ;;  %v9009_v57 = vld [vmem:[#allocation58_spill] sm:$0xff] }
 0x52b   :  { %3546 = vmatpush.bf16.msrb.mxu2 %v5569_v8  ;;  %v9010_v5 = vld [vmem:[#allocation242_spill] sm:$0xff] }
 0x52c   :  { %3474 = vmatmul.bf16.gmra.mxu1 %v7887_v43  ;;  %v657_v43 = vadd.f32 %v9009_v57, %v7813_v11  ;;  %v9014_v8 = vld [vmem:[#allocation62_spill] sm:$0xff] }
 0x52d   :  { %v2757_v24 = vpop.f32.mrf.mxu3 }
 0x52e   :  { %v2758_v27 = vadd.f32 %v2757_v24, %v9007_v13 }
 0x52f   :  { %v3024_v44 = vpop.f32.mrf.mxu2  ;;  %v2848_v23 = vpop.f32.mrf.mxu0 }
 0x530   :  { %v8016_v26 = vadd.f32 %v3024_v44, %v2936_v53  ;;  %v2849_v50 = vadd.f32 %v2848_v23, %v654_v41  ;;  %v3271_v24 = vmax.f32 %v2758_v27, 0.0  ;;  %v9012_v41 = vld [vmem:[#allocation263_spill] sm:$0xff]  ;;  %v9013_v23 = vld [vmem:[#allocation264_spill] sm:$0xff] }
 0x531   :  { %v2937_v45 = vpop.f32.mrf.mxu1 }
 0x532   :  { %9008 = vst [vmem:[#allocation128_spill] sm:$0xff] %v8016_v26  ;;  %v8018_v60 = vadd.f32 %v2937_v45, %v2849_v50 }
 0x535   :  { %v2759_v55 = vpop.f32.mrf.mxu3 }
 0x536   :  { %v2760_v47 = vadd.f32 %v2759_v55, %v9010_v5  ;;  %v659_v55 = vadd.f32 %v9014_v8, %v7813_v11 }
 0x537   :  { %v8023_v22 = vpop.f32.mrf.mxu2  ;;  %v2851_v32 = vpop.f32.mrf.mxu0 }
 0x538   :  { %9011 = vst [vmem:[#allocation227_spill] sm:$0xff] %v8023_v22  ;;  %v3273_v13 = vmax.f32 %v2760_v47, 0.0  ;;  %v2852_v53 = vadd.f32 %v2851_v32, %v657_v43 }
 0x539   :  { %v2940_v44 = vpop.f32.mrf.mxu1 }
 0x53a   :  { %v2941_v26 = vadd.f32 %v2940_v44, %v2852_v53  ;;  %3077 = vmatmul.bf16.gmra.mxu3 %v9012_v41  ;;  %3166 = vmatmul.bf16.gmra.mxu0 %v9013_v23  ;;  %v8027_v50 = vpack.c.bf16 %v3273_v13, %v3271_v24  ;;  %v5581_v44 = vld [vmem:[#allocation11 + $0x28] sm:$0xff]  ;;  %v9017_v13 = vld [vmem:[#allocation66_spill] sm:$0xff] }
 0x53b   :  { %3743 = vmatpush.bf16.msra.mxu3 %v5581_v44  ;;  %v9018_v41 = vld [vmem:[#allocation246_spill] sm:$0xff] }
 0x53c   :  { %3479 = vmatmul.bf16.gmra.mxu1 %v7905_v19  ;;  %v662_v19 = vadd.f32 %v9017_v13, %v7813_v11  ;;  %v9022_v44 = vld [vmem:[#allocation70_spill] sm:$0xff]  ;;  %v9023_v13 = vld [vmem:[#allocation72_spill] sm:$0xff] }
 0x53d   :  { %v2762_v45 = vpop.f32.mrf.mxu3 }
 0x53e   :  { %v2763_v57 = vadd.f32 %v2762_v45, %v7776_v36 }
 0x53f   :  { %v3029_v5 = vpop.f32.mrf.mxu2  ;;  %v2853_v43 = vpop.f32.mrf.mxu0 }
 0x540   :  { %v8033_v27 = vadd.f32 %v3029_v5, %v2941_v26  ;;  %v2854_v47 = vadd.f32 %v2853_v43, %v659_v55  ;;  %v3275_v36 = vmax.f32 %v2763_v57, 0.0  ;;  %v9020_v55 = vld [vmem:[#allocation265_spill] sm:$0xff]  ;;  %v9021_v43 = vld [vmem:[#allocation266_spill] sm:$0xff] }
 0x541   :  { %v2942_v32 = vpop.f32.mrf.mxu1 }
 0x542   :  { %9015 = vst [vmem:[#allocation225_spill] sm:$0xff] %v8033_v27  ;;  %v8035_v53 = vadd.f32 %v2942_v32, %v2854_v47 }
 0x544   :  { %9016 = vst [vmem:[#allocation88_spill] sm:$0xff] %v8035_v53 }
 0x545   :  { %v2764_v24 = vpop.f32.mrf.mxu3 }
 0x546   :  { %v2765_v23 = vadd.f32 %v2764_v24, %v9018_v41  ;;  %v664_v24 = vadd.f32 %v9022_v44, %v7813_v11 }
 0x547   :  { %v8040_v22 = vpop.f32.mrf.mxu2  ;;  %v2856_v8 = vpop.f32.mrf.mxu0 }
 0x548   :  { %9019 = vst [vmem:[#allocation92_spill] sm:$0xff] %v8040_v22  ;;  %v3277_v45 = vmax.f32 %v2765_v23, 0.0  ;;  %v2857_v26 = vadd.f32 %v2856_v8, %v662_v19 }
 0x549   :  { %v2945_v5 = vpop.f32.mrf.mxu1 }
 0x54a   :  { %v2946_v27 = vadd.f32 %v2945_v5, %v2857_v26  ;;  %3082 = vmatmul.bf16.gmra.mxu3 %v9020_v55  ;;  %3171 = vmatmul.bf16.gmra.mxu0 %v9021_v43  ;;  %v8044_v47 = vpack.c.bf16 %v3277_v45, %v3275_v36  ;;  %v5568_v26 = vld [vmem:[#allocation10 + $0x40] sm:$0xff]  ;;  %v9026_v45 = vld [vmem:[#allocation74_spill] sm:$0xff]  ;;  %v9027_v55 = vld [vmem:[#allocation271_spill] sm:$0xff] }
 0x54b   :  { %3547 = vmatpush.bf16.msrb.mxu2 %v5568_v26  ;;  %v9031_v26 = vld [vmem:[#allocation78_spill] sm:$0xff] }
 0x54c   :  { %3484 = vmatmul.bf16.gmra.mxu1 %v7923_v63  ;;  %v667_v63 = vadd.f32 %v9026_v45, %v7813_v11  ;;  %v9032_v45 = vld [vmem:[#allocation272_spill] sm:$0xff] }
 0x54d   :  { %v2767_v32 = vpop.f32.mrf.mxu3 }
 0x54e   :  { %v2768_v41 = vadd.f32 %v2767_v32, %v9023_v13 }
 0x54f   :  { %v3034_v22 = vpop.f32.mrf.mxu2  ;;  %v2858_v19 = vpop.f32.mrf.mxu0 }
 0x550   :  { %v8050_v57 = vadd.f32 %v3034_v22, %v2946_v27  ;;  %v2859_v23 = vadd.f32 %v2858_v19, %v664_v24  ;;  %v3279_v32 = vmax.f32 %v2768_v41, 0.0  ;;  %v9029_v24 = vld [vmem:[#allocation268_spill] sm:$0xff]  ;;  %v9030_v19 = vld [vmem:[#allocation269_spill] sm:$0xff] }
 0x551   :  { %v2947_v8 = vpop.f32.mrf.mxu1 }
 0x552   :  { %9024 = vst [vmem:[#allocation176_spill] sm:$0xff] %v8050_v57  ;;  %v8052_v5 = vadd.f32 %v2947_v8, %v2859_v23 }
 0x554   :  { %9025 = vst [vmem:[#allocation231_spill] sm:$0xff] %v8052_v5 }
 0x555   :  { %v2769_v36 = vpop.f32.mrf.mxu3 }
 0x556   :  { %v2770_v43 = vadd.f32 %v2769_v36, %v9027_v55  ;;  %v669_v36 = vadd.f32 %v9031_v26, %v7813_v11 }
 0x557   :  { %v8057_v53 = vpop.f32.mrf.mxu2  ;;  %v2861_v44 = vpop.f32.mrf.mxu0 }
 0x558   :  { %9028 = vst [vmem:[#allocation229_spill] sm:$0xff] %v8057_v53  ;;  %v3281_v13 = vmax.f32 %v2770_v43, 0.0  ;;  %v2862_v22 = vadd.f32 %v2861_v44, %v667_v63 }
 0x559   :  { %v2950_v27 = vpop.f32.mrf.mxu1 }
 0x55a   :  { %v2951_v57 = vadd.f32 %v2950_v27, %v2862_v22  ;;  %3087 = vmatmul.bf16.gmra.mxu3 %v9029_v24  ;;  %3176 = vmatmul.bf16.gmra.mxu0 %v9030_v19  ;;  %v8061_v23 = vpack.c.bf16 %v3281_v13, %v3279_v32  ;;  %v5580_v27 = vld [vmem:[#allocation11 + $0x20] sm:$0xff]  ;;  %v9034_v13 = vld [vmem:[#allocation82_spill] sm:$0xff]  ;;  %v9035_v24 = vld [vmem:[#allocation251_spill] sm:$0xff] }
 0x55b   :  { %3744 = vmatpush.bf16.msra.mxu3 %v5580_v27  ;;  %v9038_v27 = vld [vmem:[#allocation86_spill] sm:$0xff] }
 0x55c   :  { %3489 = vmatmul.bf16.gmra.mxu1 %v7941_v49  ;;  %v672_v49 = vadd.f32 %v9034_v13, %v7813_v11 }
 0x55d   :  { %v2772_v8 = vpop.f32.mrf.mxu3 }
 0x55e   :  { %v2773_v55 = vadd.f32 %v2772_v8, %v9032_v45 }
 0x55f   :  { %v3039_v53 = vpop.f32.mrf.mxu2  ;;  %v2863_v63 = vpop.f32.mrf.mxu0 }
 0x560   :  { %v8067_v41 = vadd.f32 %v3039_v53, %v2951_v57  ;;  %v2864_v43 = vadd.f32 %v2863_v63, %v669_v36  ;;  %v3283_v8 = vmax.f32 %v2773_v55, 0.0  ;;  %v9036_v36 = vld [vmem:[#allocation248_spill] sm:$0xff]  ;;  %v9037_v63 = vld [vmem:[#allocation270_spill] sm:$0xff] }
 0x561   :  { %v2952_v44 = vpop.f32.mrf.mxu1 }
 0x562   :  { %9033 = vst [vmem:[#allocation96_spill] sm:$0xff] %v8067_v41  ;;  %v8069_v22 = vadd.f32 %v2952_v44, %v2864_v43 }
 0x565   :  { %v2774_v32 = vpop.f32.mrf.mxu3 }
 0x566   :  { %v2775_v19 = vadd.f32 %v2774_v32, %v9035_v24  ;;  %v674_v32 = vadd.f32 %v9038_v27, %v7813_v11 }
 0x567   :  { %v8074_v5 = vpop.f32.mrf.mxu2  ;;  %v2866_v26 = vpop.f32.mrf.mxu0 }
 0x568   :  { %v3285_v45 = vmax.f32 %v2775_v19, 0.0  ;;  %v2867_v53 = vadd.f32 %v2866_v26, %v672_v49 }
 0x569   :  { %v2955_v57 = vpop.f32.mrf.mxu1 }
 0x56a   :  { %v2956_v41 = vadd.f32 %v2955_v57, %v2867_v53  ;;  %3092 = vmatmul.bf16.gmra.mxu3 %v9036_v36  ;;  %3181 = vmatmul.bf16.gmra.mxu0 %v9037_v63  ;;  %v8078_v43 = vpack.c.bf16 %v3285_v45, %v3283_v8  ;;  %v9041_v57 = vld [vmem:[#allocation76_spill] sm:$0xff]  ;;  %v9042_v45 = vld [vmem:[#allocation27_spill] sm:$0xff] }
 0x56b   :  { %v8089_v36 = vperm.slane %v9041_v57, 2 }
 0x56c   :  { %3494 = vmatmul.bf16.gmra.mxu1 %v7959_v17 }
 0x56d   :  { %v2777_v44 = vpop.f32.mrf.mxu3  ;;  %v686_v63 = vadd.f32 %v9042_v45, %v8089_v36 }
 0x56e   :  { %v2778_v13 = vadd.f32 %v2777_v44, %v7817_v20 }
 0x56f   :  { %v3044_v24 = vpop.f32.mrf.mxu2  ;;  %v2868_v49 = vpop.f32.mrf.mxu0 }
 0x570   :  { %v8084_v55 = vadd.f32 %v3044_v24, %v2956_v41  ;;  %v2869_v19 = vadd.f32 %v2868_v49, %v674_v32  ;;  %v3287_v27 = vmax.f32 %v2778_v13, 0.0  ;;  %v9043_v24 = vld [vmem:[#allocation253_spill] sm:$0xff] }
 0x571   :  { %v2957_v26 = vpop.f32.mrf.mxu1 }
 0x572   :  { %9039 = vst [vmem:[#allocation100_spill] sm:$0xff] %v8084_v55  ;;  %v8086_v53 = vadd.f32 %v2957_v26, %v2869_v19 }
 0x574   :  { %9040 = vst [vmem:[#allocation183_spill] sm:$0xff] %v8086_v53 }
 0x575   :  { %v2779_v8 = vpop.f32.mrf.mxu3 }
 0x576   :  { %v2780_v17 = vadd.f32 %v2779_v8, %v7825_v34  ;;  %v9044_v34 = vld [vmem:[#allocation31_spill] sm:$0xff] }
 0x577   :  { %v3147_v11 = vpop.f32.mrf.mxu0  ;;  %v688_v19 = vadd.f32 %v9044_v34, %v8089_v36 }
 0x578   :  { %v3289_v20 = vmax.f32 %v2780_v17, 0.0  ;;  %v5579_v17 = vld [vmem:[#allocation11 + $0x18] sm:$0xff] }
 0x579   :  { %v3460_v44 = vpop.f32.mrf.mxu1  ;;  %3745 = vmatpush.bf16.msra.mxu3 %v5579_v17 }
 0x57a   :  { %v8094_v41 = vadd.f32 %v3460_v44, %v686_v63  ;;  %3097 = vmatmul.bf16.gmra.mxu3 %v9043_v24  ;;  %3186 = vmatmul.bf16.gmra.mxu0 %v8959_v4  ;;  %v8098_v32 = vpack.c.bf16 %v3289_v20, %v3287_v27  ;;  %v9045_v27 = vld [vmem:[#allocation35_spill] sm:$0xff] }
 0x57b   :  { %v691_v20 = vadd.f32 %v9045_v27, %v8089_v36 }
 0x57c   :  { %3499 = vmatmul.bf16.gmra.mxu1 %v7976_v16 }
 0x57d   :  { %v3058_v49 = vpop.f32.mrf.mxu3 }
 0x57e   :  { %v3059_v13 = vadd.f32 %v3058_v49, %v7830_v46 }
 0x57f   :  { %v3149_v26 = vpop.f32.mrf.mxu0 }
 0x580   :  { %v3148_v63 = vadd.f32 %v3147_v11, %v3059_v13 }
 0x581   :  { %v3462_v57 = vpop.f32.mrf.mxu1 }
 0x582   :  { %v8103_v8 = vadd.f32 %v3462_v57, %v688_v19  ;;  %v3228_v34 = vmax.f32 %v3148_v63, 0.0  ;;  %v9046_v19 = vld [vmem:[#allocation24_spill] sm:$0xff] }
 0x585   :  { %v3060_v45 = vpop.f32.mrf.mxu3 }
 0x586   :  { %v3061_v4 = vadd.f32 %v3060_v45, %v7835_v52  ;;  %v9047_v52 = vld [vmem:[#allocation39_spill] sm:$0xff] }
 0x587   :  { %v3152_v16 = vpop.f32.mrf.mxu0  ;;  %v693_v49 = vadd.f32 %v9047_v52, %v8089_v36  ;;  %v5591_v45 = vld [vmem:[#allocation13 + $0x38] sm:$0xff] }
 0x588   :  { %v3150_v44 = vadd.f32 %v3149_v26, %v3061_v4  ;;  %3942 = vmatpush.bf16.msra.mxu0 %v5591_v45 }
 0x589   :  { %v3465_v24 = vpop.f32.mrf.mxu1 }
 0x58a   :  { %v8109_v53 = vadd.f32 %v3465_v24, %v691_v20  ;;  %v3230_v55 = vmax.f32 %v3150_v44, 0.0  ;;  %3102 = vmatmul.bf16.gmra.mxu3 %v9046_v19  ;;  %3191 = vmatmul.bf16.gmra.mxu0 %v7560_v30 }
 0x58c   :  { %3504 = vmatmul.bf16.gmra.mxu1 %v7993_v1  ;;  %v3292_v46 = vpack.c.bf16 %v3230_v55, %v3228_v34  ;;  %v9048_v1 = vld [vmem:[#allocation43_spill] sm:$0xff] }
 0x58d   :  { %v3063_v11 = vpop.f32.mrf.mxu3  ;;  %v696_v55 = vadd.f32 %v9048_v1, %v8089_v36 }
 0x58e   :  { %3548 = vmatmul.bf16.vlgmr.msrb.gmra.mxu2 %v3292_v46  ;;  %v3064_v17 = vadd.f32 %v3063_v11, %v7846_v42  ;;  %v9049_v46 = vld [vmem:[#allocation28_spill] sm:$0xff] }
 0x58f   :  { %v3154_v57 = vpop.f32.mrf.mxu0 }
 0x590   :  { %v3153_v4 = vadd.f32 %v3152_v16, %v3064_v17  ;;  %v5578_v17 = vld [vmem:[#allocation11 + $0x10] sm:$0xff] }
 0x591   :  { %v3467_v13 = vpop.f32.mrf.mxu1  ;;  %3746 = vmatpush.bf16.msra.mxu3 %v5578_v17 }
 0x592   :  { %v8116_v26 = vadd.f32 %v3467_v13, %v693_v49  ;;  %v3232_v34 = vmax.f32 %v3153_v4, 0.0 }
 0x595   :  { %v3065_v63 = vpop.f32.mrf.mxu3 }
 0x596   :  { %v3066_v30 = vadd.f32 %v3065_v63, %v7851_v58  ;;  %v9050_v58 = vld [vmem:[#allocation47_spill] sm:$0xff] }
 0x597   :  { %v3157_v27 = vpop.f32.mrf.mxu0  ;;  %v698_v11 = vadd.f32 %v9050_v58, %v8089_v36 }
 0x598   :  { %v3155_v20 = vadd.f32 %v3154_v57, %v3066_v30 }
 0x599   :  { %v3470_v44 = vpop.f32.mrf.mxu1 }
 0x59a   :  { %v8122_v24 = vadd.f32 %v3470_v44, %v696_v55  ;;  %v3234_v19 = vmax.f32 %v3155_v20, 0.0  ;;  %3107 = vmatmul.bf16.gmra.mxu3 %v9049_v46  ;;  %3196 = vmatmul.bf16.gmra.mxu0 %v7584_v48 }
 0x59c   :  { %3509 = vmatmul.bf16.gmra.mxu1 %v8010_v0  ;;  %v3294_v42 = vpack.c.bf16 %v3234_v19, %v3232_v34  ;;  %v9051_v0 = vld [vmem:[#allocation51_spill] sm:$0xff]  ;;  %v9052_v19 = vld [vmem:[#allocation226_spill] sm:$0xff] }
 0x59d   :  { %v3068_v16 = vpop.f32.mrf.mxu3  ;;  %v701_v4 = vadd.f32 %v9051_v0, %v8089_v36 }
 0x59e   :  { %3553 = vmatmul.bf16.gmra.mxu2 %v3294_v42  ;;  %v3069_v13 = vadd.f32 %v3068_v16, %v7862_v18 }
 0x59f   :  { %v3159_v52 = vpop.f32.mrf.mxu0 }
 0x5a0   :  { %v3158_v63 = vadd.f32 %v3157_v27, %v3069_v13 }
 0x5a1   :  { %v3472_v49 = vpop.f32.mrf.mxu1 }
 0x5a2   :  { %v8129_v57 = vadd.f32 %v3472_v49, %v698_v11  ;;  %v3236_v44 = vmax.f32 %v3158_v63, 0.0 }
 0x5a5   :  { %v3070_v45 = vpop.f32.mrf.mxu3 }
 0x5a6   :  { %v3071_v48 = vadd.f32 %v3070_v45, %v7867_v33  ;;  %v9053_v33 = vld [vmem:[#allocation55_spill] sm:$0xff] }
 0x5a7   :  { %v3162_v30 = vpop.f32.mrf.mxu0  ;;  %v703_v46 = vadd.f32 %v9053_v33, %v8089_v36  ;;  %v9055_v33 = vld [vmem:[#allocation230_spill] sm:$0xff] }
 0x5a8   :  { %v3160_v1 = vadd.f32 %v3159_v52, %v3071_v48  ;;  %v5590_v52 = vld [vmem:[#allocation13 + $0x30] sm:$0xff]  ;;  %v9054_v48 = vld [vmem:[#allocation32_spill] sm:$0xff] }
 0x5a9   :  { %v3475_v55 = vpop.f32.mrf.mxu1  ;;  %3943 = vmatpush.bf16.msra.mxu0 %v5590_v52 }
 0x5aa   :  { %v8135_v20 = vadd.f32 %v3475_v55, %v701_v4  ;;  %v3238_v34 = vmax.f32 %v3160_v1, 0.0  ;;  %3112 = vmatmul.bf16.gmra.mxu3 %v9052_v19  ;;  %3201 = vmatmul.bf16.gmra.mxu0 %v7608_v31  ;;  %v5577_v55 = vld [vmem:[#allocation11 + $0x8] sm:$0xff] }
 0x5ab   :  { %3747 = vmatpush.bf16.msra.mxu3 %v5577_v55  ;;  %v9057_v55 = vld [vmem:[#allocation44_spill] sm:$0xff] }
 0x5ac   :  { %3514 = vmatmul.bf16.gmra.mxu1 %v8027_v50  ;;  %v3296_v18 = vpack.c.bf16 %v3238_v34, %v3236_v44 }
 0x5ad   :  { %v3073_v27 = vpop.f32.mrf.mxu3 }
 0x5ae   :  { %3558 = vmatmul.bf16.gmra.mxu2 %v3296_v18  ;;  %v3074_v11 = vadd.f32 %v3073_v27, %v7878_v37 }
 0x5af   :  { %v3164_v42 = vpop.f32.mrf.mxu0 }
 0x5b0   :  { %v3163_v13 = vadd.f32 %v3162_v30, %v3074_v11 }
 0x5b1   :  { %v3477_v16 = vpop.f32.mrf.mxu1 }
 0x5b2   :  { %v8142_v58 = vadd.f32 %v3477_v16, %v703_v46  ;;  %v3240_v45 = vmax.f32 %v3163_v13, 0.0 }
 0x5b5   :  { %v3075_v49 = vpop.f32.mrf.mxu3 }
 0x5b6   :  { %v3076_v31 = vadd.f32 %v3075_v49, %v7883_v10  ;;  %v2992_v10 = vadd.f32 %v7901_v40, %v7896_v54  ;;  %v5589_v40 = vld [vmem:[#allocation13 + $0x28] sm:$0xff] }
 0x5b7   :  { %v3167_v17 = vpop.f32.mrf.mxu0  ;;  %3944 = vmatpush.bf16.msra.mxu0 %v5589_v40 }
 0x5b8   :  { %v3165_v50 = vadd.f32 %v3164_v42, %v3076_v31  ;;  %v2997_v42 = vadd.f32 %v7919_v56, %v7914_v28  ;;  %v5576_v56 = vld [vmem:[#allocation11] sm:$0xff] }
 0x5b9   :  { %3748 = vmatpush.bf16.msra.mxu3 %v5576_v56 }
 0x5ba   :  { %v3242_v63 = vmax.f32 %v3165_v50, 0.0  ;;  %3117 = vmatmul.bf16.gmra.mxu3 %v9054_v48  ;;  %3206 = vmatmul.bf16.gmra.mxu0 %v7632_v12 }
 0x5bc   :  { %3519 = vmatmul.bf16.gmra.mxu1 %v8044_v47  ;;  %v3298_v0 = vpack.c.bf16 %v3242_v63, %v3240_v45  ;;  %v3002_v45 = vadd.f32 %v7937_v21, %v7932_v25  ;;  %v3007_v21 = vadd.f32 %v7955_v2, %v7950_v61 }
 0x5bd   :  { %v3078_v4 = vpop.f32.mrf.mxu3 }
 0x5be   :  { %3563 = vmatmul.bf16.gmra.mxu2 %v3298_v0  ;;  %v3079_v1 = vadd.f32 %v3078_v4, %v7894_v3 }
 0x5bf   :  { %v3169_v37 = vpop.f32.mrf.mxu0 }
 0x5c0   :  { %v3168_v44 = vadd.f32 %v3167_v17, %v3079_v1  ;;  %v9056_v17 = vld [vmem:[#allocation40_spill] sm:$0xff] }
 0x5c2   :  { %v3244_v27 = vmax.f32 %v3168_v44, 0.0 }
 0x5c5   :  { %v3080_v30 = vpop.f32.mrf.mxu3 }
 0x5c6   :  { %v3081_v34 = vadd.f32 %v3080_v30, %v2992_v10  ;;  %v5588_v30 = vld [vmem:[#allocation13 + $0x20] sm:$0xff] }
 0x5c7   :  { %v3172_v19 = vpop.f32.mrf.mxu0  ;;  %3945 = vmatpush.bf16.msra.mxu0 %v5588_v30 }
 0x5c8   :  { %v3170_v18 = vadd.f32 %v3169_v37, %v3081_v34 }
 0x5ca   :  { %v3246_v12 = vmax.f32 %v3170_v18, 0.0  ;;  %3122 = vmatmul.bf16.gmra.mxu3 %v9055_v33  ;;  %3211 = vmatmul.bf16.gmra.mxu0 %v7656_v51 }
 0x5cc   :  { %3524 = vmatmul.bf16.gmra.mxu1 %v8061_v23  ;;  %v3300_v47 = vpack.c.bf16 %v3246_v12, %v3244_v27 }
 0x5cd   :  { %v3083_v3 = vpop.f32.mrf.mxu3 }
 0x5ce   :  { %3568 = vmatmul.bf16.gmra.mxu2 %v3300_v47  ;;  %v3084_v54 = vadd.f32 %v3083_v3, %v7912_v9 }
 0x5cf   :  { %v3174_v46 = vpop.f32.mrf.mxu0 }
 0x5d0   :  { %v3173_v11 = vadd.f32 %v3172_v19, %v3084_v54 }
 0x5d2   :  { %v3248_v31 = vmax.f32 %v3173_v11, 0.0 }
 0x5d5   :  { %v3085_v16 = vpop.f32.mrf.mxu3 }
 0x5d6   :  { %v3086_v52 = vadd.f32 %v3085_v16, %v2997_v42  ;;  %v8173_v42 = vpop.f32.mrf.mxu2 }
 0x5d7   :  { %v3177_v49 = vpop.f32.mrf.mxu0 }
 0x5d8   :  { %v3175_v13 = vadd.f32 %v3174_v46, %v3086_v52 }
 0x5da   :  { %v3250_v51 = vmax.f32 %v3175_v13, 0.0  ;;  %3127 = vmatmul.bf16.gmra.mxu3 %v9056_v17  ;;  %3216 = vmatmul.bf16.gmra.mxu0 %v7680_v38 }
 0x5dc   :  { %3529 = vmatmul.bf16.gmra.mxu1 %v8078_v43  ;;  %v3302_v23 = vpack.c.bf16 %v3250_v51, %v3248_v31 }
 0x5dd   :  { %v3088_v9 = vpop.f32.mrf.mxu3 }
 0x5de   :  { %3573 = vmatmul.bf16.gmra.mxu2 %v3302_v23  ;;  %v3089_v28 = vadd.f32 %v3088_v9, %v7930_v7 }
 0x5df   :  { %v3179_v50 = vpop.f32.mrf.mxu0 }
 0x5e0   :  { %v3178_v48 = vadd.f32 %v3177_v49, %v3089_v28 }
 0x5e2   :  { %v3252_v1 = vmax.f32 %v3178_v48, 0.0 }
 0x5e5   :  { %v3090_v63 = vpop.f32.mrf.mxu3 }
 0x5e6   :  { %v3091_v0 = vadd.f32 %v3090_v63, %v3002_v45 }
 0x5e7   :  { %v3182_v4 = vpop.f32.mrf.mxu0 }
 0x5e8   :  { %v3180_v37 = vadd.f32 %v3179_v50, %v3091_v0 }
 0x5ea   :  { %v3254_v38 = vmax.f32 %v3180_v37, 0.0  ;;  %3132 = vmatmul.bf16.gmra.mxu3 %v9057_v55  ;;  %3221 = vmatmul.bf16.gmra.mxu0 %v7704_v15  ;;  %v9058_v55 = vld [vmem:[#allocation245_spill] sm:$0xff] }
 0x5ec   :  { %3534 = vmatmul.bf16.gmra.mxu1 %v8098_v32  ;;  %v3304_v43 = vpack.c.bf16 %v3254_v38, %v3252_v1 }
 0x5ed   :  { %v3093_v7 = vpop.f32.mrf.mxu3 }
 0x5ee   :  { %3578 = vmatmul.bf16.gmra.mxu2 %v3304_v43  ;;  %v3094_v25 = vadd.f32 %v3093_v7, %v7948_v39  ;;  %v3012_v39 = vadd.f32 %v7972_v29, %v7967_v6  ;;  %v5587_v6 = vld [vmem:[#allocation13 + $0x18] sm:$0xff]  ;;  %v9059_v7 = vld [vmem:[#allocation80_spill] sm:$0xff] }
 0x5ef   :  { %v3184_v10 = vpop.f32.mrf.mxu0  ;;  %3946 = vmatpush.bf16.msra.mxu0 %v5587_v6 }
 0x5f0   :  { %v3183_v34 = vadd.f32 %v3182_v4, %v3094_v25 }
 0x5f2   :  { %v3256_v12 = vmax.f32 %v3183_v34, 0.0 }
 0x5f5   :  { %v3095_v44 = vpop.f32.mrf.mxu3 }
 0x5f6   :  { %v3096_v19 = vadd.f32 %v3095_v44, %v3007_v21 }
 0x5f7   :  { %v3187_v18 = vpop.f32.mrf.mxu0 }
 0x5f8   :  { %v3185_v27 = vadd.f32 %v3184_v10, %v3096_v19  ;;  %v9060_v10 = vld [vmem:[#allocation84_spill] sm:$0xff] }
 0x5f9   :  { %v3022_v25 = vadd.f32 %v9060_v10, %v9059_v7 }
 0x5fa   :  { %v3258_v15 = vmax.f32 %v3185_v27, 0.0 }
 0x5fc   :  { %v3306_v33 = vpack.c.bf16 %v3258_v15, %v3256_v12 }
 0x5fd   :  { %v3098_v32 = vpop.f32.mrf.mxu3 }
 0x5fe   :  { %3583 = vmatmul.bf16.gmra.mxu2 %v3306_v33  ;;  %v3099_v3 = vadd.f32 %v3098_v32, %v7965_v14  ;;  %v3017_v14 = vadd.f32 %v7989_v62, %v7984_v59  ;;  %v8180_v59 = vpop.f32.mrf.mxu1 }
 0x5ff   :  { %v3189_v47 = vpop.f32.mrf.mxu0 }
 0x600   :  { %v3188_v61 = vadd.f32 %v3187_v18, %v3099_v3 }
 0x602   :  { %v3260_v16 = vmax.f32 %v3188_v61, 0.0 }
 0x605   :  { %v3100_v46 = vpop.f32.mrf.mxu3 }
 0x606   :  { %v3101_v2 = vadd.f32 %v3100_v46, %v3012_v39  ;;  %v8186_v18 = vpop.f32.mrf.mxu1 }
 0x607   :  { %v3192_v54 = vpop.f32.mrf.mxu0 }
 0x608   :  { %v3190_v40 = vadd.f32 %v3189_v47, %v3101_v2 }
 0x60a   :  { %v3262_v11 = vmax.f32 %v3190_v40, 0.0 }
 0x60c   :  { %v3308_v52 = vpack.c.bf16 %v3262_v11, %v3260_v16  ;;  %v9062_v16 = vld [vmem:[#allocation227_spill] sm:$0xff] }
 0x60d   :  { %v3103_v49 = vpop.f32.mrf.mxu3  ;;  %v3027_v11 = vadd.f32 %v9062_v16, %v8018_v60 }
 0x60e   :  { %3588 = vmatmul.bf16.gmra.mxu2 %v3308_v52  ;;  %v3104_v51 = vadd.f32 %v3103_v49, %v7982_v35  ;;  %v5586_v52 = vld [vmem:[#allocation13 + $0x10] sm:$0xff] }
 0x60f   :  { %v3194_v13 = vpop.f32.mrf.mxu0  ;;  %3947 = vmatpush.bf16.msra.mxu0 %v5586_v52 }
 0x610   :  { %v3193_v17 = vadd.f32 %v3192_v54, %v3104_v51  ;;  %v9061_v54 = vld [vmem:[#allocation128_spill] sm:$0xff] }
 0x611   :  { %v3549_v31 = vpop.f32.mrf.mxu2 }
 0x612   :  { %v3550_v50 = vadd.f32 %v3549_v31, %v8094_v41  ;;  %v3264_v45 = vmax.f32 %v3193_v17, 0.0  ;;  %v5599_v41 = vld [vmem:[#allocation14 + $0x38] sm:$0xff] }
 0x613   :  { %4143 = vmatpush.bf16.msra.mxu1 %v5599_v41 }
 0x614   :  { %v3629_v0 = vmax.f32 %v3550_v50, 0.0 }
 0x615   :  { %v3105_v29 = vpop.f32.mrf.mxu3 }
 0x616   :  { %v3106_v23 = vadd.f32 %v3105_v29, %v3017_v14 }
 0x617   :  { %v3197_v9 = vpop.f32.mrf.mxu0 }
 0x618   :  { %v3195_v28 = vadd.f32 %v3194_v13, %v3106_v23 }
 0x619   :  { %v3551_v56 = vpop.f32.mrf.mxu2 }
 0x61a   :  { %v3266_v63 = vmax.f32 %v3195_v28, 0.0  ;;  %v3552_v48 = vadd.f32 %v3551_v56, %v8103_v8 }
 0x61c   :  { %v3630_v4 = vmax.f32 %v3552_v48, 0.0  ;;  %v3310_v35 = vpack.c.bf16 %v3266_v63, %v3264_v45 }
 0x61d   :  { %v3108_v37 = vpop.f32.mrf.mxu3 }
 0x61e   :  { %v3661_v1 = vpack.c.bf16 %v3630_v4, %v3629_v0  ;;  %3593 = vmatmul.bf16.gmra.mxu2 %v3310_v35  ;;  %v3109_v43 = vadd.f32 %v3108_v37, %v9058_v55  ;;  %v9063_v0 = vld [vmem:[#allocation225_spill] sm:$0xff]  ;;  %v9064_v35 = vld [vmem:[#allocation88_spill] sm:$0xff] }
 0x61f   :  { %v3199_v62 = vpop.f32.mrf.mxu0  ;;  %v9065_v37 = vld [vmem:[#allocation92_spill] sm:$0xff] }
 0x620   :  { %3749 = vmatmul.bf16.vlgmr.msra.gmra.mxu3 %v3661_v1  ;;  %v3198_v8 = vadd.f32 %v3197_v9, %v3109_v43  ;;  %v3032_v1 = vadd.f32 %v9065_v37, %v9064_v35 }
 0x621   :  { %v3554_v38 = vpop.f32.mrf.mxu2 }
 0x622   :  { %v3555_v34 = vadd.f32 %v3554_v38, %v8109_v53  ;;  %v3268_v12 = vmax.f32 %v3198_v8, 0.0  ;;  %v8190_v53 = vpop.f32.mrf.mxu1 }
 0x624   :  { %v3631_v32 = vmax.f32 %v3555_v34, 0.0 }
 0x625   :  { %v3110_v21 = vpop.f32.mrf.mxu3 }
 0x626   :  { %v3111_v30 = vadd.f32 %v3110_v21, %v3022_v25 }
 0x627   :  { %v3202_v44 = vpop.f32.mrf.mxu0 }
 0x628   :  { %v3200_v19 = vadd.f32 %v3199_v62, %v3111_v30 }
 0x629   :  { %v3556_v27 = vpop.f32.mrf.mxu2 }
 0x62a   :  { %v3270_v15 = vmax.f32 %v3200_v19, 0.0  ;;  %v3557_v33 = vadd.f32 %v3556_v27, %v8116_v26  ;;  %v8196_v56 = vpop.f32.mrf.mxu1 }
 0x62c   :  { %v3632_v47 = vmax.f32 %v3557_v33, 0.0  ;;  %v3312_v3 = vpack.c.bf16 %v3270_v15, %v3268_v12 }
 0x62d   :  { %v3113_v39 = vpop.f32.mrf.mxu3 }
 0x62e   :  { %3598 = vmatmul.bf16.gmra.mxu2 %v3312_v3  ;;  %v3662_v46 = vpack.c.bf16 %v3632_v47, %v3631_v32  ;;  %v3114_v40 = vadd.f32 %v3113_v39, %v9061_v54  ;;  %v9066_v32 = vld [vmem:[#allocation176_spill] sm:$0xff]  ;;  %v9068_v39 = vld [vmem:[#allocation231_spill] sm:$0xff] }
 0x62f   :  { %v3204_v61 = vpop.f32.mrf.mxu0  ;;  %v9070_v54 = vld [vmem:[#allocation63_spill] sm:$0xff] }
 0x630   :  { %3754 = vmatmul.bf16.gmra.mxu3 %v3662_v46  ;;  %v3203_v13 = vadd.f32 %v3202_v44, %v3114_v40  ;;  %v9069_v46 = vld [vmem:[#allocation229_spill] sm:$0xff]  ;;  %v708_v40 = vadd.f32 %v9070_v54, %v8089_v36 }
 0x631   :  { %v3559_v2 = vpop.f32.mrf.mxu2 }
 0x632   :  { %v3560_v51 = vadd.f32 %v3559_v2, %v8122_v24  ;;  %v3272_v29 = vmax.f32 %v3203_v13, 0.0  ;;  %v5598_v24 = vld [vmem:[#allocation14 + $0x30] sm:$0xff]  ;;  %v8201_v55 = vpop.f32.mrf.mxu1 }
 0x633   :  { %4144 = vmatpush.bf16.msra.mxu1 %v5598_v24  ;;  %v3042_v24 = vadd.f32 %v8074_v5, %v8069_v22 }
 0x634   :  { %v3633_v9 = vmax.f32 %v3560_v51, 0.0 }
 0x635   :  { %v3115_v49 = vpop.f32.mrf.mxu3 }
 0x636   :  { %v3116_v26 = vadd.f32 %v3115_v49, %v3027_v11  ;;  %v3483_v49 = vadd.f32 %v8186_v18, %v708_v40  ;;  %v9071_v18 = vld [vmem:[#allocation96_spill] sm:$0xff] }
 0x637   :  { %v3207_v31 = vpop.f32.mrf.mxu0 }
 0x638   :  { %v3205_v14 = vadd.f32 %v3204_v61, %v3116_v26  ;;  %v3037_v61 = vadd.f32 %v9069_v46, %v9068_v39  ;;  %v5584_v39 = vld [vmem:[#allocation13] sm:$0xff] }
 0x639   :  { %v3561_v6 = vpop.f32.mrf.mxu2 }
 0x63a   :  { %v3274_v17 = vmax.f32 %v3205_v14, 0.0  ;;  %v3562_v23 = vadd.f32 %v3561_v6, %v8129_v57  ;;  %v8205_v15 = vpop.f32.mrf.mxu1 }
 0x63c   :  { %v3634_v50 = vmax.f32 %v3562_v23, 0.0  ;;  %v3314_v28 = vpack.c.bf16 %v3274_v17, %v3272_v29 }
 0x63d   :  { %v3118_v60 = vpop.f32.mrf.mxu3 }
 0x63e   :  { %3603 = vmatmul.bf16.gmra.mxu2 %v3314_v28  ;;  %v3663_v45 = vpack.c.bf16 %v3634_v50, %v3633_v9  ;;  %v3119_v4 = vadd.f32 %v3118_v60, %v9063_v0  ;;  %v5597_v60 = vld [vmem:[#allocation14 + $0x28] sm:$0xff]  ;;  %v9072_v0 = vld [vmem:[#allocation67_spill] sm:$0xff] }
 0x63f   :  { %v3209_v63 = vpop.f32.mrf.mxu0  ;;  %4145 = vmatpush.bf16.msra.mxu1 %v5597_v60 }
 0x640   :  { %3759 = vmatmul.bf16.gmra.mxu3 %v3663_v45  ;;  %v3208_v57 = vadd.f32 %v3207_v31, %v3119_v4  ;;  %v711_v4 = vadd.f32 %v9072_v0, %v8089_v36 }
 0x641   :  { %v3564_v48 = vpop.f32.mrf.mxu2 }
 0x642   :  { %v3565_v41 = vadd.f32 %v3564_v48, %v8135_v20  ;;  %v3276_v25 = vmax.f32 %v3208_v57, 0.0  ;;  %v9067_v20 = vld [vmem:[#allocation59_spill] sm:$0xff]  ;;  %v8216_v17 = vpop.f32.mrf.mxu1  ;;  %v3486_v57 = vadd.f32 %v8190_v53, %v711_v4 }
 0x643   :  { %v706_v3 = vadd.f32 %v9067_v20, %v8089_v36  ;;  %v9076_v20 = vld [vmem:[#allocation183_spill] sm:$0xff] }
 0x644   :  { %v3635_v30 = vmax.f32 %v3565_v41, 0.0 }
 0x645   :  { %v3120_v62 = vpop.f32.mrf.mxu3  ;;  %v3481_v16 = vadd.f32 %v8180_v59, %v706_v3  ;;  %v3047_v3 = vadd.f32 %v8173_v42, %v9076_v20  ;;  %v9084_v20 = vld [vmem:[#allocation122_spill] sm:$0xff] }
 0x646   :  { %v3121_v38 = vadd.f32 %v3120_v62, %v3032_v1  ;;  %v9073_v1 = vld [vmem:[#allocation71_spill] sm:$0xff] }
 0x647   :  { %v3212_v43 = vpop.f32.mrf.mxu0  ;;  %v713_v62 = vadd.f32 %v9073_v1, %v8089_v36 }
 0x648   :  { %v3210_v7 = vadd.f32 %v3209_v63, %v3121_v38 }
 0x649   :  { %v3566_v10 = vpop.f32.mrf.mxu2  ;;  %v3488_v41 = vadd.f32 %v8196_v56, %v713_v62  ;;  %v9075_v56 = vld [vmem:[#allocation75_spill] sm:$0xff] }
 0x64a   :  { %v3278_v21 = vmax.f32 %v3210_v7, 0.0  ;;  %v3567_v8 = vadd.f32 %v3566_v10, %v8142_v58  ;;  %v5585_v58 = vld [vmem:[#allocation13 + $0x8] sm:$0xff]  ;;  %v3497_v35 = vpop.f32.mrf.mxu1 }
 0x64b   :  { %3948 = vmatpush.bf16.msra.mxu0 %v5585_v58 }
 0x64c   :  { %v3636_v44 = vmax.f32 %v3567_v8, 0.0  ;;  %v3316_v34 = vpack.c.bf16 %v3278_v21, %v3276_v25 }
 0x64d   :  { %v3123_v19 = vpop.f32.mrf.mxu3 }
 0x64e   :  { %3608 = vmatmul.bf16.gmra.mxu2 %v3316_v34  ;;  %v3664_v27 = vpack.c.bf16 %v3636_v44, %v3635_v30  ;;  %v3124_v47 = vadd.f32 %v3123_v19, %v9066_v32 }
 0x64f   :  { %v3214_v12 = vpop.f32.mrf.mxu0  ;;  %3949 = vmatpush.bf16.msra.mxu0 %v5584_v39 }
 0x650   :  { %3764 = vmatmul.bf16.gmra.mxu3 %v3664_v27  ;;  %v3213_v11 = vadd.f32 %v3212_v43, %v3124_v47  ;;  %v716_v47 = vadd.f32 %v9075_v56, %v8089_v36 }
 0x651   :  { %v3569_v33 = vpop.f32.mrf.mxu2 }
 0x652   :  { %v3570_v13 = vadd.f32 %v3569_v33, %v3481_v16  ;;  %v3280_v14 = vmax.f32 %v3213_v11, 0.0  ;;  %v9074_v33 = vld [vmem:[#allocation100_spill] sm:$0xff] }
 0x654   :  { %v3637_v23 = vmax.f32 %v3570_v13, 0.0 }
 0x655   :  { %v3125_v2 = vpop.f32.mrf.mxu3 }
 0x656   :  { %v3126_v52 = vadd.f32 %v3125_v2, %v3037_v61  ;;  %v9077_v61 = vld [vmem:[#allocation79_spill] sm:$0xff]  ;;  %v3491_v2 = vadd.f32 %v8201_v55, %v716_v47 }
 0x657   :  { %v3217_v31 = vpop.f32.mrf.mxu0  ;;  %v718_v58 = vadd.f32 %v9077_v61, %v8089_v36 }
 0x658   :  { %v3215_v26 = vadd.f32 %v3214_v12, %v3126_v52  ;;  %v3500_v12 = vpop.f32.mrf.mxu1 }
 0x659   :  { %v3571_v51 = vpop.f32.mrf.mxu2  ;;  %v3493_v11 = vadd.f32 %v8205_v15, %v718_v58  ;;  %v9085_v58 = vld [vmem:[#allocation125_spill] sm:$0xff] }
 0x65a   :  { %v3282_v6 = vmax.f32 %v3215_v26, 0.0  ;;  %v3572_v29 = vadd.f32 %v3571_v51, %v3483_v49 }
 0x65c   :  { %v3638_v9 = vmax.f32 %v3572_v29, 0.0  ;;  %v3318_v50 = vpack.c.bf16 %v3282_v6, %v3280_v14 }
 0x65d   :  { %v3128_v28 = vpop.f32.mrf.mxu3 }
 0x65e   :  { %3613 = vmatmul.bf16.gmra.mxu2 %v3318_v50  ;;  %v3665_v59 = vpack.c.bf16 %v3638_v9, %v3637_v23  ;;  %v3129_v63 = vadd.f32 %v3128_v28, %v9071_v18  ;;  %v5596_v23 = vld [vmem:[#allocation14 + $0x20] sm:$0xff]  ;;  %v9078_v28 = vld [vmem:[#allocation83_spill] sm:$0xff] }
 0x65f   :  { %v3219_v48 = vpop.f32.mrf.mxu0  ;;  %4146 = vmatpush.bf16.msra.mxu1 %v5596_v23  ;;  %v721_v15 = vadd.f32 %v9078_v28, %v8089_v36  ;;  %v9086_v23 = vld [vmem:[#allocation107_spill] sm:$0xff] }
 0x660   :  { %3769 = vmatmul.bf16.gmra.mxu3 %v3665_v59  ;;  %v3218_v38 = vadd.f32 %v3217_v31, %v3129_v63  ;;  %v3502_v13 = vpop.f32.mrf.mxu1  ;;  %v9079_v59 = vld [vmem:[#allocation87_spill] sm:$0xff] }
 0x661   :  { %v3574_v45 = vpop.f32.mrf.mxu2  ;;  %v723_v60 = vadd.f32 %v9079_v59, %v8089_v36  ;;  %v9088_v59 = vld [vmem:[#allocation129_spill] sm:$0xff] }
 0x662   :  { %v3575_v7 = vadd.f32 %v3574_v45, %v3486_v57  ;;  %v3284_v21 = vmax.f32 %v3218_v38, 0.0  ;;  %v3496_v45 = vadd.f32 %v8216_v17, %v721_v15  ;;  %v9080_v57 = vld [vmem:[#allocation91_spill] sm:$0xff] }
 0x663   :  { %v3498_v18 = vadd.f32 %v3497_v35, %v723_v60  ;;  %v726_v38 = vadd.f32 %v9080_v57, %v8089_v36 }
 0x664   :  { %v3639_v44 = vmax.f32 %v3575_v7, 0.0 }
 0x665   :  { %v3130_v37 = vpop.f32.mrf.mxu3  ;;  %v3501_v7 = vadd.f32 %v3500_v12, %v726_v38 }
 0x666   :  { %v3131_v43 = vadd.f32 %v3130_v37, %v3042_v24 }
 0x667   :  { %v3222_v22 = vpop.f32.mrf.mxu0 }
 0x668   :  { %v3220_v10 = vadd.f32 %v3219_v48, %v3131_v43  ;;  %v3505_v50 = vpop.f32.mrf.mxu1  ;;  %v9081_v43 = vld [vmem:[#allocation95_spill] sm:$0xff] }
 0x669   :  { %v3576_v25 = vpop.f32.mrf.mxu2 }
 0x66a   :  { %v3286_v8 = vmax.f32 %v3220_v10, 0.0  ;;  %v3577_v30 = vadd.f32 %v3576_v25, %v3488_v41  ;;  %v728_v41 = vadd.f32 %v9081_v43, %v8089_v36 }
 0x66c   :  { %v3640_v34 = vmax.f32 %v3577_v30, 0.0  ;;  %v3320_v5 = vpack.c.bf16 %v3286_v8, %v3284_v21  ;;  %v3503_v25 = vadd.f32 %v3502_v13, %v728_v41 }
 0x66d   :  { %v3133_v19 = vpop.f32.mrf.mxu3 }
 0x66e   :  { %3618 = vmatmul.bf16.gmra.mxu2 %v3320_v5  ;;  %v3666_v27 = vpack.c.bf16 %v3640_v34, %v3639_v44  ;;  %v3134_v32 = vadd.f32 %v3133_v19, %v9074_v33  ;;  %v5595_v34 = vld [vmem:[#allocation14 + $0x18] sm:$0xff] }
 0x66f   :  { %v3224_v16 = vpop.f32.mrf.mxu0  ;;  %4147 = vmatpush.bf16.msra.mxu1 %v5595_v34  ;;  %v8247_v33 = vld [vmem:[#allocation7] sm:$0x3f] }
 0x670   :  { %3774 = vmatmul.bf16.gmra.mxu3 %v3666_v27  ;;  %v3223_v54 = vadd.f32 %v3222_v22, %v3134_v32  ;;  %v3507_v37 = vpop.f32.mrf.mxu1  ;;  %v9082_v27 = vld [vmem:[#allocation99_spill] sm:$0xff]  ;;  %v8250_v12 = vperm.slane %v8247_v33, 3 }
 0x671   :  { %v3579_v53 = vpop.f32.mrf.mxu2  ;;  %v9083_v32 = vld [vmem:[#allocation103_spill] sm:$0xff] }
 0x672   :  { %v3580_v52 = vadd.f32 %v3579_v53, %v3491_v2  ;;  %v3288_v31 = vmax.f32 %v3223_v54, 0.0  ;;  %v731_v53 = vadd.f32 %v9082_v27, %v8089_v36  ;;  %v733_v56 = vadd.f32 %v9083_v32, %v8089_v36 }
 0x673   :  { %v777_v2 = vadd.f32 %v9085_v58, %v8250_v12  ;;  %v780_v60 = vadd.f32 %v9088_v59, %v8250_v12 }
 0x674   :  { %v3641_v14 = vmax.f32 %v3580_v52, 0.0  ;;  %v3506_v47 = vadd.f32 %v3505_v50, %v731_v53  ;;  %v3508_v39 = vadd.f32 %v3507_v37, %v733_v56  ;;  %v9087_v50 = vld [vmem:[#allocation111_spill] sm:$0xff]  ;;  %v9093_v56 = vld [vmem:[#allocation138_spill] sm:$0xff] }
 0x675   :  { %v3135_v46 = vpop.f32.mrf.mxu3  ;;  %v738_v28 = vadd.f32 %v9087_v50, %v8089_v36  ;;  %v9097_v50 = vld [vmem:[#allocation144_spill] sm:$0xff] }
 0x676   :  { %v3136_v40 = vadd.f32 %v3135_v46, %v3047_v3  ;;  %v775_v3 = vadd.f32 %v9084_v20, %v8250_v12 }
 0x678   :  { %v3225_v49 = vadd.f32 %v3224_v16, %v3136_v40  ;;  %v3510_v10 = vpop.f32.mrf.mxu1 }
 0x679   :  { %v3581_v26 = vpop.f32.mrf.mxu2 }
 0x67a   :  { %v3290_v51 = vmax.f32 %v3225_v49, 0.0  ;;  %v3582_v42 = vadd.f32 %v3581_v26, %v3493_v11  ;;  %v5607_v26 = vld [vmem:[#allocation16 + $0x38] sm:$0xff] }
 0x67b   :  { %4348 = vmatpush.bf16.msra.mxu2 %v5607_v26  ;;  %v9094_v26 = vld [vmem:[#allocation90_spill] sm:$0xff] }
 0x67c   :  { %v3642_v6 = vmax.f32 %v3582_v42, 0.0  ;;  %v3322_v29 = vpack.c.bf16 %v3290_v51, %v3288_v31 }
 0x67e   :  { %3623 = vmatmul.bf16.gmra.mxu2 %v3322_v29  ;;  %v3667_v9 = vpack.c.bf16 %v3642_v6, %v3641_v14 }
 0x680   :  { %3779 = vmatmul.bf16.gmra.mxu3 %v3667_v9  ;;  %v3512_v5 = vpop.f32.mrf.mxu1  ;;  %v736_v9 = vadd.f32 %v9086_v23, %v8089_v36 }
 0x681   :  { %v3584_v55 = vpop.f32.mrf.mxu2 }
 0x682   :  { %v3585_v63 = vadd.f32 %v3584_v55, %v3496_v45  ;;  %v3511_v15 = vadd.f32 %v3510_v10, %v736_v9  ;;  %v3513_v45 = vadd.f32 %v3512_v5, %v738_v28  ;;  %v9092_v5 = vld [vmem:[#allocation135_spill] sm:$0xff]  ;;  %v792_v28 = vadd.f32 %v9097_v50, %v8250_v12 }
 0x684   :  { %v3643_v4 = vmax.f32 %v3585_v63, 0.0 }
 0x688   :  { %v3515_v16 = vpop.f32.mrf.mxu1 }
 0x689   :  { %v3586_v48 = vpop.f32.mrf.mxu2 }
 0x68a   :  { %v3587_v0 = vadd.f32 %v3586_v48, %v3498_v18  ;;  %v9089_v48 = vld [vmem:[#allocation132_spill] sm:$0xff] }
 0x68c   :  { %v3644_v24 = vmax.f32 %v3587_v0, 0.0  ;;  %v782_v0 = vadd.f32 %v9089_v48, %v8250_v12 }
 0x68e   :  { %v3668_v1 = vpack.c.bf16 %v3644_v24, %v3643_v4 }
 0x690   :  { %3784 = vmatmul.bf16.gmra.mxu3 %v3668_v1  ;;  %v3517_v55 = vpop.f32.mrf.mxu1 }
 0x691   :  { %v3589_v62 = vpop.f32.mrf.mxu2 }
 0x692   :  { %v3590_v17 = vadd.f32 %v3589_v62, %v3501_v7  ;;  %v5594_v7 = vld [vmem:[#allocation14 + $0x10] sm:$0xff] }
 0x693   :  { %4148 = vmatpush.bf16.msra.mxu1 %v5594_v7 }
 0x694   :  { %v3645_v8 = vmax.f32 %v3590_v17, 0.0 }
 0x698   :  { %v3520_v10 = vpop.f32.mrf.mxu1 }
 0x699   :  { %v3591_v35 = vpop.f32.mrf.mxu2 }
 0x69a   :  { %v3592_v21 = vadd.f32 %v3591_v35, %v3503_v25 }
 0x69c   :  { %v3646_v30 = vmax.f32 %v3592_v21, 0.0  ;;  %v9090_v21 = vld [vmem:[#allocation115_spill] sm:$0xff] }
 0x69e   :  { %v3669_v44 = vpack.c.bf16 %v3646_v30, %v3645_v8  ;;  %v741_v8 = vadd.f32 %v9090_v21, %v8089_v36  ;;  %v9091_v30 = vld [vmem:[#allocation119_spill] sm:$0xff] }
 0x6a0   :  { %3789 = vmatmul.bf16.gmra.mxu3 %v3669_v44  ;;  %v743_v44 = vadd.f32 %v9091_v30, %v8089_v36  ;;  %v3516_v34 = vadd.f32 %v3515_v16, %v741_v8  ;;  %v3522_v53 = vpop.f32.mrf.mxu1 }
 0x6a1   :  { %v3594_v22 = vpop.f32.mrf.mxu2 }
 0x6a2   :  { %v3595_v46 = vadd.f32 %v3594_v22, %v3506_v47  ;;  %v785_v22 = vadd.f32 %v9092_v5, %v8250_v12  ;;  %v787_v47 = vadd.f32 %v9093_v56, %v8250_v12  ;;  %v5605_v56 = vld [vmem:[#allocation16 + $0x28] sm:$0xff] }
 0x6a3   :  { %v3750_v19 = vpop.f32.mrf.mxu3 }
 0x6a4   :  { %v3751_v54 = vadd.f32 %v3750_v19, %v775_v3  ;;  %v3647_v52 = vmax.f32 %v3595_v46, 0.0  ;;  %v3518_v19 = vadd.f32 %v3517_v55, %v743_v44  ;;  %v9101_v44 = vld [vmem:[#allocation150_spill] sm:$0xff] }
 0x6a6   :  { %v3830_v31 = vmax.f32 %v3751_v54, 0.0 }
 0x6a9   :  { %v3596_v61 = vpop.f32.mrf.mxu2 }
 0x6aa   :  { %v3597_v40 = vadd.f32 %v3596_v61, %v3508_v39 }
 0x6ab   :  { %v3752_v11 = vpop.f32.mrf.mxu3 }
 0x6ac   :  { %v3648_v49 = vmax.f32 %v3597_v40, 0.0  ;;  %v3753_v13 = vadd.f32 %v3752_v11, %v777_v2  ;;  %v5606_v2 = vld [vmem:[#allocation16 + $0x30] sm:$0xff] }
 0x6ad   :  { %4349 = vmatpush.bf16.msra.mxu2 %v5606_v2  ;;  %v9102_v2 = vld [vmem:[#allocation106_spill] sm:$0xff] }
 0x6ae   :  { %v3831_v51 = vmax.f32 %v3753_v13, 0.0  ;;  %v3670_v42 = vpack.c.bf16 %v3648_v49, %v3647_v52  ;;  %v3525_v49 = vpop.f32.mrf.mxu1 }
 0x6b0   :  { %v3862_v14 = vpack.c.bf16 %v3831_v51, %v3830_v31  ;;  %3794 = vmatmul.bf16.gmra.mxu3 %v3670_v42  ;;  %v746_v31 = vadd.f32 %v9094_v26, %v8089_v36  ;;  %v9095_v51 = vld [vmem:[#allocation94_spill] sm:$0xff] }
 0x6b1   :  { %v3599_v6 = vpop.f32.mrf.mxu2  ;;  %v748_v42 = vadd.f32 %v9095_v51, %v8089_v36  ;;  %4350 = vmatpush.bf16.msra.mxu2 %v5605_v56  ;;  %v9105_v51 = vld [vmem:[#allocation156_spill] sm:$0xff] }
 0x6b2   :  { %3950 = vmatmul.bf16.vlgmr.msra.gmra.mxu0 %v3862_v14  ;;  %v3600_v18 = vadd.f32 %v3599_v6, %v3511_v15  ;;  %v3521_v14 = vadd.f32 %v3520_v10, %v746_v31  ;;  %v9096_v6 = vld [vmem:[#allocation141_spill] sm:$0xff] }
 0x6b3   :  { %v3755_v29 = vpop.f32.mrf.mxu3  ;;  %v3523_v23 = vadd.f32 %v3522_v53, %v748_v42  ;;  %v802_v42 = vadd.f32 %v9105_v51, %v8250_v12 }
 0x6b4   :  { %v3756_v4 = vadd.f32 %v3755_v29, %v780_v60  ;;  %v3649_v1 = vmax.f32 %v3600_v18, 0.0  ;;  %v790_v29 = vadd.f32 %v9096_v6, %v8250_v12 }
 0x6b6   :  { %v3832_v38 = vmax.f32 %v3756_v4, 0.0  ;;  %v3527_v48 = vpop.f32.mrf.mxu1 }
 0x6b9   :  { %v3601_v63 = vpop.f32.mrf.mxu2 }
 0x6ba   :  { %v3602_v24 = vadd.f32 %v3601_v63, %v3513_v45 }
 0x6bb   :  { %v3757_v37 = vpop.f32.mrf.mxu3 }
 0x6bc   :  { %v3650_v62 = vmax.f32 %v3602_v24, 0.0  ;;  %v3758_v57 = vadd.f32 %v3757_v37, %v782_v0 }
 0x6be   :  { %v3833_v43 = vmax.f32 %v3758_v57, 0.0  ;;  %v3671_v41 = vpack.c.bf16 %v3650_v62, %v3649_v1  ;;  %v5593_v1 = vld [vmem:[#allocation14 + $0x8] sm:$0xff] }
 0x6bf   :  { %4149 = vmatpush.bf16.msra.mxu1 %v5593_v1 }
 0x6c0   :  { %3799 = vmatmul.bf16.gmra.mxu3 %v3671_v41  ;;  %v3863_v25 = vpack.c.bf16 %v3833_v43, %v3832_v38  ;;  %v9098_v38 = vld [vmem:[#allocation98_spill] sm:$0xff] }
 0x6c1   :  { %v3604_v17 = vpop.f32.mrf.mxu2  ;;  %v751_v43 = vadd.f32 %v9098_v38, %v8089_v36  ;;  %v9099_v41 = vld [vmem:[#allocation102_spill] sm:$0xff] }
 0x6c2   :  { %3955 = vmatmul.bf16.gmra.mxu0 %v3863_v25  ;;  %v3605_v27 = vadd.f32 %v3604_v17, %v3516_v34  ;;  %v753_v7 = vadd.f32 %v9099_v41, %v8089_v36  ;;  %v3530_v25 = vpop.f32.mrf.mxu1  ;;  %v9100_v17 = vld [vmem:[#allocation147_spill] sm:$0xff]  ;;  %v797_v34 = vadd.f32 %v9101_v44, %v8250_v12 }
 0x6c3   :  { %v3760_v35 = vpop.f32.mrf.mxu3  ;;  %v3526_v10 = vadd.f32 %v3525_v49, %v751_v43 }
 0x6c4   :  { %v3761_v20 = vadd.f32 %v3760_v35, %v785_v22  ;;  %v3651_v46 = vmax.f32 %v3605_v27, 0.0  ;;  %v795_v35 = vadd.f32 %v9100_v17, %v8250_v12  ;;  %v3528_v21 = vadd.f32 %v3527_v48, %v753_v7  ;;  %v9106_v48 = vld [vmem:[#allocation114_spill] sm:$0xff] }
 0x6c6   :  { %v3834_v54 = vmax.f32 %v3761_v20, 0.0 }
 0x6c9   :  { %v3606_v32 = vpop.f32.mrf.mxu2 }
 0x6ca   :  { %v3607_v3 = vadd.f32 %v3606_v32, %v3518_v19 }
 0x6cb   :  { %v3762_v39 = vpop.f32.mrf.mxu3 }
 0x6cc   :  { %v3652_v61 = vmax.f32 %v3607_v3, 0.0  ;;  %v3763_v58 = vadd.f32 %v3762_v39, %v787_v47 }
 0x6ce   :  { %v3835_v40 = vmax.f32 %v3763_v58, 0.0  ;;  %v3672_v16 = vpack.c.bf16 %v3652_v61, %v3651_v46  ;;  %v3532_v46 = vpop.f32.mrf.mxu1 }
 0x6d0   :  { %3804 = vmatmul.bf16.gmra.mxu3 %v3672_v16  ;;  %v3864_v11 = vpack.c.bf16 %v3835_v40, %v3834_v54  ;;  %v756_v54 = vadd.f32 %v9102_v2, %v8089_v36  ;;  %v9103_v40 = vld [vmem:[#allocation110_spill] sm:$0xff]  ;;  %v9112_v2 = vld [vmem:[#allocation171_spill] sm:$0xff] }
 0x6d1   :  { %v3609_v52 = vpop.f32.mrf.mxu2  ;;  %v758_v16 = vadd.f32 %v9103_v40, %v8089_v36  ;;  %v9113_v40 = vld [vmem:[#allocation174_spill] sm:$0xff] }
 0x6d2   :  { %3960 = vmatmul.bf16.gmra.mxu0 %v3864_v11  ;;  %v3610_v9 = vadd.f32 %v3609_v52, %v3521_v14  ;;  %v3531_v11 = vadd.f32 %v3530_v25, %v756_v54  ;;  %v9104_v52 = vld [vmem:[#allocation153_spill] sm:$0xff]  ;;  %v815_v54 = vadd.f32 %v9112_v2, %v8250_v12 }
 0x6d3   :  { %v3765_v13 = vpop.f32.mrf.mxu3  ;;  %v800_v49 = vadd.f32 %v9104_v52, %v8250_v12  ;;  %v5603_v52 = vld [vmem:[#allocation16 + $0x18] sm:$0xff] }
 0x6d4   :  { %v3766_v15 = vadd.f32 %v3765_v13, %v790_v29  ;;  %v3653_v45 = vmax.f32 %v3610_v9, 0.0  ;;  %v3533_v13 = vadd.f32 %v3532_v46, %v758_v16  ;;  %v817_v16 = vadd.f32 %v9113_v40, %v8250_v12 }
 0x6d6   :  { %v3836_v0 = vmax.f32 %v3766_v15, 0.0  ;;  %v3535_v29 = vpop.f32.mrf.mxu1 }
 0x6d9   :  { %v3611_v55 = vpop.f32.mrf.mxu2 }
 0x6da   :  { %v3612_v59 = vadd.f32 %v3611_v55, %v3523_v23 }
 0x6db   :  { %v3767_v60 = vpop.f32.mrf.mxu3 }
 0x6dc   :  { %v3654_v18 = vmax.f32 %v3612_v59, 0.0  ;;  %v3768_v63 = vadd.f32 %v3767_v60, %v792_v28 }
 0x6de   :  { %v3837_v4 = vmax.f32 %v3768_v63, 0.0  ;;  %v3673_v24 = vpack.c.bf16 %v3654_v18, %v3653_v45  ;;  %v5592_v45 = vld [vmem:[#allocation14] sm:$0xff] }
 0x6df   :  { %4150 = vmatpush.bf16.msra.mxu1 %v5592_v45  ;;  %v9117_v45 = vld [vmem:[#allocation181_spill] sm:$0xff] }
 0x6e0   :  { %3809 = vmatmul.bf16.gmra.mxu3 %v3673_v24  ;;  %v3865_v37 = vpack.c.bf16 %v3837_v4, %v3836_v0  ;;  %v761_v0 = vadd.f32 %v9106_v48, %v8089_v36  ;;  %v3537_v4 = vpop.f32.mrf.mxu1  ;;  %v9107_v24 = vld [vmem:[#allocation118_spill] sm:$0xff] }
 0x6e1   :  { %v3614_v62 = vpop.f32.mrf.mxu2 }
 0x6e2   :  { %3965 = vmatmul.bf16.gmra.mxu0 %v3865_v37  ;;  %v3615_v8 = vadd.f32 %v3614_v62, %v3526_v10  ;;  %v763_v37 = vadd.f32 %v9107_v24, %v8089_v36  ;;  %v3536_v1 = vadd.f32 %v3535_v29, %v761_v0  ;;  %v5604_v62 = vld [vmem:[#allocation16 + $0x20] sm:$0xff]  ;;  %v9109_v10 = vld [vmem:[#allocation162_spill] sm:$0xff] }
 0x6e3   :  { %v3770_v57 = vpop.f32.mrf.mxu3  ;;  %4351 = vmatpush.bf16.msra.mxu2 %v5604_v62  ;;  %v807_v25 = vadd.f32 %v9109_v10, %v8250_v12  ;;  %v9114_v29 = vld [vmem:[#allocation120_spill] sm:$0xff]  ;;  %v9119_v10 = vld [vmem:[#allocation130_spill] sm:$0xff] }
 0x6e4   :  { %v3771_v5 = vadd.f32 %v3770_v57, %v795_v35  ;;  %v3655_v27 = vmax.f32 %v3615_v8, 0.0  ;;  %v9108_v57 = vld [vmem:[#allocation159_spill] sm:$0xff]  ;;  %v3538_v43 = vadd.f32 %v3537_v4, %v763_v37 }
 0x6e5   :  { %v805_v38 = vadd.f32 %v9108_v57, %v8250_v12 }
 0x6e6   :  { %v3838_v47 = vmax.f32 %v3771_v5, 0.0 }
 0x6e7   :  { %4352 = vmatpush.bf16.msra.mxu2 %v5603_v52 }
 0x6e9   :  { %v3616_v30 = vpop.f32.mrf.mxu2 }
 0x6ea   :  { %v3617_v22 = vadd.f32 %v3616_v30, %v3528_v21 }
 0x6eb   :  { %v3772_v19 = vpop.f32.mrf.mxu3 }
 0x6ec   :  { %v3656_v53 = vmax.f32 %v3617_v22, 0.0  ;;  %v3773_v32 = vadd.f32 %v3772_v19, %v797_v34 }
 0x6ee   :  { %v3839_v20 = vmax.f32 %v3773_v32, 0.0  ;;  %v3674_v3 = vpack.c.bf16 %v3656_v53, %v3655_v27  ;;  %v9110_v27 = vld [vmem:[#allocation165_spill] sm:$0xff]  ;;  %v9111_v32 = vld [vmem:[#allocation168_spill] sm:$0xff] }
 0x6ef   :  { %v810_v53 = vadd.f32 %v9110_v27, %v8250_v12  ;;  %v812_v56 = vadd.f32 %v9111_v32, %v8250_v12 }
 0x6f0   :  { %v3866_v39 = vpack.c.bf16 %v3839_v20, %v3838_v47  ;;  %3814 = vmatmul.bf16.gmra.mxu3 %v3674_v3 }
 0x6f1   :  { %v3619_v61 = vpop.f32.mrf.mxu2 }
 0x6f2   :  { %3970 = vmatmul.bf16.gmra.mxu0 %v3866_v39  ;;  %v3620_v26 = vadd.f32 %v3619_v61, %v3531_v11 }
 0x6f3   :  { %v3775_v58 = vpop.f32.mrf.mxu3 }
 0x6f4   :  { %v3776_v14 = vadd.f32 %v3775_v58, %v800_v49  ;;  %v3657_v9 = vmax.f32 %v3620_v26, 0.0 }
 0x6f6   :  { %v3840_v28 = vmax.f32 %v3776_v14, 0.0 }
 0x6f9   :  { %v3621_v31 = vpop.f32.mrf.mxu2 }
 0x6fa   :  { %v3622_v6 = vadd.f32 %v3621_v31, %v3533_v13 }
 0x6fb   :  { %v3777_v23 = vpop.f32.mrf.mxu3 }
 0x6fc   :  { %v3658_v55 = vmax.f32 %v3622_v6, 0.0  ;;  %v3778_v50 = vadd.f32 %v3777_v23, %v802_v42  ;;  %v8315_v42 = vperm.slane %v8247_v33, 4 }
 0x6fe   :  { %v3841_v15 = vmax.f32 %v3778_v50, 0.0  ;;  %v3675_v59 = vpack.c.bf16 %v3658_v55, %v3657_v9  ;;  %v864_v23 = vadd.f32 %v9114_v29, %v8315_v42  ;;  %v9115_v9 = vld [vmem:[#allocation123_spill] sm:$0xff] }
 0x6ff   :  { %v866_v55 = vadd.f32 %v9115_v9, %v8315_v42 }
 0x700   :  { %v3867_v60 = vpack.c.bf16 %v3841_v15, %v3840_v28  ;;  %3819 = vmatmul.bf16.gmra.mxu3 %v3675_v59  ;;  %v9116_v15 = vld [vmem:[#allocation178_spill] sm:$0xff] }
 0x701   :  { %v3624_v18 = vpop.f32.mrf.mxu2  ;;  %v820_v59 = vadd.f32 %v9116_v15, %v8250_v12  ;;  %v9126_v15 = vld [vmem:[#allocation139_spill] sm:$0xff] }
 0x702   :  { %3975 = vmatmul.bf16.gmra.mxu0 %v3867_v60  ;;  %v3625_v41 = vadd.f32 %v3624_v18, %v3536_v1  ;;  %v822_v18 = vadd.f32 %v9117_v45, %v8250_v12 }
 0x703   :  { %v3780_v63 = vpop.f32.mrf.mxu3 }
 0x704   :  { %v3781_v17 = vadd.f32 %v3780_v63, %v805_v38  ;;  %v3659_v8 = vmax.f32 %v3625_v41, 0.0  ;;  %v9118_v41 = vld [vmem:[#allocation126_spill] sm:$0xff] }
 0x706   :  { %v3842_v34 = vmax.f32 %v3781_v17, 0.0 }
 0x709   :  { %v3626_v7 = vpop.f32.mrf.mxu2 }
 0x70a   :  { %v3627_v35 = vadd.f32 %v3626_v7, %v3538_v43  ;;  %v869_v7 = vadd.f32 %v9118_v41, %v8315_v42 }
 0x70b   :  { %v3782_v21 = vpop.f32.mrf.mxu3 }
 0x70c   :  { %v3660_v30 = vmax.f32 %v3627_v35, 0.0  ;;  %v3783_v44 = vadd.f32 %v3782_v21, %v807_v25  ;;  %v871_v25 = vadd.f32 %v9119_v10, %v8315_v42  ;;  %v9120_v21 = vld [vmem:[#allocation185_spill] sm:$0xff] }
 0x70e   :  { %v3843_v36 = vmax.f32 %v3783_v44, 0.0  ;;  %v3676_v5 = vpack.c.bf16 %v3660_v30, %v3659_v8  ;;  %v825_v8 = vadd.f32 %v9120_v21, %v8250_v12  ;;  %v9121_v44 = vld [vmem:[#allocation188_spill] sm:$0xff] }
 0x710   :  { %v3868_v22 = vpack.c.bf16 %v3843_v36, %v3842_v34  ;;  %3824 = vmatmul.bf16.gmra.mxu3 %v3676_v5  ;;  %v827_v34 = vadd.f32 %v9121_v44, %v8250_v12  ;;  %v9131_v44 = vld [vmem:[#allocation148_spill] sm:$0xff] }
 0x712   :  { %3980 = vmatmul.bf16.gmra.mxu0 %v3868_v22 }
 0x713   :  { %v3785_v19 = vpop.f32.mrf.mxu3 }
 0x714   :  { %v3786_v47 = vadd.f32 %v3785_v19, %v810_v53  ;;  %v5602_v19 = vld [vmem:[#allocation16 + $0x10] sm:$0xff] }
 0x715   :  { %4353 = vmatpush.bf16.msra.mxu2 %v5602_v19 }
 0x716   :  { %v3844_v39 = vmax.f32 %v3786_v47, 0.0 }
 0x71b   :  { %v3787_v20 = vpop.f32.mrf.mxu3 }
 0x71c   :  { %v3788_v3 = vadd.f32 %v3787_v20, %v812_v56 }
 0x71e   :  { %v3845_v46 = vmax.f32 %v3788_v3, 0.0 }
 0x720   :  { %v3869_v61 = vpack.c.bf16 %v3845_v46, %v3844_v39  ;;  %v9122_v46 = vld [vmem:[#allocation133_spill] sm:$0xff] }
 0x722   :  { %3985 = vmatmul.bf16.gmra.mxu0 %v3869_v61  ;;  %v874_v61 = vadd.f32 %v9122_v46, %v8315_v42 }
 0x723   :  { %v3790_v58 = vpop.f32.mrf.mxu3 }
 0x724   :  { %v3791_v11 = vadd.f32 %v3790_v58, %v815_v54  ;;  %v9123_v58 = vld [vmem:[#allocation136_spill] sm:$0xff] }
 0x725   :  { %v876_v2 = vadd.f32 %v9123_v58, %v8315_v42 }
 0x726   :  { %v3846_v26 = vmax.f32 %v3791_v11, 0.0 }
 0x72b   :  { %v3792_v49 = vpop.f32.mrf.mxu3 }
 0x72c   :  { %v3793_v13 = vadd.f32 %v3792_v49, %v817_v16  ;;  %v9124_v16 = vld [vmem:[#allocation192_spill] sm:$0xff]  ;;  %v9125_v49 = vld [vmem:[#allocation195_spill] sm:$0xff] }
 0x72d   :  { %v830_v11 = vadd.f32 %v9124_v16, %v8250_v12  ;;  %v9134_v16 = vld [vmem:[#allocation151_spill] sm:$0xff] }
 0x72e   :  { %v3847_v31 = vmax.f32 %v3793_v13, 0.0  ;;  %v832_v13 = vadd.f32 %v9125_v49, %v8250_v12 }
 0x72f   :  { %v3951_v51 = vpop.f32.mrf.mxu0 }
 0x730   :  { %v3870_v14 = vpack.c.bf16 %v3847_v31, %v3846_v26  ;;  %v3952_v50 = vadd.f32 %v3951_v51, %v864_v23 }
 0x732   :  { %3990 = vmatmul.bf16.gmra.mxu0 %v3870_v14  ;;  %v4031_v63 = vmax.f32 %v3952_v50, 0.0 }
 0x733   :  { %v3795_v6 = vpop.f32.mrf.mxu3 }
 0x734   :  { %v3796_v48 = vadd.f32 %v3795_v6, %v820_v59  ;;  %v879_v59 = vadd.f32 %v9126_v15, %v8315_v42 }
 0x736   :  { %v3848_v1 = vmax.f32 %v3796_v48, 0.0  ;;  %v9128_v48 = vld [vmem:[#allocation199_spill] sm:$0xff] }
 0x737   :  { %v3953_v28 = vpop.f32.mrf.mxu0 }
 0x738   :  { %v3954_v60 = vadd.f32 %v3953_v28, %v866_v55 }
 0x73a   :  { %v4032_v0 = vmax.f32 %v3954_v60, 0.0  ;;  %v9127_v60 = vld [vmem:[#allocation142_spill] sm:$0xff] }
 0x73b   :  { %v3797_v4 = vpop.f32.mrf.mxu3  ;;  %v881_v45 = vadd.f32 %v9127_v60, %v8315_v42 }
 0x73c   :  { %v4063_v24 = vpack.c.bf16 %v4032_v0, %v4031_v63  ;;  %v3798_v37 = vadd.f32 %v3797_v4, %v822_v18  ;;  %v835_v0 = vadd.f32 %v9128_v48, %v8250_v12 }
 0x73e   :  { %v3849_v62 = vmax.f32 %v3798_v37, 0.0  ;;  %4151 = vmatmul.bf16.vlgmr.msra.gmra.mxu1 %v4063_v24  ;;  %v9129_v24 = vld [vmem:[#allocation202_spill] sm:$0xff] }
 0x73f   :  { %v3956_v57 = vpop.f32.mrf.mxu0  ;;  %v837_v37 = vadd.f32 %v9129_v24, %v8250_v12  ;;  %v9139_v24 = vld [vmem:[#allocation160_spill] sm:$0xff] }
 0x740   :  { %v3871_v38 = vpack.c.bf16 %v3849_v62, %v3848_v1  ;;  %v3957_v17 = vadd.f32 %v3956_v57, %v869_v7  ;;  %v5601_v7 = vld [vmem:[#allocation16 + $0x8] sm:$0xff] }
 0x741   :  { %4354 = vmatpush.bf16.msra.mxu2 %v5601_v7 }
 0x742   :  { %3995 = vmatmul.bf16.gmra.mxu0 %v3871_v38  ;;  %v4033_v36 = vmax.f32 %v3957_v17, 0.0 }
 0x743   :  { %v3800_v43 = vpop.f32.mrf.mxu3 }
 0x744   :  { %v3801_v5 = vadd.f32 %v3800_v43, %v825_v8  ;;  %v9130_v8 = vld [vmem:[#allocation145_spill] sm:$0xff] }
 0x746   :  { %v3850_v56 = vmax.f32 %v3801_v5, 0.0 }
 0x747   :  { %v3958_v35 = vpop.f32.mrf.mxu0 }
 0x748   :  { %v3959_v30 = vadd.f32 %v3958_v35, %v871_v25 }
 0x74a   :  { %v4034_v22 = vmax.f32 %v3959_v30, 0.0  ;;  %v884_v30 = vadd.f32 %v9130_v8, %v8315_v42 }
 0x74b   :  { %v3802_v27 = vpop.f32.mrf.mxu3 }
 0x74c   :  { %v3803_v53 = vadd.f32 %v3802_v27, %v827_v34  ;;  %v4064_v32 = vpack.c.bf16 %v4034_v22, %v4033_v36  ;;  %v886_v34 = vadd.f32 %v9131_v44, %v8315_v42  ;;  %v9132_v22 = vld [vmem:[#allocation206_spill] sm:$0xff] }
 0x74d   :  { %v840_v19 = vadd.f32 %v9132_v22, %v8250_v12 }
 0x74e   :  { %v3851_v47 = vmax.f32 %v3803_v53, 0.0  ;;  %4156 = vmatmul.bf16.gmra.mxu1 %v4064_v32  ;;  %v9133_v53 = vld [vmem:[#allocation209_spill] sm:$0xff] }
 0x74f   :  { %v3961_v20 = vpop.f32.mrf.mxu0  ;;  %v842_v32 = vadd.f32 %v9133_v53, %v8250_v12 }
 0x750   :  { %v3872_v3 = vpack.c.bf16 %v3851_v47, %v3850_v56  ;;  %v3962_v54 = vadd.f32 %v3961_v20, %v874_v61 }
 0x752   :  { %4000 = vmatmul.bf16.gmra.mxu0 %v3872_v3  ;;  %v4035_v26 = vmax.f32 %v3962_v54, 0.0 }
 0x753   :  { %v3805_v39 = vpop.f32.mrf.mxu3 }
 0x754   :  { %v3806_v31 = vadd.f32 %v3805_v39, %v830_v11  ;;  %v889_v11 = vadd.f32 %v9134_v16, %v8315_v42 }
 0x756   :  { %v3852_v23 = vmax.f32 %v3806_v31, 0.0  ;;  %v9136_v31 = vld [vmem:[#allocation213_spill] sm:$0xff] }
 0x757   :  { %v3963_v40 = vpop.f32.mrf.mxu0 }
 0x758   :  { %v3964_v52 = vadd.f32 %v3963_v40, %v876_v2 }
 0x75a   :  { %v4036_v51 = vmax.f32 %v3964_v52, 0.0  ;;  %v9135_v52 = vld [vmem:[#allocation154_spill] sm:$0xff] }
 0x75b   :  { %v3807_v14 = vpop.f32.mrf.mxu3  ;;  %v891_v49 = vadd.f32 %v9135_v52, %v8315_v42 }
 0x75c   :  { %v3808_v6 = vadd.f32 %v3807_v14, %v832_v13  ;;  %v4065_v29 = vpack.c.bf16 %v4036_v51, %v4035_v26  ;;  %v845_v51 = vadd.f32 %v9136_v31, %v8250_v12  ;;  %v9146_v31 = vld [vmem:[#allocation121_spill] sm:$0xff] }
 0x75e   :  { %v3853_v9 = vmax.f32 %v3808_v6, 0.0  ;;  %4161 = vmatmul.bf16.gmra.mxu1 %v4065_v29  ;;  %v9137_v6 = vld [vmem:[#allocation216_spill] sm:$0xff] }
 0x75f   :  { %v3966_v55 = vpop.f32.mrf.mxu0  ;;  %v847_v29 = vadd.f32 %v9137_v6, %v8250_v12 }
 0x760   :  { %v3873_v50 = vpack.c.bf16 %v3853_v9, %v3852_v23  ;;  %v3967_v18 = vadd.f32 %v3966_v55, %v879_v59  ;;  %v5600_v59 = vld [vmem:[#allocation16] sm:$0xff] }
 0x761   :  { %4355 = vmatpush.bf16.msra.mxu2 %v5600_v59 }
 0x762   :  { %4005 = vmatmul.bf16.gmra.mxu0 %v3873_v50  ;;  %v4037_v1 = vmax.f32 %v3967_v18, 0.0 }
 0x763   :  { %v3810_v28 = vpop.f32.mrf.mxu3 }
 0x764   :  { %v3811_v62 = vadd.f32 %v3810_v28, %v835_v0  ;;  %v9138_v0 = vld [vmem:[#allocation157_spill] sm:$0xff] }
 0x766   :  { %v3854_v10 = vmax.f32 %v3811_v62, 0.0 }
 0x767   :  { %v3968_v63 = vpop.f32.mrf.mxu0 }
 0x768   :  { %v3969_v4 = vadd.f32 %v3968_v63, %v881_v45 }
 0x76a   :  { %v4038_v57 = vmax.f32 %v3969_v4, 0.0  ;;  %v894_v4 = vadd.f32 %v9138_v0, %v8315_v42 }
 0x76b   :  { %v3812_v38 = vpop.f32.mrf.mxu3 }
 0x76c   :  { %v3813_v43 = vadd.f32 %v3812_v38, %v837_v37  ;;  %v4066_v41 = vpack.c.bf16 %v4038_v57, %v4037_v1  ;;  %v896_v37 = vadd.f32 %v9139_v24, %v8315_v42  ;;  %v9140_v57 = vld [vmem:[#allocation220_spill] sm:$0xff] }
 0x76d   :  { %v850_v38 = vadd.f32 %v9140_v57, %v8250_v12  ;;  %v9151_v57 = vld [vmem:[#allocation131_spill] sm:$0xff] }
 0x76e   :  { %v3855_v25 = vmax.f32 %v3813_v43, 0.0  ;;  %4166 = vmatmul.bf16.gmra.mxu1 %v4066_v41  ;;  %v9141_v41 = vld [vmem:[#allocation223_spill] sm:$0xff] }
 0x76f   :  { %v3971_v17 = vpop.f32.mrf.mxu0  ;;  %v852_v7 = vadd.f32 %v9141_v41, %v8250_v12 }
 0x770   :  { %v3874_v35 = vpack.c.bf16 %v3855_v25, %v3854_v10  ;;  %v3972_v36 = vadd.f32 %v3971_v17, %v884_v30 }
 0x772   :  { %4010 = vmatmul.bf16.gmra.mxu0 %v3874_v35  ;;  %v4039_v56 = vmax.f32 %v3972_v36, 0.0 }
 0x773   :  { %v3815_v21 = vpop.f32.mrf.mxu3 }
 0x774   :  { %v3816_v47 = vadd.f32 %v3815_v21, %v840_v19  ;;  %v9143_v19 = vld [vmem:[#allocation166_spill] sm:$0xff] }
 0x776   :  { %v3856_v61 = vmax.f32 %v3816_v47, 0.0 }
 0x777   :  { %v3973_v5 = vpop.f32.mrf.mxu0 }
 0x778   :  { %v3974_v27 = vadd.f32 %v3973_v5, %v886_v34  ;;  %v9142_v5 = vld [vmem:[#allocation163_spill] sm:$0xff] }
 0x779   :  { %v899_v22 = vadd.f32 %v9142_v5, %v8315_v42 }
 0x77a   :  { %v4040_v20 = vmax.f32 %v3974_v27, 0.0  ;;  %v901_v27 = vadd.f32 %v9143_v19, %v8315_v42 }
 0x77b   :  { %v3817_v3 = vpop.f32.mrf.mxu3 }
 0x77c   :  { %v4067_v39 = vpack.c.bf16 %v4040_v20, %v4039_v56  ;;  %v3818_v46 = vadd.f32 %v3817_v3, %v842_v32 }
 0x77e   :  { %v3857_v58 = vmax.f32 %v3818_v46, 0.0  ;;  %4171 = vmatmul.bf16.gmra.mxu1 %v4067_v39  ;;  %v9144_v39 = vld [vmem:[#allocation169_spill] sm:$0xff] }
 0x77f   :  { %v3976_v2 = vpop.f32.mrf.mxu0  ;;  %v904_v46 = vadd.f32 %v9144_v39, %v8315_v42  ;;  %v9156_v39 = vld [vmem:[#allocation189_spill] sm:$0xff] }
 0x780   :  { %v3875_v54 = vpack.c.bf16 %v3857_v58, %v3856_v61  ;;  %v3977_v13 = vadd.f32 %v3976_v2, %v889_v11  ;;  %v9145_v61 = vld [vmem:[#allocation172_spill] sm:$0xff] }
 0x781   :  { %v906_v58 = vadd.f32 %v9145_v61, %v8315_v42 }
 0x782   :  { %4015 = vmatmul.bf16.gmra.mxu0 %v3875_v54  ;;  %v4041_v23 = vmax.f32 %v3977_v13, 0.0 }
 0x783   :  { %v3820_v40 = vpop.f32.mrf.mxu3 }
 0x784   :  { %v3821_v9 = vadd.f32 %v3820_v40, %v845_v51 }
 0x786   :  { %v3858_v60 = vmax.f32 %v3821_v9, 0.0  ;;  %v9148_v9 = vld [vmem:[#allocation175_spill] sm:$0xff] }
 0x787   :  { %v3978_v26 = vpop.f32.mrf.mxu0 }
 0x788   :  { %v3979_v14 = vadd.f32 %v3978_v26, %v891_v49  ;;  %v8382_v49 = vperm.slane %v8247_v33, 5 }
 0x78a   :  { %v4042_v55 = vmax.f32 %v3979_v14, 0.0  ;;  %v953_v51 = vadd.f32 %v9146_v31, %v8382_v49  ;;  %v9147_v14 = vld [vmem:[#allocation124_spill] sm:$0xff] }
 0x78b   :  { %v3822_v50 = vpop.f32.mrf.mxu3  ;;  %v955_v6 = vadd.f32 %v9147_v14, %v8382_v49 }
 0x78c   :  { %v4068_v28 = vpack.c.bf16 %v4042_v55, %v4041_v23  ;;  %v3823_v15 = vadd.f32 %v3822_v50, %v847_v29  ;;  %v909_v55 = vadd.f32 %v9148_v9, %v8315_v42  ;;  %v9159_v9 = vld [vmem:[#allocation143_spill] sm:$0xff] }
 0x78e   :  { %v3859_v45 = vmax.f32 %v3823_v15, 0.0  ;;  %4176 = vmatmul.bf16.gmra.mxu1 %v4068_v28  ;;  %v9149_v28 = vld [vmem:[#allocation179_spill] sm:$0xff] }
 0x78f   :  { %v3981_v18 = vpop.f32.mrf.mxu0  ;;  %v911_v15 = vadd.f32 %v9149_v28, %v8315_v42 }
 0x790   :  { %v3876_v63 = vpack.c.bf16 %v3859_v45, %v3858_v60  ;;  %v3982_v1 = vadd.f32 %v3981_v18, %v894_v4 }
 0x792   :  { %4020 = vmatmul.bf16.gmra.mxu0 %v3876_v63  ;;  %v4043_v10 = vmax.f32 %v3982_v1, 0.0  ;;  %v9150_v1 = vld [vmem:[#allocation127_spill] sm:$0xff] }
 0x793   :  { %v3825_v48 = vpop.f32.mrf.mxu3 }
 0x794   :  { %v3826_v25 = vadd.f32 %v3825_v48, %v850_v38  ;;  %v960_v38 = vadd.f32 %v9151_v57, %v8382_v49 }
 0x796   :  { %v3860_v30 = vmax.f32 %v3826_v25, 0.0 }
 0x797   :  { %v3983_v62 = vpop.f32.mrf.mxu0 }
 0x798   :  { %v3984_v43 = vadd.f32 %v3983_v62, %v896_v37  ;;  %v958_v62 = vadd.f32 %v9150_v1, %v8382_v49 }
 0x79a   :  { %v4044_v17 = vmax.f32 %v3984_v43, 0.0 }
 0x79b   :  { %v3827_v35 = vpop.f32.mrf.mxu3 }
 0x79c   :  { %v4069_v21 = vpack.c.bf16 %v4044_v17, %v4043_v10  ;;  %v3828_v8 = vadd.f32 %v3827_v35, %v852_v7  ;;  %v9152_v7 = vld [vmem:[#allocation182_spill] sm:$0xff] }
 0x79d   :  { %v914_v10 = vadd.f32 %v9152_v7, %v8315_v42  ;;  %v9153_v17 = vld [vmem:[#allocation186_spill] sm:$0xff]  ;;  %v9163_v7 = vld [vmem:[#allocation149_spill] sm:$0xff] }
 0x79e   :  { %v3861_v44 = vmax.f32 %v3828_v8, 0.0  ;;  %4181 = vmatmul.bf16.gmra.mxu1 %v4069_v21  ;;  %v916_v35 = vadd.f32 %v9153_v17, %v8315_v42 }
 0x79f   :  { %v3986_v34 = vpop.f32.mrf.mxu0 }
 0x7a0   :  { %v3877_v36 = vpack.c.bf16 %v3861_v44, %v3860_v30  ;;  %v3987_v53 = vadd.f32 %v3986_v34, %v899_v22 }
 0x7a2   :  { %4025 = vmatmul.bf16.gmra.mxu0 %v3877_v36  ;;  %v4045_v56 = vmax.f32 %v3987_v53, 0.0 }
 0x7a7   :  { %v3988_v12 = vpop.f32.mrf.mxu0 }
 0x7a8   :  { %v3989_v32 = vadd.f32 %v3988_v12, %v901_v27  ;;  %v9154_v12 = vld [vmem:[#allocation134_spill] sm:$0xff] }
 0x7aa   :  { %v4046_v47 = vmax.f32 %v3989_v32, 0.0  ;;  %v963_v32 = vadd.f32 %v9154_v12, %v8382_v49 }
 0x7ac   :  { %v4070_v20 = vpack.c.bf16 %v4046_v47, %v4045_v56  ;;  %v9155_v56 = vld [vmem:[#allocation137_spill] sm:$0xff] }
 0x7ad   :  { %v965_v47 = vadd.f32 %v9155_v56, %v8382_v49 }
 0x7ae   :  { %4186 = vmatmul.bf16.gmra.mxu1 %v4070_v20 }
 0x7af   :  { %v3991_v3 = vpop.f32.mrf.mxu0 }
 0x7b0   :  { %v3992_v2 = vadd.f32 %v3991_v3, %v904_v46  ;;  %v919_v46 = vadd.f32 %v9156_v39, %v8315_v42  ;;  %v9167_v39 = vld [vmem:[#allocation155_spill] sm:$0xff] }
 0x7b2   :  { %v4047_v16 = vmax.f32 %v3992_v2, 0.0 }
 0x7b7   :  { %v3993_v54 = vpop.f32.mrf.mxu0 }
 0x7b8   :  { %v3994_v40 = vadd.f32 %v3993_v54, %v906_v58  ;;  %v9157_v58 = vld [vmem:[#allocation193_spill] sm:$0xff] }
 0x7b9   :  { %v921_v2 = vadd.f32 %v9157_v58, %v8315_v42 }
 0x7ba   :  { %v4048_v11 = vmax.f32 %v3994_v40, 0.0 }
 0x7bb   :  { %v4152_v52 = vpop.f32.mrf.mxu1 }
 0x7bc   :  { %v4071_v13 = vpack.c.bf16 %v4048_v11, %v4047_v16  ;;  %v4153_v29 = vadd.f32 %v4152_v52, %v953_v51 }
 0x7be   :  { %4191 = vmatmul.bf16.gmra.mxu1 %v4071_v13  ;;  %v4232_v33 = vmax.f32 %v4153_v29, 0.0  ;;  %v9158_v29 = vld [vmem:[#allocation140_spill] sm:$0xff] }
 0x7bf   :  { %v3996_v26 = vpop.f32.mrf.mxu0 }
 0x7c0   :  { %v3997_v59 = vadd.f32 %v3996_v26, %v909_v55  ;;  %v970_v55 = vadd.f32 %v9159_v9, %v8382_v49 }
 0x7c2   :  { %v4049_v48 = vmax.f32 %v3997_v59, 0.0 }
 0x7c3   :  { %v4154_v23 = vpop.f32.mrf.mxu1 }
 0x7c4   :  { %v4155_v50 = vadd.f32 %v4154_v23, %v955_v6  ;;  %v968_v23 = vadd.f32 %v9158_v29, %v8382_v49 }
 0x7c6   :  { %v4233_v60 = vmax.f32 %v4155_v50, 0.0 }
 0x7c7   :  { %v3998_v45 = vpop.f32.mrf.mxu0 }
 0x7c8   :  { %v4264_v18 = vpack.c.bf16 %v4233_v60, %v4232_v33  ;;  %v3999_v63 = vadd.f32 %v3998_v45, %v911_v15  ;;  %v9160_v15 = vld [vmem:[#allocation196_spill] sm:$0xff] }
 0x7c9   :  { %v924_v33 = vadd.f32 %v9160_v15, %v8315_v42  ;;  %v9161_v60 = vld [vmem:[#allocation200_spill] sm:$0xff]  ;;  %v9171_v15 = vld [vmem:[#allocation161_spill] sm:$0xff] }
 0x7ca   :  { %v4050_v0 = vmax.f32 %v3999_v63, 0.0  ;;  %4356 = vmatmul.bf16.vlgmr.msra.gmra.mxu2 %v4264_v18  ;;  %v926_v45 = vadd.f32 %v9161_v60, %v8315_v42 }
 0x7cb   :  { %v4157_v4 = vpop.f32.mrf.mxu1 }
 0x7cc   :  { %v4072_v24 = vpack.c.bf16 %v4050_v0, %v4049_v48  ;;  %v4158_v43 = vadd.f32 %v4157_v4, %v958_v62 }
 0x7ce   :  { %4196 = vmatmul.bf16.gmra.mxu1 %v4072_v24  ;;  %v4234_v21 = vmax.f32 %v4158_v43, 0.0  ;;  %v9162_v43 = vld [vmem:[#allocation146_spill] sm:$0xff] }
 0x7cf   :  { %v4001_v37 = vpop.f32.mrf.mxu0 }
 0x7d0   :  { %v4002_v8 = vadd.f32 %v4001_v37, %v914_v10  ;;  %v975_v10 = vadd.f32 %v9163_v7, %v8382_v49 }
 0x7d2   :  { %v4051_v5 = vmax.f32 %v4002_v8, 0.0 }
 0x7d3   :  { %v4159_v41 = vpop.f32.mrf.mxu1 }
 0x7d4   :  { %v4160_v25 = vadd.f32 %v4159_v41, %v960_v38  ;;  %v973_v41 = vadd.f32 %v9162_v43, %v8382_v49 }
 0x7d6   :  { %v4235_v30 = vmax.f32 %v4160_v25, 0.0 }
 0x7d7   :  { %v4003_v44 = vpop.f32.mrf.mxu0 }
 0x7d8   :  { %v4004_v34 = vadd.f32 %v4003_v44, %v916_v35  ;;  %v4265_v36 = vpack.c.bf16 %v4235_v30, %v4234_v21  ;;  %v9164_v35 = vld [vmem:[#allocation203_spill] sm:$0xff] }
 0x7d9   :  { %v929_v21 = vadd.f32 %v9164_v35, %v8315_v42  ;;  %v9165_v30 = vld [vmem:[#allocation207_spill] sm:$0xff] }
 0x7da   :  { %v4052_v22 = vmax.f32 %v4004_v34, 0.0  ;;  %4361 = vmatmul.bf16.gmra.mxu2 %v4265_v36  ;;  %v931_v44 = vadd.f32 %v9165_v30, %v8315_v42 }
 0x7db   :  { %v4162_v19 = vpop.f32.mrf.mxu1 }
 0x7dc   :  { %v4073_v27 = vpack.c.bf16 %v4052_v22, %v4051_v5  ;;  %v4163_v20 = vadd.f32 %v4162_v19, %v963_v32 }
 0x7de   :  { %4201 = vmatmul.bf16.gmra.mxu1 %v4073_v27  ;;  %v4236_v54 = vmax.f32 %v4163_v20, 0.0  ;;  %v9166_v20 = vld [vmem:[#allocation152_spill] sm:$0xff] }
 0x7df   :  { %v4006_v53 = vpop.f32.mrf.mxu0 }
 0x7e0   :  { %v4007_v40 = vadd.f32 %v4006_v53, %v919_v46  ;;  %v980_v46 = vadd.f32 %v9167_v39, %v8382_v49 }
 0x7e2   :  { %v4053_v26 = vmax.f32 %v4007_v40, 0.0 }
 0x7e3   :  { %v4164_v3 = vpop.f32.mrf.mxu1 }
 0x7e4   :  { %v4165_v61 = vadd.f32 %v4164_v3, %v965_v47  ;;  %v978_v3 = vadd.f32 %v9166_v20, %v8382_v49 }
 0x7e6   :  { %v4237_v16 = vmax.f32 %v4165_v61, 0.0 }
 0x7e7   :  { %v4008_v11 = vpop.f32.mrf.mxu0 }
 0x7e8   :  { %v4009_v52 = vadd.f32 %v4008_v11, %v921_v2  ;;  %v4266_v13 = vpack.c.bf16 %v4237_v16, %v4236_v54  ;;  %v9168_v2 = vld [vmem:[#allocation210_spill] sm:$0xff] }
 0x7e9   :  { %v934_v54 = vadd.f32 %v9168_v2, %v8315_v42  ;;  %v9169_v16 = vld [vmem:[#allocation214_spill] sm:$0xff] }
 0x7ea   :  { %v4054_v31 = vmax.f32 %v4009_v52, 0.0  ;;  %4366 = vmatmul.bf16.gmra.mxu2 %v4266_v13  ;;  %v936_v11 = vadd.f32 %v9169_v16, %v8315_v42 }
 0x7eb   :  { %v4167_v51 = vpop.f32.mrf.mxu1 }
 0x7ec   :  { %v4074_v14 = vpack.c.bf16 %v4054_v31, %v4053_v26  ;;  %v4168_v50 = vadd.f32 %v4167_v51, %v968_v23 }
 0x7ee   :  { %4206 = vmatmul.bf16.gmra.mxu1 %v4074_v14  ;;  %v4238_v18 = vmax.f32 %v4168_v50, 0.0  ;;  %v9170_v50 = vld [vmem:[#allocation158_spill] sm:$0xff] }
 0x7ef   :  { %v4011_v6 = vpop.f32.mrf.mxu0 }
 0x7f0   :  { %v4012_v63 = vadd.f32 %v4011_v6, %v924_v33  ;;  %v985_v33 = vadd.f32 %v9171_v15, %v8382_v49 }
 0x7f2   :  { %v4055_v37 = vmax.f32 %v4012_v63, 0.0 }
 0x7f3   :  { %v4169_v28 = vpop.f32.mrf.mxu1 }
 0x7f4   :  { %v4170_v59 = vadd.f32 %v4169_v28, %v970_v55  ;;  %v983_v28 = vadd.f32 %v9170_v50, %v8382_v49  ;;  %v9181_v50 = vld [vmem:[#allocation187_spill] sm:$0xff] }
 0x7f6   :  { %v4239_v48 = vmax.f32 %v4170_v59, 0.0 }
 0x7f7   :  { %v4013_v0 = vpop.f32.mrf.mxu0 }
 0x7f8   :  { %v4014_v4 = vadd.f32 %v4013_v0, %v926_v45  ;;  %v4267_v24 = vpack.c.bf16 %v4239_v48, %v4238_v18  ;;  %v9172_v45 = vld [vmem:[#allocation217_spill] sm:$0xff] }
 0x7f9   :  { %v939_v18 = vadd.f32 %v9172_v45, %v8315_v42  ;;  %v9173_v48 = vld [vmem:[#allocation221_spill] sm:$0xff] }
 0x7fa   :  { %v4056_v1 = vmax.f32 %v4014_v4, 0.0  ;;  %4371 = vmatmul.bf16.gmra.mxu2 %v4267_v24  ;;  %v941_v0 = vadd.f32 %v9173_v48, %v8315_v42 }
 0x7fb   :  { %v4172_v62 = vpop.f32.mrf.mxu1 }
 0x7fc   :  { %v4075_v57 = vpack.c.bf16 %v4056_v1, %v4055_v37  ;;  %v4173_v25 = vadd.f32 %v4172_v62, %v973_v41 }
 0x7fe   :  { %4211 = vmatmul.bf16.gmra.mxu1 %v4075_v57  ;;  %v4240_v34 = vmax.f32 %v4173_v25, 0.0 }
 0x7ff   :  { %v4016_v38 = vpop.f32.mrf.mxu0 }
 0x800   :  { %v4017_v36 = vadd.f32 %v4016_v38, %v929_v21 }
 0x802   :  { %v4057_v53 = vmax.f32 %v4017_v36, 0.0 }
 0x803   :  { %v4174_v17 = vpop.f32.mrf.mxu1 }
 0x804   :  { %v4175_v8 = vadd.f32 %v4174_v17, %v975_v10  ;;  %v9174_v10 = vld [vmem:[#allocation164_spill] sm:$0xff]  ;;  %v9175_v17 = vld [vmem:[#allocation167_spill] sm:$0xff] }
 0x805   :  { %v988_v25 = vadd.f32 %v9174_v10, %v8382_v49  ;;  %v990_v35 = vadd.f32 %v9175_v17, %v8382_v49 }
 0x806   :  { %v4241_v5 = vmax.f32 %v4175_v8, 0.0 }
 0x807   :  { %v4018_v22 = vpop.f32.mrf.mxu0 }
 0x808   :  { %v4268_v19 = vpack.c.bf16 %v4241_v5, %v4240_v34  ;;  %v4019_v27 = vadd.f32 %v4018_v22, %v931_v44  ;;  %v9176_v5 = vld [vmem:[#allocation170_spill] sm:$0xff] }
 0x809   :  { %v993_v22 = vadd.f32 %v9176_v5, %v8382_v49 }
 0x80a   :  { %v4058_v12 = vmax.f32 %v4019_v27, 0.0  ;;  %4376 = vmatmul.bf16.gmra.mxu2 %v4268_v19  ;;  %v9177_v19 = vld [vmem:[#allocation173_spill] sm:$0xff] }
 0x80b   :  { %v4177_v32 = vpop.f32.mrf.mxu1  ;;  %v995_v27 = vadd.f32 %v9177_v19, %v8382_v49 }
 0x80c   :  { %v4076_v56 = vpack.c.bf16 %v4058_v12, %v4057_v53  ;;  %v4178_v61 = vadd.f32 %v4177_v32, %v978_v3  ;;  %v8451_v3 = vld [vmem:[%s8530_s11] ss:$0 sm:$0xff]  ;;  %s5917_s11 = smov [#allocation17]  }
 0x80d   :  { %s4473_s8 = sshll.u32 %s5917_s11, 4  ;;  %s4474_s8 = int_to_ptr.vmem [resolvable:$true] %s4473_s8 }
 0x80e   :  { %4216 = vmatmul.bf16.gmra.mxu1 %v4076_v56  ;;  %v4242_v52 = vmax.f32 %v4178_v61, 0.0 }
 0x80f   :  { %v4021_v47 = vpop.f32.mrf.mxu0 }
 0x810   :  { %v4022_v13 = vadd.f32 %v4021_v47, %v934_v54  ;;  %v9179_v54 = vld [vmem:[#allocation180_spill] sm:$0xff] }
 0x812   :  { %v4059_v6 = vmax.f32 %v4022_v13, 0.0 }
 0x813   :  { %v4179_v58 = vpop.f32.mrf.mxu1 }
 0x814   :  { %v4180_v40 = vadd.f32 %v4179_v58, %v980_v46  ;;  %v9178_v58 = vld [vmem:[#allocation177_spill] sm:$0xff] }
 0x815   :  { %v998_v2 = vadd.f32 %v9178_v58, %v8382_v49  ;;  %v9187_v58 = vld [vmem:[#allocation208_spill] sm:$0xff] }
 0x816   :  { %v4243_v26 = vmax.f32 %v4180_v40, 0.0  ;;  %v1000_v40 = vadd.f32 %v9179_v54, %v8382_v49 }
 0x817   :  { %v4023_v31 = vpop.f32.mrf.mxu0 }
 0x818   :  { %v4269_v51 = vpack.c.bf16 %v4243_v26, %v4242_v52  ;;  %v4024_v14 = vadd.f32 %v4023_v31, %v936_v11 }
 0x81a   :  { %v4060_v29 = vmax.f32 %v4024_v14, 0.0  ;;  %4381 = vmatmul.bf16.gmra.mxu2 %v4269_v51 }
 0x81b   :  { %v4182_v23 = vpop.f32.mrf.mxu1 }
 0x81c   :  { %v4077_v9 = vpack.c.bf16 %v4060_v29, %v4059_v6  ;;  %v4183_v59 = vadd.f32 %v4182_v23, %v983_v28  ;;  %v1005_v28 = vadd.f32 %v9181_v50, %v8382_v49 }
 0x81e   :  { %4221 = vmatmul.bf16.gmra.mxu1 %v4077_v9  ;;  %v4244_v4 = vmax.f32 %v4183_v59, 0.0  ;;  %v9180_v9 = vld [vmem:[#allocation184_spill] sm:$0xff] }
 0x81f   :  { %v4026_v55 = vpop.f32.mrf.mxu0 }
 0x820   :  { %v4027_v24 = vadd.f32 %v4026_v55, %v939_v18  ;;  %v1003_v55 = vadd.f32 %v9180_v9, %v8382_v49  ;;  %v9189_v9 = vld [vmem:[#allocation215_spill] sm:$0xff] }
 0x822   :  { %v4061_v38 = vmax.f32 %v4027_v24, 0.0 }
 0x823   :  { %v4184_v60 = vpop.f32.mrf.mxu1 }
 0x824   :  { %v4185_v63 = vadd.f32 %v4184_v60, %v985_v33 }
 0x826   :  { %v4245_v37 = vmax.f32 %v4185_v63, 0.0 }
 0x827   :  { %v4028_v1 = vpop.f32.mrf.mxu0 }
 0x828   :  { %v4270_v62 = vpack.c.bf16 %v4245_v37, %v4244_v4  ;;  %v4029_v57 = vadd.f32 %v4028_v1, %v941_v0  ;;  %v9182_v37 = vld [vmem:[#allocation191_spill] sm:$0xff] }
 0x829   :  { %v1008_v1 = vadd.f32 %v9182_v37, %v8382_v49  ;;  %v9191_v37 = vld [vmem:[#allocation222_spill] sm:$0xff] }
 0x82a   :  { %v4062_v43 = vmax.f32 %v4029_v57, 0.0  ;;  %4386 = vmatmul.bf16.gmra.mxu2 %v4270_v62  ;;  %v9183_v62 = vld [vmem:[#allocation194_spill] sm:$0xff] }
 0x82b   :  { %v4187_v41 = vpop.f32.mrf.mxu1  ;;  %v1010_v57 = vadd.f32 %v9183_v62, %v8382_v49 }
 0x82c   :  { %v4078_v7 = vpack.c.bf16 %v4062_v43, %v4061_v38  ;;  %v4188_v21 = vadd.f32 %v4187_v41, %v988_v25 }
 0x82e   :  { %4226 = vmatmul.bf16.gmra.mxu1 %v4078_v7  ;;  %v4246_v30 = vmax.f32 %v4188_v21, 0.0 }
 0x833   :  { %v4189_v42 = vpop.f32.mrf.mxu1 }
 0x834   :  { %v4190_v8 = vadd.f32 %v4189_v42, %v990_v35 }
 0x836   :  { %v4247_v44 = vmax.f32 %v4190_v8, 0.0 }
 0x838   :  { %v4271_v34 = vpack.c.bf16 %v4247_v44, %v4246_v30  ;;  %v9184_v30 = vld [vmem:[#allocation198_spill] sm:$0xff] }
 0x839   :  { %v1013_v44 = vadd.f32 %v9184_v30, %v8382_v49 }
 0x83a   :  { %4391 = vmatmul.bf16.gmra.mxu2 %v4271_v34  ;;  %v9185_v34 = vld [vmem:[#allocation201_spill] sm:$0xff] }
 0x83b   :  { %v4192_v36 = vpop.f32.mrf.mxu1 }
 0x83c   :  { %v4193_v53 = vadd.f32 %v4192_v36, %v993_v22  ;;  %v1015_v36 = vadd.f32 %v9185_v34, %v8382_v49 }
 0x83e   :  { %v4248_v56 = vmax.f32 %v4193_v53, 0.0 }
 0x843   :  { %v4194_v12 = vpop.f32.mrf.mxu1 }
 0x844   :  { %v4195_v32 = vadd.f32 %v4194_v12, %v995_v27 }
 0x846   :  { %v4249_v47 = vmax.f32 %v4195_v32, 0.0 }
 0x848   :  { %v4272_v20 = vpack.c.bf16 %v4249_v47, %v4248_v56 }
 0x84a   :  { %4396 = vmatmul.bf16.gmra.mxu2 %v4272_v20 }
 0x84b   :  { %v4197_v39 = vpop.f32.mrf.mxu1 }
 0x84c   :  { %v4198_v16 = vadd.f32 %v4197_v39, %v998_v2  ;;  %v1020_v2 = vadd.f32 %v9187_v58, %v8382_v49 }
 0x84d   :  { %v4357_v46 = vpop.f32.mrf.mxu2 }
 0x84e   :  { %v4358_v61 = vadd.f32 %v8451_v3, %v4357_v46  ;;  %v4250_v26 = vmax.f32 %v4198_v16, 0.0  ;;  %v9186_v46 = vld [vmem:[#allocation205_spill] sm:$0xff] }
 0x850   :  { %4437 = vst [vmem:[#allocation17] sm:$0xff] %v4358_v61  ;;  %v1018_v61 = vadd.f32 %v9186_v46, %v8382_v49 }
 0x853   :  { %v4199_v11 = vpop.f32.mrf.mxu1 }
 0x854   :  { %v4200_v52 = vadd.f32 %v4199_v11, %v1000_v40 }
 0x855   :  { %v4359_v13 = vpop.f32.mrf.mxu2 }
 0x856   :  { %v4251_v31 = vmax.f32 %v4200_v52, 0.0  ;;  %v4360_v51 = vadd.f32 %v8451_v3, %v4359_v13 }
 0x858   :  { %v4273_v14 = vpack.c.bf16 %v4251_v31, %v4250_v26  ;;  %4438 = vst [vmem:[#allocation17 + $0x8] sm:$0xff] %v4360_v51 }
 0x85a   :  { %4401 = vmatmul.bf16.gmra.mxu2 %v4273_v14 }
 0x85b   :  { %v4202_v6 = vpop.f32.mrf.mxu1 }
 0x85c   :  { %v4203_v15 = vadd.f32 %v4202_v6, %v1003_v55  ;;  %v1025_v55 = vadd.f32 %v9189_v9, %v8382_v49 }
 0x85d   :  { %v4362_v29 = vpop.f32.mrf.mxu2 }
 0x85e   :  { %v4363_v23 = vadd.f32 %v8451_v3, %v4362_v29  ;;  %v4252_v45 = vmax.f32 %v4203_v15, 0.0  ;;  %v9188_v29 = vld [vmem:[#allocation212_spill] sm:$0xff] }
 0x860   :  { %4439 = vst [vmem:[#allocation17 + $0x10] sm:$0xff] %v4363_v23  ;;  %v1023_v23 = vadd.f32 %v9188_v29, %v8382_v49 }
 0x863   :  { %v4204_v33 = vpop.f32.mrf.mxu1 }
 0x864   :  { %v4205_v59 = vadd.f32 %v4204_v33, %v1005_v28 }
 0x865   :  { %v4364_v60 = vpop.f32.mrf.mxu2 }
 0x866   :  { %v4253_v18 = vmax.f32 %v4205_v59, 0.0  ;;  %v4365_v63 = vadd.f32 %v8451_v3, %v4364_v60 }
 0x868   :  { %v4274_v48 = vpack.c.bf16 %v4253_v18, %v4252_v45  ;;  %4440 = vst [vmem:[#allocation17 + $0x18] sm:$0xff] %v4365_v63 }
 0x86a   :  { %4406 = vmatmul.bf16.gmra.mxu2 %v4274_v48 }
 0x86b   :  { %v4207_v0 = vpop.f32.mrf.mxu1 }
 0x86c   :  { %v4208_v38 = vadd.f32 %v4207_v0, %v1008_v1  ;;  %v1030_v1 = vadd.f32 %v9191_v37, %v8382_v49 }
 0x86d   :  { %v4367_v4 = vpop.f32.mrf.mxu2 }
 0x86e   :  { %v4368_v24 = vadd.f32 %v8451_v3, %v4367_v4  ;;  %v4254_v10 = vmax.f32 %v4208_v38, 0.0  ;;  %v9190_v4 = vld [vmem:[#allocation219_spill] sm:$0xff] }
 0x870   :  { %4441 = vst [vmem:[#allocation17 + $0x20] sm:$0xff] %v4368_v24  ;;  %v1028_v24 = vadd.f32 %v9190_v4, %v8382_v49 }
 0x873   :  { %v4209_v43 = vpop.f32.mrf.mxu1 }
 0x874   :  { %v4210_v41 = vadd.f32 %v4209_v43, %v1010_v57 }
 0x875   :  { %v4369_v7 = vpop.f32.mrf.mxu2 }
 0x876   :  { %v4255_v25 = vmax.f32 %v4210_v41, 0.0  ;;  %v4370_v17 = vadd.f32 %v8451_v3, %v4369_v7 }
 0x878   :  { %v4275_v35 = vpack.c.bf16 %v4255_v25, %v4254_v10  ;;  %4442 = vst [vmem:[#allocation17 + $0x28] sm:$0xff] %v4370_v17 }
 0x87a   :  { %4411 = vmatmul.bf16.gmra.mxu2 %v4275_v35 }
 0x87b   :  { %v4212_v21 = vpop.f32.mrf.mxu1 }
 0x87c   :  { %v4213_v5 = vadd.f32 %v4212_v21, %v1013_v44 }
 0x87d   :  { %v4372_v42 = vpop.f32.mrf.mxu2 }
 0x87e   :  { %v4373_v8 = vadd.f32 %v8451_v3, %v4372_v42  ;;  %v4256_v53 = vmax.f32 %v4213_v5, 0.0 }
 0x880   :  { %4443 = vst [vmem:[#allocation17 + $0x30] sm:$0xff] %v4373_v8 }
 0x883   :  { %v4214_v22 = vpop.f32.mrf.mxu1 }
 0x884   :  { %v4215_v19 = vadd.f32 %v4214_v22, %v1015_v36 }
 0x885   :  { %v4374_v27 = vpop.f32.mrf.mxu2 }
 0x886   :  { %v4257_v12 = vmax.f32 %v4215_v19, 0.0  ;;  %v4375_v32 = vadd.f32 %v8451_v3, %v4374_v27 }
 0x888   :  { %v4276_v56 = vpack.c.bf16 %v4257_v12, %v4256_v53  ;;  %4444 = vst [vmem:[#allocation17 + $0x38] sm:$0xff] %v4375_v32 }
 0x88a   :  { %4416 = vmatmul.bf16.gmra.mxu2 %v4276_v56 }
 0x88b   :  { %v4217_v47 = vpop.f32.mrf.mxu1 }
 0x88c   :  { %v4218_v54 = vadd.f32 %v4217_v47, %v1018_v61 }
 0x88d   :  { %v4377_v20 = vpop.f32.mrf.mxu2 }
 0x88e   :  { %v4378_v39 = vadd.f32 %v8451_v3, %v4377_v20  ;;  %v4258_v52 = vmax.f32 %v4218_v54, 0.0 }
 0x890   :  { %4445 = vst [vmem:[#allocation17 + $0x40] sm:$0xff] %v4378_v39 }
 0x893   :  { %v4219_v40 = vpop.f32.mrf.mxu1 }
 0x894   :  { %v4220_v16 = vadd.f32 %v4219_v40, %v1020_v2 }
 0x895   :  { %v4379_v11 = vpop.f32.mrf.mxu2 }
 0x896   :  { %v4259_v13 = vmax.f32 %v4220_v16, 0.0  ;;  %v4380_v26 = vadd.f32 %v8451_v3, %v4379_v11 }
 0x898   :  { %v4277_v31 = vpack.c.bf16 %v4259_v13, %v4258_v52  ;;  %4446 = vst [vmem:[#allocation17 + $0x48] sm:$0xff] %v4380_v26 }
 0x89a   :  { %4421 = vmatmul.bf16.gmra.mxu2 %v4277_v31 }
 0x89b   :  { %v4222_v51 = vpop.f32.mrf.mxu1 }
 0x89c   :  { %v4223_v50 = vadd.f32 %v4222_v51, %v1023_v23 }
 0x89d   :  { %v4382_v14 = vpop.f32.mrf.mxu2 }
 0x89e   :  { %v4383_v6 = vadd.f32 %v8451_v3, %v4382_v14  ;;  %v4260_v59 = vmax.f32 %v4223_v50, 0.0 }
 0x8a0   :  { %4447 = vst [vmem:[#allocation17 + $0x50] sm:$0xff] %v4383_v6 }
 0x8a3   :  { %v4224_v28 = vpop.f32.mrf.mxu1 }
 0x8a4   :  { %v4225_v15 = vadd.f32 %v4224_v28, %v1025_v55 }
 0x8a5   :  { %v4384_v33 = vpop.f32.mrf.mxu2 }
 0x8a6   :  { %v4261_v60 = vmax.f32 %v4225_v15, 0.0  ;;  %v4385_v45 = vadd.f32 %v8451_v3, %v4384_v33 }
 0x8a8   :  { %v4278_v18 = vpack.c.bf16 %v4261_v60, %v4260_v59  ;;  %4448 = vst [vmem:[#allocation17 + $0x58] sm:$0xff] %v4385_v45 }
 0x8aa   :  { %4426 = vmatmul.bf16.gmra.mxu2 %v4278_v18 }
 0x8ab   :  { %v4227_v63 = vpop.f32.mrf.mxu1 }
 0x8ac   :  { %v4228_v62 = vadd.f32 %v4227_v63, %v1028_v24 }
 0x8ad   :  { %v4387_v48 = vpop.f32.mrf.mxu2 }
 0x8ae   :  { %v4388_v0 = vadd.f32 %v8451_v3, %v4387_v48  ;;  %v4262_v41 = vmax.f32 %v4228_v62, 0.0 }
 0x8b0   :  { %4449 = vst [vmem:[#allocation17 + $0x60] sm:$0xff] %v4388_v0 }
 0x8b3   :  { %v4229_v57 = vpop.f32.mrf.mxu1 }
 0x8b4   :  { %v4230_v38 = vadd.f32 %v4229_v57, %v1030_v1 }
 0x8b5   :  { %v4389_v43 = vpop.f32.mrf.mxu2 }
 0x8b6   :  { %v4263_v7 = vmax.f32 %v4230_v38, 0.0  ;;  %v4390_v10 = vadd.f32 %v8451_v3, %v4389_v43 }
 0x8b8   :  { %v4279_v25 = vpack.c.bf16 %v4263_v7, %v4262_v41  ;;  %4450 = vst [vmem:[#allocation17 + $0x68] sm:$0xff] %v4390_v10 }
 0x8ba   :  { %4431 = vmatmul.bf16.gmra.mxu2 %v4279_v25 }
 0x8bd   :  { %v4392_v17 = vpop.f32.mrf.mxu2 }
 0x8be   :  { %v4393_v35 = vadd.f32 %v8451_v3, %v4392_v17 }
 0x8c0   :  { %4451 = vst [vmem:[#allocation17 + $0x70] sm:$0xff] %v4393_v35 }
 0x8c5   :  { %v4394_v21 = vpop.f32.mrf.mxu2 }
 0x8c6   :  { %v4395_v42 = vadd.f32 %v8451_v3, %v4394_v21 }
 0x8c8   :  { %4452 = vst [vmem:[#allocation17 + $0x78] sm:$0xff] %v4395_v42 }
 0x8cd   :  { %v4397_v49 = vpop.f32.mrf.mxu2 }
 0x8ce   :  { %v4398_v8 = vadd.f32 %v8451_v3, %v4397_v49 }
 0x8d0   :  { %4453 = vst [vmem:[#allocation17 + $0x80] sm:$0xff] %v4398_v8 }
 0x8d5   :  { %v4399_v30 = vpop.f32.mrf.mxu2 }
 0x8d6   :  { %v4400_v44 = vadd.f32 %v8451_v3, %v4399_v30 }
 0x8d8   :  { %4454 = vst [vmem:[#allocation17 + $0x88] sm:$0xff] %v4400_v44 }
 0x8dd   :  { %v4402_v34 = vpop.f32.mrf.mxu2 }
 0x8de   :  { %v4403_v36 = vadd.f32 %v8451_v3, %v4402_v34 }
 0x8e0   :  { %4455 = vst [vmem:[#allocation17 + $0x90] sm:$0xff] %v4403_v36 }
 0x8e5   :  { %v4404_v5 = vpop.f32.mrf.mxu2 }
 0x8e6   :  { %v4405_v22 = vadd.f32 %v8451_v3, %v4404_v5 }
 0x8e8   :  { %4456 = vst [vmem:[#allocation17 + $0x98] sm:$0xff] %v4405_v22 }
 0x8ed   :  { %v4407_v19 = vpop.f32.mrf.mxu2 }
 0x8ee   :  { %v4408_v27 = vadd.f32 %v8451_v3, %v4407_v19 }
 0x8f0   :  { %4457 = vst [vmem:[#allocation17 + $0xa0] sm:$0xff] %v4408_v27 }
 0x8f5   :  { %v4409_v53 = vpop.f32.mrf.mxu2 }
 0x8f6   :  { %v4410_v12 = vadd.f32 %v8451_v3, %v4409_v53 }
 0x8f8   :  { %4458 = vst [vmem:[#allocation17 + $0xa8] sm:$0xff] %v4410_v12 }
 0x8fd   :  { %v4412_v32 = vpop.f32.mrf.mxu2 }
 0x8fe   :  { %v4413_v56 = vadd.f32 %v8451_v3, %v4412_v32 }
 0x900   :  { %4459 = vst [vmem:[#allocation17 + $0xb0] sm:$0xff] %v4413_v56 }
 0x905   :  { %v4414_v47 = vpop.f32.mrf.mxu2 }
 0x906   :  { %v4415_v20 = vadd.f32 %v8451_v3, %v4414_v47 }
 0x908   :  { %4460 = vst [vmem:[#allocation17 + $0xb8] sm:$0xff] %v4415_v20 }
 0x90d   :  { %v4417_v39 = vpop.f32.mrf.mxu2 }
 0x90e   :  { %v4418_v46 = vadd.f32 %v8451_v3, %v4417_v39 }
 0x910   :  { %4461 = vst [vmem:[#allocation17 + $0xc0] sm:$0xff] %v4418_v46 }
 0x915   :  { %v4419_v61 = vpop.f32.mrf.mxu2 }
 0x916   :  { %v4420_v58 = vadd.f32 %v8451_v3, %v4419_v61 }
 0x918   :  { %4462 = vst [vmem:[#allocation17 + $0xc8] sm:$0xff] %v4420_v58 }
 0x91d   :  { %v4422_v2 = vpop.f32.mrf.mxu2 }
 0x91e   :  { %v4423_v54 = vadd.f32 %v8451_v3, %v4422_v2 }
 0x920   :  { %4463 = vst [vmem:[#allocation17 + $0xd0] sm:$0xff] %v4423_v54 }
 0x925   :  { %v4424_v40 = vpop.f32.mrf.mxu2 }
 0x926   :  { %v4425_v16 = vadd.f32 %v8451_v3, %v4424_v40 }
 0x928   :  { %4464 = vst [vmem:[#allocation17 + $0xd8] sm:$0xff] %v4425_v16 }
 0x92d   :  { %v4427_v11 = vpop.f32.mrf.mxu2 }
 0x92e   :  { %v4428_v52 = vadd.f32 %v8451_v3, %v4427_v11 }
 0x930   :  { %4465 = vst [vmem:[#allocation17 + $0xe0] sm:$0xff] %v4428_v52 }
 0x935   :  { %v4429_v13 = vpop.f32.mrf.mxu2 }
 0x936   :  { %v4430_v26 = vadd.f32 %v8451_v3, %v4429_v13 }
 0x938   :  { %4466 = vst [vmem:[#allocation17 + $0xe8] sm:$0xff] %v4430_v26 }
 0x93d   :  { %v4432_v31 = vpop.f32.mrf.mxu2 }
 0x93e   :  { %v4433_v51 = vadd.f32 %v8451_v3, %v4432_v31 }
 0x940   :  { %4467 = vst [vmem:[#allocation17 + $0xf0] sm:$0xff] %v4433_v51 }
 0x945   :  { %v4434_v14 = vpop.f32.mrf.mxu2 }
 0x946   :  { %v4435_v6 = vadd.f32 %v8451_v3, %v4434_v14 }
 0x948   :  { %4468 = vst [vmem:[#allocation17 + $0xf8] sm:$0xff] %v4435_v6 }
 0x949   :  { %4481 = dma.vmem_to_hbm [thread:$0]  %s4474_s8, 4096, %s4476_s3, [#allocation4], %s5904_s13, %s5904_s13, %s5905_s14  }
 0x94a   :  { %5900 = dma.done.wait [#allocation4], 4096  }
 0x94b   :  { %5901 = vsyncadd [#allocation4], 4294963200 }
 0x94c   :  { %4486 = vsyncpa [#allocation3], 1 }
 0x94d   :  { %4487 = vsyncpa [#allocation6], 1 }
 0x94e   :  { %4488 = vsyncpa [#allocation9], 1 }
 0x94f   :  { %4489 = vsyncpa [#allocation12], 1 }
 0x950   :  { %4490 = vsyncpa [#allocation15], 1 }
 0x951   :  { %4491 = vsyncpa [#allocation4], 1 }

</bundles_post_ra>
